<compile_context>
chip_gen: v7x
topology: tpu7x:2x2x1
jax: 0.10.0
libtpu: 0.0.40
codegen_flags: <defaults>
</compile_context>

<pallas_src>
import functools

import jax
import jax.numpy as jnp
from jax.experimental import pallas as pl
from jax.experimental.pallas import tpu as pltpu

SPACING = (0.001, 0.001)


def get_new_coords_grid_scale4(coords, spacing):
    # get_new_coords(): grid sample mode, scale == 4, align_corners == False.
    # TODO(synk): align_corners=True branch (in-place coord rescaling) and the
    # dropped_coords / quasirandom branches are host-side bookkeeping, not
    # implemented here.
    s0, s1 = spacing
    c0 = coords[:, 0]
    c1 = coords[:, 1]
    new_coords = jnp.concatenate(
        [
            jnp.stack([c0, c1 + s1], axis=1),
            jnp.stack([c0 + s0, c1], axis=1),
            jnp.stack([c0 + s0, c1 + s1], axis=1),
        ],
        axis=0,
    )
    return new_coords


def _upsample_nn_kernel(new_ct_ref, coords_ref, values_ref, values_copy_ref,
                        out_ref, minval_sc, acc_sc, *, n_copy_tiles):
    # new_ct_ref     : (2, Tn)  query coords for this output tile (shifted, transposed)
    # coords_ref     : (Tk, 2)  K-tile of the original sampled coords
    # values_ref     : (C, Tk)  K-tile of the values (gather source)
    # values_copy_ref: (C, Tn)  output-tile-aligned values block (pass-through path)
    # out_ref        : (C, Tn)  tile of cat((values, new_values), dim=1)
    # minval_sc      : (1, Tn)  running min squared distance (online argmin)
    # acc_sc         : (C, Tn)  running gathered values
    i = pl.program_id(0)
    k = pl.program_id(1)
    is_copy = i < n_copy_tiles

    # ---- pass-through tiles: out[:, i*Tn:(i+1)*Tn] = values[:, i*Tn:(i+1)*Tn]
    @pl.when(jnp.logical_and(is_copy, k == 0))
    def _copy():
        out_ref[...] = values_copy_ref[...]

    # ---- nearest-neighbor tiles: online argmin over K tiles of the inputs
    @pl.when(jnp.logical_not(is_copy))
    def _compute():
        @pl.when(k == 0)
        def _init():
            minval_sc[...] = jnp.full_like(minval_sc, jnp.inf)
            acc_sc[...] = jnp.zeros_like(acc_sc)

        qx = new_ct_ref[0:1, :]          # (1, Tn)  lane-dense queries
        qy = new_ct_ref[1:2, :]          # (1, Tn)
        cx = coords_ref[:, 0:1]          # (Tk, 1)  sublane-dense input points
        cy = coords_ref[:, 1:2]          # (Tk, 1)

        # Fused squared-distance map; argmin(d2) == argmin(norm).
        # TODO(synk): NaN coords make the row never "improve" (output 0);
        # torch's .min would still return an index for that degenerate case.
        d2 = jnp.square(cx - qx) + jnp.square(cy - qy)        # (Tk, Tn)

        tile_min = jnp.min(d2, axis=0, keepdims=True)         # (1, Tn)
        row = jax.lax.broadcasted_iota(jnp.int32, d2.shape, 0)
        big = jnp.array(jnp.iinfo(jnp.int32).max, jnp.int32)
        # first row (within this K tile) attaining the tile minimum
        idx_rel = jnp.min(jnp.where(d2 <= tile_min, row, big),
                          axis=0, keepdims=True)              # (1, Tn)
        onehot = (row == idx_rel).astype(jnp.float32)         # (Tk, Tn), one compare

        # gather-as-matmul restricted to this K tile: (C,Tk)x(Tk,Tn)->(C,Tn).
        # HIGHEST precision keeps the f32 selection through the 0/1 matrix exact.
        gathered = jax.lax.dot_general(
            values_ref[...], onehot,
            dimension_numbers=(((1,), (0,)), ((), ())),
            preferred_element_type=jnp.float32,
            precision=jax.lax.Precision.HIGHEST,
        )

        # strict '<' keeps the FIRST global index on ties (torch .min(dim=1)).
        improved = tile_min < minval_sc[...]                   # (1, Tn)
        minval_sc[...] = jnp.where(improved, tile_min, minval_sc[...])
        acc_sc[...] = jnp.where(improved, gathered, acc_sc[...])

        @pl.when(k == pl.num_programs(1) - 1)
        def _finalize():
            out_ref[...] = acc_sc[...].astype(out_ref.dtype)


@functools.partial(jax.jit, static_argnames=("tile_n", "tile_k"))
def upsample_nearest(values, coords, *, tile_n=512, tile_k=256):
    """Equivalent of upsample_nn(values, inr, layer) for mode='nearest'.

    values: (C, N_in) float32, coords: (N_in, 2) float32.
    Returns (out_values (C, 4*N_in), sampled_coords (4*N_in, 2)).
    """
    C, N_in = values.shape
    s0, s1 = SPACING

    # TODO(synk): general N_in needs a masked/padded last tile; here tile sizes
    # must divide N_in exactly (and be lane-aligned).
    assert tile_n % 128 == 0 and tile_k % 128 == 0
    assert N_in % tile_n == 0 and N_in % tile_k == 0

    n_copy = N_in // tile_n          # pass-through output tiles
    n_k = N_in // tile_k             # reduction tiles over the input points
    N_new = 3 * N_in
    N_total = 4 * N_in
    n_out_tiles = N_total // tile_n  # = 4*n_copy (even -> balanced on v7x 2 TCs)

    shift = jnp.array([s0 / 2.0, s1 / 2.0], dtype=values.dtype)  # buffer 'shift'
    new_coords = get_new_coords_grid_scale4(coords, SPACING)     # (N_new, 2)
    sampled_coords = jnp.concatenate([coords, new_coords], axis=0)

    # (new_coords - layer.shift), transposed to (2, N_new): lane-dense blocks.
    new_ct = (new_coords - shift[None, :]).T

    kernel = functools.partial(_upsample_nn_kernel, n_copy_tiles=n_copy)

    out_values = pl.pallas_call(
        kernel,
        out_shape=jax.ShapeDtypeStruct((C, N_total), values.dtype),
        grid_spec=pltpu.PrefetchScalarGridSpec(
            num_scalar_prefetch=0,
            grid=(n_out_tiles, n_k),
            in_specs=[
                # query coords for output tile i (ignored on copy tiles);
                # constant over k -> DMA'd once per output tile.
                pl.BlockSpec((2, tile_n),
                             lambda i, k: (0, jnp.maximum(i - n_copy, 0))),
                # input coords, streamed over k on compute tiles; pinned to
                # block 0 on copy tiles so the copy phase issues no K DMAs.
                pl.BlockSpec((tile_k, 2),
                             lambda i, k: (jnp.where(i < n_copy, 0, k), 0)),
                # values (gather source), streamed over k, pinned on copy tiles.
                pl.BlockSpec((C, tile_k),
                             lambda i, k: (0, jnp.where(i < n_copy, 0, k))),
                # values aligned to the output tile (pass-through copy path).
                pl.BlockSpec((C, tile_n),
                             lambda i, k: (0, jnp.minimum(i, n_copy - 1))),
            ],
            out_specs=pl.BlockSpec((C, tile_n), lambda i, k: (0, i)),
            scratch_shapes=[
                pltpu.VMEM((1, tile_n), jnp.float32),   # running min distance
                pltpu.VMEM((C, tile_n), jnp.float32),   # running gathered values
            ],
        ),
        compiler_params=pltpu.CompilerParams(
            dimension_semantics=("parallel", "arbitrary"),
        ),
    )(new_ct, coords, values, values)

    return out_values, sampled_coords


if __name__ == "__main__":
    key = jax.random.PRNGKey(0)
    k_coords, k_vals = jax.random.split(key)

    N_in = 512   # number of sampled INR points
    C = 8        # channels

    coords = jax.random.uniform(k_coords, (N_in, 2), jnp.float32, -1.0, 1.0)
    values = jax.random.normal(k_vals, (C, N_in), jnp.float32)

    out_values, sampled_coords = upsample_nearest(values, coords,
                                                  tile_n=512, tile_k=256)
    out_values = jax.block_until_ready(out_values)

    # pure-JAX reference of the PyTorch semantics
    shift = jnp.array([SPACING[0] / 2.0, SPACING[1] / 2.0], jnp.float32)
    new_coords = get_new_coords_grid_scale4(coords, SPACING)
    diffs = jnp.linalg.norm(
        (new_coords - shift)[:, None, :] - coords[None, :, :], axis=-1
    )
    idx = jnp.argmin(diffs, axis=1)
    ref = jnp.concatenate([values, values[:, idx]], axis=1)

    assert out_values.shape == (C, 4 * N_in)
    assert sampled_coords.shape == (4 * N_in, 2)
    assert jnp.allclose(out_values, ref, atol=1e-6, rtol=1e-6)

    print("KERNEL_OK")
</pallas_src>

<mosaic_0001>
module attributes {stable_mosaic.version = 11 : i64} {
  func.func @_upsample_nn_kernel(%arg0: i32, %arg1: i32, %arg2: memref<2x512xf32, #tpu.memory_space<vmem>>, %arg3: memref<256x2xf32, #tpu.memory_space<vmem>>, %arg4: memref<8x256xf32, #tpu.memory_space<vmem>>, %arg5: memref<8x512xf32, #tpu.memory_space<vmem>>, %arg6: memref<8x512xf32, #tpu.memory_space<vmem>>, %arg7: memref<1x512xf32, #tpu.memory_space<vmem>>, %arg8: memref<8x512xf32, #tpu.memory_space<vmem>>) attributes {dimension_semantics = [#tpu.dimension_semantics<parallel>, #tpu.dimension_semantics<arbitrary>], iteration_bounds = array<i64: 4, 2>, scalar_prefetch = 0 : i64, scratch_operands = 2 : i64, tpu.core_type = #tpu.core_type<tc>, window_params = [{transform_indices = @transform_0, window_bounds = array<i64: 2, 512>}, {transform_indices = @transform_1, window_bounds = array<i64: 256, 2>}, {transform_indices = @transform_2, window_bounds = array<i64: 8, 256>}, {transform_indices = @transform_3, window_bounds = array<i64: 8, 512>}, {transform_indices = @transform_4, window_bounds = array<i64: 8, 512>}]} {
    %c1_i32 = arith.constant 1 : i32
    %0 = arith.cmpi slt, %arg0, %c1_i32 : i32
    %c0_i32 = arith.constant 0 : i32
    %1 = arith.cmpi eq, %arg1, %c0_i32 : i32
    %2 = arith.andi %0, %1 : i1
    %3 = arith.extui %2 : i1 to i32
    %c0_i32_0 = arith.constant 0 : i32
    %4 = arith.cmpi ne, %3, %c0_i32_0 : i32
    scf.if %4 {
      %c0 = arith.constant 0 : index
      %c0_2 = arith.constant 0 : index
      %8 = vector.load %arg5[%c0, %c0_2] : memref<8x512xf32, #tpu.memory_space<vmem>>, vector<8x512xf32>
      %c0_3 = arith.constant 0 : index
      %c0_4 = arith.constant 0 : index
      %9 = vector.load %arg6[%c0_3, %c0_4] : memref<8x512xf32, #tpu.memory_space<vmem>>, vector<8x512xf32>
      tpu.vector_store %arg6[%c0_3, %c0_4], %8 {strides = array<i32>} : memref<8x512xf32, #tpu.memory_space<vmem>>, vector<8x512xf32>,
    } else {
    }
    %true = arith.constant true
    %5 = arith.xori %0, %true : i1
    %6 = arith.extui %5 : i1 to i32
    %c0_i32_1 = arith.constant 0 : i32
    %7 = arith.cmpi ne, %6, %c0_i32_1 : i32
    scf.if %7 {
      %c0_i32_2 = arith.constant 0 : i32
      %8 = arith.cmpi eq, %arg1, %c0_i32_2 : i32
      %9 = arith.extui %8 : i1 to i32
      %c0_i32_3 = arith.constant 0 : i32
      %10 = arith.cmpi ne, %9, %c0_i32_3 : i32
      scf.if %10 {
        %cst_26 = arith.constant 0x7F800000 : f32
        %52 = vector.broadcast %cst_26 : f32 to vector<1x512xf32>
        %c0_27 = arith.constant 0 : index
        %c0_28 = arith.constant 0 : index
        %53 = vector.load %arg7[%c0_27, %c0_28] : memref<1x512xf32, #tpu.memory_space<vmem>>, vector<1x512xf32>
        tpu.vector_store %arg7[%c0_27, %c0_28], %52 {strides = array<i32>} : memref<1x512xf32, #tpu.memory_space<vmem>>, vector<1x512xf32>,
        %cst_29 = arith.constant 0.000000e+00 : f32
        %54 = vector.broadcast %cst_29 : f32 to vector<8x512xf32>
        %c0_30 = arith.constant 0 : index
        %c0_31 = arith.constant 0 : index
        %55 = vector.load %arg8[%c0_30, %c0_31] : memref<8x512xf32, #tpu.memory_space<vmem>>, vector<8x512xf32>
        tpu.vector_store %arg8[%c0_30, %c0_31], %54 {strides = array<i32>} : memref<8x512xf32, #tpu.memory_space<vmem>>, vector<8x512xf32>,
      } else {
      }
      %c0 = arith.constant 0 : index
      %c0_4 = arith.constant 0 : index
      %11 = vector.load %arg2[%c0, %c0_4] : memref<2x512xf32, #tpu.memory_space<vmem>>, vector<1x512xf32>
      %c1 = arith.constant 1 : index
      %c0_5 = arith.constant 0 : index
      %12 = vector.load %arg2[%c1, %c0_5] : memref<2x512xf32, #tpu.memory_space<vmem>>, vector<1x512xf32>
      %c0_6 = arith.constant 0 : index
      %c0_7 = arith.constant 0 : index
      %13 = vector.load %arg3[%c0_6, %c0_7] : memref<256x2xf32, #tpu.memory_space<vmem>>, vector<256x1xf32>
      %c0_8 = arith.constant 0 : index
      %c1_9 = arith.constant 1 : index
      %14 = vector.load %arg3[%c0_8, %c1_9] : memref<256x2xf32, #tpu.memory_space<vmem>>, vector<256x1xf32>
      %15 = vector.broadcast %13 : vector<256x1xf32> to vector<256x512xf32>
      %16 = vector.broadcast %11 : vector<1x512xf32> to vector<256x512xf32>
      %17 = arith.subf %15, %16 : vector<256x512xf32>
      %18 = arith.mulf %17, %17 : vector<256x512xf32>
      %19 = vector.broadcast %14 : vector<256x1xf32> to vector<256x512xf32>
      %20 = vector.broadcast %12 : vector<1x512xf32> to vector<256x512xf32>
      %21 = arith.subf %19, %20 : vector<256x512xf32>
      %22 = arith.mulf %21, %21 : vector<256x512xf32>
      %23 = arith.addf %18, %22 : vector<256x512xf32>
      %cst = arith.constant dense<0x7F800000> : vector<512xf32>
      %24 = vector.multi_reduction <minimumf>, %23, %cst [0] : vector<256x512xf32> to vector<512xf32>
      %25 = vector.shape_cast %24 : vector<512xf32> to vector<1x512xf32>
      %26 = tpu.iota {dimensions = array<i32: 0>} : vector<256x512xi32>
      %27 = vector.broadcast %25 : vector<1x512xf32> to vector<256x512xf32>
      %28 = arith.cmpf ole, %23, %27 : vector<256x512xf32>
      %c2147483647_i32 = arith.constant 2147483647 : i32
      %29 = vector.broadcast %c2147483647_i32 : i32 to vector<256x512xi32>
      %30 = arith.select %28, %26, %29 : vector<256x512xi1>, vector<256x512xi32>
      %cst_10 = arith.constant dense<2147483647> : vector<512xi32>
      %31 = vector.multi_reduction <minsi>, %30, %cst_10 [0] : vector<256x512xi32> to vector<512xi32>
      %32 = vector.shape_cast %31 : vector<512xi32> to vector<1x512xi32>
      %33 = vector.broadcast %32 : vector<1x512xi32> to vector<256x512xi32>
      %34 = arith.cmpi eq, %26, %33 : vector<256x512xi32>
      %35 = arith.extui %34 : vector<256x512xi1> to vector<256x512xi32>
      %36 = arith.sitofp %35 : vector<256x512xi32> to vector<256x512xf32>
      %c0_11 = arith.constant 0 : index
      %c0_12 = arith.constant 0 : index
      %37 = vector.load %arg4[%c0_11, %c0_12] : memref<8x256xf32, #tpu.memory_space<vmem>>, vector<8x256xf32>
      %cst_13 = arith.constant dense<0.000000e+00> : vector<8x512xf32>
      %38 = tpu.matmul %37, %36, %cst_13 {dimension_numbers = #tpu.dot_dimension_numbers<[1], [0], [0], [1], [0, 0, 1, 1], [], []>, precision = #tpu.contract_precision<fp32>} : vector<8x256xf32>, vector<256x512xf32>, vector<8x512xf32> -> vector<8x512xf32>
      %c0_14 = arith.constant 0 : index
      %c0_15 = arith.constant 0 : index
      %39 = vector.load %arg7[%c0_14, %c0_15] : memref<1x512xf32, #tpu.memory_space<vmem>>, vector<1x512xf32>
      %40 = arith.cmpf olt, %25, %39 : vector<1x512xf32>
      %c0_16 = arith.constant 0 : index
      %c0_17 = arith.constant 0 : index
      %41 = vector.load %arg7[%c0_16, %c0_17] : memref<1x512xf32, #tpu.memory_space<vmem>>, vector<1x512xf32>
      %42 = arith.select %40, %25, %41 : vector<1x512xi1>, vector<1x512xf32>
      %c0_18 = arith.constant 0 : index
      %c0_19 = arith.constant 0 : index
      %43 = vector.load %arg7[%c0_18, %c0_19] : memref<1x512xf32, #tpu.memory_space<vmem>>, vector<1x512xf32>
      tpu.vector_store %arg7[%c0_18, %c0_19], %42 {strides = array<i32>} : memref<1x512xf32, #tpu.memory_space<vmem>>, vector<1x512xf32>,
      %c0_20 = arith.constant 0 : index
      %c0_21 = arith.constant 0 : index
      %44 = vector.load %arg8[%c0_20, %c0_21] : memref<8x512xf32, #tpu.memory_space<vmem>>, vector<8x512xf32>
      %45 = vector.shape_cast %40 : vector<1x512xi1> to vector<1x512xi1>
      %46 = vector.broadcast %45 : vector<1x512xi1> to vector<8x512xi1>
      %47 = arith.select %46, %38, %44 : vector<8x512xi1>, vector<8x512xf32>
      %c0_22 = arith.constant 0 : index
      %c0_23 = arith.constant 0 : index
      %48 = vector.load %arg8[%c0_22, %c0_23] : memref<8x512xf32, #tpu.memory_space<vmem>>, vector<8x512xf32>
      tpu.vector_store %arg8[%c0_22, %c0_23], %47 {strides = array<i32>} : memref<8x512xf32, #tpu.memory_space<vmem>>, vector<8x512xf32>,
      %c1_i32_24 = arith.constant 1 : i32
      %49 = arith.cmpi eq, %arg1, %c1_i32_24 : i32
      %50 = arith.extui %49 : i1 to i32
      %c0_i32_25 = arith.constant 0 : i32
      %51 = arith.cmpi ne, %50, %c0_i32_25 : i32
      scf.if %51 {
        %c0_26 = arith.constant 0 : index
        %c0_27 = arith.constant 0 : index
        %52 = vector.load %arg8[%c0_26, %c0_27] : memref<8x512xf32, #tpu.memory_space<vmem>>, vector<8x512xf32>
        %c0_28 = arith.constant 0 : index
        %c0_29 = arith.constant 0 : index
        %53 = vector.load %arg6[%c0_28, %c0_29] : memref<8x512xf32, #tpu.memory_space<vmem>>, vector<8x512xf32>
        tpu.vector_store %arg6[%c0_28, %c0_29], %52 {strides = array<i32>} : memref<8x512xf32, #tpu.memory_space<vmem>>, vector<8x512xf32>,
      } else {
      }
    } else {
    }
    return
  }
  func.func @transform_0(%arg0: i32, %arg1: i32) -> (i32, i32) {
    %c1_i32 = arith.constant 1 : i32
    %0 = arith.subi %arg0, %c1_i32 : i32
    %c0_i32 = arith.constant 0 : i32
    %1 = arith.maxsi %0, %c0_i32 : i32
    %c0_i32_0 = arith.constant 0 : i32
    %c0_i32_1 = arith.constant 0 : i32
    return %c0_i32_0, %1 : i32, i32
  }
  func.func @transform_1(%arg0: i32, %arg1: i32) -> (i32, i32) {
    %c1_i32 = arith.constant 1 : i32
    %0 = arith.cmpi slt, %arg0, %c1_i32 : i32
    %c0_i32 = arith.constant 0 : i32
    %1 = arith.select %0, %c0_i32, %arg1 : i32
    %c0_i32_0 = arith.constant 0 : i32
    %c0_i32_1 = arith.constant 0 : i32
    return %1, %c0_i32_0 : i32, i32
  }
  func.func @transform_2(%arg0: i32, %arg1: i32) -> (i32, i32) {
    %c1_i32 = arith.constant 1 : i32
    %0 = arith.cmpi slt, %arg0, %c1_i32 : i32
    %c0_i32 = arith.constant 0 : i32
    %1 = arith.select %0, %c0_i32, %arg1 : i32
    %c0_i32_0 = arith.constant 0 : i32
    %c0_i32_1 = arith.constant 0 : i32
    return %c0_i32_0, %1 : i32, i32
  }
  func.func @transform_3(%arg0: i32, %arg1: i32) -> (i32, i32) {
    %c0_i32 = arith.constant 0 : i32
    %0 = arith.minsi %arg0, %c0_i32 : i32
    %c0_i32_0 = arith.constant 0 : i32
    %c0_i32_1 = arith.constant 0 : i32
    return %c0_i32_0, %0 : i32, i32
  }
  func.func @transform_4(%arg0: i32, %arg1: i32) -> (i32, i32) {
    %c0_i32 = arith.constant 0 : i32
    %c0_i32_0 = arith.constant 0 : i32
    return %c0_i32, %arg0 : i32, i32
  }
}

</mosaic_0001>

<bundles_post_ra>
// kernel: upsample_nearest.1
= control target key start
LH: loop header
LB: loop body
LE: loop exit
PB: predicated region body
PF: predicated region fallthrough
CT: control target
= control target key end

     0   :  { %9 = vsyncpa [#allocation5], 0  ;;  %s11762_s0 = inlined_call_operand.vmem [shape: f32[2,1536], index: 0, kind: input, shape index: {}]   ;;  %s11763_s1 = inlined_call_operand.vmem [shape: f32[512,2], index: 1, kind: input, shape index: {}]   ;;  %s11764_s2 = inlined_call_operand.vmem [shape: f32[8,512], index: 2, kind: input, shape index: {}, may-alias: {2,3}]   ;;  %s11765_s3 = inlined_call_operand.vmem [shape: f32[8,512], index: 3, kind: input, shape index: {}, may-alias: {2,3}]   ;;  %s11766_s4 = inlined_call_operand.hbm [shape: f32[8,2048], index: 4, kind: output, shape index: {}]  }
   0x1   :  { %11 = vsyncpa [#allocation5 + $0x1], 0  ;;  %s6820_s15 = smov 0   ;;  %s6822_s16 = smov 0  }
   0x2   :  { %s6824_s17 = smov 0   ;;  %s6826_s18 = smov 0  }
   0x3   :  { %s6828_s19 = smov 0   ;;  %s6830_s20 = smov 0  }
   0x4   :  { %s6832_s21 = smov 0   ;;  %s6834_s22 = smov 0  }
   0x5 LB: > { %12743 = sst [smem:[#allocation7_spill]] %s6781_s21  ;;  %s5283_s23 = sadd.s32 4294967295, %s6785_s22   ;;  %s6785_s22 = sphi %s6834_s22, %s17_s22   ;;  %s6781_s21 = sphi %s6832_s21, %s14341_s21   ;;  %s6777_s20 = sphi %s6830_s20, %s14346_s20   ;;  %s6773_s19 = sphi %s6828_s19, %s14339_s19   ;;  %s6769_s18 = sphi %s6826_s18, %s14345_s18   ;;  %s6765_s17 = sphi %s6824_s17, %s14344_s17   ;;  %s6761_s16 = sphi %s6822_s16, %s14343_s16   ;;  %s6757_s15 = sphi %s6820_s15, %s14342_s15  }
   0x6   : > { %s5284_s24 = sadd.s32 4294967294, %s6785_s22   ;;  %s26_s25 = sadd.s32 1, %s6777_s20 }
   0x7   : > { %p27_p0 = scmp.ge.s32.totalorder %s26_s25, 2  ;;  %s29_s26 = sadd.s32 1, %s6781_s21 }
   0x8   : > { %p168_p1 = scmp.ne.s32.totalorder %s6765_s17, %s6761_s16  ;;  %p169_p2 = scmp.eq.s32.totalorder %s5283_s23, 7 }
   0x9   : > { %s14348_s25 = smov (%p27_p0, %s26_s25), 0  ;;  %s14350_s26 = smov (!%p27_p0, %s29_s26), %s6781_s21 }
   0xa   : > { %12744 = sst [smem:[#allocation8_spill]] %s14348_s25  ;;  %p6869_p3 = por %p169_p2, %p168_p1 }
   0xb   : > { %p174_p4 = scmp.ne.s32.totalorder %s6761_s16, %s6757_s15  ;;  %p31_p5 = scmp.ge.s32.totalorder %s14350_s26, 4 }
   0xc   : > { %p175_p6 = scmp.eq.s32.totalorder %s5284_s24, 7  ;;  %p5289_p7 = scmp.ge.s32.totalorder %s6785_s22, 1 }
   0xd   : > { %p247_p8 = scmp.lt.s32.totalorder %s6785_s22, 9  ;;  %s14352_s26 = smov (%p31_p5, %s14350_s26), 0 }
   0xe   : > { %12746 = sst [smem:[#allocation9_spill]] %s14352_s26  ;;  %p6879_p9 = por %p175_p6, %p174_p4 }
   0xf   : > { %p248_p10 = pnand %p5289_p7, %p247_p8  ;;  %s155_s29 = ssub.s32 %s6781_s21, %s14352_s26 }
  0x10   : > { %s158_s30 = sadd.s32 1, %s6765_s17  ;;  %p156_p11 = scmp.eq.s32.totalorder %s155_s29, 0 }
  0x11   : > { %251 = sbr.rel (%p248_p10) target bundleno = 1327 (0x52f), region = 36  ;;  %s11767_s6 = sand.u32 (!%p248_p10), 1, %s6761_s16  }
  0x12   : > { %s6887_s5 = scalar_select %p156_p11, %s6765_s17, %s158_s30  }
  0x13   : > { %s5291_s7 = sadd.s32 (!%p248_p10), 4294967295, %s6773_s19  ;;  %s6893_s8 = sshll.u32 (!%p248_p10), %s11767_s6, 5 }
  0x14   : > { %p298_p12 = scmp.gt.s32.totalorder (!%p248_p10), %s5291_s7, 0  ;;  %p309_p13 = scmp.lt.s32.totalorder (!%p248_p10), %s6773_s19, 1 }
  0x15   : > { %p329_p0 = scmp.lt.s32.totalorder (!%p248_p10), %s6773_s19, 0  ;;  %p341_p5 = scmp.eq.s32.totalorder (!%p248_p10), %s6769_s18, 0 }
  0x17   : > { %p342_p6 = pnand (!%p248_p10), %p341_p5, %p309_p13 }
  0x18   : > { %s14354_s7 = smov (!%p298_p12, %s5291_s7), 0 }
  0x19   : > { %s310_s9 = scalar_select %p309_p13, 0, %s6769_s18 }
  0x1a   : > { %s5292_s10 = sshll.u32 %s14354_s7, 2 }
  0x1b   : > { %p301_p1 = scmp.lt.s32.totalorder %s5292_s10, 11  ;;  %s5294_s11 = sshll.u32 %s310_s9, 5 }
  0x1c   : > { %p312_p2 = scmp.lt.s32.totalorder %s5294_s11, 63  ;;  %s5296_s12 = sshll.u32 %s310_s9, 1 }
  0x1d   : > { %s14356_s10 = smov (!%p301_p1, %s5292_s10), 11  ;;  %p322_p4 = scmp.lt.s32.totalorder %s5296_s12, 3 }
  0x1e   : > { %s14358_s11 = smov (!%p312_p2, %s5294_s11), 63  ;;  %s5293_s13 = sshll.u32 %s14356_s10, 1 }
  0x1f   : > { %s6903_s24 = scalar_lea.vmem %s11762_s0, %s5293_s13  ;;  %s5295_s29 = sshll.u32 %s14358_s11, 3 }
  0x20   : > { %s6908_s7 = scalar_lea.vmem %s11763_s1, %s5295_s29  ;;  %s14360_s12 = smov (!%p322_p4, %s5296_s12), 3 }
  0x21   : > { %s330_s9 = scalar_select %p329_p0, %s6773_s19, 0 }
  0x22   : > { %s5297_s26 = sshll.u32 %s14360_s12, 3  ;;  %s6925_s29 = scalar_lea.vmem [#allocation4], %s6893_s8 }
  0x23   : > { %s6919_s21 = scalar_lea.vmem %s11764_s2, %s5297_s26  ;;  %s5298_s13 = sshll.u32 %s330_s9, 2 }
  0x24   : > { %p332_p7 = scmp.lt.s32.totalorder %s5298_s13, 3  ;;  %345 = sbr.rel (%p342_p6) target bundleno = 44 (0x2c), region = 40 }
  0x26   : > { %s14362_s13 = smov (!%p332_p7, %s5298_s13), 3 }
  0x27   : > { %s5299_s11 = sshll.u32 %s14362_s13, 3 }
  0x28   : > { %s335_s23 = scalar_lea.vmem %s11765_s3, %s5299_s11 }
  0x29   : > { %v346_v0 = vld [vmem:[%s335_s23] sm:$0xff] (!%p342_p6)  ;;  %v347_v1 = vld [vmem:[%s335_s23 + $0x8] sm:$0xff] (!%p342_p6)  ;;  %v348_v2 = vld [vmem:[%s335_s23 + $0x10] sm:$0xff] (!%p342_p6) }
  0x2a   : > { %350 = vst [vmem:[%s6925_s29] sm:$0xff] (!%p342_p6), %v346_v0  ;;  %351 = vst [vmem:[%s6925_s29 + $0x8] sm:$0xff] (!%p342_p6), %v347_v1  ;;  %v349_v3 = vld [vmem:[%s335_s23 + $0x18] sm:$0xff] (!%p342_p6) }
  0x2b   : > { %352 = vst [vmem:[%s6925_s29 + $0x10] sm:$0xff] %v348_v2  ;;  %353 = vst [vmem:[%s6925_s29 + $0x18] sm:$0xff] %v349_v3 }
  0x2c PF: > { %357 = sbr.rel (%p309_p13) target bundleno = 1302 (0x516), region = 44 }
  0x33   : > { %p5301_p8 = scmp.ne.s32.totalorder %s6769_s18, 0 }
  0x34   : > { %v361_v4 = vlaneseq (!%p5301_p8)  ;;  %v6787_v5 = vmov (!%p5301_p8), 0.0   ;;  %v6788_v6 = vmov (!%p5301_p8), inf  }
  0x35   : > { %360 = sbr.rel (%p5301_p8) target bundleno = 60 (0x3c), region = 48  ;;  %366 = vst [vmem:[#allocation3] sm:$0xff] (!%p5301_p8), %v6787_v5  ;;  %367 = vst [vmem:[#allocation3 + $0x8] sm:$0xff] (!%p5301_p8), %v6787_v5 }
  0x36   : > { %368 = vst [vmem:[#allocation3 + $0x10] sm:$0xff] (!%p5301_p8), %v6787_v5  ;;  %369 = vst [vmem:[#allocation3 + $0x18] sm:$0xff] (!%p5301_p8), %v6787_v5  ;;  %vm363_vm0 = vcmp.lt.s32.totalorder (!%p5301_p8), %v361_v4, 512 }
  0x37   : > { %365 = vst.msk [vmem:[#allocation2] sm:$0xf] (!%p5301_p8), %vm363_vm0, %v6788_v6 }
  0x3c PF: > { %v373_v7 = vld [vmem:[%s6908_s7] sm:$0xff]  ;;  %v6789_v8 = vmov 1   ;;  %v11770_v9 = vmov 0   ;;  %v374_v10 = vld [vmem:[%s6908_s7 + $0x8] sm:$0xff]  ;;  %v375_v11 = vld [vmem:[%s6908_s7 + $0x10] sm:$0xff]  ;;  %v11772_v38 = vlaneseq  ;;  %p5815_p10 = scmp.ne.s32.totalorder %s6769_s18, 1 }
  0x3d   : > { %6689 = vset.pattern.permute.xlu1 %v6789_v8  ;;  %6688 = vset.pattern.permute.xlu0 %v11770_v9  ;;  %v376_v12 = vld [vmem:[%s6908_s7 + $0x18] sm:$0xff]  ;;  %v377_v13 = vld [vmem:[%s6908_s7 + $0x20] sm:$0xff]  ;;  %v378_v14 = vld [vmem:[%s6908_s7 + $0x28] sm:$0xff] }
  0x3e   : > { %843 = vperm.xlu1 %6689, %v373_v7   ;;  %407 = vperm.xlu0 %6688, %v373_v7   ;;  %v379_v15 = vld [vmem:[%s6908_s7 + $0x30] sm:$0xff]  ;;  %v380_v16 = vld [vmem:[%s6908_s7 + $0x38] sm:$0xff]  ;;  %v381_v17 = vld [vmem:[%s6908_s7 + $0x40] sm:$0xff]  ;;  %v6967_v40 = vshrl.u32 %v11772_v38, 7 }
  0x3f   : > { %v382_v18 = vld [vmem:[%s6908_s7 + $0x48] sm:$0xff]  ;;  %v383_v19 = vld [vmem:[%s6908_s7 + $0x50] sm:$0xff]  ;;  %v384_v20 = vld [vmem:[%s6908_s7 + $0x58] sm:$0xff] }
  0x40   : > { %v385_v21 = vld [vmem:[%s6908_s7 + $0x60] sm:$0xff]  ;;  %v386_v22 = vld [vmem:[%s6908_s7 + $0x68] sm:$0xff]  ;;  %v387_v23 = vld [vmem:[%s6908_s7 + $0x70] sm:$0xff]  ;;  %12748 = vst [vmem:[#allocation10_spill] sm:$0xff] %v6967_v40  ;;  %v6971_v42 = vsub.s32 0, %v6967_v40  ;;  %v6974_v43 = vsub.s32 1, %v6967_v40 }
  0x41   : > { %v388_v24 = vld [vmem:[%s6908_s7 + $0x78] sm:$0xff]  ;;  %v389_v25 = vld [vmem:[%s6908_s7 + $0x80] sm:$0xff]  ;;  %v390_v26 = vld [vmem:[%s6908_s7 + $0x88] sm:$0xff]  ;;  %v6977_v44 = vsub.s32 2, %v6967_v40  ;;  %v6980_v45 = vsub.s32 3, %v6967_v40 }
  0x42   : > { %847 = vperm.xlu1 %6689, %v374_v10   ;;  %412 = vperm.xlu0 %6688, %v374_v10   ;;  %v391_v27 = vld [vmem:[%s6908_s7 + $0x90] sm:$0xff]  ;;  %v392_v28 = vld [vmem:[%s6908_s7 + $0x98] sm:$0xff]  ;;  %v393_v29 = vld [vmem:[%s6908_s7 + $0xa0] sm:$0xff]  ;;  %12749 = vst [vmem:[#allocation11_spill] sm:$0xff] %v6971_v42 }
  0x43   : > { %v394_v30 = vld [vmem:[%s6908_s7 + $0xa8] sm:$0xff]  ;;  %v395_v31 = vld [vmem:[%s6908_s7 + $0xb0] sm:$0xff]  ;;  %v396_v32 = vld [vmem:[%s6908_s7 + $0xb8] sm:$0xff]  ;;  %12750 = vst [vmem:[#allocation12_spill] sm:$0xff] %v6974_v43 }
  0x44   : > { %v397_v33 = vld [vmem:[%s6908_s7 + $0xc0] sm:$0xff]  ;;  %v398_v34 = vld [vmem:[%s6908_s7 + $0xc8] sm:$0xff]  ;;  %v399_v35 = vld [vmem:[%s6908_s7 + $0xd0] sm:$0xff]  ;;  %12751 = vst [vmem:[#allocation13_spill] sm:$0xff] %v6977_v44 }
  0x45   : > { %v400_v36 = vld [vmem:[%s6908_s7 + $0xd8] sm:$0xff]  ;;  %v401_v37 = vld [vmem:[%s6908_s7 + $0xe0] sm:$0xff]  ;;  %v402_v39 = vld [vmem:[%s6908_s7 + $0xe8] sm:$0xff]  ;;  %12752 = vst [vmem:[#allocation14_spill] sm:$0xff] %v6980_v45 }
  0x46   : > { %851 = vperm.xlu1 %6689, %v375_v11   ;;  %417 = vperm.xlu0 %6688, %v375_v11   ;;  %v403_v41 = vld [vmem:[%s6908_s7 + $0xf0] sm:$0xff]  ;;  %v5302_v46 = vld [vmem:[%s6903_s24 + $0x1] ss:$2 sm:$0xf]  ;;  %v404_v47 = vld [vmem:[%s6908_s7 + $0xf8] sm:$0xff] }
  0x47   : > { %v370_v48 = vld [vmem:[%s6903_s24] ss:$2 sm:$0xf]  ;;  %v6986_v49 = vrot.slane %v5302_v46, %v6971_v42  ;;  %v6989_v50 = vrot.slane %v5302_v46, %v6974_v43  ;;  %v6992_v51 = vrot.slane %v5302_v46, %v6977_v44  ;;  %v6995_v52 = vrot.slane %v5302_v46, %v6980_v45 }
  0x48   : > { %v6998_v53 = vrot.slane %v370_v48, %v6971_v42  ;;  %v7001_v54 = vrot.slane %v370_v48, %v6974_v43  ;;  %v7004_v55 = vrot.slane %v370_v48, %v6977_v44  ;;  %v7007_v56 = vrot.slane %v370_v48, %v6980_v45 }
  0x4a   : > { %855 = vperm.xlu1 %6689, %v376_v12   ;;  %422 = vperm.xlu0 %6688, %v376_v12  }
  0x4e   : > { %859 = vperm.xlu1 %6689, %v377_v13   ;;  %427 = vperm.xlu0 %6688, %v377_v13  }
  0x52   : > { %863 = vperm.xlu1 %6689, %v378_v14   ;;  %432 = vperm.xlu0 %6688, %v378_v14  }
  0x56   : > { %867 = vperm.xlu1 %6689, %v379_v15   ;;  %437 = vperm.xlu0 %6688, %v379_v15  }
  0x5a   : > { %871 = vperm.xlu1 %6689, %v380_v16   ;;  %442 = vperm.xlu0 %6688, %v380_v16  }
  0x5e   : > { %875 = vperm.xlu1 %6689, %v381_v17   ;;  %447 = vperm.xlu0 %6688, %v381_v17  }
  0x62   : > { %879 = vperm.xlu1 %6689, %v382_v18   ;;  %452 = vperm.xlu0 %6688, %v382_v18  }
  0x66   : > { %883 = vperm.xlu1 %6689, %v383_v19   ;;  %457 = vperm.xlu0 %6688, %v383_v19  }
  0x6a   : > { %887 = vperm.xlu1 %6689, %v384_v20   ;;  %462 = vperm.xlu0 %6688, %v384_v20  }
  0x6e   : > { %891 = vperm.xlu1 %6689, %v385_v21   ;;  %467 = vperm.xlu0 %6688, %v385_v21  }
  0x72   : > { %895 = vperm.xlu1 %6689, %v386_v22   ;;  %472 = vperm.xlu0 %6688, %v386_v22  }
  0x76   : > { %899 = vperm.xlu1 %6689, %v387_v23   ;;  %477 = vperm.xlu0 %6688, %v387_v23  }
  0x7a   : > { %903 = vperm.xlu1 %6689, %v388_v24   ;;  %482 = vperm.xlu0 %6688, %v388_v24  }
  0x7e   : > { %907 = vperm.xlu1 %6689, %v389_v25   ;;  %487 = vperm.xlu0 %6688, %v389_v25  }
  0x82   : > { %911 = vperm.xlu1 %6689, %v390_v26   ;;  %492 = vperm.xlu0 %6688, %v390_v26  }
  0x86   : > { %915 = vperm.xlu1 %6689, %v391_v27   ;;  %497 = vperm.xlu0 %6688, %v391_v27  }
  0x8a   : > { %919 = vperm.xlu1 %6689, %v392_v28   ;;  %502 = vperm.xlu0 %6688, %v392_v28  }
  0x8e   : > { %923 = vperm.xlu1 %6689, %v393_v29   ;;  %507 = vperm.xlu0 %6688, %v393_v29  }
  0x92   : > { %927 = vperm.xlu1 %6689, %v394_v30   ;;  %512 = vperm.xlu0 %6688, %v394_v30  }
  0x96   : > { %931 = vperm.xlu1 %6689, %v395_v31   ;;  %517 = vperm.xlu0 %6688, %v395_v31  }
  0x9a   : > { %935 = vperm.xlu1 %6689, %v396_v32   ;;  %522 = vperm.xlu0 %6688, %v396_v32  }
  0x9e   : > { %939 = vperm.xlu1 %6689, %v397_v33   ;;  %527 = vperm.xlu0 %6688, %v397_v33  }
  0xa2   : > { %943 = vperm.xlu1 %6689, %v398_v34   ;;  %532 = vperm.xlu0 %6688, %v398_v34  }
  0xa6   : > { %947 = vperm.xlu1 %6689, %v399_v35   ;;  %537 = vperm.xlu0 %6688, %v399_v35  }
  0xaa   : > { %951 = vperm.xlu1 %6689, %v400_v36   ;;  %542 = vperm.xlu0 %6688, %v400_v36  }
  0xae   : > { %955 = vperm.xlu1 %6689, %v401_v37   ;;  %547 = vperm.xlu0 %6688, %v401_v37  }
  0xb2   : > { %959 = vperm.xlu1 %6689, %v402_v39   ;;  %552 = vperm.xlu0 %6688, %v402_v39  }
  0xb6   : > { %963 = vperm.xlu1 %6689, %v403_v41   ;;  %557 = vperm.xlu0 %6688, %v403_v41  }
  0xba   : > { %967 = vperm.xlu1 %6689, %v404_v47   ;;  %562 = vperm.xlu0 %6688, %v404_v47  }
  0xbd   : > { %v844_v57 = vpop.permute.xlu1 %843  ;;  %v408_v58 = vpop.permute.xlu0 %407 }
  0xbe   : > { %v991_v59 = vsub.f32 %v844_v57, %v6986_v49  ;;  %v992_v60 = vsub.f32 %v844_v57, %v6989_v50  ;;  %v993_v61 = vsub.f32 %v844_v57, %v6992_v51  ;;  %v994_v62 = vsub.f32 %v844_v57, %v6995_v52  ;;  %6690 = vset.pattern.permute.xlu0 %v6789_v8 }
  0xbf   : > { %v586_v63 = vsub.f32 %v408_v58, %v6998_v53  ;;  %v587_v0 = vsub.f32 %v408_v58, %v7001_v54  ;;  %v588_v1 = vsub.f32 %v408_v58, %v7004_v55  ;;  %v589_v2 = vsub.f32 %v408_v58, %v7007_v56 }
  0xc0   : > { %v1119_v3 = vmul.f32 %v991_v59, %v991_v59  ;;  %v1120_v4 = vmul.f32 %v992_v60, %v992_v60  ;;  %v1121_v5 = vmul.f32 %v993_v61, %v993_v61  ;;  %v1122_v6 = vmul.f32 %v994_v62, %v994_v62 }
  0xc1   : > { %v714_v7 = vmul.f32 %v586_v63, %v586_v63  ;;  %v715_v10 = vmul.f32 %v587_v0, %v587_v0  ;;  %v716_v11 = vmul.f32 %v588_v1, %v588_v1  ;;  %v717_v12 = vmul.f32 %v589_v2, %v589_v2  ;;  %v848_v13 = vpop.permute.xlu1 %847  ;;  %v413_v8 = vpop.permute.xlu0 %412 }
  0xc2   : > { %v997_v14 = vsub.f32 %v848_v13, %v6992_v51  ;;  %v592_v20 = vsub.f32 %v413_v8, %v7004_v55  ;;  %v995_v23 = vsub.f32 %v848_v13, %v6986_v49  ;;  %v996_v24 = vsub.f32 %v848_v13, %v6989_v50 }
  0xc3   : > { %v7019_v15 = vadd.f32 %v1119_v3, %v714_v7  ;;  %v7021_v16 = vadd.f32 %v1120_v4, %v715_v10  ;;  %v7023_v17 = vadd.f32 %v1121_v5, %v716_v11  ;;  %v7025_v18 = vadd.f32 %v1122_v6, %v717_v12 }
  0xc4   : > { %v1125_v19 = vmul.f32 %v997_v14, %v997_v14  ;;  %v720_v21 = vmul.f32 %v592_v20, %v592_v20  ;;  %v998_v27 = vsub.f32 %v848_v13, %v6995_v52  ;;  %v590_v28 = vsub.f32 %v413_v8, %v6998_v53 }
  0xc5   : > { %v852_v25 = vpop.permute.xlu1 %851  ;;  %v418_v26 = vpop.permute.xlu0 %417  ;;  %v591_v29 = vsub.f32 %v413_v8, %v7001_v54  ;;  %v593_v30 = vsub.f32 %v413_v8, %v7007_v56  ;;  %v1123_v31 = vmul.f32 %v995_v23, %v995_v23  ;;  %v1124_v32 = vmul.f32 %v996_v24, %v996_v24 }
  0xc6   : > { %v7028_v22 = vadd.f32 %v1125_v19, %v720_v21  ;;  %v1126_v33 = vmul.f32 %v998_v27, %v998_v27  ;;  %v718_v34 = vmul.f32 %v590_v28, %v590_v28  ;;  %v999_v36 = vsub.f32 %v852_v25, %v6986_v49 }
  0xc7   : > { %v719_v35 = vmul.f32 %v591_v29, %v591_v29  ;;  %v721_v37 = vmul.f32 %v593_v30, %v593_v30  ;;  %v1000_v39 = vsub.f32 %v852_v25, %v6989_v50  ;;  %v1001_v41 = vsub.f32 %v852_v25, %v6992_v51 }
  0xc8   : > { %v1002_v46 = vsub.f32 %v852_v25, %v6995_v52  ;;  %v594_v57 = vsub.f32 %v418_v26, %v6998_v53  ;;  %v595_v58 = vsub.f32 %v418_v26, %v7001_v54  ;;  %v596_v59 = vsub.f32 %v418_v26, %v7004_v55 }
  0xc9   : > { %v856_v47 = vpop.permute.xlu1 %855  ;;  %v423_v48 = vpop.permute.xlu0 %422  ;;  %v597_v60 = vsub.f32 %v418_v26, %v7007_v56  ;;  %v7044_v61 = vadd.f32 %v1123_v31, %v718_v34  ;;  %v7046_v62 = vadd.f32 %v1124_v32, %v719_v35  ;;  %v1127_v63 = vmul.f32 %v999_v36, %v999_v36 }
  0xca   : > { %v7048_v0 = vadd.f32 %v1126_v33, %v721_v37  ;;  %v1128_v1 = vmul.f32 %v1000_v39, %v1000_v39  ;;  %v1129_v2 = vmul.f32 %v1001_v41, %v1001_v41  ;;  %v1130_v3 = vmul.f32 %v1002_v46, %v1002_v46 }
  0xcb   : > { %v722_v4 = vmul.f32 %v594_v57, %v594_v57  ;;  %v723_v5 = vmul.f32 %v595_v58, %v595_v58  ;;  %v724_v6 = vmul.f32 %v596_v59, %v596_v59  ;;  %v725_v7 = vmul.f32 %v597_v60, %v597_v60 }
  0xcc   : > { %v1003_v10 = vsub.f32 %v856_v47, %v6986_v49  ;;  %v1004_v11 = vsub.f32 %v856_v47, %v6989_v50  ;;  %v1005_v12 = vsub.f32 %v856_v47, %v6992_v51  ;;  %v1006_v13 = vsub.f32 %v856_v47, %v6995_v52 }
  0xcd   : > { %v860_v14 = vpop.permute.xlu1 %859  ;;  %v428_v8 = vpop.permute.xlu0 %427  ;;  %v1375_v19 = vmin.f32 %v7019_v15, %v7044_v61  ;;  %v1412_v20 = vmin.f32 %v7021_v16, %v7046_v62  ;;  %v598_v21 = vsub.f32 %v423_v48, %v6998_v53  ;;  %v599_v23 = vsub.f32 %v423_v48, %v7001_v54 }
  0xce   : > { %v1449_v24 = vmin.f32 %v7023_v17, %v7028_v22  ;;  %v1486_v25 = vmin.f32 %v7025_v18, %v7048_v0  ;;  %v600_v26 = vsub.f32 %v423_v48, %v7004_v55  ;;  %v601_v27 = vsub.f32 %v423_v48, %v7007_v56 }
  0xcf   : > { %v7066_v28 = vadd.f32 %v1127_v63, %v722_v4  ;;  %v7068_v29 = vadd.f32 %v1128_v1, %v723_v5  ;;  %v7070_v30 = vadd.f32 %v1129_v2, %v724_v6  ;;  %v7072_v31 = vadd.f32 %v1130_v3, %v725_v7 }
  0xd0   : > { %v1131_v32 = vmul.f32 %v1003_v10, %v1003_v10  ;;  %v1132_v33 = vmul.f32 %v1004_v11, %v1004_v11  ;;  %v1133_v34 = vmul.f32 %v1005_v12, %v1005_v12  ;;  %v1134_v35 = vmul.f32 %v1006_v13, %v1006_v13 }
  0xd1   : > { %v726_v36 = vmul.f32 %v598_v21, %v598_v21  ;;  %v727_v37 = vmul.f32 %v599_v23, %v599_v23  ;;  %v1007_v39 = vsub.f32 %v860_v14, %v6986_v49  ;;  %v1008_v41 = vsub.f32 %v860_v14, %v6989_v50  ;;  %v864_v58 = vpop.permute.xlu1 %863  ;;  %v433_v59 = vpop.permute.xlu0 %432 }
  0xd2   : > { %v728_v46 = vmul.f32 %v600_v26, %v600_v26  ;;  %v729_v47 = vmul.f32 %v601_v27, %v601_v27  ;;  %v1009_v48 = vsub.f32 %v860_v14, %v6992_v51  ;;  %v1010_v57 = vsub.f32 %v860_v14, %v6995_v52 }
  0xd3   : > { %v602_v60 = vsub.f32 %v428_v8, %v6998_v53  ;;  %v603_v63 = vsub.f32 %v428_v8, %v7001_v54  ;;  %v604_v1 = vsub.f32 %v428_v8, %v7004_v55  ;;  %v605_v2 = vsub.f32 %v428_v8, %v7007_v56 }
  0xd4   : > { %v1376_v3 = vmin.f32 %v1375_v19, %v7066_v28  ;;  %v1413_v4 = vmin.f32 %v1412_v20, %v7068_v29  ;;  %v1450_v5 = vmin.f32 %v1449_v24, %v7070_v30  ;;  %v1487_v6 = vmin.f32 %v1486_v25, %v7072_v31 }
  0xd5   : > { %v7086_v7 = vadd.f32 %v1131_v32, %v726_v36  ;;  %v7088_v10 = vadd.f32 %v1132_v33, %v727_v37  ;;  %v1135_v11 = vmul.f32 %v1007_v39, %v1007_v39  ;;  %v1136_v12 = vmul.f32 %v1008_v41, %v1008_v41  ;;  %v868_v33 = vpop.permute.xlu1 %867  ;;  %v438_v36 = vpop.permute.xlu0 %437 }
  0xd6   : > { %v7090_v13 = vadd.f32 %v1133_v34, %v728_v46  ;;  %v7092_v14 = vadd.f32 %v1134_v35, %v729_v47  ;;  %v1137_v21 = vmul.f32 %v1009_v48, %v1009_v48  ;;  %v1138_v8 = vmul.f32 %v1010_v57, %v1010_v57 }
  0xd7   : > { %12753 = vst [vmem:[#allocation15_spill] sm:$0xff] %v7088_v10  ;;  %v730_v23 = vmul.f32 %v602_v60, %v602_v60  ;;  %v731_v19 = vmul.f32 %v603_v63, %v603_v63  ;;  %v732_v26 = vmul.f32 %v604_v1, %v604_v1  ;;  %v733_v20 = vmul.f32 %v605_v2, %v605_v2 }
  0xd8   : > { %12754 = vst [vmem:[#allocation16_spill] sm:$0xff] %v7090_v13  ;;  %12755 = vst [vmem:[#allocation17_spill] sm:$0xff] %v7092_v14  ;;  %v1011_v24 = vsub.f32 %v864_v58, %v6986_v49  ;;  %v1012_v25 = vsub.f32 %v864_v58, %v6989_v50  ;;  %v1013_v27 = vsub.f32 %v864_v58, %v6992_v51 }
  0xd9   : > { %v1014_v32 = vsub.f32 %v864_v58, %v6995_v52  ;;  %v1377_v34 = vmin.f32 %v1376_v3, %v7086_v7  ;;  %v1414_v35 = vmin.f32 %v1413_v4, %v7088_v10  ;;  %v606_v37 = vsub.f32 %v433_v59, %v6998_v53 }
  0xda   : > { %v607_v39 = vsub.f32 %v433_v59, %v7001_v54  ;;  %v1451_v41 = vmin.f32 %v1450_v5, %v7090_v13  ;;  %v1488_v46 = vmin.f32 %v1487_v6, %v7092_v14  ;;  %v608_v47 = vsub.f32 %v433_v59, %v7004_v55 }
  0xdb   : > { %v609_v48 = vsub.f32 %v433_v59, %v7007_v56  ;;  %v7106_v57 = vadd.f32 %v1135_v11, %v730_v23  ;;  %v7108_v58 = vadd.f32 %v1136_v12, %v731_v19  ;;  %v7110_v60 = vadd.f32 %v1137_v21, %v732_v26  ;;  %v872_v21 = vpop.permute.xlu1 %871  ;;  %v443_v23 = vpop.permute.xlu0 %442 }
  0xdc   : > { %v7112_v63 = vadd.f32 %v1138_v8, %v733_v20  ;;  %v1139_v1 = vmul.f32 %v1011_v24, %v1011_v24  ;;  %v1140_v2 = vmul.f32 %v1012_v25, %v1012_v25  ;;  %v1141_v3 = vmul.f32 %v1013_v27, %v1013_v27 }
  0xdd   : > { %12756 = vst [vmem:[#allocation18_spill] sm:$0xff] %v7106_v57  ;;  %12757 = vst [vmem:[#allocation19_spill] sm:$0xff] %v7108_v58  ;;  %v1142_v4 = vmul.f32 %v1014_v32, %v1014_v32  ;;  %v734_v9 = vmul.f32 %v606_v37, %v606_v37  ;;  %v735_v5 = vmul.f32 %v607_v39, %v607_v39 }
  0xde   : > { %12758 = vst [vmem:[#allocation20_spill] sm:$0xff] %v7110_v60  ;;  %12759 = vst [vmem:[#allocation21_spill] sm:$0xff] %v7112_v63  ;;  %v1015_v6 = vsub.f32 %v868_v33, %v6986_v49  ;;  %v1016_v38 = vsub.f32 %v868_v33, %v6989_v50  ;;  %v736_v45 = vmul.f32 %v608_v47, %v608_v47 }
  0xdf   : > { %v737_v59 = vmul.f32 %v609_v48, %v609_v48  ;;  %v1017_v11 = vsub.f32 %v868_v33, %v6992_v51  ;;  %v1018_v12 = vsub.f32 %v868_v33, %v6995_v52  ;;  %v610_v8 = vsub.f32 %v438_v36, %v6998_v53 }
  0xe0   : > { %v611_v19 = vsub.f32 %v438_v36, %v7001_v54  ;;  %v612_v26 = vsub.f32 %v438_v36, %v7004_v55  ;;  %v613_v20 = vsub.f32 %v438_v36, %v7007_v56  ;;  %v1378_v24 = vmin.f32 %v1377_v34, %v7106_v57 }
  0xe1   : > { %v1415_v25 = vmin.f32 %v1414_v35, %v7108_v58  ;;  %v1452_v27 = vmin.f32 %v1451_v41, %v7110_v60  ;;  %v1489_v32 = vmin.f32 %v1488_v46, %v7112_v63  ;;  %v7126_v37 = vadd.f32 %v1139_v1, %v734_v9 }
  0xe2   : > { %v7128_v33 = vadd.f32 %v1140_v2, %v735_v5  ;;  %v1143_v39 = vmul.f32 %v1015_v6, %v1015_v6  ;;  %v1144_v47 = vmul.f32 %v1016_v38, %v1016_v38  ;;  %v7130_v48 = vadd.f32 %v1141_v3, %v736_v45  ;;  %v876_v2 = vpop.permute.xlu1 %875  ;;  %v448_v38 = vpop.permute.xlu0 %447 }
  0xe3   : > { %12760 = vst [vmem:[#allocation22_spill] sm:$0xff] %v7126_v37  ;;  %v7132_v43 = vadd.f32 %v1142_v4, %v737_v59  ;;  %v1145_v44 = vmul.f32 %v1017_v11, %v1017_v11  ;;  %v1146_v36 = vmul.f32 %v1018_v12, %v1018_v12  ;;  %v738_v42 = vmul.f32 %v610_v8, %v610_v8 }
  0xe4   : > { %12761 = vst [vmem:[#allocation23_spill] sm:$0xff] %v7128_v33  ;;  %12762 = vst [vmem:[#allocation24_spill] sm:$0xff] %v7130_v48  ;;  %v739_v34 = vmul.f32 %v611_v19, %v611_v19  ;;  %v740_v57 = vmul.f32 %v612_v26, %v612_v26  ;;  %v741_v35 = vmul.f32 %v613_v20, %v613_v20 }
  0xe5   : > { %12763 = vst [vmem:[#allocation25_spill] sm:$0xff] %v7132_v43  ;;  %v1019_v41 = vsub.f32 %v872_v21, %v6986_v49  ;;  %v1020_v46 = vsub.f32 %v872_v21, %v6989_v50  ;;  %v1021_v9 = vsub.f32 %v872_v21, %v6992_v51  ;;  %v1022_v1 = vsub.f32 %v872_v21, %v6995_v52 }
  0xe6   : > { %v1379_v45 = vmin.f32 %v1378_v24, %v7126_v37  ;;  %v1416_v3 = vmin.f32 %v1415_v25, %v7128_v33  ;;  %v614_v4 = vsub.f32 %v443_v23, %v6998_v53  ;;  %v615_v5 = vsub.f32 %v443_v23, %v7001_v54 }
  0xe7   : > { %v1453_v6 = vmin.f32 %v1452_v27, %v7130_v48  ;;  %v1490_v59 = vmin.f32 %v1489_v32, %v7132_v43  ;;  %v616_v11 = vsub.f32 %v443_v23, %v7004_v55  ;;  %v617_v12 = vsub.f32 %v443_v23, %v7007_v56 }
  0xe8   : > { %v7146_v8 = vadd.f32 %v1143_v39, %v738_v42  ;;  %v7148_v21 = vadd.f32 %v1144_v47, %v739_v34  ;;  %v7150_v19 = vadd.f32 %v1145_v44, %v740_v57  ;;  %v7152_v26 = vadd.f32 %v1146_v36, %v741_v35  ;;  %v880_v44 = vpop.permute.xlu1 %879  ;;  %v453_v57 = vpop.permute.xlu0 %452 }
  0xe9   : > { %v1147_v20 = vmul.f32 %v1019_v41, %v1019_v41  ;;  %v1148_v24 = vmul.f32 %v1020_v46, %v1020_v46  ;;  %v1149_v25 = vmul.f32 %v1021_v9, %v1021_v9  ;;  %v1150_v33 = vmul.f32 %v1022_v1, %v1022_v1 }
  0xea   : > { %12764 = vst [vmem:[#allocation26_spill] sm:$0xff] %v7146_v8  ;;  %12765 = vst [vmem:[#allocation27_spill] sm:$0xff] %v7148_v21  ;;  %v742_v37 = vmul.f32 %v614_v4, %v614_v4  ;;  %v743_v27 = vmul.f32 %v615_v5, %v615_v5  ;;  %v1023_v32 = vsub.f32 %v876_v2, %v6986_v49 }
  0xeb   : > { %12766 = vst [vmem:[#allocation28_spill] sm:$0xff] %v7150_v19  ;;  %12767 = vst [vmem:[#allocation29_spill] sm:$0xff] %v7152_v26  ;;  %v1024_v43 = vsub.f32 %v876_v2, %v6989_v50  ;;  %v744_v48 = vmul.f32 %v616_v11, %v616_v11  ;;  %v745_v23 = vmul.f32 %v617_v12, %v617_v12 }
  0xec   : > { %v1025_v42 = vsub.f32 %v876_v2, %v6992_v51  ;;  %v1026_v39 = vsub.f32 %v876_v2, %v6995_v52  ;;  %v618_v47 = vsub.f32 %v448_v38, %v6998_v53  ;;  %v619_v36 = vsub.f32 %v448_v38, %v7001_v54 }
  0xed   : > { %v620_v34 = vsub.f32 %v448_v38, %v7004_v55  ;;  %v621_v35 = vsub.f32 %v448_v38, %v7007_v56  ;;  %v1380_v41 = vmin.f32 %v1379_v45, %v7146_v8  ;;  %v1417_v46 = vmin.f32 %v1416_v3, %v7148_v21 }
  0xee   : > { %v1454_v9 = vmin.f32 %v1453_v6, %v7150_v19  ;;  %v1491_v1 = vmin.f32 %v1490_v59, %v7152_v26  ;;  %v7166_v4 = vadd.f32 %v1147_v20, %v742_v37  ;;  %v7168_v2 = vadd.f32 %v1148_v24, %v743_v27  ;;  %v884_v24 = vpop.permute.xlu1 %883 }
  0xef   : > { %v1151_v5 = vmul.f32 %v1023_v32, %v1023_v32  ;;  %v1152_v11 = vmul.f32 %v1024_v43, %v1024_v43  ;;  %v7170_v12 = vadd.f32 %v1149_v25, %v744_v48  ;;  %v7172_v63 = vadd.f32 %v1150_v33, %v745_v23  ;;  %v458_v43 = vpop.permute.xlu0 %457 }
  0xf0   : > { %12768 = vst [vmem:[#allocation30_spill] sm:$0xff] %v7166_v4  ;;  %12769 = vst [vmem:[#allocation31_spill] sm:$0xff] %v7168_v2  ;;  %v1153_v60 = vmul.f32 %v1025_v42, %v1025_v42  ;;  %v1154_v38 = vmul.f32 %v1026_v39, %v1026_v39  ;;  %v746_v58 = vmul.f32 %v618_v47, %v618_v47 }
  0xf1   : > { %12770 = vst [vmem:[#allocation32_spill] sm:$0xff] %v7170_v12  ;;  %12771 = vst [vmem:[#allocation33_spill] sm:$0xff] %v7172_v63  ;;  %v747_v45 = vmul.f32 %v619_v36, %v619_v36  ;;  %v748_v8 = vmul.f32 %v620_v34, %v620_v34  ;;  %v749_v3 = vmul.f32 %v621_v35, %v621_v35 }
  0xf2   : > { %v1027_v6 = vsub.f32 %v880_v44, %v6986_v49  ;;  %v1028_v59 = vsub.f32 %v880_v44, %v6989_v50  ;;  %v1029_v37 = vsub.f32 %v880_v44, %v6992_v51  ;;  %v1030_v20 = vsub.f32 %v880_v44, %v6995_v52 }
  0xf3   : > { %v1381_v48 = vmin.f32 %v1380_v41, %v7166_v4  ;;  %v1418_v33 = vmin.f32 %v1417_v46, %v7168_v2  ;;  %v622_v25 = vsub.f32 %v453_v57, %v6998_v53  ;;  %v623_v27 = vsub.f32 %v453_v57, %v7001_v54 }
  0xf4   : > { %v1455_v32 = vmin.f32 %v1454_v9, %v7170_v12  ;;  %v1492_v23 = vmin.f32 %v1491_v1, %v7172_v63  ;;  %v624_v42 = vsub.f32 %v453_v57, %v7004_v55  ;;  %v625_v39 = vsub.f32 %v453_v57, %v7007_v56 }
  0xf5   : > { %v7186_v47 = vadd.f32 %v1151_v5, %v746_v58  ;;  %v7188_v44 = vadd.f32 %v1152_v11, %v747_v45  ;;  %v7190_v36 = vadd.f32 %v1153_v60, %v748_v8  ;;  %v7192_v34 = vadd.f32 %v1154_v38, %v749_v3  ;;  %v888_v60 = vpop.permute.xlu1 %887  ;;  %v463_v8 = vpop.permute.xlu0 %462 }
  0xf6   : > { %v1155_v35 = vmul.f32 %v1027_v6, %v1027_v6  ;;  %v1156_v41 = vmul.f32 %v1028_v59, %v1028_v59  ;;  %v1157_v46 = vmul.f32 %v1029_v37, %v1029_v37  ;;  %v1158_v2 = vmul.f32 %v1030_v20, %v1030_v20 }
  0xf7   : > { %12772 = vst [vmem:[#allocation34_spill] sm:$0xff] %v7186_v47  ;;  %12773 = vst [vmem:[#allocation35_spill] sm:$0xff] %v7188_v44  ;;  %v750_v4 = vmul.f32 %v622_v25, %v622_v25  ;;  %v751_v9 = vmul.f32 %v623_v27, %v623_v27  ;;  %v1031_v1 = vsub.f32 %v884_v24, %v6986_v49 }
  0xf8   : > { %12774 = vst [vmem:[#allocation36_spill] sm:$0xff] %v7190_v36  ;;  %12775 = vst [vmem:[#allocation37_spill] sm:$0xff] %v7192_v34  ;;  %v1032_v63 = vsub.f32 %v884_v24, %v6989_v50  ;;  %v752_v12 = vmul.f32 %v624_v42, %v624_v42  ;;  %v753_v57 = vmul.f32 %v625_v39, %v625_v39 }
  0xf9   : > { %v1033_v58 = vsub.f32 %v884_v24, %v6992_v51  ;;  %v1034_v5 = vsub.f32 %v884_v24, %v6995_v52  ;;  %v626_v11 = vsub.f32 %v458_v43, %v6998_v53  ;;  %v627_v38 = vsub.f32 %v458_v43, %v7001_v54 }
  0xfa   : > { %v628_v45 = vsub.f32 %v458_v43, %v7004_v55  ;;  %v629_v3 = vsub.f32 %v458_v43, %v7007_v56  ;;  %v1382_v6 = vmin.f32 %v1381_v48, %v7186_v47  ;;  %v1419_v59 = vmin.f32 %v1418_v33, %v7188_v44 }
  0xfb   : > { %v1456_v37 = vmin.f32 %v1455_v32, %v7190_v36  ;;  %v1493_v20 = vmin.f32 %v1492_v23, %v7192_v34  ;;  %v7206_v25 = vadd.f32 %v1155_v35, %v750_v4  ;;  %v7208_v24 = vadd.f32 %v1156_v41, %v751_v9  ;;  %v892_v41 = vpop.permute.xlu1 %891 }
  0xfc   : > { %v1159_v27 = vmul.f32 %v1031_v1, %v1031_v1  ;;  %v1160_v42 = vmul.f32 %v1032_v63, %v1032_v63  ;;  %v7210_v39 = vadd.f32 %v1157_v46, %v752_v12  ;;  %v7212_v26 = vadd.f32 %v1158_v2, %v753_v57  ;;  %v468_v63 = vpop.permute.xlu0 %467 }
  0xfd   : > { %12776 = vst [vmem:[#allocation38_spill] sm:$0xff] %v7206_v25  ;;  %12777 = vst [vmem:[#allocation39_spill] sm:$0xff] %v7208_v24  ;;  %v1161_v19 = vmul.f32 %v1033_v58, %v1033_v58  ;;  %v1162_v43 = vmul.f32 %v1034_v5, %v1034_v5  ;;  %v754_v21 = vmul.f32 %v626_v11, %v626_v11 }
  0xfe   : > { %12778 = vst [vmem:[#allocation40_spill] sm:$0xff] %v7210_v39  ;;  %12779 = vst [vmem:[#allocation41_spill] sm:$0xff] %v7212_v26  ;;  %v755_v48 = vmul.f32 %v627_v38, %v627_v38  ;;  %v756_v47 = vmul.f32 %v628_v45, %v628_v45  ;;  %v757_v33 = vmul.f32 %v629_v3, %v629_v3 }
  0xff   : > { %v1035_v32 = vsub.f32 %v888_v60, %v6986_v49  ;;  %v1036_v23 = vsub.f32 %v888_v60, %v6989_v50  ;;  %v1037_v4 = vsub.f32 %v888_v60, %v6992_v51  ;;  %v1038_v35 = vsub.f32 %v888_v60, %v6995_v52 }
 0x100   : > { %v1383_v12 = vmin.f32 %v1382_v6, %v7206_v25  ;;  %v1420_v2 = vmin.f32 %v1419_v59, %v7208_v24  ;;  %v630_v46 = vsub.f32 %v463_v8, %v6998_v53  ;;  %v631_v9 = vsub.f32 %v463_v8, %v7001_v54 }
 0x101   : > { %v1457_v1 = vmin.f32 %v1456_v37, %v7210_v39  ;;  %v1494_v57 = vmin.f32 %v1493_v20, %v7212_v26  ;;  %v632_v58 = vsub.f32 %v463_v8, %v7004_v55  ;;  %v633_v5 = vsub.f32 %v463_v8, %v7007_v56 }
 0x102   : > { %v7226_v11 = vadd.f32 %v1159_v27, %v754_v21  ;;  %v7228_v60 = vadd.f32 %v1160_v42, %v755_v48  ;;  %v7230_v38 = vadd.f32 %v1161_v19, %v756_v47  ;;  %v7232_v45 = vadd.f32 %v1162_v43, %v757_v33  ;;  %v896_v19 = vpop.permute.xlu1 %895  ;;  %v473_v47 = vpop.permute.xlu0 %472 }
 0x103   : > { %v1163_v3 = vmul.f32 %v1035_v32, %v1035_v32  ;;  %v1164_v6 = vmul.f32 %v1036_v23, %v1036_v23  ;;  %v1165_v59 = vmul.f32 %v1037_v4, %v1037_v4  ;;  %v1166_v24 = vmul.f32 %v1038_v35, %v1038_v35 }
 0x104   : > { %12780 = vst [vmem:[#allocation42_spill] sm:$0xff] %v7226_v11  ;;  %12781 = vst [vmem:[#allocation43_spill] sm:$0xff] %v7228_v60  ;;  %v758_v25 = vmul.f32 %v630_v46, %v630_v46  ;;  %v759_v37 = vmul.f32 %v631_v9, %v631_v9  ;;  %v1039_v20 = vsub.f32 %v892_v41, %v6986_v49 }
 0x105   : > { %12782 = vst [vmem:[#allocation44_spill] sm:$0xff] %v7230_v38  ;;  %12783 = vst [vmem:[#allocation45_spill] sm:$0xff] %v7232_v45  ;;  %v1040_v26 = vsub.f32 %v892_v41, %v6989_v50  ;;  %v760_v39 = vmul.f32 %v632_v58, %v632_v58  ;;  %v761_v8 = vmul.f32 %v633_v5, %v633_v5 }
 0x106   : > { %v1041_v21 = vsub.f32 %v892_v41, %v6992_v51  ;;  %v1042_v27 = vsub.f32 %v892_v41, %v6995_v52  ;;  %v634_v42 = vsub.f32 %v468_v63, %v6998_v53  ;;  %v635_v43 = vsub.f32 %v468_v63, %v7001_v54 }
 0x107   : > { %v636_v48 = vsub.f32 %v468_v63, %v7004_v55  ;;  %v637_v33 = vsub.f32 %v468_v63, %v7007_v56  ;;  %v1384_v32 = vmin.f32 %v1383_v12, %v7226_v11  ;;  %v1421_v23 = vmin.f32 %v1420_v2, %v7228_v60 }
 0x108   : > { %v1458_v4 = vmin.f32 %v1457_v1, %v7230_v38  ;;  %v1495_v35 = vmin.f32 %v1494_v57, %v7232_v45  ;;  %v7246_v46 = vadd.f32 %v1163_v3, %v758_v25  ;;  %v7248_v41 = vadd.f32 %v1164_v6, %v759_v37  ;;  %v900_v6 = vpop.permute.xlu1 %899 }
 0x109   : > { %v1167_v9 = vmul.f32 %v1039_v20, %v1039_v20  ;;  %v1168_v58 = vmul.f32 %v1040_v26, %v1040_v26  ;;  %v7250_v5 = vadd.f32 %v1165_v59, %v760_v39  ;;  %v7252_v34 = vadd.f32 %v1166_v24, %v761_v8  ;;  %v478_v26 = vpop.permute.xlu0 %477 }
 0x10a   : > { %12784 = vst [vmem:[#allocation46_spill] sm:$0xff] %v7246_v46  ;;  %12785 = vst [vmem:[#allocation47_spill] sm:$0xff] %v7248_v41  ;;  %v1169_v36 = vmul.f32 %v1041_v21, %v1041_v21  ;;  %v1170_v63 = vmul.f32 %v1042_v27, %v1042_v27  ;;  %v762_v44 = vmul.f32 %v634_v42, %v634_v42 }
 0x10b   : > { %12786 = vst [vmem:[#allocation48_spill] sm:$0xff] %v7250_v5  ;;  %12787 = vst [vmem:[#allocation49_spill] sm:$0xff] %v7252_v34  ;;  %v763_v12 = vmul.f32 %v635_v43, %v635_v43  ;;  %v764_v11 = vmul.f32 %v636_v48, %v636_v48  ;;  %v765_v2 = vmul.f32 %v637_v33, %v637_v33 }
 0x10c   : > { %v1043_v1 = vsub.f32 %v896_v19, %v6986_v49  ;;  %v1044_v57 = vsub.f32 %v896_v19, %v6989_v50  ;;  %v1045_v25 = vsub.f32 %v896_v19, %v6992_v51  ;;  %v1046_v3 = vsub.f32 %v896_v19, %v6995_v52 }
 0x10d   : > { %v1385_v39 = vmin.f32 %v1384_v32, %v7246_v46  ;;  %v1422_v24 = vmin.f32 %v1421_v23, %v7248_v41  ;;  %v638_v59 = vsub.f32 %v473_v47, %v6998_v53  ;;  %v639_v37 = vsub.f32 %v473_v47, %v7001_v54 }
 0x10e   : > { %v1459_v20 = vmin.f32 %v1458_v4, %v7250_v5  ;;  %v1496_v8 = vmin.f32 %v1495_v35, %v7252_v34  ;;  %v640_v21 = vsub.f32 %v473_v47, %v7004_v55  ;;  %v641_v27 = vsub.f32 %v473_v47, %v7007_v56 }
 0x10f   : > { %v7266_v42 = vadd.f32 %v1167_v9, %v762_v44  ;;  %v7268_v19 = vadd.f32 %v1168_v58, %v763_v12  ;;  %v7270_v43 = vadd.f32 %v1169_v36, %v764_v11  ;;  %v7272_v48 = vadd.f32 %v1170_v63, %v765_v2  ;;  %v904_v36 = vpop.permute.xlu1 %903  ;;  %v483_v11 = vpop.permute.xlu0 %482 }
 0x110   : > { %v1171_v33 = vmul.f32 %v1043_v1, %v1043_v1  ;;  %v1172_v32 = vmul.f32 %v1044_v57, %v1044_v57  ;;  %v1173_v23 = vmul.f32 %v1045_v25, %v1045_v25  ;;  %v1174_v41 = vmul.f32 %v1046_v3, %v1046_v3 }
 0x111   : > { %12788 = vst [vmem:[#allocation50_spill] sm:$0xff] %v7266_v42  ;;  %12789 = vst [vmem:[#allocation51_spill] sm:$0xff] %v7268_v19  ;;  %v766_v46 = vmul.f32 %v638_v59, %v638_v59  ;;  %v767_v4 = vmul.f32 %v639_v37, %v639_v37  ;;  %v1047_v35 = vsub.f32 %v900_v6, %v6986_v49 }
 0x112   : > { %12790 = vst [vmem:[#allocation52_spill] sm:$0xff] %v7270_v43  ;;  %12791 = vst [vmem:[#allocation53_spill] sm:$0xff] %v7272_v48  ;;  %v1048_v34 = vsub.f32 %v900_v6, %v6989_v50  ;;  %v768_v5 = vmul.f32 %v640_v21, %v640_v21  ;;  %v769_v47 = vmul.f32 %v641_v27, %v641_v27 }
 0x113   : > { %v1049_v44 = vsub.f32 %v900_v6, %v6992_v51  ;;  %v1050_v9 = vsub.f32 %v900_v6, %v6995_v52  ;;  %v642_v58 = vsub.f32 %v478_v26, %v6998_v53  ;;  %v643_v63 = vsub.f32 %v478_v26, %v7001_v54 }
 0x114   : > { %v644_v12 = vsub.f32 %v478_v26, %v7004_v55  ;;  %v645_v2 = vsub.f32 %v478_v26, %v7007_v56  ;;  %v1386_v1 = vmin.f32 %v1385_v39, %v7266_v42  ;;  %v1423_v57 = vmin.f32 %v1422_v24, %v7268_v19 }
 0x115   : > { %v1460_v25 = vmin.f32 %v1459_v20, %v7270_v43  ;;  %v1497_v3 = vmin.f32 %v1496_v8, %v7272_v48  ;;  %v7286_v59 = vadd.f32 %v1171_v33, %v766_v46  ;;  %v7288_v6 = vadd.f32 %v1172_v32, %v767_v4  ;;  %v908_v32 = vpop.permute.xlu1 %907 }
 0x116   : > { %v1175_v37 = vmul.f32 %v1047_v35, %v1047_v35  ;;  %v1176_v21 = vmul.f32 %v1048_v34, %v1048_v34  ;;  %v7290_v27 = vadd.f32 %v1173_v23, %v768_v5  ;;  %v7292_v45 = vadd.f32 %v1174_v41, %v769_v47  ;;  %v488_v34 = vpop.permute.xlu0 %487 }
 0x117   : > { %12792 = vst [vmem:[#allocation54_spill] sm:$0xff] %v7286_v59  ;;  %12793 = vst [vmem:[#allocation55_spill] sm:$0xff] %v7288_v6  ;;  %v1177_v38 = vmul.f32 %v1049_v44, %v1049_v44  ;;  %v1178_v26 = vmul.f32 %v1050_v9, %v1050_v9  ;;  %v770_v60 = vmul.f32 %v642_v58, %v642_v58 }
 0x118   : > { %12794 = vst [vmem:[#allocation56_spill] sm:$0xff] %v7290_v27  ;;  %12795 = vst [vmem:[#allocation57_spill] sm:$0xff] %v7292_v45  ;;  %v771_v39 = vmul.f32 %v643_v63, %v643_v63  ;;  %v772_v42 = vmul.f32 %v644_v12, %v644_v12  ;;  %v773_v24 = vmul.f32 %v645_v2, %v645_v2 }
 0x119   : > { %v1051_v20 = vsub.f32 %v904_v36, %v6986_v49  ;;  %v1052_v8 = vsub.f32 %v904_v36, %v6989_v50  ;;  %v1053_v46 = vsub.f32 %v904_v36, %v6992_v51  ;;  %v1054_v33 = vsub.f32 %v904_v36, %v6995_v52 }
 0x11a   : > { %v1387_v5 = vmin.f32 %v1386_v1, %v7286_v59  ;;  %v1424_v41 = vmin.f32 %v1423_v57, %v7288_v6  ;;  %v646_v23 = vsub.f32 %v483_v11, %v6998_v53  ;;  %v647_v4 = vsub.f32 %v483_v11, %v7001_v54 }
 0x11b   : > { %v1461_v35 = vmin.f32 %v1460_v25, %v7290_v27  ;;  %v1498_v47 = vmin.f32 %v1497_v3, %v7292_v45  ;;  %v648_v44 = vsub.f32 %v483_v11, %v7004_v55  ;;  %v649_v9 = vsub.f32 %v483_v11, %v7007_v56 }
 0x11c   : > { %v7306_v58 = vadd.f32 %v1175_v37, %v770_v60  ;;  %v7308_v36 = vadd.f32 %v1176_v21, %v771_v39  ;;  %v7310_v63 = vadd.f32 %v1177_v38, %v772_v42  ;;  %v7312_v12 = vadd.f32 %v1178_v26, %v773_v24  ;;  %v912_v38 = vpop.permute.xlu1 %911  ;;  %v493_v42 = vpop.permute.xlu0 %492 }
 0x11d   : > { %v1179_v2 = vmul.f32 %v1051_v20, %v1051_v20  ;;  %v1180_v1 = vmul.f32 %v1052_v8, %v1052_v8  ;;  %v1181_v57 = vmul.f32 %v1053_v46, %v1053_v46  ;;  %v1182_v6 = vmul.f32 %v1054_v33, %v1054_v33 }
 0x11e   : > { %12796 = vst [vmem:[#allocation58_spill] sm:$0xff] %v7306_v58  ;;  %12797 = vst [vmem:[#allocation59_spill] sm:$0xff] %v7308_v36  ;;  %v774_v59 = vmul.f32 %v646_v23, %v646_v23  ;;  %v775_v25 = vmul.f32 %v647_v4, %v647_v4  ;;  %v1055_v3 = vsub.f32 %v908_v32, %v6986_v49 }
 0x11f   : > { %12798 = vst [vmem:[#allocation60_spill] sm:$0xff] %v7310_v63  ;;  %12799 = vst [vmem:[#allocation61_spill] sm:$0xff] %v7312_v12  ;;  %v1056_v45 = vsub.f32 %v908_v32, %v6989_v50  ;;  %v776_v27 = vmul.f32 %v648_v44, %v648_v44  ;;  %v777_v11 = vmul.f32 %v649_v9, %v649_v9 }
 0x120   : > { %v1057_v60 = vsub.f32 %v908_v32, %v6992_v51  ;;  %v1058_v37 = vsub.f32 %v908_v32, %v6995_v52  ;;  %v650_v21 = vsub.f32 %v488_v34, %v6998_v53  ;;  %v651_v26 = vsub.f32 %v488_v34, %v7001_v54 }
 0x121   : > { %v652_v39 = vsub.f32 %v488_v34, %v7004_v55  ;;  %v653_v24 = vsub.f32 %v488_v34, %v7007_v56  ;;  %v1388_v20 = vmin.f32 %v1387_v5, %v7306_v58  ;;  %v1425_v8 = vmin.f32 %v1424_v41, %v7308_v36 }
 0x122   : > { %v1462_v46 = vmin.f32 %v1461_v35, %v7310_v63  ;;  %v1499_v33 = vmin.f32 %v1498_v47, %v7312_v12  ;;  %v7326_v23 = vadd.f32 %v1179_v2, %v774_v59  ;;  %v7328_v32 = vadd.f32 %v1180_v1, %v775_v25  ;;  %v916_v1 = vpop.permute.xlu1 %915 }
 0x123   : > { %v1183_v4 = vmul.f32 %v1055_v3, %v1055_v3  ;;  %v1184_v44 = vmul.f32 %v1056_v45, %v1056_v45  ;;  %v7330_v9 = vadd.f32 %v1181_v57, %v776_v27  ;;  %v7332_v48 = vadd.f32 %v1182_v6, %v777_v11  ;;  %v498_v45 = vpop.permute.xlu0 %497 }
 0x124   : > { %12800 = vst [vmem:[#allocation62_spill] sm:$0xff] %v7326_v23  ;;  %12801 = vst [vmem:[#allocation63_spill] sm:$0xff] %v7328_v32  ;;  %v1185_v43 = vmul.f32 %v1057_v60, %v1057_v60  ;;  %v1186_v34 = vmul.f32 %v1058_v37, %v1058_v37  ;;  %v778_v19 = vmul.f32 %v650_v21, %v650_v21 }
 0x125   : > { %12802 = vst [vmem:[#allocation64_spill] sm:$0xff] %v7330_v9  ;;  %12803 = vst [vmem:[#allocation65_spill] sm:$0xff] %v7332_v48  ;;  %v779_v5 = vmul.f32 %v651_v26, %v651_v26  ;;  %v780_v58 = vmul.f32 %v652_v39, %v652_v39  ;;  %v781_v41 = vmul.f32 %v653_v24, %v653_v24 }
 0x126   : > { %v1059_v35 = vsub.f32 %v912_v38, %v6986_v49  ;;  %v1060_v47 = vsub.f32 %v912_v38, %v6989_v50  ;;  %v1061_v59 = vsub.f32 %v912_v38, %v6992_v51  ;;  %v1062_v2 = vsub.f32 %v912_v38, %v6995_v52 }
 0x127   : > { %v1389_v27 = vmin.f32 %v1388_v20, %v7326_v23  ;;  %v1426_v6 = vmin.f32 %v1425_v8, %v7328_v32  ;;  %v654_v57 = vsub.f32 %v493_v42, %v6998_v53  ;;  %v655_v25 = vsub.f32 %v493_v42, %v7001_v54 }
 0x128   : > { %v1463_v3 = vmin.f32 %v1462_v46, %v7330_v9  ;;  %v1500_v11 = vmin.f32 %v1499_v33, %v7332_v48  ;;  %v656_v60 = vsub.f32 %v493_v42, %v7004_v55  ;;  %v657_v37 = vsub.f32 %v493_v42, %v7007_v56 }
 0x129   : > { %v7346_v21 = vadd.f32 %v1183_v4, %v778_v19  ;;  %v7348_v38 = vadd.f32 %v1184_v44, %v779_v5  ;;  %v7350_v26 = vadd.f32 %v1185_v43, %v780_v58  ;;  %v7352_v39 = vadd.f32 %v1186_v34, %v781_v41  ;;  %v920_v43 = vpop.permute.xlu1 %919  ;;  %v503_v58 = vpop.permute.xlu0 %502 }
 0x12a   : > { %v1187_v24 = vmul.f32 %v1059_v35, %v1059_v35  ;;  %v1188_v20 = vmul.f32 %v1060_v47, %v1060_v47  ;;  %v1189_v8 = vmul.f32 %v1061_v59, %v1061_v59  ;;  %v1190_v32 = vmul.f32 %v1062_v2, %v1062_v2 }
 0x12b   : > { %12804 = vst [vmem:[#allocation66_spill] sm:$0xff] %v7346_v21  ;;  %12805 = vst [vmem:[#allocation67_spill] sm:$0xff] %v7348_v38  ;;  %v782_v23 = vmul.f32 %v654_v57, %v654_v57  ;;  %v783_v46 = vmul.f32 %v655_v25, %v655_v25  ;;  %v1063_v33 = vsub.f32 %v916_v1, %v6986_v49 }
 0x12c   : > { %12806 = vst [vmem:[#allocation68_spill] sm:$0xff] %v7350_v26  ;;  %12807 = vst [vmem:[#allocation69_spill] sm:$0xff] %v7352_v39  ;;  %v1064_v48 = vsub.f32 %v916_v1, %v6989_v50  ;;  %v784_v9 = vmul.f32 %v656_v60, %v656_v60  ;;  %v785_v42 = vmul.f32 %v657_v37, %v657_v37 }
 0x12d   : > { %v1065_v19 = vsub.f32 %v916_v1, %v6992_v51  ;;  %v1066_v4 = vsub.f32 %v916_v1, %v6995_v52  ;;  %v658_v44 = vsub.f32 %v498_v45, %v6998_v53  ;;  %v659_v34 = vsub.f32 %v498_v45, %v7001_v54 }
 0x12e   : > { %v660_v5 = vsub.f32 %v498_v45, %v7004_v55  ;;  %v661_v41 = vsub.f32 %v498_v45, %v7007_v56  ;;  %v1390_v35 = vmin.f32 %v1389_v27, %v7346_v21  ;;  %v1427_v47 = vmin.f32 %v1426_v6, %v7348_v38 }
 0x12f   : > { %v1464_v59 = vmin.f32 %v1463_v3, %v7350_v26  ;;  %v1501_v2 = vmin.f32 %v1500_v11, %v7352_v39  ;;  %v7366_v57 = vadd.f32 %v1187_v24, %v782_v23  ;;  %v7368_v1 = vadd.f32 %v1188_v20, %v783_v46  ;;  %v924_v20 = vpop.permute.xlu1 %923 }
 0x130   : > { %v1191_v25 = vmul.f32 %v1063_v33, %v1063_v33  ;;  %v1192_v60 = vmul.f32 %v1064_v48, %v1064_v48  ;;  %v7370_v37 = vadd.f32 %v1189_v8, %v784_v9  ;;  %v7372_v12 = vadd.f32 %v1190_v32, %v785_v42  ;;  %v508_v48 = vpop.permute.xlu0 %507 }
 0x131   : > { %12808 = vst [vmem:[#allocation70_spill] sm:$0xff] %v7366_v57  ;;  %12809 = vst [vmem:[#allocation71_spill] sm:$0xff] %v7368_v1  ;;  %v1193_v63 = vmul.f32 %v1065_v19, %v1065_v19  ;;  %v1194_v45 = vmul.f32 %v1066_v4, %v1066_v4  ;;  %v786_v36 = vmul.f32 %v658_v44, %v658_v44 }
 0x132   : > { %12810 = vst [vmem:[#allocation72_spill] sm:$0xff] %v7370_v37  ;;  %12811 = vst [vmem:[#allocation73_spill] sm:$0xff] %v7372_v12  ;;  %v787_v27 = vmul.f32 %v659_v34, %v659_v34  ;;  %v788_v21 = vmul.f32 %v660_v5, %v660_v5  ;;  %v789_v6 = vmul.f32 %v661_v41, %v661_v41 }
 0x133   : > { %v1067_v3 = vsub.f32 %v920_v43, %v6986_v49  ;;  %v1068_v11 = vsub.f32 %v920_v43, %v6989_v50  ;;  %v1069_v23 = vsub.f32 %v920_v43, %v6992_v51  ;;  %v1070_v24 = vsub.f32 %v920_v43, %v6995_v52 }
 0x134   : > { %v1391_v9 = vmin.f32 %v1390_v35, %v7366_v57  ;;  %v1428_v32 = vmin.f32 %v1427_v47, %v7368_v1  ;;  %v662_v8 = vsub.f32 %v503_v58, %v6998_v53  ;;  %v663_v46 = vsub.f32 %v503_v58, %v7001_v54 }
 0x135   : > { %v1465_v33 = vmin.f32 %v1464_v59, %v7370_v37  ;;  %v1502_v42 = vmin.f32 %v1501_v2, %v7372_v12  ;;  %v664_v19 = vsub.f32 %v503_v58, %v7004_v55  ;;  %v665_v4 = vsub.f32 %v503_v58, %v7007_v56 }
 0x136   : > { %v7386_v44 = vadd.f32 %v1191_v25, %v786_v36  ;;  %v7388_v43 = vadd.f32 %v1192_v60, %v787_v27  ;;  %v7390_v34 = vadd.f32 %v1193_v63, %v788_v21  ;;  %v7392_v5 = vadd.f32 %v1194_v45, %v789_v6  ;;  %v928_v63 = vpop.permute.xlu1 %927  ;;  %v513_v21 = vpop.permute.xlu0 %512 }
 0x137   : > { %v1195_v41 = vmul.f32 %v1067_v3, %v1067_v3  ;;  %v1196_v35 = vmul.f32 %v1068_v11, %v1068_v11  ;;  %v1197_v47 = vmul.f32 %v1069_v23, %v1069_v23  ;;  %v1198_v1 = vmul.f32 %v1070_v24, %v1070_v24 }
 0x138   : > { %12812 = vst [vmem:[#allocation74_spill] sm:$0xff] %v7386_v44  ;;  %12813 = vst [vmem:[#allocation75_spill] sm:$0xff] %v7388_v43  ;;  %v790_v57 = vmul.f32 %v662_v8, %v662_v8  ;;  %v791_v59 = vmul.f32 %v663_v46, %v663_v46  ;;  %v1071_v2 = vsub.f32 %v924_v20, %v6986_v49 }
 0x139   : > { %12814 = vst [vmem:[#allocation76_spill] sm:$0xff] %v7390_v34  ;;  %12815 = vst [vmem:[#allocation77_spill] sm:$0xff] %v7392_v5  ;;  %v1072_v12 = vsub.f32 %v924_v20, %v6989_v50  ;;  %v792_v37 = vmul.f32 %v664_v19, %v664_v19  ;;  %v793_v58 = vmul.f32 %v665_v4, %v665_v4 }
 0x13a   : > { %v1073_v36 = vsub.f32 %v924_v20, %v6992_v51  ;;  %v1074_v25 = vsub.f32 %v924_v20, %v6995_v52  ;;  %v666_v60 = vsub.f32 %v508_v48, %v6998_v53  ;;  %v667_v45 = vsub.f32 %v508_v48, %v7001_v54 }
 0x13b   : > { %v668_v27 = vsub.f32 %v508_v48, %v7004_v55  ;;  %v669_v6 = vsub.f32 %v508_v48, %v7007_v56  ;;  %v1392_v3 = vmin.f32 %v1391_v9, %v7386_v44  ;;  %v1429_v11 = vmin.f32 %v1428_v32, %v7388_v43 }
 0x13c   : > { %v1466_v23 = vmin.f32 %v1465_v33, %v7390_v34  ;;  %v1503_v24 = vmin.f32 %v1502_v42, %v7392_v5  ;;  %v7406_v8 = vadd.f32 %v1195_v41, %v790_v57  ;;  %v7408_v20 = vadd.f32 %v1196_v35, %v791_v59  ;;  %v932_v35 = vpop.permute.xlu1 %931 }
 0x13d   : > { %v1199_v46 = vmul.f32 %v1071_v2, %v1071_v2  ;;  %v1200_v19 = vmul.f32 %v1072_v12, %v1072_v12  ;;  %v7410_v4 = vadd.f32 %v1197_v47, %v792_v37  ;;  %v7412_v39 = vadd.f32 %v1198_v1, %v793_v58  ;;  %v518_v12 = vpop.permute.xlu0 %517 }
 0x13e   : > { %12816 = vst [vmem:[#allocation78_spill] sm:$0xff] %v7406_v8  ;;  %12817 = vst [vmem:[#allocation79_spill] sm:$0xff] %v7408_v20  ;;  %v1201_v26 = vmul.f32 %v1073_v36, %v1073_v36  ;;  %v1202_v48 = vmul.f32 %v1074_v25, %v1074_v25  ;;  %v794_v38 = vmul.f32 %v666_v60, %v666_v60 }
 0x13f   : > { %12818 = vst [vmem:[#allocation80_spill] sm:$0xff] %v7410_v4  ;;  %12819 = vst [vmem:[#allocation81_spill] sm:$0xff] %v7412_v39  ;;  %v795_v9 = vmul.f32 %v667_v45, %v667_v45  ;;  %v796_v44 = vmul.f32 %v668_v27, %v668_v27  ;;  %v797_v32 = vmul.f32 %v669_v6, %v669_v6 }
 0x140   : > { %v1075_v33 = vsub.f32 %v928_v63, %v6986_v49  ;;  %v1076_v42 = vsub.f32 %v928_v63, %v6989_v50  ;;  %v670_v57 = vsub.f32 %v513_v21, %v6998_v53  ;;  %v671_v41 = vsub.f32 %v513_v21, %v7001_v54 }
 0x141   : > { %v1393_v37 = vmin.f32 %v1392_v3, %v7406_v8  ;;  %v1430_v1 = vmin.f32 %v1429_v11, %v7408_v20  ;;  %v1077_v47 = vsub.f32 %v928_v63, %v6992_v51  ;;  %v672_v59 = vsub.f32 %v513_v21, %v7004_v55 }
 0x142   : > { %v1467_v2 = vmin.f32 %v1466_v23, %v7410_v4  ;;  %v1504_v58 = vmin.f32 %v1503_v24, %v7412_v39  ;;  %v1078_v36 = vsub.f32 %v928_v63, %v6995_v52  ;;  %v673_v25 = vsub.f32 %v513_v21, %v7007_v56 }
 0x143   : > { %v7426_v60 = vadd.f32 %v1199_v46, %v794_v38  ;;  %v7428_v45 = vadd.f32 %v1200_v19, %v795_v9  ;;  %v7430_v27 = vadd.f32 %v1201_v26, %v796_v44  ;;  %v7432_v6 = vadd.f32 %v1202_v48, %v797_v32  ;;  %v936_v26 = vpop.permute.xlu1 %935  ;;  %v523_v44 = vpop.permute.xlu0 %522 }
 0x144   : > { %v1203_v3 = vmul.f32 %v1075_v33, %v1075_v33  ;;  %v1204_v11 = vmul.f32 %v1076_v42, %v1076_v42  ;;  %v798_v20 = vmul.f32 %v670_v57, %v670_v57  ;;  %v799_v8 = vmul.f32 %v671_v41, %v671_v41 }
 0x145   : > { %12820 = vst [vmem:[#allocation82_spill] sm:$0xff] %v7426_v60  ;;  %12821 = vst [vmem:[#allocation83_spill] sm:$0xff] %v7428_v45  ;;  %v1205_v5 = vmul.f32 %v1077_v47, %v1077_v47  ;;  %v800_v23 = vmul.f32 %v672_v59, %v672_v59  ;;  %v1079_v24 = vsub.f32 %v932_v35, %v6986_v49 }
 0x146   : > { %12822 = vst [vmem:[#allocation84_spill] sm:$0xff] %v7430_v27  ;;  %12823 = vst [vmem:[#allocation85_spill] sm:$0xff] %v7432_v6  ;;  %v1080_v63 = vsub.f32 %v932_v35, %v6989_v50  ;;  %v1206_v39 = vmul.f32 %v1078_v36, %v1078_v36  ;;  %v801_v21 = vmul.f32 %v673_v25, %v673_v25 }
 0x147   : > { %v1081_v38 = vsub.f32 %v932_v35, %v6992_v51  ;;  %v1082_v46 = vsub.f32 %v932_v35, %v6995_v52  ;;  %v1394_v19 = vmin.f32 %v1393_v37, %v7426_v60  ;;  %v674_v48 = vsub.f32 %v518_v12, %v6998_v53 }
 0x148   : > { %v675_v9 = vsub.f32 %v518_v12, %v7001_v54  ;;  %v676_v32 = vsub.f32 %v518_v12, %v7004_v55  ;;  %v1431_v33 = vmin.f32 %v1430_v1, %v7428_v45  ;;  %v1468_v42 = vmin.f32 %v1467_v2, %v7430_v27 }
 0x149   : > { %v7444_v57 = vadd.f32 %v1203_v3, %v798_v20  ;;  %v7446_v41 = vadd.f32 %v1204_v11, %v799_v8  ;;  %v7449_v35 = vmin.f32 %v1504_v58, %v7432_v6  ;;  %v7451_v47 = vadd.f32 %v1205_v5, %v800_v23  ;;  %v940_v11 = vpop.permute.xlu1 %939 }
 0x14a   : > { %v1207_v37 = vmul.f32 %v1079_v24, %v1079_v24  ;;  %v1208_v59 = vmul.f32 %v1080_v63, %v1080_v63  ;;  %v7453_v36 = vadd.f32 %v1206_v39, %v801_v21  ;;  %v1209_v25 = vmul.f32 %v1081_v38, %v1081_v38  ;;  %v528_v39 = vpop.permute.xlu0 %527 }
 0x14b   : > { %12824 = vst [vmem:[#allocation86_spill] sm:$0xff] %v7444_v57  ;;  %12825 = vst [vmem:[#allocation87_spill] sm:$0xff] %v7446_v41  ;;  %v1210_v60 = vmul.f32 %v1082_v46, %v1082_v46  ;;  %v677_v4 = vsub.f32 %v518_v12, %v7007_v56  ;;  %v802_v1 = vmul.f32 %v674_v48, %v674_v48 }
 0x14c   : > { %12826 = vst [vmem:[#allocation88_spill] sm:$0xff] %v7451_v47  ;;  %12827 = vst [vmem:[#allocation89_spill] sm:$0xff] %v7453_v36  ;;  %v803_v45 = vmul.f32 %v675_v9, %v675_v9  ;;  %v804_v2 = vmul.f32 %v676_v32, %v676_v32  ;;  %v1083_v20 = vsub.f32 %v936_v26, %v6986_v49 }
 0x14d   : > { %v1395_v8 = vmin.f32 %v1394_v19, %v7444_v57  ;;  %v1432_v58 = vmin.f32 %v1431_v33, %v7446_v41  ;;  %v1084_v5 = vsub.f32 %v936_v26, %v6989_v50  ;;  %v1085_v3 = vsub.f32 %v936_v26, %v6992_v51 }
 0x14e   : > { %v1469_v23 = vmin.f32 %v1468_v42, %v7451_v47  ;;  %v1086_v24 = vsub.f32 %v936_v26, %v6995_v52  ;;  %v678_v12 = vsub.f32 %v523_v44, %v6998_v53  ;;  %v679_v63 = vsub.f32 %v523_v44, %v7001_v54 }
 0x14f   : > { %v1506_v21 = vmin.f32 %v7449_v35, %v7453_v36  ;;  %v805_v38 = vmul.f32 %v677_v4, %v677_v4  ;;  %v680_v46 = vsub.f32 %v523_v44, %v7004_v55  ;;  %v681_v19 = vsub.f32 %v523_v44, %v7007_v56 }
 0x150   : > { %v7469_v48 = vadd.f32 %v1207_v37, %v802_v1  ;;  %v7471_v9 = vadd.f32 %v1208_v59, %v803_v45  ;;  %v7473_v32 = vadd.f32 %v1209_v25, %v804_v2  ;;  %v1211_v33 = vmul.f32 %v1083_v20, %v1083_v20  ;;  %v944_v59 = vpop.permute.xlu1 %943  ;;  %v533_v25 = vpop.permute.xlu0 %532 }
 0x151   : > { %v1212_v26 = vmul.f32 %v1084_v5, %v1084_v5  ;;  %v1213_v42 = vmul.f32 %v1085_v3, %v1085_v3  ;;  %v1087_v47 = vsub.f32 %v940_v11, %v6986_v49  ;;  %v682_v41 = vsub.f32 %v528_v39, %v6998_v53 }
 0x152   : > { %12828 = vst [vmem:[#allocation90_spill] sm:$0xff] %v7469_v48  ;;  %12829 = vst [vmem:[#allocation91_spill] sm:$0xff] %v7471_v9  ;;  %v1214_v57 = vmul.f32 %v1086_v24, %v1086_v24  ;;  %v806_v35 = vmul.f32 %v678_v12, %v678_v12  ;;  %v807_v4 = vmul.f32 %v679_v63, %v679_v63 }
 0x153   : > { %12830 = vst [vmem:[#allocation92_spill] sm:$0xff] %v7473_v32  ;;  %v1088_v36 = vsub.f32 %v940_v11, %v6989_v50  ;;  %v808_v6 = vmul.f32 %v680_v46, %v680_v46  ;;  %v809_v44 = vmul.f32 %v681_v19, %v681_v19  ;;  %v1089_v37 = vsub.f32 %v940_v11, %v6992_v51 }
 0x154   : > { %v683_v45 = vsub.f32 %v528_v39, %v7001_v54  ;;  %v7480_v1 = vadd.f32 %v1210_v60, %v805_v38  ;;  %v1396_v2 = vmin.f32 %v1395_v8, %v7469_v48  ;;  %v1433_v20 = vmin.f32 %v1432_v58, %v7471_v9 }
 0x155   : > { %v684_v5 = vsub.f32 %v528_v39, %v7004_v55  ;;  %v1090_v3 = vsub.f32 %v940_v11, %v6995_v52  ;;  %v1215_v24 = vmul.f32 %v1087_v47, %v1087_v47  ;;  %v685_v12 = vsub.f32 %v528_v39, %v7007_v56 }
 0x156   : > { %12831 = vst [vmem:[#allocation93_spill] sm:$0xff] %v7480_v1  ;;  %v810_v63 = vmul.f32 %v682_v41, %v682_v41  ;;  %v1470_v46 = vmin.f32 %v1469_v23, %v7473_v32  ;;  %v7488_v19 = vadd.f32 %v1211_v33, %v806_v35  ;;  %v7490_v27 = vadd.f32 %v1212_v26, %v807_v4 }
 0x157   : > { %v1216_v60 = vmul.f32 %v1088_v36, %v1088_v36  ;;  %v7492_v38 = vadd.f32 %v1213_v42, %v808_v6  ;;  %v7494_v8 = vadd.f32 %v1214_v57, %v809_v44  ;;  %v1217_v58 = vmul.f32 %v1089_v37, %v1089_v37  ;;  %v948_v36 = vpop.permute.xlu1 %947  ;;  %v538_v6 = vpop.permute.xlu0 %537 }
 0x158   : > { %12832 = vst [vmem:[#allocation94_spill] sm:$0xff] %v7488_v19  ;;  %12833 = vst [vmem:[#allocation95_spill] sm:$0xff] %v7490_v27  ;;  %v811_v9 = vmul.f32 %v683_v45, %v683_v45  ;;  %v812_v48 = vmul.f32 %v684_v5, %v684_v5  ;;  %v1091_v11 = vsub.f32 %v944_v59, %v6986_v49 }
 0x159   : > { %12834 = vst [vmem:[#allocation96_spill] sm:$0xff] %v7492_v38  ;;  %12835 = vst [vmem:[#allocation97_spill] sm:$0xff] %v7494_v8  ;;  %v1092_v47 = vsub.f32 %v944_v59, %v6989_v50  ;;  %v1093_v41 = vsub.f32 %v944_v59, %v6992_v51  ;;  %v1507_v39 = vmin.f32 %v1506_v21, %v7480_v1 }
 0x15a   : > { %v1218_v23 = vmul.f32 %v1090_v3, %v1090_v3  ;;  %v813_v33 = vmul.f32 %v685_v12, %v685_v12  ;;  %v7500_v26 = vadd.f32 %v1215_v24, %v810_v63  ;;  %v1397_v57 = vmin.f32 %v1396_v2, %v7488_v19 }
 0x15b   : > { %v1434_v42 = vmin.f32 %v1433_v20, %v7490_v27  ;;  %v686_v35 = vsub.f32 %v533_v25, %v6998_v53  ;;  %v687_v4 = vsub.f32 %v533_v25, %v7001_v54  ;;  %v1471_v44 = vmin.f32 %v1470_v46, %v7492_v38 }
 0x15c   : > { %12836 = vst [vmem:[#allocation98_spill] sm:$0xff] %v7500_v26  ;;  %v1508_v37 = vmin.f32 %v1507_v39, %v7494_v8  ;;  %v7508_v45 = vadd.f32 %v1216_v60, %v811_v9  ;;  %v1094_v21 = vsub.f32 %v944_v59, %v6995_v52  ;;  %v7511_v5 = vadd.f32 %v1217_v58, %v812_v48 }
 0x15d   : > { %v1219_v3 = vmul.f32 %v1091_v11, %v1091_v11  ;;  %v1220_v24 = vmul.f32 %v1092_v47, %v1092_v47  ;;  %v1221_v12 = vmul.f32 %v1093_v41, %v1093_v41  ;;  %v7513_v2 = vadd.f32 %v1218_v23, %v813_v33  ;;  %v952_v47 = vpop.permute.xlu1 %951  ;;  %v543_v41 = vpop.permute.xlu0 %542 }
 0x15e   : > { %12837 = vst [vmem:[#allocation99_spill] sm:$0xff] %v7508_v45  ;;  %12838 = vst [vmem:[#allocation100_spill] sm:$0xff] %v7511_v5  ;;  %v7516_v20 = vmin.f32 %v1397_v57, %v7500_v26  ;;  %v688_v63 = vsub.f32 %v533_v25, %v7004_v55  ;;  %v689_v46 = vsub.f32 %v533_v25, %v7007_v56 }
 0x15f   : > { %12839 = vst [vmem:[#allocation101_spill] sm:$0xff] %v7513_v2  ;;  %v814_v38 = vmul.f32 %v686_v35, %v686_v35  ;;  %v815_v39 = vmul.f32 %v687_v4, %v687_v4  ;;  %v1095_v9 = vsub.f32 %v948_v36, %v6986_v49  ;;  %v1096_v59 = vsub.f32 %v948_v36, %v6989_v50 }
 0x160   : > { %v1435_v48 = vmin.f32 %v1434_v42, %v7508_v45  ;;  %v1222_v60 = vmul.f32 %v1094_v21, %v1094_v21  ;;  %v1097_v58 = vsub.f32 %v948_v36, %v6992_v51  ;;  %v1098_v11 = vsub.f32 %v948_v36, %v6995_v52 }
 0x161   : > { %v690_v23 = vsub.f32 %v538_v6, %v6998_v53  ;;  %v691_v33 = vsub.f32 %v538_v6, %v7001_v54  ;;  %v692_v25 = vsub.f32 %v538_v6, %v7004_v55  ;;  %v693_v57 = vsub.f32 %v538_v6, %v7007_v56 }
 0x162   : > { %v1472_v35 = vmin.f32 %v1471_v44, %v7511_v5  ;;  %v1509_v4 = vmin.f32 %v1508_v37, %v7513_v2  ;;  %v816_v42 = vmul.f32 %v688_v63, %v688_v63  ;;  %v817_v21 = vmul.f32 %v689_v46, %v689_v46  ;;  %v548_v63 = vpop.permute.xlu0 %547 }
 0x163   : > { %v7531_v45 = vadd.f32 %v1219_v3, %v814_v38  ;;  %v7533_v26 = vadd.f32 %v1220_v24, %v815_v39  ;;  %v1223_v36 = vmul.f32 %v1095_v9, %v1095_v9  ;;  %v1224_v8 = vmul.f32 %v1096_v59, %v1096_v59  ;;  %v956_v24 = vpop.permute.xlu1 %955 }
 0x164   : > { %v1225_v27 = vmul.f32 %v1097_v58, %v1097_v58  ;;  %v1226_v19 = vmul.f32 %v1098_v11, %v1098_v11  ;;  %v1099_v1 = vsub.f32 %v952_v47, %v6986_v49  ;;  %v694_v32 = vsub.f32 %v543_v41, %v6998_v53 }
 0x165   : > { %12840 = vst [vmem:[#allocation102_spill] sm:$0xff] %v7531_v45  ;;  %12841 = vst [vmem:[#allocation103_spill] sm:$0xff] %v7533_v26  ;;  %v818_v34 = vmul.f32 %v690_v23, %v690_v23  ;;  %v819_v6 = vmul.f32 %v691_v33, %v691_v33  ;;  %v820_v43 = vmul.f32 %v692_v25, %v692_v25 }
 0x166   : > { %v821_v44 = vmul.f32 %v693_v57, %v693_v57  ;;  %v7537_v5 = vadd.f32 %v1221_v12, %v816_v42  ;;  %v7539_v37 = vadd.f32 %v1222_v60, %v817_v21  ;;  %v1100_v38 = vsub.f32 %v952_v47, %v6989_v50 }
 0x167   : > { %v695_v3 = vsub.f32 %v543_v41, %v7001_v54  ;;  %v1399_v46 = vmin.f32 %v7516_v20, %v7531_v45  ;;  %v1101_v39 = vsub.f32 %v952_v47, %v6992_v51  ;;  %v1102_v9 = vsub.f32 %v952_v47, %v6995_v52 }
 0x168   : > { %12842 = vst [vmem:[#allocation104_spill] sm:$0xff] %v7537_v5  ;;  %12843 = vst [vmem:[#allocation105_spill] sm:$0xff] %v7539_v37  ;;  %v696_v59 = vsub.f32 %v543_v41, %v7004_v55  ;;  %v1436_v12 = vmin.f32 %v1435_v48, %v7533_v26  ;;  %v1227_v58 = vmul.f32 %v1099_v1, %v1099_v1 }
 0x169   : > { %v697_v60 = vsub.f32 %v543_v41, %v7007_v56  ;;  %v822_v11 = vmul.f32 %v694_v32, %v694_v32  ;;  %v7550_v23 = vadd.f32 %v1223_v36, %v818_v34  ;;  %v7552_v33 = vadd.f32 %v1224_v8, %v819_v6 }
 0x16a   : > { %v7554_v25 = vadd.f32 %v1225_v27, %v820_v43  ;;  %v7556_v57 = vadd.f32 %v1226_v19, %v821_v44  ;;  %v1473_v20 = vmin.f32 %v1472_v35, %v7537_v5  ;;  %v1510_v47 = vmin.f32 %v1509_v4, %v7539_v37  ;;  %v960_v27 = vpop.permute.xlu1 %959  ;;  %v553_v19 = vpop.permute.xlu0 %552 }
 0x16b   : > { %12844 = vst [vmem:[#allocation106_spill] sm:$0xff] %v7550_v23  ;;  %12845 = vst [vmem:[#allocation107_spill] sm:$0xff] %v7552_v33  ;;  %v1228_v42 = vmul.f32 %v1100_v38, %v1100_v38  ;;  %v823_v21 = vmul.f32 %v695_v3, %v695_v3  ;;  %v1229_v45 = vmul.f32 %v1101_v39, %v1101_v39 }
 0x16c   : > { %12846 = vst [vmem:[#allocation108_spill] sm:$0xff] %v7554_v25  ;;  %12847 = vst [vmem:[#allocation109_spill] sm:$0xff] %v7556_v57  ;;  %v1230_v48 = vmul.f32 %v1102_v9, %v1102_v9  ;;  %v824_v1 = vmul.f32 %v696_v59, %v696_v59  ;;  %v1103_v41 = vsub.f32 %v956_v24, %v6986_v49 }
 0x16d   : > { %v825_v32 = vmul.f32 %v697_v60, %v697_v60  ;;  %v7561_v34 = vadd.f32 %v1227_v58, %v822_v11  ;;  %v1104_v8 = vsub.f32 %v956_v24, %v6989_v50  ;;  %v1105_v43 = vsub.f32 %v956_v24, %v6992_v51 }
 0x16e   : > { %v7566_v35 = vmin.f32 %v1399_v46, %v7550_v23  ;;  %v7569_v4 = vmin.f32 %v1436_v12, %v7552_v33  ;;  %v7572_v36 = vmin.f32 %v1473_v20, %v7554_v25  ;;  %v7575_v6 = vmin.f32 %v1510_v47, %v7556_v57 }
 0x16f   : > { %12848 = vst [vmem:[#allocation110_spill] sm:$0xff] %v7561_v34  ;;  %v7577_v44 = vadd.f32 %v1228_v42, %v823_v21  ;;  %v1106_v38 = vsub.f32 %v956_v24, %v6995_v52  ;;  %v698_v3 = vsub.f32 %v548_v63, %v6998_v53  ;;  %v699_v39 = vsub.f32 %v548_v63, %v7001_v54 }
 0x170   : > { %v7582_v9 = vadd.f32 %v1229_v45, %v824_v1  ;;  %v1231_v46 = vmul.f32 %v1103_v41, %v1103_v41  ;;  %v700_v59 = vsub.f32 %v548_v63, %v7004_v55  ;;  %v701_v12 = vsub.f32 %v548_v63, %v7007_v56  ;;  %v964_v41 = vpop.permute.xlu1 %963 }
 0x171   : > { %12849 = vst [vmem:[#allocation111_spill] sm:$0xff] %v7577_v44  ;;  %v7586_v58 = vadd.f32 %v1230_v48, %v825_v32  ;;  %v1232_v11 = vmul.f32 %v1104_v8, %v1104_v8  ;;  %v1233_v20 = vmul.f32 %v1105_v43, %v1105_v43  ;;  %v1107_v24 = vsub.f32 %v960_v27, %v6986_v49  ;;  %v558_v32 = vpop.permute.xlu0 %557 }
 0x172   : > { %12850 = vst [vmem:[#allocation112_spill] sm:$0xff] %v7582_v9  ;;  %v1108_v47 = vsub.f32 %v960_v27, %v6989_v50  ;;  %v702_v42 = vsub.f32 %v553_v19, %v6998_v53  ;;  %v703_v45 = vsub.f32 %v553_v19, %v7001_v54  ;;  %v1234_v1 = vmul.f32 %v1106_v38, %v1106_v38 }
 0x173   : > { %12851 = vst [vmem:[#allocation113_spill] sm:$0xff] %v7586_v58  ;;  %v826_v63 = vmul.f32 %v698_v3, %v698_v3  ;;  %v827_v48 = vmul.f32 %v699_v39, %v699_v39  ;;  %v828_v57 = vmul.f32 %v700_v59, %v700_v59  ;;  %v829_v60 = vmul.f32 %v701_v12, %v701_v12 }
 0x174   : > { %v1109_v8 = vsub.f32 %v960_v27, %v6992_v51  ;;  %v1110_v43 = vsub.f32 %v960_v27, %v6995_v52  ;;  %v1475_v25 = vmin.f32 %v7572_v36, %v7582_v9  ;;  %v1512_v33 = vmin.f32 %v7575_v6, %v7586_v58 }
 0x175   : > { %v704_v23 = vsub.f32 %v553_v19, %v7004_v55  ;;  %v705_v38 = vsub.f32 %v553_v19, %v7007_v56  ;;  %v1235_v3 = vmul.f32 %v1107_v24, %v1107_v24  ;;  %v1236_v39 = vmul.f32 %v1108_v47, %v1108_v47 }
 0x176   : > { %v830_v21 = vmul.f32 %v702_v42, %v702_v42  ;;  %v831_v37 = vmul.f32 %v703_v45, %v703_v45  ;;  %v7604_v59 = vadd.f32 %v1231_v46, %v826_v63  ;;  %v7606_v12 = vadd.f32 %v1232_v11, %v827_v48  ;;  %v968_v46 = vpop.permute.xlu1 %967  ;;  %v563_v42 = vpop.permute.xlu0 %562 }
 0x177   : > { %v1111_v27 = vsub.f32 %v964_v41, %v6986_v49  ;;  %v1112_v5 = vsub.f32 %v964_v41, %v6989_v50  ;;  %v7610_v36 = vadd.f32 %v1233_v20, %v828_v57  ;;  %v7612_v9 = vadd.f32 %v1234_v1, %v829_v60 }
 0x178   : > { %12852 = vst [vmem:[#allocation114_spill] sm:$0xff] %v7604_v59  ;;  %12853 = vst [vmem:[#allocation115_spill] sm:$0xff] %v7606_v12  ;;  %v1237_v6 = vmul.f32 %v1109_v8, %v1109_v8  ;;  %v1238_v58 = vmul.f32 %v1110_v43, %v1110_v43  ;;  %v832_v26 = vmul.f32 %v704_v23, %v704_v23 }
 0x179   : > { %12854 = vst [vmem:[#allocation116_spill] sm:$0xff] %v7610_v36  ;;  %12855 = vst [vmem:[#allocation117_spill] sm:$0xff] %v7612_v9  ;;  %v833_v19 = vmul.f32 %v705_v38, %v705_v38  ;;  %v1113_v24 = vsub.f32 %v964_v41, %v6992_v51  ;;  %v1114_v47 = vsub.f32 %v964_v41, %v6995_v52 }
 0x17a   : > { %v7616_v11 = vadd.f32 %v1235_v3, %v830_v21  ;;  %v7618_v45 = vadd.f32 %v1236_v39, %v831_v37  ;;  %v706_v63 = vsub.f32 %v558_v32, %v6998_v53  ;;  %v707_v57 = vsub.f32 %v558_v32, %v7001_v54 }
 0x17b   : > { %v1239_v60 = vmul.f32 %v1111_v27, %v1111_v27  ;;  %v1240_v20 = vmul.f32 %v1112_v5, %v1112_v5  ;;  %v708_v1 = vsub.f32 %v558_v32, %v7004_v55  ;;  %v709_v23 = vsub.f32 %v558_v32, %v7007_v56 }
 0x17c   : > { %12856 = vst [vmem:[#allocation118_spill] sm:$0xff] %v7616_v11  ;;  %12857 = vst [vmem:[#allocation119_spill] sm:$0xff] %v7618_v45  ;;  %v1115_v48 = vsub.f32 %v968_v46, %v6986_v49  ;;  %v1116_v41 = vsub.f32 %v968_v46, %v6989_v50  ;;  %v710_v8 = vsub.f32 %v563_v42, %v6998_v53 }
 0x17d   : > { %v711_v21 = vsub.f32 %v563_v42, %v7001_v54  ;;  %v1117_v37 = vsub.f32 %v968_v46, %v6992_v51  ;;  %v1118_v43 = vsub.f32 %v968_v46, %v6995_v52  ;;  %v712_v38 = vsub.f32 %v563_v42, %v7004_v55 }
 0x17e   : > { %v713_v5 = vsub.f32 %v563_v42, %v7007_v56  ;;  %v7632_v3 = vadd.f32 %v1237_v6, %v832_v26  ;;  %v7634_v39 = vadd.f32 %v1238_v58, %v833_v19  ;;  %v834_v32 = vmul.f32 %v706_v63, %v706_v63 }
 0x17f   : > { %v835_v49 = vmul.f32 %v707_v57, %v707_v57  ;;  %v1241_v27 = vmul.f32 %v1113_v24, %v1113_v24  ;;  %v1242_v50 = vmul.f32 %v1114_v47, %v1114_v47  ;;  %v836_v2 = vmul.f32 %v708_v1, %v708_v1 }
 0x180   : > { %12858 = vst [vmem:[#allocation120_spill] sm:$0xff] %v7632_v3  ;;  %12859 = vst [vmem:[#allocation121_spill] sm:$0xff] %v7634_v39  ;;  %v837_v53 = vmul.f32 %v709_v23, %v709_v23  ;;  %v1243_v14 = vmul.f32 %v1115_v48, %v1115_v48  ;;  %v1244_v54 = vmul.f32 %v1116_v41, %v1116_v41 }
 0x181   : > { %v838_v13 = vmul.f32 %v710_v8, %v710_v8  ;;  %v839_v51 = vmul.f32 %v711_v21, %v711_v21  ;;  %v1245_v10 = vmul.f32 %v1117_v37, %v1117_v37  ;;  %v1246_v52 = vmul.f32 %v1118_v43, %v1118_v43 }
 0x182   : > { %v840_v46 = vmul.f32 %v712_v38, %v712_v38  ;;  %v841_v55 = vmul.f32 %v713_v5, %v713_v5  ;;  %v12860_v56 = vmin.f32 %v7566_v35, %v7561_v34  ;;  %v12861_v58 = vmin.f32 %v7569_v4, %v7577_v44  ;;  %v12930_v44 = vld [vmem:[#allocation39_spill] sm:$0xff]  ;;  %v12933_v34 = vld [vmem:[#allocation40_spill] sm:$0xff] }
 0x183   : > { %v7644_v19 = vadd.f32 %v1239_v60, %v834_v32  ;;  %v7646_v24 = vadd.f32 %v1240_v20, %v835_v49  ;;  %v1476_v47 = vmin.f32 %v1475_v25, %v7610_v36  ;;  %v1513_v42 = vmin.f32 %v1512_v33, %v7612_v9  ;;  %v12926_v9 = vld [vmem:[#allocation36_spill] sm:$0xff] }
 0x184   : > { %v1402_v26 = vmin.f32 %v12860_v56, %v7604_v59  ;;  %v1439_v6 = vmin.f32 %v12861_v58, %v7606_v12  ;;  %v7650_v63 = vadd.f32 %v1241_v27, %v836_v2  ;;  %v7652_v57 = vadd.f32 %v1242_v50, %v837_v53  ;;  %v12928_v59 = vld [vmem:[#allocation37_spill] sm:$0xff] }
 0x185   : > { %12862 = vst [vmem:[#allocation122_spill] sm:$0xff] %v7644_v19  ;;  %12863 = vst [vmem:[#allocation123_spill] sm:$0xff] %v7646_v24  ;;  %v7656_v23 = vadd.f32 %v1243_v14, %v838_v13  ;;  %v7658_v4 = vadd.f32 %v1244_v54, %v839_v51  ;;  %v1477_v60 = vmin.f32 %v1476_v47, %v7632_v3  ;;  %v7675_v58 = vadd.s32 8, %v6967_v40  ;;  %v12922_v3 = vld [vmem:[#allocation32_spill] sm:$0xff] }
 0x186   : > { %12864 = vst [vmem:[#allocation124_spill] sm:$0xff] %v7650_v63  ;;  %12865 = vst [vmem:[#allocation125_spill] sm:$0xff] %v7652_v57  ;;  %v1403_v35 = vmin.f32 %v1402_v26, %v7616_v11  ;;  %v1440_v1 = vmin.f32 %v1439_v6, %v7618_v45  ;;  %v1514_v20 = vmin.f32 %v1513_v42, %v7634_v39  ;;  %v7678_v6 = vadd.s32 16, %v6967_v40  ;;  %v12920_v39 = vld [vmem:[#allocation30_spill] sm:$0xff]  ;;  %v12923_v45 = vld [vmem:[#allocation33_spill] sm:$0xff] }
 0x187   : > { %12866 = vst [vmem:[#allocation126_spill] sm:$0xff] %v7656_v23  ;;  %12867 = vst [vmem:[#allocation127_spill] sm:$0xff] %v7658_v4  ;;  %v7662_v48 = vadd.f32 %v1245_v10, %v840_v46  ;;  %v7664_v25 = vadd.f32 %v1246_v52, %v841_v55  ;;  %v1478_v41 = vmin.f32 %v1477_v60, %v7650_v63  ;;  %v7681_v47 = vadd.s32 24, %v6967_v40  ;;  %v12916_v63 = vld [vmem:[#allocation26_spill] sm:$0xff] }
 0x188   : > { %v1404_v2 = vmin.f32 %v1403_v35, %v7644_v19  ;;  %v1441_v33 = vmin.f32 %v1440_v1, %v7646_v24  ;;  %v1515_v8 = vmin.f32 %v1514_v20, %v7652_v57  ;;  %12870 = vst [vmem:[#allocation130_spill] sm:$0xff] %v7675_v58  ;;  %12871 = vst [vmem:[#allocation131_spill] sm:$0xff] %v7678_v6  ;;  %v7684_v42 = vadd.s32 32, %v6967_v40  ;;  %v12918_v24 = vld [vmem:[#allocation28_spill] sm:$0xff]  ;;  %v12919_v19 = vld [vmem:[#allocation29_spill] sm:$0xff] }
 0x189   : > { %12868 = vst [vmem:[#allocation128_spill] sm:$0xff] %v7662_v48  ;;  %12869 = vst [vmem:[#allocation129_spill] sm:$0xff] %v7664_v25  ;;  %v1479_v21 = vmin.f32 %v1478_v41, %v7662_v48  ;;  %v7687_v35 = vadd.s32 40, %v6967_v40  ;;  %v7690_v1 = vadd.s32 48, %v6967_v40  ;;  %v7693_v60 = vadd.s32 56, %v6967_v40  ;;  %v12924_v11 = vld [vmem:[#allocation34_spill] sm:$0xff] }
 0x18a   : > { %v1405_v13 = vmin.f32 %v1404_v2, %v7656_v23  ;;  %v1442_v14 = vmin.f32 %v1441_v33, %v7658_v4  ;;  %v1516_v37 = vmin.f32 %v1515_v8, %v7664_v25  ;;  %12872 = vst [vmem:[#allocation132_spill] sm:$0xff] %v7681_v47  ;;  %12873 = vst [vmem:[#allocation133_spill] sm:$0xff] %v7684_v42  ;;  %v7696_v20 = vadd.s32 64, %v6967_v40 }
 0x18b   : > { %v1480_v38 = vrot.slane %v1479_v21, 4  ;;  %12874 = vst [vmem:[#allocation134_spill] sm:$0xff] %v7687_v35  ;;  %12875 = vst [vmem:[#allocation135_spill] sm:$0xff] %v7690_v1  ;;  %v7699_v2 = vadd.s32 72, %v6967_v40  ;;  %v7702_v8 = vadd.s32 80, %v6967_v40  ;;  %v7745_v25 = vadd.s32 184, %v6967_v40 }
 0x18c   : > { %v1406_v10 = vrot.slane %v1405_v13, 4  ;;  %v1443_v43 = vrot.slane %v1442_v14, 4  ;;  %v1517_v5 = vrot.slane %v1516_v37, 4  ;;  %12876 = vst [vmem:[#allocation136_spill] sm:$0xff] %v7693_v60  ;;  %12877 = vst [vmem:[#allocation137_spill] sm:$0xff] %v7696_v20  ;;  %v7752_v23 = vadd.s32 192, %v6967_v40 }
 0x18d   : > { %v1481_v27 = vmin.f32 %v1479_v21, %v1480_v38  ;;  %12878 = vst [vmem:[#allocation138_spill] sm:$0xff] %v7699_v2  ;;  %12879 = vst [vmem:[#allocation139_spill] sm:$0xff] %v7702_v8  ;;  %v7717_v38 = vadd.s32 120, %v6967_v40  ;;  %v7755_v57 = vadd.s32 200, %v6967_v40 }
 0x18e   : > { %v1407_v32 = vmin.f32 %v1405_v13, %v1406_v10  ;;  %v1444_v49 = vmin.f32 %v1442_v14, %v1443_v43  ;;  %v1518_v50 = vmin.f32 %v1516_v37, %v1517_v5  ;;  %v7705_v13 = vadd.s32 88, %v6967_v40  ;;  %12894 = vst [vmem:[#allocation154_spill] sm:$0xff] %v7745_v25  ;;  %12897 = vst [vmem:[#allocation157_spill] sm:$0xff] %v7752_v23  ;;  %v12914_v23 = vld [vmem:[#allocation24_spill] sm:$0xff]  ;;  %v12915_v25 = vld [vmem:[#allocation25_spill] sm:$0xff] }
 0x18f   : > { %v1482_v51 = vrot.slane %v1481_v27, 2  ;;  %v7708_v37 = vadd.s32 96, %v6967_v40  ;;  %v7711_v10 = vadd.s32 104, %v6967_v40  ;;  %v7714_v43 = vadd.s32 112, %v6967_v40  ;;  %12884 = vst [vmem:[#allocation144_spill] sm:$0xff] %v7717_v38  ;;  %12898 = vst [vmem:[#allocation158_spill] sm:$0xff] %v7755_v57 }
 0x190   : > { %v1408_v53 = vrot.slane %v1407_v32, 2  ;;  %v1445_v54 = vrot.slane %v1444_v49, 2  ;;  %v1519_v52 = vrot.slane %v1518_v50, 2  ;;  %12880 = vst [vmem:[#allocation140_spill] sm:$0xff] %v7705_v13  ;;  %v7720_v5 = vadd.s32 128, %v6967_v40  ;;  %v12913_v57 = vld [vmem:[#allocation23_spill] sm:$0xff] }
 0x191   : > { %v1483_v56 = vmin.f32 %v1481_v27, %v1482_v51  ;;  %12881 = vst [vmem:[#allocation141_spill] sm:$0xff] %v7708_v37  ;;  %12882 = vst [vmem:[#allocation142_spill] sm:$0xff] %v7711_v10  ;;  %v7729_v27 = vadd.s32 152, %v6967_v40 }
 0x192   : > { %v1409_v46 = vmin.f32 %v1407_v32, %v1408_v53  ;;  %v1446_v55 = vmin.f32 %v1444_v49, %v1445_v54  ;;  %v1520_v26 = vmin.f32 %v1518_v50, %v1519_v52  ;;  %12883 = vst [vmem:[#allocation143_spill] sm:$0xff] %v7714_v43  ;;  %12885 = vst [vmem:[#allocation145_spill] sm:$0xff] %v7720_v5  ;;  %v7723_v32 = vadd.s32 136, %v6967_v40 }
 0x193   : > { %v1484_v14 = vrot.slane %v1483_v56, 1  ;;  %v7726_v49 = vadd.s32 144, %v6967_v40  ;;  %12888 = vst [vmem:[#allocation148_spill] sm:$0xff] %v7729_v27  ;;  %v7732_v50 = vadd.s32 160, %v6967_v40  ;;  %v7735_v53 = vadd.s32 168, %v6967_v40  ;;  %v12929_v27 = vld [vmem:[#allocation38_spill] sm:$0xff] }
 0x194   : > { %v1410_v33 = vrot.slane %v1409_v46, 1  ;;  %v1447_v41 = vrot.slane %v1446_v55, 1  ;;  %v1521_v21 = vrot.slane %v1520_v26, 1  ;;  %12886 = vst [vmem:[#allocation146_spill] sm:$0xff] %v7723_v32  ;;  %v7742_v52 = vadd.s32 176, %v6967_v40 }
 0x195   : > { %12887 = vst [vmem:[#allocation147_spill] sm:$0xff] %v7726_v49  ;;  %12889 = vst [vmem:[#allocation149_spill] sm:$0xff] %v7732_v50  ;;  %v7747_v48 = vmin.f32 %v1483_v56, %v1484_v14  ;;  %v7767_v56 = vadd.s32 232, %v6967_v40  ;;  %v12905_v14 = vld [vmem:[#allocation15_spill] sm:$0xff]  ;;  %v12934_v49 = vld [vmem:[#allocation41_spill] sm:$0xff] }
 0x196   : > { %12890 = vst [vmem:[#allocation150_spill] sm:$0xff] %v7735_v53  ;;  %v7737_v54 = vmin.f32 %v1409_v46, %v1410_v33  ;;  %v7739_v51 = vmin.f32 %v1446_v55, %v1447_v41  ;;  %12893 = vst [vmem:[#allocation153_spill] sm:$0xff] %v7742_v52  ;;  %v7749_v4 = vmin.f32 %v1520_v26, %v1521_v21  ;;  %v7758_v46 = vadd.s32 208, %v6967_v40  ;;  %v12906_v21 = vld [vmem:[#allocation16_spill] sm:$0xff]  ;;  %v12917_v52 = vld [vmem:[#allocation27_spill] sm:$0xff] }
 0x197   : > { %12895 = vst [vmem:[#allocation155_spill] sm:$0xff] %v7747_v48  ;;  %v7761_v55 = vadd.s32 216, %v6967_v40  ;;  %v7764_v33 = vadd.s32 224, %v6967_v40  ;;  %12902 = vst [vmem:[#allocation162_spill] sm:$0xff] %v7767_v56  ;;  %v7770_v26 = vadd.s32 240, %v6967_v40  ;;  %v7773_v41 = vadd.s32 248, %v6967_v40 }
 0x198   : > { %12891 = vst [vmem:[#allocation151_spill] sm:$0xff] %v7737_v54  ;;  %12892 = vst [vmem:[#allocation152_spill] sm:$0xff] %v7739_v51  ;;  %vm1556_vm1 = vcmp.le.f32.partialorder %v7019_v15, %v7737_v54  ;;  %vm1557_vm2 = vcmp.le.f32.partialorder %v7021_v16, %v7739_v51  ;;  %vm1560_vm3 = vcmp.le.f32.partialorder %v7044_v61, %v7737_v54  ;;  %v12909_v56 = vld [vmem:[#allocation19_spill] sm:$0xff] }
 0x199   : > { %12896 = vst [vmem:[#allocation156_spill] sm:$0xff] %v7749_v4  ;;  %12899 = vst [vmem:[#allocation159_spill] sm:$0xff] %v7758_v46  ;;  %vm1561_vm4 = vcmp.le.f32.partialorder %v7046_v62, %v7739_v51  ;;  %vm1558_vm5 = vcmp.le.f32.partialorder %v7023_v17, %v7747_v48  ;;  %vm1559_vm6 = vcmp.le.f32.partialorder %v7025_v18, %v7749_v4  ;;  %v12912_v46 = vld [vmem:[#allocation22_spill] sm:$0xff]  ;;  %v12921_v53 = vld [vmem:[#allocation31_spill] sm:$0xff]  ;;  %v1684_v36 = vsel %vm1556_vm1, %v6967_v40, 2147483647 }
 0x19a   : > { %12900 = vst [vmem:[#allocation160_spill] sm:$0xff] %v7761_v55  ;;  %12901 = vst [vmem:[#allocation161_spill] sm:$0xff] %v7764_v33  ;;  %vm1562_vm7 = vcmp.le.f32.partialorder %v7028_v22, %v7747_v48  ;;  %vm1563_vm8 = vcmp.le.f32.partialorder %v7048_v0, %v7749_v4  ;;  %vm1564_vm9 = vcmp.le.f32.partialorder %v7066_v28, %v7737_v54  ;;  %v12910_v33 = vld [vmem:[#allocation20_spill] sm:$0xff]  ;;  %v12911_v55 = vld [vmem:[#allocation21_spill] sm:$0xff]  ;;  %v7853_v12 = vsel %vm1557_vm2, %v6967_v40, 2147483647 }
 0x19b   : > { %12903 = vst [vmem:[#allocation163_spill] sm:$0xff] %v7770_v26  ;;  %12904 = vst [vmem:[#allocation164_spill] sm:$0xff] %v7773_v41  ;;  %v12907_v41 = vld [vmem:[#allocation17_spill] sm:$0xff]  ;;  %v12908_v26 = vld [vmem:[#allocation18_spill] sm:$0xff]  ;;  %vm1584_vm15 = vcmp.le.f32.partialorder %v12920_v39, %v7737_v54  ;;  %vm1585_vm0 = vcmp.le.f32.partialorder %v12921_v53, %v7739_v51  ;;  %vm1586_vm10 = vcmp.le.f32.partialorder %v12922_v3, %v7747_v48  ;;  %v7865_v15 = vsel %vm1558_vm5, %v6967_v40, 2147483647 }
 0x19c   : > { %vm1587_vm11 = vcmp.le.f32.partialorder %v12923_v45, %v7749_v4  ;;  %v12925_v50 = vld [vmem:[#allocation35_spill] sm:$0xff]  ;;  %12927 = vst [vmem:[#allocation15_spill] sm:$0xff] %v7853_v12  ;;  %vm1591_vm12 = vcmp.le.f32.partialorder %v12928_v59, %v7749_v4  ;;  %vm1592_vm13 = vcmp.le.f32.partialorder %v12929_v27, %v7737_v54  ;;  %vm1593_vm14 = vcmp.le.f32.partialorder %v12930_v44, %v7739_v51  ;;  %v12935_v17 = vld [vmem:[#allocation42_spill] sm:$0xff]  ;;  %v12940_v62 = vld [vmem:[#allocation44_spill] sm:$0xff] }
 0x19d   : > { %12931 = vst [vmem:[#allocation16_spill] sm:$0xff] %v7865_v15  ;;  %v7871_v16 = vsel %vm1559_vm6, %v6967_v40, 2147483647  ;;  %v1688_v12 = vsel %vm1560_vm3, %v7675_v58, 2147483647  ;;  %vm1594_vm1 = vcmp.le.f32.partialorder %v12933_v34, %v7747_v48  ;;  %vm1595_vm2 = vcmp.le.f32.partialorder %v12934_v49, %v7749_v4  ;;  %v12941_v15 = vld [vmem:[#allocation45_spill] sm:$0xff] }
 0x19e   : > { %12932 = vst [vmem:[#allocation17_spill] sm:$0xff] %v7871_v16  ;;  %v7887_v18 = vsel %vm1561_vm4, %v7675_v58, 2147483647  ;;  %v7893_v61 = vsel %vm1562_vm7, %v7675_v58, 2147483647  ;;  %vm1812_vm3 = vcmp.lt.s32.totalorder %v1684_v36, %v1688_v12  ;;  %v12939_v16 = vld [vmem:[#allocation43_spill] sm:$0xff]  ;;  %vm12942_vm7 = vcmp.le.f32.partialorder %v7068_v29, %v7739_v51 }
 0x19f   : > { %12936 = vst [vmem:[#allocation18_spill] sm:$0xff] %v7887_v18  ;;  %12937 = vst [vmem:[#allocation19_spill] sm:$0xff] %v7893_v61  ;;  %v7899_v40 = vsel %vm1563_vm8, %v7675_v58, 2147483647  ;;  %vm1597_vm6 = vcmp.le.f32.partialorder %v12939_v16, %v7739_v51  ;;  %v1692_v22 = vsel %vm1564_vm9, %v7678_v6, 2147483647  ;;  %vm12944_vm8 = vcmp.le.f32.partialorder %v7070_v30, %v7747_v48 }
 0x1a0   : > { %12938 = vst [vmem:[#allocation20_spill] sm:$0xff] %v7899_v40  ;;  %v7915_v0 = vsel %vm12942_vm7, %v7678_v6, 2147483647  ;;  %v7921_v58 = vsel %vm12944_vm8, %v7678_v6, 2147483647  ;;  %v1813_v40 = vsel %vm1812_vm3, %v1684_v36, %v1688_v12  ;;  %v12946_v61 = vld [vmem:[#allocation46_spill] sm:$0xff]  ;;  %vm12949_vm7 = vcmp.le.f32.partialorder %v7072_v31, %v7749_v4 }
 0x1a1   : > { %12943 = vst [vmem:[#allocation21_spill] sm:$0xff] %v7915_v0  ;;  %12945 = vst [vmem:[#allocation22_spill] sm:$0xff] %v7921_v58  ;;  %v12947_v18 = vld [vmem:[#allocation47_spill] sm:$0xff]  ;;  %v12948_v28 = vld [vmem:[#allocation48_spill] sm:$0xff]  ;;  %v7933_v29 = vsel %vm12949_vm7, %v7678_v6, 2147483647  ;;  %vm12951_vm8 = vcmp.le.f32.partialorder %v7086_v7, %v7737_v54  ;;  %vm12952_vm3 = vcmp.le.f32.partialorder %v12905_v14, %v7739_v51  ;;  %vm1814_vm4 = vcmp.lt.s32.totalorder %v1813_v40, %v1692_v22 }
 0x1a2   : > { %12950 = vst [vmem:[#allocation23_spill] sm:$0xff] %v7933_v29  ;;  %v1696_v30 = vsel %vm12951_vm8, %v7681_v47, 2147483647  ;;  %v7943_v12 = vsel %vm12952_vm3, %v7681_v47, 2147483647  ;;  %v12954_v36 = vld [vmem:[#allocation49_spill] sm:$0xff]  ;;  %vm12957_vm8 = vcmp.le.f32.partialorder %v12906_v21, %v7747_v48  ;;  %vm12958_vm3 = vcmp.le.f32.partialorder %v12907_v41, %v7749_v4 }
 0x1a3   : > { %12953 = vst [vmem:[#allocation24_spill] sm:$0xff] %v7943_v12  ;;  %v12955_v58 = vld [vmem:[#allocation50_spill] sm:$0xff]  ;;  %v12956_v31 = vld [vmem:[#allocation51_spill] sm:$0xff]  ;;  %v7955_v7 = vsel %vm12957_vm8, %v7681_v47, 2147483647  ;;  %vm12959_vm9 = vcmp.le.f32.partialorder %v12908_v26, %v7737_v54  ;;  %v1815_v12 = vsel %vm1814_vm4, %v1813_v40, %v1692_v22  ;;  %v12960_v29 = vld [vmem:[#allocation52_spill] sm:$0xff]  ;;  %vm12967_vm4 = vcmp.le.f32.partialorder %v12911_v55, %v7749_v4 }
 0x1a4   : > { %v7961_v14 = vsel %vm12958_vm3, %v7681_v47, 2147483647  ;;  %v1700_v6 = vsel %vm12959_vm9, %v7684_v42, 2147483647  ;;  %v12961_v0 = vld [vmem:[#allocation53_spill] sm:$0xff]  ;;  %v12962_v21 = vld [vmem:[#allocation54_spill] sm:$0xff]  ;;  %vm12963_vm3 = vcmp.le.f32.partialorder %v12909_v56, %v7739_v51  ;;  %vm12965_vm9 = vcmp.le.f32.partialorder %v12910_v33, %v7747_v48 }
 0x1a5   : > { %v7977_v41 = vsel %vm12963_vm3, %v7684_v42, 2147483647  ;;  %v7983_v40 = vsel %vm12965_vm9, %v7684_v42, 2147483647  ;;  %v7989_v26 = vsel %vm12967_vm4, %v7684_v42, 2147483647  ;;  %vm1816_vm5 = vcmp.lt.s32.totalorder %v1815_v12, %v1696_v30 }
 0x1a6   : > { %12964 = vst [vmem:[#allocation25_spill] sm:$0xff] %v7977_v41  ;;  %12966 = vst [vmem:[#allocation26_spill] sm:$0xff] %v7983_v40  ;;  %v12969_v22 = vld [vmem:[#allocation55_spill] sm:$0xff]  ;;  %v12970_v56 = vld [vmem:[#allocation56_spill] sm:$0xff]  ;;  %vm12972_vm9 = vcmp.le.f32.partialorder %v12912_v46, %v7737_v54  ;;  %vm12973_vm4 = vcmp.le.f32.partialorder %v12913_v57, %v7739_v51  ;;  %vm12975_vm8 = vcmp.le.f32.partialorder %v12914_v23, %v7747_v48  ;;  %v8073_v39 = vsel %vm1586_vm10, %v7693_v60, 2147483647 }
 0x1a7   : > { %12968 = vst [vmem:[#allocation27_spill] sm:$0xff] %v7989_v26  ;;  %v12971_v47 = vld [vmem:[#allocation57_spill] sm:$0xff]  ;;  %v1704_v33 = vsel %vm12972_vm9, %v7687_v35, 2147483647  ;;  %v8005_v55 = vsel %vm12973_vm4, %v7687_v35, 2147483647  ;;  %v1817_v26 = vsel %vm1816_vm5, %v1815_v12, %v1696_v30  ;;  %vm12980_vm4 = vcmp.le.f32.partialorder %v12915_v25, %v7749_v4 }
 0x1a8   : > { %12974 = vst [vmem:[#allocation28_spill] sm:$0xff] %v8005_v55  ;;  %v8011_v42 = vsel %vm12975_vm8, %v7687_v35, 2147483647  ;;  %v12977_v40 = vld [vmem:[#allocation58_spill] sm:$0xff]  ;;  %v12978_v41 = vld [vmem:[#allocation59_spill] sm:$0xff]  ;;  %v12979_v46 = vld [vmem:[#allocation60_spill] sm:$0xff]  ;;  %vm12982_vm8 = vcmp.le.f32.partialorder %v12916_v63, %v7737_v54  ;;  %vm12983_vm5 = vcmp.le.f32.partialorder %v12917_v52, %v7739_v51  ;;  %vm1818_vm3 = vcmp.lt.s32.totalorder %v1817_v26, %v1700_v6 }
 0x1a9   : > { %12976 = vst [vmem:[#allocation29_spill] sm:$0xff] %v8011_v42  ;;  %v8023_v57 = vsel %vm12980_vm4, %v7687_v35, 2147483647  ;;  %v1708_v23 = vsel %vm12982_vm8, %v7690_v1, 2147483647  ;;  %v12985_v12 = vld [vmem:[#allocation61_spill] sm:$0xff]  ;;  %vm12988_vm8 = vcmp.le.f32.partialorder %v12918_v24, %v7747_v48  ;;  %vm12999_vm10 = vcmp.le.f32.partialorder %v12924_v11, %v7737_v54 }
 0x1aa   : > { %12981 = vst [vmem:[#allocation30_spill] sm:$0xff] %v8023_v57  ;;  %v8033_v30 = vsel %vm12983_vm5, %v7690_v1, 2147483647  ;;  %vm1615_vm9 = vcmp.le.f32.partialorder %v12985_v12, %v7749_v4  ;;  %v12986_v42 = vld [vmem:[#allocation62_spill] sm:$0xff]  ;;  %v12987_v25 = vld [vmem:[#allocation63_spill] sm:$0xff]  ;;  %vm12989_vm5 = vcmp.le.f32.partialorder %v12919_v19, %v7749_v4  ;;  %v12990_v57 = vld [vmem:[#allocation64_spill] sm:$0xff] }
 0x1ab   : > { %12984 = vst [vmem:[#allocation31_spill] sm:$0xff] %v8033_v30  ;;  %v8045_v63 = vsel %vm12988_vm8, %v7690_v1, 2147483647  ;;  %v8051_v52 = vsel %vm12989_vm5, %v7690_v1, 2147483647  ;;  %v1819_v30 = vsel %vm1818_vm3, %v1817_v26, %v1700_v6  ;;  %vm1618_vm4 = vcmp.le.f32.partialorder %v12990_v57, %v7747_v48  ;;  %v12991_v55 = vld [vmem:[#allocation65_spill] sm:$0xff] }
 0x1ac   : > { %v1712_v35 = vsel %vm1584_vm15, %v7693_v60, 2147483647  ;;  %vm1619_vm7 = vcmp.le.f32.partialorder %v12991_v55, %v7749_v4  ;;  %v12992_v24 = vld [vmem:[#allocation66_spill] sm:$0xff]  ;;  %v8067_v19 = vsel %vm1585_vm0, %v7693_v60, 2147483647  ;;  %12994 = vst [vmem:[#allocation33_spill] sm:$0xff] %v8073_v39  ;;  %vm1820_vm15 = vcmp.lt.s32.totalorder %v1819_v30, %v1704_v33 }
 0x1ad   : > { %vm1620_vm8 = vcmp.le.f32.partialorder %v12992_v24, %v7737_v54  ;;  %12993 = vst [vmem:[#allocation32_spill] sm:$0xff] %v8067_v19  ;;  %v8079_v6 = vsel %vm1587_vm11, %v7693_v60, 2147483647  ;;  %v12996_v26 = vld [vmem:[#allocation67_spill] sm:$0xff]  ;;  %v12997_v53 = vld [vmem:[#allocation68_spill] sm:$0xff]  ;;  %v12998_v1 = vld [vmem:[#allocation69_spill] sm:$0xff]  ;;  %vm13000_vm11 = vcmp.le.f32.partialorder %v12925_v50, %v7739_v51  ;;  %vm13002_vm3 = vcmp.le.f32.partialorder %v12926_v9, %v7747_v48 }
 0x1ae   : > { %12995 = vst [vmem:[#allocation34_spill] sm:$0xff] %v8079_v6  ;;  %v1716_v3 = vsel %vm12999_vm10, %v7696_v20, 2147483647  ;;  %v8095_v45 = vsel %vm13000_vm11, %v7696_v20, 2147483647  ;;  %v1821_v6 = vsel %vm1820_vm15, %v1819_v30, %v1704_v33  ;;  %v13004_v39 = vld [vmem:[#allocation70_spill] sm:$0xff] }
 0x1af   : > { %13001 = vst [vmem:[#allocation35_spill] sm:$0xff] %v8095_v45  ;;  %v8101_v60 = vsel %vm13002_vm3, %v7696_v20, 2147483647  ;;  %vm1624_vm5 = vcmp.le.f32.partialorder %v13004_v39, %v7737_v54  ;;  %v13005_v19 = vld [vmem:[#allocation71_spill] sm:$0xff]  ;;  %v13006_v11 = vld [vmem:[#allocation72_spill] sm:$0xff]  ;;  %vm1822_vm15 = vcmp.lt.s32.totalorder %v1821_v6, %v1708_v23  ;;  %v13009_v30 = vld [vmem:[#allocation73_spill] sm:$0xff] }
 0x1b0   : > { %13003 = vst [vmem:[#allocation36_spill] sm:$0xff] %v8101_v60  ;;  %vm1625_vm0 = vcmp.le.f32.partialorder %v13005_v19, %v7739_v51  ;;  %vm1626_vm10 = vcmp.le.f32.partialorder %v13006_v11, %v7747_v48  ;;  %v8113_v50 = vsel %vm1591_vm12, %v7696_v20, 2147483647  ;;  %v1720_v9 = vsel %vm1592_vm13, %v7699_v2, 2147483647  ;;  %v13010_v60 = vld [vmem:[#allocation74_spill] sm:$0xff] }
 0x1b1   : > { %13007 = vst [vmem:[#allocation37_spill] sm:$0xff] %v8113_v50  ;;  %v8123_v33 = vsel %vm1593_vm14, %v7699_v2, 2147483647  ;;  %vm1627_vm3 = vcmp.le.f32.partialorder %v13009_v30, %v7749_v4  ;;  %vm1628_vm11 = vcmp.le.f32.partialorder %v13010_v60, %v7737_v54  ;;  %v13011_v59 = vld [vmem:[#allocation75_spill] sm:$0xff]  ;;  %v8135_v27 = vsel %vm1594_vm1, %v7699_v2, 2147483647 }
 0x1b2   : > { %13008 = vst [vmem:[#allocation38_spill] sm:$0xff] %v8123_v33  ;;  %v8141_v44 = vsel %vm1595_vm2, %v7699_v2, 2147483647  ;;  %vm13012_vm13 = vcmp.le.f32.partialorder %v12935_v17, %v7737_v54  ;;  %v1823_v33 = vsel %vm1822_vm15, %v1821_v6, %v1708_v23  ;;  %v13013_v50 = vld [vmem:[#allocation76_spill] sm:$0xff]  ;;  %v13014_v45 = vld [vmem:[#allocation77_spill] sm:$0xff]  ;;  %v13015_v34 = vld [vmem:[#allocation78_spill] sm:$0xff]  ;;  %vm13017_vm2 = vcmp.le.f32.partialorder %v12940_v62, %v7747_v48 }
 0x1b3   : > { %v1724_v20 = vsel %vm13012_vm13, %v7702_v8, 2147483647  ;;  %vm1630_vm14 = vcmp.le.f32.partialorder %v13013_v50, %v7747_v48  ;;  %v8157_v49 = vsel %vm1597_vm6, %v7702_v8, 2147483647  ;;  %v8163_v17 = vsel %vm13017_vm2, %v7702_v8, 2147483647 }
 0x1b4   : > { %13016 = vst [vmem:[#allocation39_spill] sm:$0xff] %v8157_v49  ;;  %13018 = vst [vmem:[#allocation40_spill] sm:$0xff] %v8163_v17  ;;  %vm13019_vm15 = vcmp.le.f32.partialorder %v12941_v15, %v7749_v4  ;;  %vm1824_vm13 = vcmp.lt.s32.totalorder %v1823_v33, %v1712_v35  ;;  %v13021_v6 = vld [vmem:[#allocation79_spill] sm:$0xff]  ;;  %v13022_v16 = vld [vmem:[#allocation80_spill] sm:$0xff]  ;;  %vm13024_vm2 = vcmp.le.f32.partialorder %v12946_v61, %v7737_v54  ;;  %v8395_v19 = vsel %vm1627_vm3, %v7723_v32, 2147483647 }
 0x1b5   : > { %v8169_v23 = vsel %vm13019_vm15, %v7702_v8, 2147483647  ;;  %v13023_v2 = vld [vmem:[#allocation81_spill] sm:$0xff]  ;;  %v1728_v62 = vsel %vm13024_vm2, %v7705_v13, 2147483647  ;;  %vm13025_vm15 = vcmp.le.f32.partialorder %v12947_v18, %v7739_v51  ;;  %vm13026_vm1 = vcmp.le.f32.partialorder %v12948_v28, %v7747_v48  ;;  %v13028_v17 = vld [vmem:[#allocation82_spill] sm:$0xff] }
 0x1b6   : > { %13020 = vst [vmem:[#allocation41_spill] sm:$0xff] %v8169_v23  ;;  %v8185_v15 = vsel %vm13025_vm15, %v7705_v13, 2147483647  ;;  %v8191_v8 = vsel %vm13026_vm1, %v7705_v13, 2147483647  ;;  %v1825_v23 = vsel %vm1824_vm13, %v1823_v33, %v1712_v35  ;;  %v13029_v49 = vld [vmem:[#allocation83_spill] sm:$0xff]  ;;  %vm13031_vm15 = vcmp.le.f32.partialorder %v12954_v36, %v7749_v4 }
 0x1b7   : > { %13027 = vst [vmem:[#allocation42_spill] sm:$0xff] %v8191_v8  ;;  %v13030_v61 = vld [vmem:[#allocation84_spill] sm:$0xff]  ;;  %v8203_v18 = vsel %vm13031_vm15, %v7705_v13, 2147483647  ;;  %vm13033_vm1 = vcmp.le.f32.partialorder %v12955_v58, %v7737_v54  ;;  %vm13034_vm13 = vcmp.le.f32.partialorder %v12956_v31, %v7739_v51  ;;  %vm1826_vm6 = vcmp.lt.s32.totalorder %v1825_v23, %v1716_v3  ;;  %v13036_v33 = vld [vmem:[#allocation85_spill] sm:$0xff]  ;;  %v13037_v36 = vld [vmem:[#allocation86_spill] sm:$0xff] }
 0x1b8   : > { %13032 = vst [vmem:[#allocation43_spill] sm:$0xff] %v8203_v18  ;;  %v8209_v35 = vsel %vm13033_vm1, %v7708_v37, 2147483647  ;;  %v8215_v28 = vsel %vm13034_vm13, %v7708_v37, 2147483647  ;;  %v13038_v13 = vld [vmem:[#allocation87_spill] sm:$0xff]  ;;  %vm13039_vm1 = vcmp.le.f32.partialorder %v12960_v29, %v7747_v48  ;;  %vm13041_vm13 = vcmp.le.f32.partialorder %v12961_v0, %v7749_v4 }
 0x1b9   : > { %13035 = vst [vmem:[#allocation44_spill] sm:$0xff] %v8215_v28  ;;  %v8227_v58 = vsel %vm13039_vm1, %v7708_v37, 2147483647  ;;  %v8233_v31 = vsel %vm13041_vm13, %v7708_v37, 2147483647  ;;  %vm13042_vm2 = vcmp.le.f32.partialorder %v12962_v21, %v7737_v54  ;;  %v1827_v18 = vsel %vm1826_vm6, %v1825_v23, %v1716_v3  ;;  %v13043_v8 = vld [vmem:[#allocation88_spill] sm:$0xff] }
 0x1ba   : > { %13040 = vst [vmem:[#allocation45_spill] sm:$0xff] %v8227_v58  ;;  %v8239_v28 = vsel %vm13042_vm2, %v7711_v10, 2147483647  ;;  %v13044_v29 = vld [vmem:[#allocation89_spill] sm:$0xff]  ;;  %v13045_v58 = vld [vmem:[#allocation90_spill] sm:$0xff]  ;;  %vm13046_vm13 = vcmp.le.f32.partialorder %v12969_v22, %v7739_v51  ;;  %vm13048_vm2 = vcmp.le.f32.partialorder %v12970_v56, %v7747_v48  ;;  %vm13050_vm6 = vcmp.le.f32.partialorder %v12971_v47, %v7749_v4  ;;  %v13052_v23 = vld [vmem:[#allocation91_spill] sm:$0xff] }
 0x1bb   : > { %v8251_v0 = vsel %vm13046_vm13, %v7711_v10, 2147483647  ;;  %v8257_v21 = vsel %vm13048_vm2, %v7711_v10, 2147483647  ;;  %v8263_v3 = vsel %vm13050_vm6, %v7711_v10, 2147483647  ;;  %vm1828_vm1 = vcmp.lt.s32.totalorder %v1827_v18, %v1720_v9 }
 0x1bc   : > { %13047 = vst [vmem:[#allocation46_spill] sm:$0xff] %v8251_v0  ;;  %13049 = vst [vmem:[#allocation47_spill] sm:$0xff] %v8257_v21  ;;  %v13053_v22 = vld [vmem:[#allocation92_spill] sm:$0xff]  ;;  %v13054_v37 = vld [vmem:[#allocation93_spill] sm:$0xff]  ;;  %vm13055_vm2 = vcmp.le.f32.partialorder %v12977_v40, %v7737_v54  ;;  %vm13056_vm6 = vcmp.le.f32.partialorder %v12978_v41, %v7739_v51  ;;  %vm13058_vm15 = vcmp.le.f32.partialorder %v12979_v46, %v7747_v48  ;;  %v8299_v41 = vsel %vm1615_vm9, %v7714_v43, 2147483647 }
 0x1bd   : > { %13051 = vst [vmem:[#allocation48_spill] sm:$0xff] %v8263_v3  ;;  %v8275_v56 = vsel %vm13055_vm2, %v7714_v43, 2147483647  ;;  %v8281_v47 = vsel %vm13056_vm6, %v7714_v43, 2147483647  ;;  %v1829_v3 = vsel %vm1828_vm1, %v1827_v18, %v1720_v9  ;;  %v13060_v21 = vld [vmem:[#allocation94_spill] sm:$0xff]  ;;  %vm13065_vm1 = vcmp.le.f32.partialorder %v12987_v25, %v7739_v51 }
 0x1be   : > { %13057 = vst [vmem:[#allocation49_spill] sm:$0xff] %v8281_v47  ;;  %v8287_v10 = vsel %vm13058_vm15, %v7714_v43, 2147483647  ;;  %vm1648_vm12 = vcmp.le.f32.partialorder %v13060_v21, %v7737_v54  ;;  %v13061_v40 = vld [vmem:[#allocation95_spill] sm:$0xff]  ;;  %v13062_v0 = vld [vmem:[#allocation96_spill] sm:$0xff]  ;;  %13063 = vst [vmem:[#allocation51_spill] sm:$0xff] %v8299_v41  ;;  %vm13064_vm15 = vcmp.le.f32.partialorder %v12986_v42, %v7737_v54  ;;  %vm1830_vm6 = vcmp.lt.s32.totalorder %v1829_v3, %v1724_v20 }
 0x1bf   : > { %13059 = vst [vmem:[#allocation50_spill] sm:$0xff] %v8287_v10  ;;  %v8305_v46 = vsel %vm13064_vm15, %v7717_v38, 2147483647  ;;  %v8311_v9 = vsel %vm13065_vm1, %v7717_v38, 2147483647  ;;  %v13067_v18 = vld [vmem:[#allocation97_spill] sm:$0xff]  ;;  %v1831_v41 = vsel %vm1830_vm6, %v1829_v3, %v1724_v20  ;;  %vm13079_vm6 = vcmp.le.f32.partialorder %v12998_v1, %v7749_v4 }
 0x1c0   : > { %13066 = vst [vmem:[#allocation52_spill] sm:$0xff] %v8311_v9  ;;  %vm1651_vm13 = vcmp.le.f32.partialorder %v13067_v18, %v7749_v4  ;;  %v13068_v12 = vld [vmem:[#allocation98_spill] sm:$0xff]  ;;  %v13069_v43 = vld [vmem:[#allocation99_spill] sm:$0xff]  ;;  %v8323_v42 = vsel %vm1618_vm4, %v7717_v38, 2147483647  ;;  %v13072_v10 = vld [vmem:[#allocation100_spill] sm:$0xff]  ;;  %vm1832_vm4 = vcmp.lt.s32.totalorder %v1831_v41, %v1728_v62 }
 0x1c1   : > { %vm1652_vm9 = vcmp.le.f32.partialorder %v13068_v12, %v7737_v54  ;;  %vm1653_vm2 = vcmp.le.f32.partialorder %v13069_v43, %v7739_v51  ;;  %13070 = vst [vmem:[#allocation53_spill] sm:$0xff] %v8323_v42  ;;  %v8329_v25 = vsel %vm1619_vm7, %v7717_v38, 2147483647  ;;  %v8335_v9 = vsel %vm1620_vm8, %v7720_v5, 2147483647  ;;  %v13073_v57 = vld [vmem:[#allocation101_spill] sm:$0xff] }
 0x1c2   : > { %13071 = vst [vmem:[#allocation54_spill] sm:$0xff] %v8329_v25  ;;  %v13074_v42 = vld [vmem:[#allocation102_spill] sm:$0xff]  ;;  %vm13075_vm7 = vcmp.le.f32.partialorder %v12996_v26, %v7739_v51  ;;  %vm13077_vm8 = vcmp.le.f32.partialorder %v12997_v53, %v7747_v48  ;;  %v8359_v24 = vsel %vm13079_vm6, %v7720_v5, 2147483647  ;;  %v13081_v3 = vld [vmem:[#allocation103_spill] sm:$0xff]  ;;  %v13082_v26 = vld [vmem:[#allocation104_spill] sm:$0xff] }
 0x1c3   : > { %v8347_v55 = vsel %vm13075_vm7, %v7720_v5, 2147483647  ;;  %v8353_v20 = vsel %vm13077_vm8, %v7720_v5, 2147483647  ;;  %13080 = vst [vmem:[#allocation57_spill] sm:$0xff] %v8359_v24  ;;  %vm1657_vm1 = vcmp.le.f32.partialorder %v13081_v3, %v7739_v51  ;;  %vm1658_vm7 = vcmp.le.f32.partialorder %v13082_v26, %v7747_v48  ;;  %v13083_v38 = vld [vmem:[#allocation105_spill] sm:$0xff] }
 0x1c4   : > { %13076 = vst [vmem:[#allocation55_spill] sm:$0xff] %v8347_v55  ;;  %13078 = vst [vmem:[#allocation56_spill] sm:$0xff] %v8353_v20  ;;  %vm1659_vm15 = vcmp.le.f32.partialorder %v13083_v38, %v7749_v4  ;;  %v8371_v53 = vsel %vm1624_vm5, %v7723_v32, 2147483647  ;;  %v8377_v1 = vsel %vm1625_vm0, %v7723_v32, 2147483647  ;;  %v1833_v24 = vsel %vm1832_vm4, %v1831_v41, %v1728_v62 }
 0x1c5   : > { %13084 = vst [vmem:[#allocation58_spill] sm:$0xff] %v8377_v1  ;;  %v8383_v5 = vsel %vm1626_vm10, %v7723_v32, 2147483647  ;;  %v13086_v20 = vld [vmem:[#allocation106_spill] sm:$0xff]  ;;  %v13087_v39 = vld [vmem:[#allocation107_spill] sm:$0xff]  ;;  %v13088_v55 = vld [vmem:[#allocation108_spill] sm:$0xff]  ;;  %vm13091_vm0 = vcmp.le.f32.partialorder %v13011_v59, %v7739_v51  ;;  %vm1834_vm10 = vcmp.lt.s32.totalorder %v1833_v24, %v8209_v35 }
 0x1c6   : > { %13085 = vst [vmem:[#allocation59_spill] sm:$0xff] %v8383_v5  ;;  %vm1660_vm8 = vcmp.le.f32.partialorder %v13086_v20, %v7737_v54  ;;  %vm1661_vm5 = vcmp.le.f32.partialorder %v13087_v39, %v7739_v51  ;;  %13089 = vst [vmem:[#allocation60_spill] sm:$0xff] %v8395_v19  ;;  %v13090_v1 = vld [vmem:[#allocation147_spill] sm:$0xff]  ;;  %v13093_v41 = vld [vmem:[#allocation109_spill] sm:$0xff]  ;;  %v1835_v5 = vsel %vm1834_vm10, %v1833_v24, %v8209_v35 }
 0x1c7   : > { %v8401_v11 = vsel %vm1628_vm11, %v13090_v1, 2147483647  ;;  %v8407_v62 = vsel %vm13091_vm0, %v13090_v1, 2147483647  ;;  %vm1663_vm4 = vcmp.le.f32.partialorder %v13093_v41, %v7749_v4  ;;  %v13094_v30 = vld [vmem:[#allocation110_spill] sm:$0xff]  ;;  %v13095_v32 = vld [vmem:[#allocation111_spill] sm:$0xff]  ;;  %vm13097_vm11 = vcmp.le.f32.partialorder %v13014_v45, %v7749_v4 }
 0x1c8   : > { %13092 = vst [vmem:[#allocation61_spill] sm:$0xff] %v8407_v62  ;;  %v8420_v60 = vsel %vm1630_vm14, %v13090_v1, 2147483647  ;;  %v8426_v59 = vsel %vm13097_vm11, %v13090_v1, 2147483647  ;;  %v13099_v62 = vld [vmem:[#allocation148_spill] sm:$0xff]  ;;  %vm13100_vm0 = vcmp.le.f32.partialorder %v13015_v34, %v7737_v54  ;;  %vm13104_vm11 = vcmp.le.f32.partialorder %v13021_v6, %v7739_v51 }
 0x1c9   : > { %13096 = vst [vmem:[#allocation62_spill] sm:$0xff] %v8420_v60  ;;  %13098 = vst [vmem:[#allocation63_spill] sm:$0xff] %v8426_v59  ;;  %v8432_v19 = vsel %vm13100_vm0, %v13099_v62, 2147483647  ;;  %v13101_v25 = vld [vmem:[#allocation112_spill] sm:$0xff]  ;;  %v13102_v50 = vld [vmem:[#allocation113_spill] sm:$0xff]  ;;  %vm13106_vm0 = vcmp.le.f32.partialorder %v13022_v16, %v7747_v48  ;;  %vm13108_vm10 = vcmp.le.f32.partialorder %v13023_v2, %v7749_v4  ;;  %vm1836_vm3 = vcmp.lt.s32.totalorder %v1835_v5, %v8239_v28 }
 0x1ca   : > { %v13103_v60 = vld [vmem:[#allocation114_spill] sm:$0xff]  ;;  %v8445_v45 = vsel %vm13104_vm11, %v13099_v62, 2147483647  ;;  %v8451_v34 = vsel %vm13106_vm0, %v13099_v62, 2147483647  ;;  %v13110_v24 = vld [vmem:[#allocation115_spill] sm:$0xff]  ;;  %vm13114_vm0 = vcmp.le.f32.partialorder %v13028_v17, %v7737_v54  ;;  %vm13117_vm14 = vcmp.le.f32.partialorder %v13030_v61, %v7747_v48 }
 0x1cb   : > { %13105 = vst [vmem:[#allocation64_spill] sm:$0xff] %v8445_v45  ;;  %13107 = vst [vmem:[#allocation65_spill] sm:$0xff] %v8451_v34  ;;  %v8457_v35 = vsel %vm13108_vm10, %v13099_v62, 2147483647  ;;  %v13111_v6 = vld [vmem:[#allocation116_spill] sm:$0xff]  ;;  %v13112_v1 = vld [vmem:[#allocation117_spill] sm:$0xff]  ;;  %vm13115_vm10 = vcmp.le.f32.partialorder %v13029_v49, %v7739_v51 }
 0x1cc   : > { %13109 = vst [vmem:[#allocation66_spill] sm:$0xff] %v8457_v35  ;;  %v13113_v16 = vld [vmem:[#allocation149_spill] sm:$0xff]  ;;  %v1837_v35 = vsel %vm1836_vm3, %v1835_v5, %v8239_v28  ;;  %v13119_v45 = vld [vmem:[#allocation118_spill] sm:$0xff]  ;;  %v13120_v17 = vld [vmem:[#allocation119_spill] sm:$0xff]  ;;  %vm13126_vm3 = vcmp.le.f32.partialorder %v13038_v13, %v7739_v51 }
 0x1cd   : > { %v8470_v34 = vsel %vm13114_vm0, %v13113_v16, 2147483647  ;;  %v8476_v2 = vsel %vm13115_vm10, %v13113_v16, 2147483647  ;;  %v8482_v62 = vsel %vm13117_vm14, %v13113_v16, 2147483647  ;;  %vm13122_vm10 = vcmp.le.f32.partialorder %v13036_v33, %v7749_v4 }
 0x1ce   : > { %13116 = vst [vmem:[#allocation67_spill] sm:$0xff] %v8476_v2  ;;  %13118 = vst [vmem:[#allocation68_spill] sm:$0xff] %v8482_v62  ;;  %v13121_v59 = vld [vmem:[#allocation120_spill] sm:$0xff]  ;;  %v8495_v49 = vsel %vm13122_vm10, %v13113_v16, 2147483647  ;;  %v13124_v61 = vld [vmem:[#allocation150_spill] sm:$0xff]  ;;  %vm13125_vm14 = vcmp.le.f32.partialorder %v13037_v36, %v7737_v54  ;;  %vm1838_vm11 = vcmp.lt.s32.totalorder %v1837_v35, %v8275_v56  ;;  %vm13135_vm0 = vcmp.le.f32.partialorder %v13045_v58, %v7737_v54 }
 0x1cf   : > { %13123 = vst [vmem:[#allocation69_spill] sm:$0xff] %v8495_v49  ;;  %v8501_v5 = vsel %vm13125_vm14, %v13124_v61, 2147483647  ;;  %v8507_v28 = vsel %vm13126_vm3, %v13124_v61, 2147483647  ;;  %v13128_v62 = vld [vmem:[#allocation121_spill] sm:$0xff]  ;;  %vm13131_vm14 = vcmp.le.f32.partialorder %v13043_v8, %v7747_v48  ;;  %vm13133_vm3 = vcmp.le.f32.partialorder %v13044_v29, %v7749_v4 }
 0x1d0   : > { %13127 = vst [vmem:[#allocation70_spill] sm:$0xff] %v8507_v28  ;;  %v13129_v33 = vld [vmem:[#allocation122_spill] sm:$0xff]  ;;  %v13130_v16 = vld [vmem:[#allocation123_spill] sm:$0xff]  ;;  %v8520_v36 = vsel %vm13131_vm14, %v13124_v61, 2147483647  ;;  %v13134_v28 = vld [vmem:[#allocation153_spill] sm:$0xff]  ;;  %v1839_v2 = vsel %vm1838_vm11, %v1837_v35, %v8275_v56  ;;  %vm13142_vm11 = vcmp.le.f32.partialorder %v13054_v37, %v7749_v4 }
 0x1d1   : > { %13132 = vst [vmem:[#allocation71_spill] sm:$0xff] %v8520_v36  ;;  %v8526_v13 = vsel %vm13133_vm3, %v13124_v61, 2147483647  ;;  %v8532_v49 = vsel %vm13135_vm0, %v13134_v28, 2147483647  ;;  %v13136_v47 = vld [vmem:[#allocation124_spill] sm:$0xff]  ;;  %vm13139_vm3 = vcmp.le.f32.partialorder %v13052_v23, %v7739_v51  ;;  %vm13140_vm0 = vcmp.le.f32.partialorder %v13053_v22, %v7747_v48 }
 0x1d2   : > { %vm1678_vm6 = vcmp.le.f32.partialorder %v13136_v47, %v7747_v48  ;;  %v13137_v8 = vld [vmem:[#allocation125_spill] sm:$0xff]  ;;  %v13138_v36 = vld [vmem:[#allocation126_spill] sm:$0xff]  ;;  %v8545_v29 = vsel %vm13139_vm3, %v13134_v28, 2147483647  ;;  %v8551_v58 = vsel %vm13140_vm0, %v13134_v28, 2147483647  ;;  %vm1840_vm10 = vcmp.lt.s32.totalorder %v1839_v2, %v8305_v46 }
 0x1d3   : > { %13141 = vst [vmem:[#allocation72_spill] sm:$0xff] %v8551_v58  ;;  %v8557_v56 = vsel %vm13142_vm11, %v13134_v28, 2147483647  ;;  %v13144_v35 = vld [vmem:[#allocation127_spill] sm:$0xff]  ;;  %v13145_v23 = vld [vmem:[#allocation128_spill] sm:$0xff]  ;;  %v13146_v61 = vld [vmem:[#allocation154_spill] sm:$0xff]  ;;  %vm13147_vm0 = vcmp.le.f32.partialorder %v13061_v40, %v7739_v51  ;;  %vm13148_vm11 = vcmp.le.f32.partialorder %v13062_v0, %v7747_v48 }
 0x1d4   : > { %13143 = vst [vmem:[#allocation73_spill] sm:$0xff] %v8557_v56  ;;  %vm1681_vm14 = vcmp.le.f32.partialorder %v13144_v35, %v7739_v51  ;;  %vm1682_vm3 = vcmp.le.f32.partialorder %v13145_v23, %v7747_v48  ;;  %v8568_v22 = vsel %vm1648_vm12, %v13146_v61, 2147483647  ;;  %v8574_v37 = vsel %vm13147_vm0, %v13146_v61, 2147483647  ;;  %v13149_v58 = vld [vmem:[#allocation157_spill] sm:$0xff] }
 0x1d5   : > { %v8580_v28 = vsel %vm13148_vm11, %v13146_v61, 2147483647  ;;  %v1841_v56 = vsel %vm1840_vm10, %v1839_v2, %v8305_v46  ;;  %v8587_v21 = vsel %vm1651_vm13, %v13146_v61, 2147483647  ;;  %v8593_v40 = vsel %vm1652_vm9, %v13149_v58, 2147483647 }
 0x1d6   : > { %v8599_v0 = vsel %vm1653_vm2, %v13149_v58, 2147483647  ;;  %vm1842_vm12 = vcmp.lt.s32.totalorder %v1841_v56, %v8335_v9  ;;  %vm13150_vm10 = vcmp.le.f32.partialorder %v13072_v10, %v7747_v48  ;;  %vm13151_vm13 = vcmp.le.f32.partialorder %v13073_v57, %v7749_v4  ;;  %v13152_v12 = vld [vmem:[#allocation158_spill] sm:$0xff]  ;;  %v13180_v35 = vld [vmem:[#allocation16_spill] sm:$0xff]  ;;  %v13183_v23 = vld [vmem:[#allocation21_spill] sm:$0xff] }
 0x1d7   : > { %v8606_v46 = vsel %vm13150_vm10, %v13149_v58, 2147483647  ;;  %v8612_v18 = vsel %vm13151_vm13, %v13149_v58, 2147483647  ;;  %vm13153_vm9 = vcmp.le.f32.partialorder %v13074_v42, %v7737_v54  ;;  %v1843_v2 = vsel %vm1842_vm12, %v1841_v56, %v8335_v9  ;;  %v13154_v9 = vld [vmem:[#allocation159_spill] sm:$0xff] }
 0x1d8   : > { %v8618_v43 = vsel %vm13153_vm9, %v13152_v12, 2147483647  ;;  %v8625_v10 = vsel %vm1657_vm1, %v13152_v12, 2147483647  ;;  %v8631_v57 = vsel %vm1658_vm7, %v13152_v12, 2147483647  ;;  %vm1844_vm2 = vcmp.lt.s32.totalorder %v1843_v2, %v8371_v53 }
 0x1d9   : > { %v8637_v42 = vsel %vm1659_vm15, %v13152_v12, 2147483647  ;;  %v8644_v3 = vsel %vm1660_vm8, %v13154_v9, 2147483647  ;;  %v8650_v26 = vsel %vm1661_vm5, %v13154_v9, 2147483647  ;;  %vm13155_vm1 = vcmp.le.f32.partialorder %v13088_v55, %v7747_v48 }
 0x1da   : > { %v8656_v38 = vsel %vm13155_vm1, %v13154_v9, 2147483647  ;;  %v1845_v56 = vsel %vm1844_vm2, %v1843_v2, %v8371_v53  ;;  %v8663_v20 = vsel %vm1663_vm4, %v13154_v9, 2147483647  ;;  %v13156_v12 = vld [vmem:[#allocation160_spill] sm:$0xff]  ;;  %vm13157_vm15 = vcmp.le.f32.partialorder %v13094_v30, %v7737_v54  ;;  %v13161_v30 = vld [vmem:[#allocation161_spill] sm:$0xff] }
 0x1db   : > { %v8669_v39 = vsel %vm13157_vm15, %v13156_v12, 2147483647  ;;  %vm13158_vm7 = vcmp.le.f32.partialorder %v13095_v32, %v7739_v51  ;;  %vm1846_vm8 = vcmp.lt.s32.totalorder %v1845_v56, %v8401_v11  ;;  %vm13159_vm5 = vcmp.le.f32.partialorder %v13101_v25, %v7747_v48  ;;  %v13186_v9 = vld [vmem:[#allocation24_spill] sm:$0xff] }
 0x1dc   : > { %v8675_v55 = vsel %vm13158_vm7, %v13156_v12, 2147483647  ;;  %v8682_v53 = vsel %vm13159_vm5, %v13156_v12, 2147483647  ;;  %vm13160_vm4 = vcmp.le.f32.partialorder %v13102_v50, %v7749_v4  ;;  %vm13162_vm0 = vcmp.le.f32.partialorder %v13103_v60, %v7737_v54 }
 0x1dd   : > { %v8688_v41 = vsel %vm13160_vm4, %v13156_v12, 2147483647  ;;  %v8694_v32 = vsel %vm13162_vm0, %v13161_v30, 2147483647  ;;  %v1847_v2 = vsel %vm1846_vm8, %v1845_v56, %v8401_v11  ;;  %vm13163_vm11 = vcmp.le.f32.partialorder %v13110_v24, %v7739_v51  ;;  %v13166_v11 = vld [vmem:[#allocation162_spill] sm:$0xff] }
 0x1de   : > { %v8701_v25 = vsel %vm13163_vm11, %v13161_v30, 2147483647  ;;  %vm13164_vm12 = vcmp.le.f32.partialorder %v13111_v6, %v7747_v48  ;;  %vm13165_vm10 = vcmp.le.f32.partialorder %v13112_v1, %v7749_v4  ;;  %vm1848_vm13 = vcmp.lt.s32.totalorder %v1847_v2, %v8432_v19 }
 0x1df   : > { %v8707_v50 = vsel %vm13164_vm12, %v13161_v30, 2147483647  ;;  %v8713_v60 = vsel %vm13165_vm10, %v13161_v30, 2147483647  ;;  %vm13167_vm9 = vcmp.le.f32.partialorder %v13119_v45, %v7737_v54  ;;  %vm13168_vm2 = vcmp.le.f32.partialorder %v13120_v17, %v7739_v51  ;;  %v13171_v30 = vld [vmem:[#allocation163_spill] sm:$0xff] }
 0x1e0   : > { %v8720_v24 = vsel %vm13167_vm9, %v13166_v11, 2147483647  ;;  %v8726_v6 = vsel %vm13168_vm2, %v13166_v11, 2147483647  ;;  %vm13169_vm1 = vcmp.le.f32.partialorder %v13121_v59, %v7747_v48  ;;  %v1849_v56 = vsel %vm1848_vm13, %v1847_v2, %v8432_v19 }
 0x1e1   : > { %v8732_v1 = vsel %vm13169_vm1, %v13166_v11, 2147483647  ;;  %vm13170_vm15 = vcmp.le.f32.partialorder %v13128_v62, %v7749_v4  ;;  %vm13172_vm7 = vcmp.le.f32.partialorder %v13129_v33, %v7737_v54  ;;  %vm13173_vm8 = vcmp.le.f32.partialorder %v13130_v16, %v7739_v51  ;;  %v13175_v33 = vld [vmem:[#allocation164_spill] sm:$0xff] }
 0x1e2   : > { %v8739_v45 = vsel %vm13170_vm15, %v13166_v11, 2147483647  ;;  %v8745_v17 = vsel %vm13172_vm7, %v13171_v30, 2147483647  ;;  %v8751_v59 = vsel %vm13173_vm8, %v13171_v30, 2147483647  ;;  %vm1850_vm5 = vcmp.lt.s32.totalorder %v1849_v56, %v8470_v34 }
 0x1e3   : > { %v8758_v19 = vsel %vm1678_vm6, %v13171_v30, 2147483647  ;;  %vm13174_vm4 = vcmp.le.f32.partialorder %v13137_v8, %v7749_v4  ;;  %vm13176_vm0 = vcmp.le.f32.partialorder %v13138_v36, %v7737_v54  ;;  %v1851_v2 = vsel %vm1850_vm5, %v1849_v56, %v8470_v34  ;;  %v13178_v36 = vld [vmem:[#allocation15_spill] sm:$0xff]  ;;  %v13181_v51 = vld [vmem:[#allocation20_spill] sm:$0xff]  ;;  %v13182_v11 = vld [vmem:[#allocation17_spill] sm:$0xff] }
 0x1e4   : > { %v8764_v62 = vsel %vm13174_vm4, %v13171_v30, 2147483647  ;;  %v8770_v16 = vsel %vm13176_vm0, %v13175_v33, 2147483647  ;;  %v8777_v47 = vsel %vm1681_vm14, %v13175_v33, 2147483647  ;;  %vm1852_vm6 = vcmp.lt.s32.totalorder %v1851_v2, %v8501_v5 }
 0x1e5   : > { %v8783_v8 = vsel %vm1682_vm3, %v13175_v33, 2147483647  ;;  %v13177_v30 = vld [vmem:[#allocation18_spill] sm:$0xff]  ;;  %v1853_v54 = vsel %vm1852_vm6, %v1851_v2, %v8501_v5  ;;  %v13179_v56 = vld [vmem:[#allocation19_spill] sm:$0xff]  ;;  %vm2025_vm12 = vcmp.lt.s32.totalorder %v13182_v11, %v13181_v51 }
 0x1e6   : > { %vm1883_vm11 = vcmp.lt.s32.totalorder %v13178_v36, %v13177_v30  ;;  %vm1954_vm14 = vcmp.lt.s32.totalorder %v13180_v35, %v13179_v56  ;;  %vm1854_vm10 = vcmp.lt.s32.totalorder %v1853_v54, %v8532_v49  ;;  %v2026_v12 = vsel %vm2025_vm12, %v13182_v11, %v13181_v51  ;;  %v13184_v2 = vld [vmem:[#allocation22_spill] sm:$0xff] }
 0x1e7   : > { %v1884_v34 = vsel %vm1883_vm11, %v13178_v36, %v13177_v30  ;;  %v1955_v48 = vsel %vm1954_vm14, %v13180_v35, %v13179_v56  ;;  %v1855_v5 = vsel %vm1854_vm10, %v1853_v54, %v8532_v49  ;;  %v13185_v36 = vld [vmem:[#allocation23_spill] sm:$0xff]  ;;  %v13187_v54 = vld [vmem:[#allocation25_spill] sm:$0xff] }
 0x1e8   : > { %vm1885_vm3 = vcmp.lt.s32.totalorder %v1884_v34, %v13183_v23  ;;  %vm1956_vm13 = vcmp.lt.s32.totalorder %v1955_v48, %v13184_v2  ;;  %vm2027_vm9 = vcmp.lt.s32.totalorder %v2026_v12, %v13185_v36  ;;  %vm1856_vm2 = vcmp.lt.s32.totalorder %v1855_v5, %v8568_v22 }
 0x1e9   : > { %v1886_v30 = vsel %vm1885_vm3, %v1884_v34, %v13183_v23  ;;  %v1957_v58 = vsel %vm1956_vm13, %v1955_v48, %v13184_v2  ;;  %v2028_v61 = vsel %vm2027_vm9, %v2026_v12, %v13185_v36  ;;  %v1857_v56 = vsel %vm1856_vm2, %v1855_v5, %v8568_v22  ;;  %v13188_v34 = vld [vmem:[#allocation26_spill] sm:$0xff]  ;;  %v13189_v22 = vld [vmem:[#allocation27_spill] sm:$0xff] }
 0x1ea   : > { %vm1887_vm1 = vcmp.lt.s32.totalorder %v1886_v30, %v13186_v9  ;;  %vm1958_vm15 = vcmp.lt.s32.totalorder %v1957_v58, %v7955_v7  ;;  %vm2029_vm7 = vcmp.lt.s32.totalorder %v2028_v61, %v7961_v14  ;;  %vm1858_vm8 = vcmp.lt.s32.totalorder %v1857_v56, %v8593_v40 }
 0x1eb   : > { %v1888_v51 = vsel %vm1887_vm1, %v1886_v30, %v13186_v9  ;;  %v1959_v49 = vsel %vm1958_vm15, %v1957_v58, %v7955_v7  ;;  %v2030_v11 = vsel %vm2029_vm7, %v2028_v61, %v7961_v14  ;;  %v1859_v48 = vsel %vm1858_vm8, %v1857_v56, %v8593_v40  ;;  %v13190_v9 = vld [vmem:[#allocation28_spill] sm:$0xff]  ;;  %v13191_v61 = vld [vmem:[#allocation29_spill] sm:$0xff]  ;;  %v13192_v58 = vld [vmem:[#allocation30_spill] sm:$0xff] }
 0x1ec   : > { %vm1889_vm5 = vcmp.lt.s32.totalorder %v1888_v51, %v13187_v54  ;;  %vm1960_vm4 = vcmp.lt.s32.totalorder %v1959_v49, %v13188_v34  ;;  %vm2031_vm0 = vcmp.lt.s32.totalorder %v2030_v11, %v13189_v22  ;;  %vm1860_vm6 = vcmp.lt.s32.totalorder %v1859_v48, %v8618_v43  ;;  %v13193_v40 = vld [vmem:[#allocation31_spill] sm:$0xff]  ;;  %v13195_v56 = vld [vmem:[#allocation32_spill] sm:$0xff] }
 0x1ed   : > { %v1890_v12 = vsel %vm1889_vm5, %v1888_v51, %v13187_v54  ;;  %v1961_v35 = vsel %vm1960_vm4, %v1959_v49, %v13188_v34  ;;  %v2032_v23 = vsel %vm2031_vm0, %v2030_v11, %v13189_v22  ;;  %v1861_v7 = vsel %vm1860_vm6, %v1859_v48, %v8618_v43  ;;  %v13194_v43 = vld [vmem:[#allocation129_spill] sm:$0xff]  ;;  %v13197_v48 = vld [vmem:[#allocation34_spill] sm:$0xff] }
 0x1ee   : > { %vm1891_vm11 = vcmp.lt.s32.totalorder %v1890_v12, %v13190_v9  ;;  %vm1962_vm14 = vcmp.lt.s32.totalorder %v1961_v35, %v13191_v61  ;;  %vm2033_vm12 = vcmp.lt.s32.totalorder %v2032_v23, %v13192_v58  ;;  %vm1862_vm10 = vcmp.lt.s32.totalorder %v1861_v7, %v8644_v3  ;;  %v13196_v11 = vld [vmem:[#allocation33_spill] sm:$0xff] }
 0x1ef   : > { %v1892_v14 = vsel %vm1891_vm11, %v1890_v12, %v13190_v9  ;;  %v1963_v5 = vsel %vm1962_vm14, %v1961_v35, %v13191_v61  ;;  %v2034_v30 = vsel %vm2033_vm12, %v2032_v23, %v13192_v58  ;;  %v1863_v2 = vsel %vm1862_vm10, %v1861_v7, %v8644_v3  ;;  %v13198_v12 = vld [vmem:[#allocation35_spill] sm:$0xff]  ;;  %v13199_v9 = vld [vmem:[#allocation36_spill] sm:$0xff]  ;;  %v13201_v35 = vld [vmem:[#allocation38_spill] sm:$0xff] }
 0x1f0   : > { %vm1893_vm3 = vcmp.lt.s32.totalorder %v1892_v14, %v13193_v40  ;;  %vm1964_vm13 = vcmp.lt.s32.totalorder %v1963_v5, %v8045_v63  ;;  %vm2035_vm9 = vcmp.lt.s32.totalorder %v2034_v30, %v8051_v52  ;;  %vm1683_vm2 = vcmp.le.f32.partialorder %v13194_v43, %v7749_v4  ;;  %v13211_v43 = vld [vmem:[#allocation48_spill] sm:$0xff] }
 0x1f1   : > { %v1894_v36 = vsel %vm1893_vm3, %v1892_v14, %v13193_v40  ;;  %vm1864_vm1 = vcmp.lt.s32.totalorder %v1863_v2, %v8669_v39  ;;  %v1965_v51 = vsel %vm1964_vm13, %v1963_v5, %v8045_v63  ;;  %v2036_v54 = vsel %vm2035_vm9, %v2034_v30, %v8051_v52 }
 0x1f2   : > { %vm1895_vm15 = vcmp.lt.s32.totalorder %v1894_v36, %v13195_v56  ;;  %v1865_v49 = vsel %vm1864_vm1, %v1863_v2, %v8669_v39  ;;  %vm1966_vm7 = vcmp.lt.s32.totalorder %v1965_v51, %v13196_v11  ;;  %vm2037_vm8 = vcmp.lt.s32.totalorder %v2036_v54, %v13197_v48  ;;  %v13200_v39 = vld [vmem:[#allocation37_spill] sm:$0xff]  ;;  %v13203_v2 = vld [vmem:[#allocation40_spill] sm:$0xff] }
 0x1f3   : > { %v1896_v3 = vsel %vm1895_vm15, %v1894_v36, %v13195_v56  ;;  %vm1866_vm5 = vcmp.lt.s32.totalorder %v1865_v49, %v8694_v32  ;;  %v1967_v34 = vsel %vm1966_vm7, %v1965_v51, %v13196_v11  ;;  %v2038_v22 = vsel %vm2037_vm8, %v2036_v54, %v13197_v48  ;;  %v13205_v51 = vld [vmem:[#allocation42_spill] sm:$0xff] }
 0x1f4   : > { %vm1897_vm4 = vcmp.lt.s32.totalorder %v1896_v3, %v13198_v12  ;;  %v1867_v63 = vsel %vm1866_vm5, %v1865_v49, %v8694_v32  ;;  %vm1968_vm0 = vcmp.lt.s32.totalorder %v1967_v34, %v13199_v9  ;;  %vm2039_vm6 = vcmp.lt.s32.totalorder %v2038_v22, %v13200_v39  ;;  %v13202_v32 = vld [vmem:[#allocation39_spill] sm:$0xff]  ;;  %v13207_v49 = vld [vmem:[#allocation44_spill] sm:$0xff] }
 0x1f5   : > { %v1898_v52 = vsel %vm1897_vm4, %v1896_v3, %v13198_v12  ;;  %vm1868_vm11 = vcmp.lt.s32.totalorder %v1867_v63, %v8720_v24  ;;  %v1969_v23 = vsel %vm1968_vm0, %v1967_v34, %v13199_v9  ;;  %v2040_v7 = vsel %vm2039_vm6, %v2038_v22, %v13200_v39  ;;  %v13209_v12 = vld [vmem:[#allocation46_spill] sm:$0xff]  ;;  %v13210_v9 = vld [vmem:[#allocation47_spill] sm:$0xff] }
 0x1f6   : > { %vm1899_vm14 = vcmp.lt.s32.totalorder %v1898_v52, %v13201_v35  ;;  %v1869_v14 = vsel %vm1868_vm11, %v1867_v63, %v8720_v24  ;;  %vm1970_vm12 = vcmp.lt.s32.totalorder %v1969_v23, %v8135_v27  ;;  %vm2041_vm10 = vcmp.lt.s32.totalorder %v2040_v7, %v8141_v44  ;;  %v13204_v24 = vld [vmem:[#allocation41_spill] sm:$0xff] }
 0x1f7   : > { %v1900_v61 = vsel %vm1899_vm14, %v1898_v52, %v13201_v35  ;;  %vm1870_vm3 = vcmp.lt.s32.totalorder %v1869_v14, %v8745_v17  ;;  %v1971_v58 = vsel %vm1970_vm12, %v1969_v23, %v8135_v27  ;;  %v2042_v40 = vsel %vm2041_vm10, %v2040_v7, %v8141_v44  ;;  %v13212_v35 = vld [vmem:[#allocation49_spill] sm:$0xff] }
 0x1f8   : > { %vm1901_vm13 = vcmp.lt.s32.totalorder %v1900_v61, %v13202_v32  ;;  %v1871_v5 = vsel %vm1870_vm3, %v1869_v14, %v8745_v17  ;;  %vm1972_vm9 = vcmp.lt.s32.totalorder %v1971_v58, %v13203_v2  ;;  %vm2043_vm1 = vcmp.lt.s32.totalorder %v2042_v40, %v13204_v24  ;;  %v13206_v17 = vld [vmem:[#allocation43_spill] sm:$0xff] }
 0x1f9   : > { %v1902_v30 = vsel %vm1901_vm13, %v1900_v61, %v13202_v32  ;;  %vm1872_vm15 = vcmp.lt.s32.totalorder %v1871_v5, %v8770_v16  ;;  %v1973_v36 = vsel %vm1972_vm9, %v1971_v58, %v13203_v2  ;;  %v2044_v56 = vsel %vm2043_vm1, %v2042_v40, %v13204_v24  ;;  %v13213_v61 = vld [vmem:[#allocation50_spill] sm:$0xff]  ;;  %v13214_v32 = vld [vmem:[#allocation51_spill] sm:$0xff]  ;;  %v13216_v2 = vld [vmem:[#allocation53_spill] sm:$0xff] }
 0x1fa   : > { %vm1903_vm7 = vcmp.lt.s32.totalorder %v1902_v30, %v8185_v15  ;;  %v1873_v27 = vsel %vm1872_vm15, %v1871_v5, %v8770_v16  ;;  %vm1974_vm8 = vcmp.lt.s32.totalorder %v1973_v36, %v13205_v51  ;;  %vm2045_vm5 = vcmp.lt.s32.totalorder %v2044_v56, %v13206_v17  ;;  %v13217_v24 = vld [vmem:[#allocation54_spill] sm:$0xff] }
 0x1fb   : > { %v1904_v44 = vsel %vm1903_vm7, %v1902_v30, %v8185_v15  ;;  %v1874_v54 = vrot.slane %v1873_v27, 4  ;;  %v1975_v3 = vsel %vm1974_vm8, %v1973_v36, %v13205_v51  ;;  %v2046_v11 = vsel %vm2045_vm5, %v2044_v56, %v13206_v17  ;;  %v13208_v15 = vld [vmem:[#allocation45_spill] sm:$0xff]  ;;  %v13218_v56 = vld [vmem:[#allocation55_spill] sm:$0xff]  ;;  %v13219_v17 = vld [vmem:[#allocation56_spill] sm:$0xff] }
 0x1fc   : > { %vm1905_vm4 = vcmp.lt.s32.totalorder %v1904_v44, %v13207_v49  ;;  %v8886_v48 = vsel %vm1683_vm2, %v13175_v33, 2147483647  ;;  %vm1976_vm0 = vcmp.lt.s32.totalorder %v1975_v3, %v13208_v15  ;;  %vm2047_vm6 = vcmp.lt.s32.totalorder %v2046_v11, %v8233_v31 }
 0x1fd   : > { %v1906_v16 = vsel %vm1905_vm4, %v1904_v44, %v13207_v49  ;;  %vm1875_vm11 = vcmp.lt.s32.totalorder %v1873_v27, %v1874_v54  ;;  %v1977_v34 = vsel %vm1976_vm0, %v1975_v3, %v13208_v15  ;;  %v2048_v22 = vsel %vm2047_vm6, %v2046_v11, %v8233_v31  ;;  %v13215_v31 = vld [vmem:[#allocation52_spill] sm:$0xff]  ;;  %v13221_v49 = vld [vmem:[#allocation58_spill] sm:$0xff] }
 0x1fe   : > { %vm1907_vm14 = vcmp.lt.s32.totalorder %v1906_v16, %v13209_v12  ;;  %v1876_v63 = vsel %vm1875_vm11, %v1873_v27, %v1874_v54  ;;  %vm1978_vm12 = vcmp.lt.s32.totalorder %v1977_v34, %v13210_v9  ;;  %vm2049_vm2 = vcmp.lt.s32.totalorder %v2048_v22, %v13211_v43  ;;  %v13220_v54 = vld [vmem:[#allocation57_spill] sm:$0xff] }
 0x1ff   : > { %v1908_v52 = vsel %vm1907_vm14, %v1906_v16, %v13209_v12  ;;  %v1877_v39 = vrot.slane %v1876_v63, 2  ;;  %v1979_v23 = vsel %vm1978_vm12, %v1977_v34, %v13210_v9  ;;  %v2050_v7 = vsel %vm2049_vm2, %v2048_v22, %v13211_v43  ;;  %v13222_v12 = vld [vmem:[#allocation59_spill] sm:$0xff]  ;;  %v13223_v34 = vld [vmem:[#allocation60_spill] sm:$0xff]  ;;  %v13224_v22 = vld [vmem:[#allocation61_spill] sm:$0xff] }
 0x200   : > { %vm1909_vm10 = vcmp.lt.s32.totalorder %v1908_v52, %v13212_v35  ;;  %vm1980_vm3 = vcmp.lt.s32.totalorder %v1979_v23, %v13213_v61  ;;  %vm2051_vm13 = vcmp.lt.s32.totalorder %v2050_v7, %v13214_v32  ;;  %v13225_v9 = vld [vmem:[#allocation10_spill] sm:$0xff] }
 0x201   : > { %v1910_v14 = vsel %vm1909_vm10, %v1908_v52, %v13212_v35  ;;  %vm1878_vm9 = vcmp.lt.s32.totalorder %v1876_v63, %v1877_v39  ;;  %v1981_v58 = vsel %vm1980_vm3, %v1979_v23, %v13213_v61  ;;  %v2052_v40 = vsel %vm2051_vm13, %v2050_v7, %v13214_v32  ;;  %v13227_v35 = vld [vmem:[#allocation63_spill] sm:$0xff]  ;;  %v13228_v23 = vld [vmem:[#allocation130_spill] sm:$0xff]  ;;  %v13229_v7 = vld [vmem:[#allocation64_spill] sm:$0xff] }
 0x202   : > { %vm1911_vm1 = vcmp.lt.s32.totalorder %v1910_v14, %v13215_v31  ;;  %v1879_v5 = vsel %vm1878_vm9, %v1876_v63, %v1877_v39  ;;  %vm1982_vm15 = vcmp.lt.s32.totalorder %v1981_v58, %v13216_v2  ;;  %vm2053_vm7 = vcmp.lt.s32.totalorder %v2052_v40, %v13217_v24  ;;  %v13226_v39 = vld [vmem:[#allocation62_spill] sm:$0xff] }
 0x203   : > { %v1912_v30 = vsel %vm1911_vm1, %v1910_v14, %v13215_v31  ;;  %v1880_v36 = vrot.slane %v1879_v5, 1  ;;  %v1983_v27 = vsel %vm1982_vm15, %v1981_v58, %v13216_v2  ;;  %v2054_v44 = vsel %vm2053_vm7, %v2052_v40, %v13217_v24  ;;  %v13230_v40 = vld [vmem:[#allocation65_spill] sm:$0xff]  ;;  %v13232_v2 = vld [vmem:[#allocation67_spill] sm:$0xff] }
 0x204   : > { %vm1913_vm8 = vcmp.lt.s32.totalorder %v1912_v30, %v13218_v56  ;;  %vm1984_vm5 = vcmp.lt.s32.totalorder %v1983_v27, %v13219_v17  ;;  %vm2055_vm4 = vcmp.lt.s32.totalorder %v2054_v44, %v13220_v54  ;;  %v12164_v32 = vmov 0.0  }
 0x205   : > { %v1914_v51 = vsel %vm1913_vm8, %v1912_v30, %v13218_v56  ;;  %vm1881_vm0 = vcmp.lt.s32.totalorder %v1879_v5, %v1880_v36  ;;  %v1985_v3 = vsel %vm1984_vm5, %v1983_v27, %v13219_v17  ;;  %v2056_v11 = vsel %vm2055_vm4, %v2054_v44, %v13220_v54  ;;  %v13234_v44 = vld [vmem:[#allocation68_spill] sm:$0xff]  ;;  %v13237_v54 = vld [vmem:[#allocation70_spill] sm:$0xff] }
 0x206   : > { %vm1915_vm6 = vcmp.lt.s32.totalorder %v1914_v51, %v13221_v49  ;;  %v8918_v16 = vsel %vm1881_vm0, %v1879_v5, %v1880_v36  ;;  %vm1986_vm11 = vcmp.lt.s32.totalorder %v1985_v3, %v13222_v12  ;;  %vm2057_vm14 = vcmp.lt.s32.totalorder %v2056_v11, %v13223_v34  ;;  %v13231_v5 = vld [vmem:[#allocation66_spill] sm:$0xff] }
 0x207   : > { %v1916_v15 = vsel %vm1915_vm6, %v1914_v51, %v13221_v49  ;;  %v1987_v63 = vsel %vm1986_vm11, %v1985_v3, %v13222_v12  ;;  %v2058_v52 = vsel %vm2057_vm14, %v2056_v11, %v13223_v34  ;;  %vm2096_vm2 = vcmp.eq.s32.totalorder %v13225_v9, %v8918_v16  ;;  %v13235_v51 = vld [vmem:[#allocation69_spill] sm:$0xff]  ;;  %v13238_v12 = vld [vmem:[#allocation71_spill] sm:$0xff] }
 0x208   : > { %vm1917_vm12 = vcmp.lt.s32.totalorder %v1916_v15, %v13224_v22  ;;  %vm1988_vm10 = vcmp.lt.s32.totalorder %v1987_v63, %v13226_v39  ;;  %vm2059_vm3 = vcmp.lt.s32.totalorder %v2058_v52, %v13227_v35  ;;  %vm2100_vm13 = vcmp.eq.s32.totalorder %v13228_v23, %v8918_v16 }
 0x209   : > { %v1918_v43 = vsel %vm1917_vm12, %v1916_v15, %v13224_v22  ;;  %v1989_v14 = vsel %vm1988_vm10, %v1987_v63, %v13226_v39  ;;  %v2060_v61 = vsel %vm2059_vm3, %v2058_v52, %v13227_v35  ;;  %v5303_v31 = vsel %vm2096_vm2, 1.0, %v12164_v32  ;;  %v13239_v39 = vld [vmem:[#allocation72_spill] sm:$0xff]  ;;  %v13240_v35 = vld [vmem:[#allocation73_spill] sm:$0xff] }
 0x20a   : > { %vm1919_vm9 = vcmp.lt.s32.totalorder %v1918_v43, %v13229_v7  ;;  %vm1990_vm1 = vcmp.lt.s32.totalorder %v1989_v14, %v13230_v40  ;;  %vm2061_vm15 = vcmp.lt.s32.totalorder %v2060_v61, %v13231_v5  ;;  %v5307_v30 = vsel %vm2100_vm13, 1.0, %v12164_v32 }
 0x20b   : > { %v1920_v58 = vsel %vm1919_vm9, %v1918_v43, %v13229_v7  ;;  %v1991_v24 = vsel %vm1990_vm1, %v1989_v14, %v13230_v40  ;;  %v2062_v36 = vsel %vm2061_vm15, %v2060_v61, %v13231_v5  ;;  %v8950_v56 = vsub.f32 %v5303_v31, %v5303_v31  ;;  %v13241_v5 = vld [vmem:[#allocation131_spill] sm:$0xff] }
 0x20c   : > { %vm1921_vm7 = vcmp.lt.s32.totalorder %v1920_v58, %v13232_v2  ;;  %vm1992_vm8 = vcmp.lt.s32.totalorder %v1991_v24, %v13234_v44  ;;  %vm2063_vm5 = vcmp.lt.s32.totalorder %v2062_v36, %v13235_v51  ;;  %v8955_v17 = vsub.f32 %v5307_v30, %v5307_v30 }
 0x20d   : > { %13233 = vst [vmem:[#allocation74_spill] sm:$0xff] %v8950_v56  ;;  %v1922_v27 = vsel %vm1921_vm7, %v1920_v58, %v13232_v2  ;;  %v1993_v49 = vsel %vm1992_vm8, %v1991_v24, %v13234_v44  ;;  %v2064_v3 = vsel %vm2063_vm5, %v2062_v36, %v13235_v51  ;;  %v12141_v11 = vand.u32 4294901760, %v8950_v56 }
 0x20e   : > { %13236 = vst [vmem:[#allocation75_spill] sm:$0xff] %v8955_v17  ;;  %vm1923_vm4 = vcmp.lt.s32.totalorder %v1922_v27, %v13237_v54  ;;  %vm1994_vm0 = vcmp.lt.s32.totalorder %v1993_v49, %v13238_v12  ;;  %vm2065_vm6 = vcmp.lt.s32.totalorder %v2064_v3, %v8526_v13  ;;  %v12140_v34 = vand.u32 4294901760, %v8955_v17 }
 0x20f   : > { %v1924_v15 = vsel %vm1923_vm4, %v1922_v27, %v13237_v54  ;;  %v1995_v22 = vsel %vm1994_vm0, %v1993_v49, %v13238_v12  ;;  %v2066_v63 = vsel %vm2065_vm6, %v2064_v3, %v8526_v13  ;;  %v8971_v52 = vsub.f32 %v8950_v56, %v12141_v11 }
 0x210   : > { %vm1925_vm11 = vcmp.lt.s32.totalorder %v1924_v15, %v8545_v29  ;;  %vm1996_vm14 = vcmp.lt.s32.totalorder %v1995_v22, %v13239_v39  ;;  %vm2067_vm12 = vcmp.lt.s32.totalorder %v2066_v63, %v13240_v35  ;;  %v8979_v7 = vsub.f32 %v8955_v17, %v12140_v34 }
 0x211   : > { %v1926_v43 = vsel %vm1925_vm11, %v1924_v15, %v8545_v29  ;;  %v1997_v13 = vsel %vm1996_vm14, %v1995_v22, %v13239_v39  ;;  %v2068_v14 = vsel %vm2067_vm12, %v2066_v63, %v13240_v35  ;;  %vm2104_vm15 = vcmp.eq.s32.totalorder %v13241_v5, %v8918_v16 }
 0x212   : > { %vm1927_vm10 = vcmp.lt.s32.totalorder %v1926_v43, %v8574_v37  ;;  %vm1998_vm3 = vcmp.lt.s32.totalorder %v1997_v13, %v8580_v28  ;;  %vm2069_vm9 = vcmp.lt.s32.totalorder %v2068_v14, %v8587_v21  ;;  %v13286_v34 = vmov 0 }
 0x213   : > { %v1928_v31 = vsel %vm1927_vm10, %v1926_v43, %v8574_v37  ;;  %v1999_v58 = vsel %vm1998_vm3, %v1997_v13, %v8580_v28  ;;  %v2070_v40 = vsel %vm2069_vm9, %v2068_v14, %v8587_v21  ;;  %v13242_v37 = vld [vmem:[#allocation132_spill] sm:$0xff]  ;;  %v5311_v21 = vsel %vm2104_vm15, 1.0, %v12164_v32  ;;  %v13249_v14 = vld [vmem:[#allocation135_spill] sm:$0xff] }
 0x214   : > { %vm1929_vm1 = vcmp.lt.s32.totalorder %v1928_v31, %v8599_v0  ;;  %vm2000_vm7 = vcmp.lt.s32.totalorder %v1999_v58, %v8606_v46  ;;  %vm2071_vm8 = vcmp.lt.s32.totalorder %v2070_v40, %v8612_v18  ;;  %vm2108_vm5 = vcmp.eq.s32.totalorder %v13242_v37, %v8918_v16 }
 0x215   : > { %v1930_v30 = vsel %vm1929_vm1, %v1928_v31, %v8599_v0  ;;  %v2001_v2 = vsel %vm2000_vm7, %v1999_v58, %v8606_v46  ;;  %v2072_v28 = vsel %vm2071_vm8, %v2070_v40, %v8612_v18  ;;  %v5315_v24 = vsel %vm2108_vm5, 1.0, %v12164_v32  ;;  %v13250_v31 = vld [vmem:[#allocation136_spill] sm:$0xff]  ;;  %v13252_v58 = vld [vmem:[#allocation137_spill] sm:$0xff] }
 0x216   : > { %vm1931_vm4 = vcmp.lt.s32.totalorder %v1930_v30, %v8625_v10  ;;  %vm2002_vm0 = vcmp.lt.s32.totalorder %v2001_v2, %v8631_v57  ;;  %vm2073_vm6 = vcmp.lt.s32.totalorder %v2072_v28, %v8637_v42  ;;  %v9016_v36 = vsub.f32 %v5311_v21, %v5311_v21 }
 0x217   : > { %v1932_v0 = vsel %vm1931_vm4, %v1930_v30, %v8625_v10  ;;  %v2003_v46 = vsel %vm2002_vm0, %v2001_v2, %v8631_v57  ;;  %v2074_v18 = vsel %vm2073_vm6, %v2072_v28, %v8637_v42  ;;  %v9021_v10 = vsub.f32 %v5315_v24, %v5315_v24 }
 0x218   : > { %vm1933_vm11 = vcmp.lt.s32.totalorder %v1932_v0, %v8650_v26  ;;  %13243 = vst [vmem:[#allocation76_spill] sm:$0xff] %v9016_v36  ;;  %vm2004_vm14 = vcmp.lt.s32.totalorder %v2003_v46, %v8656_v38  ;;  %vm2075_vm12 = vcmp.lt.s32.totalorder %v2074_v18, %v8663_v20  ;;  %v13309_v61 = vmov 0 }
 0x219   : > { %v1934_v27 = vsel %vm1933_vm11, %v1932_v0, %v8650_v26  ;;  %13244 = vst [vmem:[#allocation77_spill] sm:$0xff] %v9021_v10  ;;  %v2005_v44 = vsel %vm2004_vm14, %v2003_v46, %v8656_v38  ;;  %v2076_v51 = vsel %vm2075_vm12, %v2074_v18, %v8663_v20  ;;  %v13245_v38 = vld [vmem:[#allocation133_spill] sm:$0xff]  ;;  %v13379_v17 = vmov 0 }
 0x21a   : > { %vm1935_vm10 = vcmp.lt.s32.totalorder %v1934_v27, %v8675_v55  ;;  %vm2006_vm3 = vcmp.lt.s32.totalorder %v2005_v44, %v8682_v53  ;;  %vm2077_vm9 = vcmp.lt.s32.totalorder %v2076_v51, %v8688_v41  ;;  %vm2112_vm7 = vcmp.eq.s32.totalorder %v13245_v38, %v8918_v16 }
 0x21b   : > { %v1936_v42 = vsel %vm1935_vm10, %v1934_v27, %v8675_v55  ;;  %v2007_v54 = vsel %vm2006_vm3, %v2005_v44, %v8682_v53  ;;  %v2078_v49 = vsel %vm2077_vm9, %v2076_v51, %v8688_v41  ;;  %v13246_v55 = vld [vmem:[#allocation134_spill] sm:$0xff]  ;;  %v5319_v41 = vsel %vm2112_vm7, 1.0, %v12164_v32 }
 0x21c   : > { %vm1937_vm1 = vcmp.lt.s32.totalorder %v1936_v42, %v8701_v25  ;;  %vm2008_vm8 = vcmp.lt.s32.totalorder %v2007_v54, %v8707_v50  ;;  %vm2079_vm4 = vcmp.lt.s32.totalorder %v2078_v49, %v8713_v60  ;;  %vm2116_vm0 = vcmp.eq.s32.totalorder %v13246_v55, %v8918_v16  ;;  %v13254_v27 = vld [vmem:[#allocation138_spill] sm:$0xff] }
 0x21d   : > { %v1938_v20 = vsel %vm1937_vm1, %v1936_v42, %v8701_v25  ;;  %v2009_v3 = vsel %vm2008_vm8, %v2007_v54, %v8707_v50  ;;  %v2080_v53 = vsel %vm2079_vm4, %v2078_v49, %v8713_v60  ;;  %v5323_v15 = vsel %vm2116_vm0, 1.0, %v12164_v32  ;;  %v13255_v42 = vld [vmem:[#allocation139_spill] sm:$0xff] }
 0x21e   : > { %vm1939_vm6 = vcmp.lt.s32.totalorder %v1938_v20, %v8726_v6  ;;  %vm2010_vm11 = vcmp.lt.s32.totalorder %v2009_v3, %v8732_v1  ;;  %vm2081_vm14 = vcmp.lt.s32.totalorder %v2080_v53, %v8739_v45  ;;  %v9058_v12 = vsub.f32 %v5319_v41, %v5319_v41 }
 0x21f   : > { %v1940_v25 = vsel %vm1939_vm6, %v1938_v20, %v8726_v6  ;;  %v2011_v50 = vsel %vm2010_vm11, %v2009_v3, %v8732_v1  ;;  %v2082_v60 = vsel %vm2081_vm14, %v2080_v53, %v8739_v45  ;;  %v9063_v6 = vsub.f32 %v5323_v15, %v5323_v15 }
 0x220   : > { %vm1941_vm12 = vcmp.lt.s32.totalorder %v1940_v25, %v8751_v59  ;;  %13247 = vst [vmem:[#allocation78_spill] sm:$0xff] %v9058_v12  ;;  %vm2012_vm10 = vcmp.lt.s32.totalorder %v2011_v50, %v8758_v19  ;;  %vm2083_vm3 = vcmp.lt.s32.totalorder %v2082_v60, %v8764_v62  ;;  %vm12145_vm4 = vcmp.eq.s32.totalorder %v13249_v14, %v8918_v16 }
 0x221   : > { %v1942_v22 = vsel %vm1941_vm12, %v1940_v25, %v8751_v59  ;;  %13248 = vst [vmem:[#allocation79_spill] sm:$0xff] %v9063_v6  ;;  %v2013_v63 = vsel %vm2012_vm10, %v2011_v50, %v8758_v19  ;;  %v2084_v43 = vsel %vm2083_vm3, %v2082_v60, %v8764_v62  ;;  %vm12144_vm6 = vcmp.eq.s32.totalorder %v13250_v31, %v8918_v16  ;;  %v13258_v60 = vld [vmem:[#allocation140_spill] sm:$0xff] }
 0x222   : > { %vm1943_vm9 = vcmp.lt.s32.totalorder %v1942_v22, %v8777_v47  ;;  %vm2014_vm1 = vcmp.lt.s32.totalorder %v2013_v63, %v8783_v8  ;;  %vm2085_vm8 = vcmp.lt.s32.totalorder %v2084_v43, %v8886_v48  ;;  %vm12139_vm14 = vcmp.eq.s32.totalorder %v13252_v58, %v8918_v16 }
 0x223   : > { %v1944_v45 = vsel %vm1943_vm9, %v1942_v22, %v8777_v47  ;;  %v2015_v35 = vsel %vm2014_vm1, %v2013_v63, %v8783_v8  ;;  %v2086_v13 = vsel %vm2085_vm8, %v2084_v43, %v8886_v48  ;;  %v5327_v47 = vsel %vm12145_vm4, 1.0, %v12164_v32 }
 0x224   : > { %v1945_v39 = vrot.slane %v1944_v45, 4  ;;  %v2016_v19 = vrot.slane %v2015_v35, 4  ;;  %v2087_v62 = vrot.slane %v2086_v13, 4  ;;  %v5331_v8 = vsel %vm12144_vm6, 1.0, %v12164_v32 }
 0x225   : > { %v9087_v48 = vsub.f32 %v5327_v47, %v5327_v47  ;;  %v9091_v30 = vsub.f32 %v5331_v8, %v5331_v8  ;;  %vm12138_vm3 = vcmp.eq.s32.totalorder %v13254_v27, %v8918_v16  ;;  %v5335_v44 = vsel %vm12139_vm14, 1.0, %v12164_v32 }
 0x226   : > { %vm1946_vm11 = vcmp.lt.s32.totalorder %v1944_v45, %v1945_v39  ;;  %vm2017_vm12 = vcmp.lt.s32.totalorder %v2015_v35, %v2016_v19  ;;  %vm2088_vm10 = vcmp.lt.s32.totalorder %v2086_v13, %v2087_v62  ;;  %v5339_v51 = vsel %vm12138_vm3, 1.0, %v12164_v32 }
 0x227   : > { %13251 = vst [vmem:[#allocation80_spill] sm:$0xff] %v9087_v48  ;;  %v1947_v40 = vsel %vm1946_vm11, %v1944_v45, %v1945_v39  ;;  %13253 = vst [vmem:[#allocation81_spill] sm:$0xff] %v9091_v30  ;;  %v2018_v28 = vsel %vm2017_vm12, %v2015_v35, %v2016_v19  ;;  %v2089_v21 = vsel %vm2088_vm10, %v2086_v13, %v2087_v62  ;;  %v13260_v19 = vmov 0 }
 0x228   : > { %v1948_v2 = vrot.slane %v1947_v40, 2  ;;  %v2019_v24 = vrot.slane %v2018_v28, 2  ;;  %v2090_v46 = vrot.slane %v2089_v21, 2  ;;  %vm12136_vm1 = vcmp.eq.s32.totalorder %v13255_v42, %v8918_v16 }
 0x229   : > { %v9107_v49 = vsub.f32 %v5335_v44, %v5335_v44  ;;  %v9109_v41 = vsub.f32 %v5339_v51, %v5339_v51  ;;  %vm12137_vm12 = vcmp.eq.s32.totalorder %v13258_v60, %v8918_v16  ;;  %v5343_v63 = vsel %vm12136_vm1, 1.0, %v12164_v32 }
 0x22a   : > { %vm1949_vm9 = vcmp.lt.s32.totalorder %v1947_v40, %v1948_v2  ;;  %vm2020_vm8 = vcmp.lt.s32.totalorder %v2018_v28, %v2019_v24  ;;  %vm2091_vm11 = vcmp.lt.s32.totalorder %v2089_v21, %v2090_v46  ;;  %v9123_v43 = vsel %vm12137_vm12, 1.0, %v12164_v32 }
 0x22b   : > { %v1950_v54 = vsel %vm1949_vm9, %v1947_v40, %v1948_v2  ;;  %13256 = vst [vmem:[#allocation82_spill] sm:$0xff] %v9107_v49  ;;  %v2021_v3 = vsel %vm2020_vm8, %v2018_v28, %v2019_v24  ;;  %v2092_v53 = vsel %vm2091_vm11, %v2089_v21, %v2090_v46  ;;  %13257 = vst [vmem:[#allocation83_spill] sm:$0xff] %v9109_v41  ;;  %v13263_v8 = vmov 0 }
 0x22c   : > { %v1951_v20 = vrot.slane %v1950_v54, 1  ;;  %v2022_v25 = vrot.slane %v2021_v3, 1  ;;  %v2093_v15 = vrot.slane %v2092_v53, 1  ;;  %v9127_v39 = vsub.f32 %v5343_v63, %v5343_v63 }
 0x22d   : > { %v12152_v40 = vmov 1.0|1.0   ;;  %v13268_v46 = vmov 0  ;;  %v13291_v50 = vmov 0  ;;  %v13296_v1 = vmov 0 }
 0x22e   : > { %vm1952_vm10 = vcmp.lt.s32.totalorder %v1950_v54, %v1951_v20  ;;  %vm2023_vm9 = vcmp.lt.s32.totalorder %v2021_v3, %v2022_v25  ;;  %vm2094_vm8 = vcmp.lt.s32.totalorder %v2092_v53, %v2093_v15  ;;  %13259 = vst [vmem:[#allocation84_spill] sm:$0xff] %v9127_v39 }
 0x22f   : > { %v9125_v45 = vsel %vm1952_vm10, %v1950_v54, %v1951_v20  ;;  %v9129_v35 = vsel %vm2023_vm9, %v2021_v3, %v2022_v25  ;;  %v9131_v13 = vsel %vm2094_vm8, %v2092_v53, %v2093_v15  ;;  %vm9143_vm10 = vmpackc.low %vm2100_vm13, %vm2096_vm2  ;;  %v13273_v53 = vmov 0 }
 0x230   : > { %vm2097_vm11 = vcmp.eq.s32.totalorder %v13225_v9, %v9125_v45  ;;  %vm2101_vm1 = vcmp.eq.s32.totalorder %v13228_v23, %v9125_v45  ;;  %v13261_v19 = vsel %vm9143_vm10, 4294967295, %v13260_v19  ;;  %vm2099_vm8 = vcmp.eq.s32.totalorder %v13225_v9, %v9131_v13 }
 0x231   : > { %13262 = vst [vmem:[#allocation85_spill] sm:$0xff] %v13261_v19  ;;  %v5304_v62 = vsel %vm2097_vm11, 1.0, %v12164_v32  ;;  %v5308_v47 = vsel %vm2101_vm1, 1.0, %v12164_v32  ;;  %vm9149_vm9 = vmpackc.low %vm2101_vm1, %vm2097_vm11  ;;  %vm2103_vm12 = vcmp.eq.s32.totalorder %v13228_v23, %v9131_v13  ;;  %v5306_v21 = vsel %vm2099_vm8, 1.0, %v12164_v32 }
 0x232   : > { %v13264_v8 = vsel %vm9149_vm9, 4294967295, %v13263_v8  ;;  %5823 = vmatprep.subr.msk.bf16.mxu0 %vm9149_vm9, %v12152_v40  ;;  %v9160_v2 = vsub.f32 %v5304_v62, %v5304_v62  ;;  %v9162_v28 = vsub.f32 %v5308_v47, %v5308_v47  ;;  %v5310_v24 = vsel %vm2103_vm12, 1.0, %v12164_v32  ;;  %vm9166_vm2 = vmpackc.low %vm2103_vm12, %vm2099_vm8 }
 0x233   : > { %13265 = vst [vmem:[#allocation86_spill] sm:$0xff] %v13264_v8  ;;  %v13269_v46 = vsel %vm9166_vm2, 4294967295, %v13268_v46  ;;  %6207 = vmatprep.subr.msk.bf16.mxu1 %vm9166_vm2, %v12152_v40  ;;  %v9173_v44 = vsub.f32 %v5306_v21, %v5306_v21  ;;  %v9175_v51 = vsub.f32 %v5310_v24, %v5310_v24  ;;  %5825 = vmatpush1.bf16.msk.msra.mxu0 %vm9143_vm10, %v12152_v40  ;;  %v13278_v62 = vmov 0 }
 0x234   : > { %13266 = vst [vmem:[#allocation87_spill] sm:$0xff] %v9160_v2  ;;  %13267 = vst [vmem:[#allocation88_spill] sm:$0xff] %v9162_v28  ;;  %vm2098_vm13 = vcmp.eq.s32.totalorder %v13225_v9, %v9129_v35  ;;  %vm2102_vm1 = vcmp.eq.s32.totalorder %v13228_v23, %v9129_v35  ;;  %vm2105_vm12 = vcmp.eq.s32.totalorder %v13241_v5, %v9125_v45 }
 0x235   : > { %13270 = vst [vmem:[#allocation89_spill] sm:$0xff] %v13269_v46  ;;  %13271 = vst [vmem:[#allocation90_spill] sm:$0xff] %v9173_v44  ;;  %v5305_v20 = vsel %vm2098_vm13, 1.0, %v12164_v32  ;;  %vm2109_vm11 = vcmp.eq.s32.totalorder %v13242_v37, %v9125_v45  ;;  %v5309_v3 = vsel %vm2102_vm1, 1.0, %v12164_v32  ;;  %v5312_v15 = vsel %vm2105_vm12, 1.0, %v12164_v32 }
 0x236   : > { %13272 = vst [vmem:[#allocation91_spill] sm:$0xff] %v9175_v51  ;;  %vm9191_vm8 = vmpackc.low %vm2102_vm1, %vm2098_vm13  ;;  %v9195_v25 = vsub.f32 %v5305_v20, %v5305_v20  ;;  %v5316_v23 = vsel %vm2109_vm11, 1.0, %v12164_v32  ;;  %v9202_v63 = vsub.f32 %v5309_v3, %v5309_v3  ;;  %v9208_v47 = vsub.f32 %v5312_v15, %v5312_v15 }
 0x237   : > { %v13274_v53 = vsel %vm9191_vm8, 4294967295, %v13273_v53  ;;  %6209 = vmatpush1.bf16.msk.msra.mxu1 %vm9191_vm8, %v12152_v40  ;;  %vm9204_vm3 = vmpackc.low %vm2109_vm11, %vm2105_vm12  ;;  %v9210_v21 = vsub.f32 %v5316_v23, %v5316_v23  ;;  %vm2107_vm13 = vcmp.eq.s32.totalorder %v13241_v5, %v9131_v13  ;;  %vm2111_vm1 = vcmp.eq.s32.totalorder %v13242_v37, %v9131_v13 }
 0x238   : > { %13275 = vst [vmem:[#allocation92_spill] sm:$0xff] %v13274_v53  ;;  %13276 = vst [vmem:[#allocation93_spill] sm:$0xff] %v9195_v25  ;;  %v13279_v62 = vsel %vm9204_vm3, 4294967295, %v13278_v62  ;;  %v12142_v24 = vand.u32 4294901760, %v9195_v25  ;;  %5827 = vmatprep.subr.msk.bf16.mxu0 %vm9204_vm3, %v12152_v40  ;;  %v5314_v20 = vsel %vm2107_vm13, 1.0, %v12164_v32  ;;  %v13283_v3 = vmov 0 }
 0x239   : > { %13277 = vst [vmem:[#allocation94_spill] sm:$0xff] %v9202_v63  ;;  %13280 = vst [vmem:[#allocation95_spill] sm:$0xff] %v13279_v62  ;;  %vm2106_vm11 = vcmp.eq.s32.totalorder %v13241_v5, %v9129_v35  ;;  %v12143_v15 = vand.u32 4294901760, %v9202_v63  ;;  %v5318_v23 = vsel %vm2111_vm1, 1.0, %v12164_v32  ;;  %v9239_v11 = vsub.f32 %v5314_v20, %v5314_v20 }
 0x23a   : > { %13281 = vst [vmem:[#allocation96_spill] sm:$0xff] %v9208_v47  ;;  %13282 = vst [vmem:[#allocation97_spill] sm:$0xff] %v9210_v21  ;;  %v9249_v5 = vsub.f32 %v9195_v25, %v12142_v24  ;;  %v9254_v54 = vsub.f32 %v5318_v23, %v5318_v23  ;;  %v5313_v20 = vsel %vm2106_vm11, 1.0, %v12164_v32  ;;  %vm2119_vm6 = vcmp.eq.s32.totalorder %v13246_v55, %v9131_v13 }
 0x23b   : > { %vm9227_vm12 = vmpackc.low %vm2108_vm5, %vm2104_vm15  ;;  %13289 = vst [vmem:[#allocation100_spill] sm:$0xff] %v9239_v11  ;;  %vm2110_vm15 = vcmp.eq.s32.totalorder %v13242_v37, %v9129_v35  ;;  %v9265_v37 = vsub.f32 %v9202_v63, %v12143_v15  ;;  %v9270_v24 = vsub.f32 %v5313_v20, %v5313_v20  ;;  %vm2114_vm4 = vcmp.eq.s32.totalorder %v13245_v38, %v9129_v35 }
 0x23c   : > { %v13284_v3 = vsel %vm9227_vm12, 4294967295, %v13283_v3  ;;  %vm9235_vm14 = vmpackc.low %vm2111_vm1, %vm2107_vm13  ;;  %5829 = vmatpush1.bf16.msk.msra.mxu0 %vm9227_vm12, %v12152_v40  ;;  %13290 = vst [vmem:[#allocation101_spill] sm:$0xff] %v9254_v54  ;;  %v5317_v22 = vsel %vm2110_vm15, 1.0, %v12164_v32  ;;  %vm2113_vm13 = vcmp.eq.s32.totalorder %v13245_v38, %v9125_v45  ;;  %vm2117_vm1 = vcmp.eq.s32.totalorder %v13246_v55, %v9125_v45 }
 0x23d   : > { %13285 = vst [vmem:[#allocation98_spill] sm:$0xff] %v13284_v3  ;;  %v13287_v34 = vsel %vm9235_vm14, 4294967295, %v13286_v34  ;;  %6211 = vmatprep.subr.msk.bf16.mxu1 %vm9235_vm14, %v12152_v40  ;;  %vm9258_vm5 = vmpackc.low %vm2110_vm15, %vm2106_vm11  ;;  %v9272_v23 = vsub.f32 %v5317_v22, %v5317_v22  ;;  %v5320_v0 = vsel %vm2113_vm13, 1.0, %v12164_v32  ;;  %vm2115_vm11 = vcmp.eq.s32.totalorder %v13245_v38, %v9131_v13 }
 0x23e   : > { %13288 = vst [vmem:[#allocation99_spill] sm:$0xff] %v13287_v34  ;;  %v13292_v50 = vsel %vm9258_vm5, 4294967295, %v13291_v50  ;;  %6213 = vmatpush1.bf16.msk.msra.mxu1 %vm9258_vm5, %v12152_v40  ;;  %13294 = vst [vmem:[#allocation103_spill] sm:$0xff] %v9270_v24  ;;  %v5324_v59 = vsel %vm2117_vm1, 1.0, %v12164_v32  ;;  %v9293_v26 = vsub.f32 %v5320_v0, %v5320_v0  ;;  %v5322_v20 = vsel %vm2115_vm11, 1.0, %v12164_v32 }
 0x23f   : > { %13293 = vst [vmem:[#allocation102_spill] sm:$0xff] %v13292_v50  ;;  %13295 = vst [vmem:[#allocation104_spill] sm:$0xff] %v9272_v23  ;;  %v9295_v57 = vsub.f32 %v5324_v59, %v5324_v59  ;;  %v13301_v22 = vmov 0  ;;  %v5326_v0 = vsel %vm2119_vm6, 1.0, %v12164_v32  ;;  %v13304_v59 = vmov 0 }
 0x240   : > { %vm9286_vm15 = vmpackc.low %vm2117_vm1, %vm2113_vm13  ;;  %13299 = vst [vmem:[#allocation106_spill] sm:$0xff] %v9293_v26  ;;  %v9315_v15 = vsub.f32 %v5322_v20, %v5322_v20  ;;  %v9327_v18 = vsub.f32 %v5326_v0, %v5326_v0  ;;  %v5321_v29 = vsel %vm2114_vm4, 1.0, %v12164_v32  ;;  %v13325_v50 = vmov 0.0  }
 0x241   : > { %v13297_v1 = vsel %vm9286_vm15, 4294967295, %v13296_v1  ;;  %5831 = vmatprep.subr.msk.bf16.mxu0 %vm9286_vm15, %v12152_v40  ;;  %13300 = vst [vmem:[#allocation107_spill] sm:$0xff] %v9295_v57  ;;  %vm9306_vm13 = vmpackc.low %vm2116_vm0, %vm2112_vm7  ;;  %vm2118_vm7 = vcmp.eq.s32.totalorder %v13246_v55, %v9129_v35  ;;  %v9340_v38 = vsub.f32 %v5321_v29, %v5321_v29  ;;  %vm2127_vm15 = vcmp.eq.s32.totalorder %v13250_v31, %v9131_v13 }
 0x242   : > { %13298 = vst [vmem:[#allocation105_spill] sm:$0xff] %v13297_v1  ;;  %v13302_v22 = vsel %vm9306_vm13, 4294967295, %v13301_v22  ;;  %vm9311_vm1 = vmpackc.low %vm2119_vm6, %vm2115_vm11  ;;  %5833 = vmatpush1.bf16.msk.msra.mxu0 %vm9306_vm13, %v12152_v40  ;;  %v5325_v20 = vsel %vm2118_vm7, 1.0, %v12164_v32  ;;  %vm2121_vm6 = vcmp.eq.s32.totalorder %v13249_v14, %v9125_v45  ;;  %vm2125_vm11 = vcmp.eq.s32.totalorder %v13250_v31, %v9125_v45 }
 0x243   : > { %13303 = vst [vmem:[#allocation108_spill] sm:$0xff] %v13302_v22  ;;  %v13305_v59 = vsel %vm9311_vm1, 4294967295, %v13304_v59  ;;  %13307 = vst [vmem:[#allocation110_spill] sm:$0xff] %v9315_v15  ;;  %6215 = vmatprep.subr.msk.bf16.mxu1 %vm9311_vm1, %v12152_v40  ;;  %v9342_v55 = vsub.f32 %v5325_v20, %v5325_v20  ;;  %v5328_v0 = vsel %vm2121_vm6, 1.0, %v12164_v32  ;;  %v13316_v22 = vmov 0 }
 0x244   : > { %13306 = vst [vmem:[#allocation109_spill] sm:$0xff] %v13305_v59  ;;  %13308 = vst [vmem:[#allocation111_spill] sm:$0xff] %v9327_v18  ;;  %v5332_v29 = vsel %vm2125_vm11, 1.0, %v12164_v32  ;;  %v13319_v20 = vmov 0  ;;  %vm2123_vm1 = vcmp.eq.s32.totalorder %v13249_v14, %v9131_v13  ;;  %v13323_v1 = vmov 1.0|1.0  }
 0x245   : > { %vm9331_vm0 = vmpackc.low %vm2118_vm7, %vm2114_vm4  ;;  %13312 = vst [vmem:[#allocation113_spill] sm:$0xff] %v9340_v38  ;;  %vm13314_vm4 = vcmp.eq.s32.totalorder %v13249_v14, %v8918_v16  ;;  %vm13315_vm7 = vcmp.eq.s32.totalorder %v13250_v31, %v8918_v16  ;;  %v9373_v32 = vsub.f32 %v5332_v29, %v5332_v29  ;;  %v5330_v3 = vsel %vm2123_vm1, 1.0, %v13325_v50 }
 0x246   : > { %v13310_v61 = vsel %vm9331_vm0, 4294967295, %v13309_v61  ;;  %6217 = vmatpush1.bf16.msk.msra.mxu1 %vm9331_vm0, %v12152_v40  ;;  %13313 = vst [vmem:[#allocation114_spill] sm:$0xff] %v9342_v55  ;;  %vm9353_vm13 = vmpackc.low %vm13315_vm7, %vm13314_vm4  ;;  %v9362_v40 = vsub.f32 %v5328_v0, %v5328_v0  ;;  %v13326_v0 = vmov 0  ;;  %v5334_v34 = vsel %vm2127_vm15, 1.0, %v13325_v50 }
 0x247   : > { %13311 = vst [vmem:[#allocation112_spill] sm:$0xff] %v13310_v61  ;;  %v13317_v22 = vsel %vm9353_vm13, 4294967295, %v13316_v22  ;;  %vm9358_vm0 = vmpackc.low %vm2125_vm11, %vm2121_vm6  ;;  %v9384_v61 = vsub.f32 %v5330_v3, %v5330_v3  ;;  %vm2122_vm11 = vcmp.eq.s32.totalorder %v13249_v14, %v9129_v35  ;;  %v9393_v29 = vsub.f32 %v5334_v34, %v5334_v34 }
 0x248   : > { %13318 = vst [vmem:[#allocation115_spill] sm:$0xff] %v13317_v22  ;;  %v13320_v20 = vsel %vm9358_vm0, 4294967295, %v13319_v20  ;;  %13322 = vst [vmem:[#allocation117_spill] sm:$0xff] %v9362_v40  ;;  %5835 = vmatprep.subr.msk.bf16.mxu0 %vm9358_vm0, %v13323_v1  ;;  %v5329_v59 = vsel %vm2122_vm11, 1.0, %v13325_v50  ;;  %vm2129_vm4 = vcmp.eq.s32.totalorder %v13252_v58, %v9125_v45  ;;  %vm2133_vm7 = vcmp.eq.s32.totalorder %v13254_v27, %v9125_v45 }
 0x249   : > { %13321 = vst [vmem:[#allocation116_spill] sm:$0xff] %v13320_v20  ;;  %13324 = vst [vmem:[#allocation118_spill] sm:$0xff] %v9373_v32  ;;  %5837 = vmatpush1.bf16.msk.msra.mxu0 %vm9353_vm13, %v13323_v1  ;;  %v9406_v14 = vsub.f32 %v5329_v59, %v5329_v59  ;;  %v5336_v34 = vsel %vm2129_vm4, 1.0, %v13325_v50  ;;  %v13338_v3 = vmov 0  ;;  %v5340_v59 = vsel %vm2133_vm7, 1.0, %v13325_v50 }
 0x24a   : > { %vm9376_vm6 = vmpackc.low %vm2127_vm15, %vm2123_vm1  ;;  %13329 = vst [vmem:[#allocation120_spill] sm:$0xff] %v9384_v61  ;;  %vm2126_vm1 = vcmp.eq.s32.totalorder %v13250_v31, %v9129_v35  ;;  %vm2135_vm0 = vcmp.eq.s32.totalorder %v13254_v27, %v9131_v13  ;;  %v9439_v53 = vsub.f32 %v5340_v59, %v5340_v59 }
 0x24b   : > { %v13327_v0 = vsel %vm9376_vm6, 4294967295, %v13326_v0  ;;  %6219 = vmatprep.subr.msk.bf16.mxu1 %vm9376_vm6, %v13323_v1  ;;  %13330 = vst [vmem:[#allocation121_spill] sm:$0xff] %v9393_v29  ;;  %v5333_v20 = vsel %vm2126_vm1, 1.0, %v13325_v50  ;;  %vm9397_vm15 = vmpackc.low %vm2126_vm1, %vm2122_vm11  ;;  %vm13336_vm11 = vcmp.eq.s32.totalorder %v13252_v58, %v8918_v16  ;;  %vm13337_vm1 = vcmp.eq.s32.totalorder %v13254_v27, %v8918_v16 }
 0x24c   : > { %13328 = vst [vmem:[#allocation119_spill] sm:$0xff] %v13327_v0  ;;  %v13331_v0 = vmov 0  ;;  %6221 = vmatpush1.bf16.msk.msra.mxu1 %vm9397_vm15, %v13323_v1  ;;  %13334 = vst [vmem:[#allocation123_spill] sm:$0xff] %v9406_v14  ;;  %v9408_v31 = vsub.f32 %v5333_v20, %v5333_v20  ;;  %v13341_v20 = vmov 0  ;;  %vm2131_vm6 = vcmp.eq.s32.totalorder %v13252_v58, %v9131_v13 }
 0x24d   : > { %v13332_v0 = vsel %vm9397_vm15, 4294967295, %v13331_v0  ;;  %vm9419_vm13 = vmpackc.low %vm13337_vm1, %vm13336_vm11  ;;  %13345 = vst [vmem:[#allocation128_spill] sm:$0xff] %v9439_v53  ;;  %v5338_v19 = vsel %vm2131_vm6, 1.0, %v13325_v50  ;;  %v5342_v46 = vsel %vm2135_vm0, 1.0, %v13325_v50  ;;  %vm2137_vm11 = vcmp.eq.s32.totalorder %v13255_v42, %v9125_v45 }
 0x24e   : > { %13333 = vst [vmem:[#allocation122_spill] sm:$0xff] %v13332_v0  ;;  %13335 = vst [vmem:[#allocation124_spill] sm:$0xff] %v9408_v31  ;;  %v13339_v3 = vsel %vm9419_vm13, 4294967295, %v13338_v3  ;;  %v9428_v0 = vsub.f32 %v5336_v34, %v5336_v34  ;;  %v13346_v34 = vmov 0  ;;  %v9450_v22 = vsub.f32 %v5338_v19, %v5338_v19 }
 0x24f   : > { %13340 = vst [vmem:[#allocation125_spill] sm:$0xff] %v13339_v3  ;;  %vm9424_vm15 = vmpackc.low %vm2133_vm7, %vm2129_vm4  ;;  %vm2130_vm7 = vcmp.eq.s32.totalorder %v13252_v58, %v9129_v35  ;;  %v9459_v59 = vsub.f32 %v5342_v46, %v5342_v46  ;;  %vm2141_vm1 = vcmp.eq.s32.totalorder %v13258_v60, %v9125_v45  ;;  %v5344_v19 = vsel %vm2137_vm11, 1.0, %v13325_v50 }
 0x250   : > { %v13342_v20 = vsel %vm9424_vm15, 4294967295, %v13341_v20  ;;  %13344 = vst [vmem:[#allocation127_spill] sm:$0xff] %v9428_v0  ;;  %5839 = vmatprep.subr.msk.bf16.mxu0 %vm9424_vm15, %v13323_v1  ;;  %vm9442_vm4 = vmpackc.low %vm2135_vm0, %vm2131_vm6  ;;  %vm2134_vm6 = vcmp.eq.s32.totalorder %v13254_v27, %v9129_v35  ;;  %v5337_v62 = vsel %vm2130_vm7, 1.0, %v13325_v50  ;;  %v13358_v46 = vmov 0 }
 0x251   : > { %13343 = vst [vmem:[#allocation126_spill] sm:$0xff] %v13342_v20  ;;  %v13347_v34 = vsel %vm9442_vm4, 4294967295, %v13346_v34  ;;  %6223 = vmatprep.subr.msk.bf16.mxu1 %vm9442_vm4, %v13323_v1  ;;  %13349 = vst [vmem:[#allocation18_spill] sm:$0xff] %v9450_v22  ;;  %5841 = vmatpush1.bf16.msk.msra.mxu0 %vm9419_vm13, %v13323_v1  ;;  %v5341_v20 = vsel %vm2134_vm6, 1.0, %v13325_v50  ;;  %v9472_v58 = vsub.f32 %v5337_v62, %v5337_v62  ;;  %v5348_v62 = vsel %vm2141_vm1, 1.0, %v13325_v50 }
 0x252   : > { %13348 = vst [vmem:[#allocation164_spill] sm:$0xff] %v13347_v34  ;;  %13350 = vst [vmem:[#allocation15_spill] sm:$0xff] %v9459_v59  ;;  %v13351_v34 = vmov 0  ;;  %v9474_v27 = vsub.f32 %v5341_v20, %v5341_v20  ;;  %v13361_v20 = vmov 0  ;;  %vm2139_vm4 = vcmp.eq.s32.totalorder %v13255_v42, %v9131_v13 }
 0x253   : > { %vm9463_vm0 = vmpackc.low %vm2134_vm6, %vm2130_vm7  ;;  %13354 = vst [vmem:[#allocation16_spill] sm:$0xff] %v9472_v58  ;;  %vm13356_vm7 = vcmp.eq.s32.totalorder %v13255_v42, %v8918_v16  ;;  %vm13357_vm6 = vcmp.eq.s32.totalorder %v13258_v60, %v8918_v16  ;;  %vm2143_vm15 = vcmp.eq.s32.totalorder %v13258_v60, %v9131_v13  ;;  %v9505_v4 = vsub.f32 %v5348_v62, %v5348_v62 }
 0x254   : > { %v13352_v34 = vsel %vm9463_vm0, 4294967295, %v13351_v34  ;;  %6225 = vmatpush1.bf16.msk.msra.mxu1 %vm9463_vm0, %v13323_v1  ;;  %13355 = vst [vmem:[#allocation20_spill] sm:$0xff] %v9474_v27  ;;  %vm9485_vm13 = vmpackc.low %vm13357_vm6, %vm13356_vm7  ;;  %v5346_v9 = vsel %vm2139_vm4, 1.0, %v13325_v50  ;;  %v5350_v63 = vsel %vm2143_vm15, 1.0, %v13325_v50  ;;  %v9523_v62 = vsub.f32 %v9123_v43, %v9123_v43 }
 0x255   : > { %13353 = vst [vmem:[#allocation19_spill] sm:$0xff] %v13352_v34  ;;  %v13359_v46 = vsel %vm9485_vm13, 4294967295, %v13358_v46  ;;  %vm9490_vm0 = vmpackc.low %vm2141_vm1, %vm2137_vm11  ;;  %v9494_v34 = vsub.f32 %v5344_v19, %v5344_v19  ;;  %v13366_v19 = vmov 0  ;;  %v9516_v3 = vsub.f32 %v5346_v9, %v5346_v9  ;;  %v13372_v9 = vld [vmem:[#allocation141_spill] sm:$0xff] }
 0x256   : > { %13360 = vst [vmem:[#allocation17_spill] sm:$0xff] %v13359_v46  ;;  %v13362_v20 = vsel %vm9490_vm0, 4294967295, %v13361_v20  ;;  %5843 = vmatprep.subr.msk.bf16.mxu0 %vm9490_vm0, %v13323_v1  ;;  %13365 = vst [vmem:[#allocation23_spill] sm:$0xff] %v9505_v4  ;;  %v9527_v8 = vsub.f32 %v5350_v63, %v5350_v63  ;;  %vm2145_vm1 = vcmp.eq.s32.totalorder %v13372_v9, %v9125_v45  ;;  %v13373_v43 = vmov 0 }
 0x257   : > { %13363 = vst [vmem:[#allocation21_spill] sm:$0xff] %v13362_v20  ;;  %13364 = vst [vmem:[#allocation22_spill] sm:$0xff] %v9494_v34  ;;  %5845 = vmatpush1.bf16.msk.msra.mxu0 %vm9485_vm13, %v13323_v1  ;;  %v5352_v63 = vsel %vm2145_vm1, 1.0, %v13325_v50 }
 0x258   : > { %vm9508_vm11 = vmpackc.low %vm2143_vm15, %vm2139_vm4  ;;  %13369 = vst [vmem:[#allocation25_spill] sm:$0xff] %v9516_v3  ;;  %vm2138_vm4 = vcmp.eq.s32.totalorder %v13255_v42, %v9129_v35  ;;  %vm2142_vm15 = vcmp.eq.s32.totalorder %v13258_v60, %v9129_v35  ;;  %v13377_v42 = vld [vmem:[#allocation142_spill] sm:$0xff] }
 0x259   : > { %v13367_v19 = vsel %vm9508_vm11, 4294967295, %v13366_v19  ;;  %6227 = vmatprep.subr.msk.bf16.mxu1 %vm9508_vm11, %v13323_v1  ;;  %13370 = vst [vmem:[#allocation26_spill] sm:$0xff] %v9523_v62  ;;  %13371 = vst [vmem:[#allocation27_spill] sm:$0xff] %v9527_v8  ;;  %v5349_v20 = vsel %vm2142_vm15, 1.0, %v13325_v50  ;;  %vm2149_vm6 = vcmp.eq.s32.totalorder %v13377_v42, %v9125_v45  ;;  %v13384_v8 = vmov 0 }
 0x25a   : > { %13368 = vst [vmem:[#allocation24_spill] sm:$0xff] %v13367_v19  ;;  %v5345_v19 = vsel %vm2138_vm4, 1.0, %v13325_v50  ;;  %vm9536_vm7 = vmpackc.low %vm2142_vm15, %vm2138_vm4  ;;  %v9547_v60 = vsub.f32 %v5349_v20, %v5349_v20  ;;  %v5356_v46 = vsel %vm2149_vm6, 1.0, %v13325_v50  ;;  %vm2147_vm4 = vcmp.eq.s32.totalorder %v13372_v9, %v9131_v13 }
 0x25b   : > { %v13374_v43 = vsel %vm9536_vm7, 4294967295, %v13373_v43  ;;  %v9540_v25 = vsub.f32 %v5345_v19, %v5345_v19  ;;  %6229 = vmatpush1.bf16.msk.msra.mxu1 %vm9536_vm7, %v13323_v1  ;;  %vm9551_vm13 = vmpackc.low %vm2149_vm6, %vm2145_vm1  ;;  %v9563_v20 = vsub.f32 %v5356_v46, %v5356_v46  ;;  %vm2151_vm15 = vcmp.eq.s32.totalorder %v13377_v42, %v9131_v13 }
 0x25c   : > { %13375 = vst [vmem:[#allocation28_spill] sm:$0xff] %v13374_v43  ;;  %13378 = vst [vmem:[#allocation30_spill] sm:$0xff] %v9547_v60  ;;  %v13380_v17 = vsel %vm9551_vm13, 4294967295, %v13379_v17  ;;  %5847 = vmatprep.subr.msk.bf16.mxu0 %vm9551_vm13, %v13323_v1  ;;  %v9561_v43 = vsub.f32 %v5352_v63, %v5352_v63  ;;  %v5354_v62 = vsel %vm2147_vm4, 1.0, %v13325_v50  ;;  %v5358_v39 = vsel %vm2151_vm15, 1.0, %v13325_v50 }
 0x25d   : > { %13376 = vst [vmem:[#allocation29_spill] sm:$0xff] %v9540_v25  ;;  %13381 = vst [vmem:[#allocation31_spill] sm:$0xff] %v13380_v17  ;;  %vm2144_vm6 = vcmp.eq.s32.totalorder %v13372_v9, %v8918_v16  ;;  %v9579_v46 = vsub.f32 %v5354_v62, %v5354_v62  ;;  %v9581_v63 = vsub.f32 %v5358_v39, %v5358_v39  ;;  %v13389_v17 = vmov 0 }
 0x25e   : > { %13382 = vst [vmem:[#allocation129_spill] sm:$0xff] %v9561_v43  ;;  %13383 = vst [vmem:[#allocation32_spill] sm:$0xff] %v9563_v20  ;;  %vm2148_vm13 = vcmp.eq.s32.totalorder %v13377_v42, %v8918_v16  ;;  %v5351_v56 = vsel %vm2144_vm6, 1.0, %v13325_v50  ;;  %v13401_v25 = vmov 0 }
 0x25f   : > { %vm9570_vm1 = vmpackc.low %vm2151_vm15, %vm2147_vm4  ;;  %13387 = vst [vmem:[#allocation34_spill] sm:$0xff] %v9579_v46  ;;  %v5355_v19 = vsel %vm2148_vm13, 1.0, %v13325_v50  ;;  %v9591_v20 = vsub.f32 %v5351_v56, %v5351_v56  ;;  %vm2146_vm15 = vcmp.eq.s32.totalorder %v13372_v9, %v9129_v35  ;;  %v13397_v56 = vld [vmem:[#allocation143_spill] sm:$0xff] }
 0x260   : > { %v13385_v8 = vsel %vm9570_vm1, 4294967295, %v13384_v8  ;;  %6231 = vmatprep.subr.msk.bf16.mxu1 %vm9570_vm1, %v13323_v1  ;;  %13388 = vst [vmem:[#allocation35_spill] sm:$0xff] %v9581_v63  ;;  %vm9587_vm4 = vmpackc.low %vm2148_vm13, %vm2144_vm6  ;;  %vm2150_vm1 = vcmp.eq.s32.totalorder %v13377_v42, %v9129_v35  ;;  %v9600_v39 = vsub.f32 %v5355_v19, %v5355_v19  ;;  %v5353_v62 = vsel %vm2146_vm15, 1.0, %v13325_v50 }
 0x261   : > { %13386 = vst [vmem:[#allocation33_spill] sm:$0xff] %v13385_v8  ;;  %v13390_v17 = vsel %vm9587_vm4, 4294967295, %v13389_v17  ;;  %13392 = vst [vmem:[#allocation37_spill] sm:$0xff] %v9591_v20  ;;  %5849 = vmatpush1.bf16.msk.msra.mxu0 %vm9587_vm4, %v13323_v1  ;;  %v5357_v8 = vsel %vm2150_vm1, 1.0, %v13325_v50  ;;  %v13394_v63 = vmov 0  ;;  %vm2153_vm6 = vcmp.eq.s32.totalorder %v13397_v56, %v9125_v45 }
 0x262   : > { %13391 = vst [vmem:[#allocation36_spill] sm:$0xff] %v13390_v17  ;;  %13393 = vst [vmem:[#allocation38_spill] sm:$0xff] %v9600_v39  ;;  %v9614_v42 = vsub.f32 %v5353_v62, %v5353_v62  ;;  %v9616_v19 = vsub.f32 %v5357_v8, %v5357_v8  ;;  %v13400_v17 = vld [vmem:[#allocation144_spill] sm:$0xff]  ;;  %v5360_v60 = vsel %vm2153_vm6, 1.0, %v13325_v50  ;;  %v13406_v62 = vmov 0 }
 0x263   : > { %vm9604_vm13 = vmpackc.low %vm2150_vm1, %vm2146_vm15  ;;  %vm2157_vm4 = vcmp.eq.s32.totalorder %v13400_v17, %v9125_v45  ;;  %vm2155_vm15 = vcmp.eq.s32.totalorder %v13397_v56, %v9131_v13  ;;  %v9634_v46 = vsub.f32 %v5360_v60, %v5360_v60  ;;  %v13428_v20 = vmov 0 }
 0x264   : > { %v13395_v63 = vsel %vm9604_vm13, 4294967295, %v13394_v63  ;;  %6233 = vmatpush1.bf16.msk.msra.mxu1 %vm9604_vm13, %v13323_v1  ;;  %13398 = vst [vmem:[#allocation40_spill] sm:$0xff] %v9614_v42  ;;  %13399 = vst [vmem:[#allocation41_spill] sm:$0xff] %v9616_v19  ;;  %v5364_v43 = vsel %vm2157_vm4, 1.0, %v13325_v50  ;;  %vm2156_vm13 = vcmp.eq.s32.totalorder %v13400_v17, %v8918_v16  ;;  %v13411_v19 = vmov 0 }
 0x265   : > { %13396 = vst [vmem:[#allocation39_spill] sm:$0xff] %v13395_v63  ;;  %vm9623_vm1 = vmpackc.low %vm2157_vm4, %vm2153_vm6  ;;  %v9636_v9 = vsub.f32 %v5364_v43, %v5364_v43  ;;  %vm2159_vm4 = vcmp.eq.s32.totalorder %v13400_v17, %v9131_v13  ;;  %v5362_v63 = vsel %vm2155_vm15, 1.0, %v13325_v50  ;;  %vm2152_vm6 = vcmp.eq.s32.totalorder %v13397_v56, %v8918_v16 }
 0x266   : > { %v13402_v25 = vsel %vm9623_vm1, 4294967295, %v13401_v25  ;;  %5851 = vmatprep.subr.msk.bf16.mxu0 %vm9623_vm1, %v13323_v1  ;;  %13404 = vst [vmem:[#allocation43_spill] sm:$0xff] %v9634_v46  ;;  %v5366_v8 = vsel %vm2159_vm4, 1.0, %v13325_v50  ;;  %vm9646_vm7 = vmpackc.low %vm2159_vm4, %vm2155_vm15  ;;  %v9650_v60 = vsub.f32 %v5362_v63, %v5362_v63  ;;  %v5359_v43 = vsel %vm2152_vm6, 1.0, %v13325_v50 }
 0x267   : > { %13403 = vst [vmem:[#allocation42_spill] sm:$0xff] %v13402_v25  ;;  %13405 = vst [vmem:[#allocation44_spill] sm:$0xff] %v9636_v9  ;;  %v13407_v62 = vsel %vm9646_vm7, 4294967295, %v13406_v62  ;;  %v5363_v25 = vsel %vm2156_vm13, 1.0, %v13325_v50  ;;  %6235 = vmatprep.subr.msk.bf16.mxu1 %vm9646_vm7, %v13323_v1  ;;  %v9657_v9 = vsub.f32 %v5366_v8, %v5366_v8  ;;  %v9663_v46 = vsub.f32 %v5359_v43, %v5359_v43  ;;  %v13416_v8 = vld [vmem:[#allocation145_spill] sm:$0xff]  ;;  %v13417_v43 = vld [vmem:[#allocation146_spill] sm:$0xff] }
 0x268   : > { %13408 = vst [vmem:[#allocation45_spill] sm:$0xff] %v13407_v62  ;;  %13409 = vst [vmem:[#allocation46_spill] sm:$0xff] %v9650_v60  ;;  %v9665_v42 = vsub.f32 %v5363_v25, %v5363_v25  ;;  %vm2154_vm15 = vcmp.eq.s32.totalorder %v13397_v56, %v9129_v35  ;;  %vm2158_vm4 = vcmp.eq.s32.totalorder %v13400_v17, %v9129_v35  ;;  %v13423_v62 = vmov 0 }
 0x269   : > { %13410 = vst [vmem:[#allocation47_spill] sm:$0xff] %v9657_v9  ;;  %vm9659_vm1 = vmpackc.low %vm2156_vm13, %vm2152_vm6  ;;  %v5361_v63 = vsel %vm2154_vm15, 1.0, %v13325_v50  ;;  %vm2161_vm13 = vcmp.eq.s32.totalorder %v13416_v8, %v9125_v45  ;;  %vm2165_vm6 = vcmp.eq.s32.totalorder %v13417_v43, %v9125_v45  ;;  %v5365_v56 = vsel %vm2158_vm4, 1.0, %v13325_v50 }
 0x26a   : > { %v13412_v19 = vsel %vm9659_vm1, 4294967295, %v13411_v19  ;;  %13414 = vst [vmem:[#allocation49_spill] sm:$0xff] %v9663_v46  ;;  %13415 = vst [vmem:[#allocation50_spill] sm:$0xff] %v9665_v42  ;;  %5853 = vmatpush1.bf16.msk.msra.mxu0 %vm9659_vm1, %v13323_v1  ;;  %v9686_v9 = vsub.f32 %v5361_v63, %v5361_v63  ;;  %v9691_v17 = vsub.f32 %v5365_v56, %v5365_v56  ;;  %v5368_v60 = vsel %vm2161_vm13, 1.0, %v13325_v50 }
 0x26b   : > { %13413 = vst [vmem:[#allocation48_spill] sm:$0xff] %v13412_v19  ;;  %vm9682_vm7 = vmpackc.low %vm2158_vm4, %vm2154_vm15  ;;  %v13418_v19 = vmov 0  ;;  %v5372_v25 = vsel %vm2165_vm6, 1.0, %v13325_v50  ;;  %vm2163_vm15 = vcmp.eq.s32.totalorder %v13416_v8, %v9131_v13  ;;  %vm2167_vm4 = vcmp.eq.s32.totalorder %v13417_v43, %v9131_v13 }
 0x26c   : > { %v13419_v19 = vsel %vm9682_vm7, 4294967295, %v13418_v19  ;;  %13421 = vst [vmem:[#allocation52_spill] sm:$0xff] %v9686_v9  ;;  %6237 = vmatpush1.bf16.msk.msra.mxu1 %vm9682_vm7, %v13323_v1  ;;  %13422 = vst [vmem:[#allocation53_spill] sm:$0xff] %v9691_v17  ;;  %v9707_v56 = vsub.f32 %v5372_v25, %v5372_v25  ;;  %v5370_v46 = vsel %vm2163_vm15, 1.0, %v13325_v50  ;;  %v5374_v39 = vsel %vm2167_vm4, 1.0, %v13325_v50 }
 0x26d   : > { %13420 = vst [vmem:[#allocation51_spill] sm:$0xff] %v13419_v19  ;;  %vm9695_vm1 = vmpackc.low %vm2165_vm6, %vm2161_vm13  ;;  %v9705_v19 = vsub.f32 %v5368_v60, %v5368_v60  ;;  %vm2160_vm6 = vcmp.eq.s32.totalorder %v13416_v8, %v8918_v16  ;;  %v9723_v60 = vsub.f32 %v5370_v46, %v5370_v46  ;;  %v9725_v25 = vsub.f32 %v5374_v39, %v5374_v39 }
 0x26e   : > { %v13424_v62 = vsel %vm9695_vm1, 4294967295, %v13423_v62  ;;  %5855 = vmatprep.subr.msk.bf16.mxu0 %vm9695_vm1, %v13323_v1  ;;  %13427 = vst [vmem:[#allocation56_spill] sm:$0xff] %v9707_v56  ;;  %vm9714_vm13 = vmpackc.low %vm2167_vm4, %vm2163_vm15  ;;  %vm2164_vm1 = vcmp.eq.s32.totalorder %v13417_v43, %v8918_v16  ;;  %v5367_v42 = vsel %vm2160_vm6, 1.0, %v13325_v50  ;;  %vm2162_vm4 = vcmp.eq.s32.totalorder %v13416_v8, %v9129_v35 }
 0x26f   : > { %13425 = vst [vmem:[#allocation54_spill] sm:$0xff] %v13424_v62  ;;  %13426 = vst [vmem:[#allocation55_spill] sm:$0xff] %v9705_v19  ;;  %v13429_v20 = vsel %vm9714_vm13, 4294967295, %v13428_v20  ;;  %6239 = vmatprep.subr.msk.bf16.mxu1 %vm9714_vm13, %v13323_v1  ;;  %v5371_v63 = vsel %vm2164_vm1, 1.0, %v13325_v50  ;;  %v13433_v62 = vmov 0  ;;  %v9735_v56 = vsub.f32 %v5367_v42, %v5367_v42  ;;  %v13441_v42 = vld [vmem:[#allocation147_spill] sm:$0xff] }
 0x270   : > { %13430 = vst [vmem:[#allocation57_spill] sm:$0xff] %v13429_v20  ;;  %13431 = vst [vmem:[#allocation58_spill] sm:$0xff] %v9723_v60  ;;  %vm2166_vm13 = vcmp.eq.s32.totalorder %v13417_v43, %v9129_v35  ;;  %v9744_v46 = vsub.f32 %v5371_v63, %v5371_v63  ;;  %v5369_v39 = vsel %vm2162_vm4, 1.0, %v13325_v50  ;;  %v13445_v9 = vmov 0 }
 0x271   : > { %13432 = vst [vmem:[#allocation59_spill] sm:$0xff] %v9725_v25  ;;  %vm9731_vm15 = vmpackc.low %vm2164_vm1, %vm2160_vm6  ;;  %v5373_v20 = vsel %vm2166_vm13, 1.0, %v13325_v50  ;;  %v13438_v25 = vmov 0  ;;  %vm2169_vm6 = vcmp.eq.s32.totalorder %v13441_v42, %v9125_v45  ;;  %v9758_v43 = vsub.f32 %v5369_v39, %v5369_v39 }
 0x272   : > { %v13434_v62 = vsel %vm9731_vm15, 4294967295, %v13433_v62  ;;  %13436 = vst [vmem:[#allocation61_spill] sm:$0xff] %v9735_v56  ;;  %5857 = vmatpush1.bf16.msk.msra.mxu0 %vm9731_vm15, %v13323_v1  ;;  %13437 = vst [vmem:[#allocation62_spill] sm:$0xff] %v9744_v46  ;;  %v9760_v63 = vsub.f32 %v5373_v20, %v5373_v20  ;;  %v5376_v17 = vsel %vm2169_vm6, 1.0, %v13325_v50  ;;  %v13450_v39 = vmov 0 }
 0x273   : > { %13435 = vst [vmem:[#allocation60_spill] sm:$0xff] %v13434_v62  ;;  %vm9748_vm1 = vmpackc.low %vm2166_vm13, %vm2162_vm4  ;;  %v13444_v62 = vld [vmem:[#allocation148_spill] sm:$0xff]  ;;  %vm2171_vm4 = vcmp.eq.s32.totalorder %v13441_v42, %v9131_v13  ;;  %v9778_v60 = vsub.f32 %v5376_v17, %v5376_v17  ;;  %v13472_v56 = vmov 0 }
 0x274   : > { %v13439_v25 = vsel %vm9748_vm1, 4294967295, %v13438_v25  ;;  %6241 = vmatpush1.bf16.msk.msra.mxu1 %vm9748_vm1, %v13323_v1  ;;  %13442 = vst [vmem:[#allocation130_spill] sm:$0xff] %v9758_v43  ;;  %13443 = vst [vmem:[#allocation64_spill] sm:$0xff] %v9760_v63  ;;  %vm2173_vm15 = vcmp.eq.s32.totalorder %v13444_v62, %v9125_v45  ;;  %vm2172_vm1 = vcmp.eq.s32.totalorder %v13444_v62, %v8918_v16  ;;  %v13455_v63 = vmov 0 }
 0x275   : > { %13440 = vst [vmem:[#allocation63_spill] sm:$0xff] %v13439_v25  ;;  %v5380_v19 = vsel %vm2173_vm15, 1.0, %v13325_v50  ;;  %vm9767_vm13 = vmpackc.low %vm2173_vm15, %vm2169_vm6  ;;  %vm2175_vm15 = vcmp.eq.s32.totalorder %v13444_v62, %v9131_v13  ;;  %v5378_v25 = vsel %vm2171_vm4, 1.0, %v13325_v50  ;;  %vm2168_vm6 = vcmp.eq.s32.totalorder %v13441_v42, %v8918_v16 }
 0x276   : > { %v13446_v9 = vsel %vm9767_vm13, 4294967295, %v13445_v9  ;;  %5859 = vmatprep.subr.msk.bf16.mxu0 %vm9767_vm13, %v13323_v1  ;;  %13448 = vst [vmem:[#allocation66_spill] sm:$0xff] %v9778_v60  ;;  %v9780_v8 = vsub.f32 %v5380_v19, %v5380_v19  ;;  %v5382_v20 = vsel %vm2175_vm15, 1.0, %v13325_v50  ;;  %vm9790_vm7 = vmpackc.low %vm2175_vm15, %vm2171_vm4  ;;  %v9794_v17 = vsub.f32 %v5378_v25, %v5378_v25 }
 0x277   : > { %13447 = vst [vmem:[#allocation65_spill] sm:$0xff] %v13446_v9  ;;  %v13451_v39 = vsel %vm9790_vm7, 4294967295, %v13450_v39  ;;  %v5375_v19 = vsel %vm2168_vm6, 1.0, %v13325_v50  ;;  %v5379_v9 = vsel %vm2172_vm1, 1.0, %v13325_v50  ;;  %6243 = vmatprep.subr.msk.bf16.mxu1 %vm9790_vm7, %v13323_v1  ;;  %vm9803_vm13 = vmpackc.low %vm2172_vm1, %vm2168_vm6  ;;  %vm2170_vm4 = vcmp.eq.s32.totalorder %v13441_v42, %v9129_v35 }
 0x278   : > { %13449 = vst [vmem:[#allocation67_spill] sm:$0xff] %v9780_v8  ;;  %13452 = vst [vmem:[#allocation68_spill] sm:$0xff] %v13451_v39  ;;  %v9801_v8 = vsub.f32 %v5382_v20, %v5382_v20  ;;  %v13456_v63 = vsel %vm9803_vm13, 4294967295, %v13455_v63  ;;  %v9807_v60 = vsub.f32 %v5375_v19, %v5375_v19  ;;  %v9809_v43 = vsub.f32 %v5379_v9, %v5379_v9  ;;  %v13460_v20 = vld [vmem:[#allocation149_spill] sm:$0xff]  ;;  %v13461_v19 = vld [vmem:[#allocation150_spill] sm:$0xff] }
 0x279   : > { %13453 = vst [vmem:[#allocation69_spill] sm:$0xff] %v9794_v17  ;;  %13457 = vst [vmem:[#allocation71_spill] sm:$0xff] %v13456_v63  ;;  %5861 = vmatpush1.bf16.msk.msra.mxu0 %vm9803_vm13, %v13323_v1  ;;  %vm2174_vm15 = vcmp.eq.s32.totalorder %v13444_v62, %v9129_v35  ;;  %v5377_v25 = vsel %vm2170_vm4, 1.0, %v13325_v50  ;;  %vm2177_vm1 = vcmp.eq.s32.totalorder %v13460_v20, %v9125_v45  ;;  %v13462_v63 = vmov 0 }
 0x27a   : > { %13454 = vst [vmem:[#allocation70_spill] sm:$0xff] %v9801_v8  ;;  %13458 = vst [vmem:[#allocation72_spill] sm:$0xff] %v9807_v60  ;;  %vm2181_vm6 = vcmp.eq.s32.totalorder %v13461_v19, %v9125_v45  ;;  %v5381_v42 = vsel %vm2174_vm15, 1.0, %v13325_v50  ;;  %v9830_v8 = vsub.f32 %v5377_v25, %v5377_v25  ;;  %v5384_v17 = vsel %vm2177_vm1, 1.0, %v13325_v50 }
 0x27b   : > { %13459 = vst [vmem:[#allocation73_spill] sm:$0xff] %v9809_v43  ;;  %vm9826_vm7 = vmpackc.low %vm2174_vm15, %vm2170_vm4  ;;  %v9835_v62 = vsub.f32 %v5381_v42, %v5381_v42  ;;  %v5388_v9 = vsel %vm2181_vm6, 1.0, %v13325_v50  ;;  %v13467_v39 = vmov 0  ;;  %vm2179_vm4 = vcmp.eq.s32.totalorder %v13460_v20, %v9131_v13 }
 0x27c   : > { %v13463_v63 = vsel %vm9826_vm7, 4294967295, %v13462_v63  ;;  %13465 = vst [vmem:[#allocation132_spill] sm:$0xff] %v9830_v8  ;;  %6245 = vmatpush1.bf16.msk.msra.mxu1 %vm9826_vm7, %v13323_v1  ;;  %vm9839_vm13 = vmpackc.low %vm2181_vm6, %vm2177_vm1  ;;  %v9851_v42 = vsub.f32 %v5388_v9, %v5388_v9  ;;  %vm2183_vm15 = vcmp.eq.s32.totalorder %v13461_v19, %v9131_v13  ;;  %v5386_v60 = vsel %vm2179_vm4, 1.0, %v13325_v50 }
 0x27d   : > { %13464 = vst [vmem:[#allocation131_spill] sm:$0xff] %v13463_v63  ;;  %13466 = vst [vmem:[#allocation133_spill] sm:$0xff] %v9835_v62  ;;  %v13468_v39 = vsel %vm9839_vm13, 4294967295, %v13467_v39  ;;  %5863 = vmatprep.subr.msk.bf16.mxu0 %vm9839_vm13, %v13323_v1  ;;  %v9849_v63 = vsub.f32 %v5384_v17, %v5384_v17  ;;  %v5390_v46 = vsel %vm2183_vm15, 1.0, %v13325_v50  ;;  %vm2176_vm6 = vcmp.eq.s32.totalorder %v13460_v20, %v8918_v16 }
 0x27e   : > { %13469 = vst [vmem:[#allocation134_spill] sm:$0xff] %v13468_v39  ;;  %13471 = vst [vmem:[#allocation136_spill] sm:$0xff] %v9851_v42  ;;  %v9867_v17 = vsub.f32 %v5386_v60, %v5386_v60  ;;  %v9869_v9 = vsub.f32 %v5390_v46, %v5390_v46  ;;  %vm2180_vm13 = vcmp.eq.s32.totalorder %v13461_v19, %v8918_v16  ;;  %v5383_v43 = vsel %vm2176_vm6, 1.0, %v13325_v50 }
 0x27f   : > { %13470 = vst [vmem:[#allocation135_spill] sm:$0xff] %v9849_v63  ;;  %vm9858_vm1 = vmpackc.low %vm2183_vm15, %vm2179_vm4  ;;  %v5387_v25 = vsel %vm2180_vm13, 1.0, %v13325_v50  ;;  %v13477_v39 = vmov 0  ;;  %v9879_v42 = vsub.f32 %v5383_v43, %v5383_v43  ;;  %vm2178_vm15 = vcmp.eq.s32.totalorder %v13460_v20, %v9129_v35  ;;  %v13485_v43 = vld [vmem:[#allocation153_spill] sm:$0xff] }
 0x280   : > { %v13473_v56 = vsel %vm9858_vm1, 4294967295, %v13472_v56  ;;  %6247 = vmatprep.subr.msk.bf16.mxu1 %vm9858_vm1, %v13323_v1  ;;  %13475 = vst [vmem:[#allocation138_spill] sm:$0xff] %v9867_v17  ;;  %13476 = vst [vmem:[#allocation139_spill] sm:$0xff] %v9869_v9  ;;  %vm2182_vm1 = vcmp.eq.s32.totalorder %v13461_v19, %v9129_v35  ;;  %v9888_v60 = vsub.f32 %v5387_v25, %v5387_v25  ;;  %v5385_v46 = vsel %vm2178_vm15, 1.0, %v13325_v50 }
 0x281   : > { %13474 = vst [vmem:[#allocation137_spill] sm:$0xff] %v13473_v56  ;;  %vm9875_vm4 = vmpackc.low %vm2180_vm13, %vm2176_vm6  ;;  %v5389_v56 = vsel %vm2182_vm1, 1.0, %v13325_v50  ;;  %v13482_v9 = vmov 0  ;;  %vm2185_vm6 = vcmp.eq.s32.totalorder %v13485_v43, %v9125_v45  ;;  %v9902_v19 = vsub.f32 %v5385_v46, %v5385_v46 }
 0x282   : > { %v13478_v39 = vsel %vm9875_vm4, 4294967295, %v13477_v39  ;;  %13480 = vst [vmem:[#allocation141_spill] sm:$0xff] %v9879_v42  ;;  %5865 = vmatpush1.bf16.msk.msra.mxu0 %vm9875_vm4, %v13323_v1  ;;  %13481 = vst [vmem:[#allocation142_spill] sm:$0xff] %v9888_v60  ;;  %v9904_v25 = vsub.f32 %v5389_v56, %v5389_v56  ;;  %v5392_v62 = vsel %vm2185_vm6, 1.0, %v13325_v50  ;;  %v13489_v8 = vmov 0 }
 0x283   : > { %13479 = vst [vmem:[#allocation140_spill] sm:$0xff] %v13478_v39  ;;  %vm9892_vm13 = vmpackc.low %vm2182_vm1, %vm2178_vm15  ;;  %v13488_v39 = vld [vmem:[#allocation154_spill] sm:$0xff]  ;;  %vm2187_vm15 = vcmp.eq.s32.totalorder %v13485_v43, %v9131_v13  ;;  %v9922_v17 = vsub.f32 %v5392_v62, %v5392_v62  ;;  %v13494_v46 = vmov 0  ;;  %v13516_v42 = vmov 0 }
 0x284   : > { %v13483_v9 = vsel %vm9892_vm13, 4294967295, %v13482_v9  ;;  %6249 = vmatpush1.bf16.msk.msra.mxu1 %vm9892_vm13, %v13323_v1  ;;  %13486 = vst [vmem:[#allocation144_spill] sm:$0xff] %v9902_v19  ;;  %13487 = vst [vmem:[#allocation145_spill] sm:$0xff] %v9904_v25  ;;  %vm2189_vm4 = vcmp.eq.s32.totalorder %v13488_v39, %v9125_v45  ;;  %vm2188_vm13 = vcmp.eq.s32.totalorder %v13488_v39, %v8918_v16  ;;  %v13499_v25 = vmov 0 }
 0x285   : > { %13484 = vst [vmem:[#allocation143_spill] sm:$0xff] %v13483_v9  ;;  %v5396_v63 = vsel %vm2189_vm4, 1.0, %v13325_v50  ;;  %vm9911_vm1 = vmpackc.low %vm2189_vm4, %vm2185_vm6  ;;  %vm2191_vm4 = vcmp.eq.s32.totalorder %v13488_v39, %v9131_v13  ;;  %v5394_v9 = vsel %vm2187_vm15, 1.0, %v13325_v50  ;;  %vm2184_vm6 = vcmp.eq.s32.totalorder %v13485_v43, %v8918_v16 }
 0x286   : > { %v13490_v8 = vsel %vm9911_vm1, 4294967295, %v13489_v8  ;;  %5867 = vmatprep.subr.msk.bf16.mxu0 %vm9911_vm1, %v13323_v1  ;;  %13492 = vst [vmem:[#allocation147_spill] sm:$0xff] %v9922_v17  ;;  %v9924_v20 = vsub.f32 %v5396_v63, %v5396_v63  ;;  %v5398_v56 = vsel %vm2191_vm4, 1.0, %v13325_v50  ;;  %vm9934_vm7 = vmpackc.low %vm2191_vm4, %vm2187_vm15  ;;  %v9938_v62 = vsub.f32 %v5394_v9, %v5394_v9 }
 0x287   : > { %13491 = vst [vmem:[#allocation146_spill] sm:$0xff] %v13490_v8  ;;  %v13495_v46 = vsel %vm9934_vm7, 4294967295, %v13494_v46  ;;  %v5391_v63 = vsel %vm2184_vm6, 1.0, %v13325_v50  ;;  %v5395_v8 = vsel %vm2188_vm13, 1.0, %v13325_v50  ;;  %6251 = vmatprep.subr.msk.bf16.mxu1 %vm9934_vm7, %v13323_v1  ;;  %vm9947_vm1 = vmpackc.low %vm2188_vm13, %vm2184_vm6  ;;  %vm2186_vm15 = vcmp.eq.s32.totalorder %v13485_v43, %v9129_v35 }
 0x288   : > { %13493 = vst [vmem:[#allocation148_spill] sm:$0xff] %v9924_v20  ;;  %13496 = vst [vmem:[#allocation149_spill] sm:$0xff] %v13495_v46  ;;  %v9945_v20 = vsub.f32 %v5398_v56, %v5398_v56  ;;  %v13500_v25 = vsel %vm9947_vm1, 4294967295, %v13499_v25  ;;  %v9951_v17 = vsub.f32 %v5391_v63, %v5391_v63  ;;  %v9953_v19 = vsub.f32 %v5395_v8, %v5395_v8  ;;  %v13504_v56 = vld [vmem:[#allocation157_spill] sm:$0xff]  ;;  %v13505_v63 = vld [vmem:[#allocation158_spill] sm:$0xff] }
 0x289   : > { %13497 = vst [vmem:[#allocation150_spill] sm:$0xff] %v9938_v62  ;;  %13501 = vst [vmem:[#allocation154_spill] sm:$0xff] %v13500_v25  ;;  %5869 = vmatpush1.bf16.msk.msra.mxu0 %vm9947_vm1, %v13323_v1  ;;  %vm2190_vm4 = vcmp.eq.s32.totalorder %v13488_v39, %v9129_v35  ;;  %v5393_v9 = vsel %vm2186_vm15, 1.0, %v13325_v50  ;;  %vm2193_vm13 = vcmp.eq.s32.totalorder %v13504_v56, %v9125_v45  ;;  %v13506_v25 = vmov 0 }
 0x28a   : > { %13498 = vst [vmem:[#allocation153_spill] sm:$0xff] %v9945_v20  ;;  %13502 = vst [vmem:[#allocation165_spill] sm:$0xff] %v9951_v17  ;;  %vm2197_vm6 = vcmp.eq.s32.totalorder %v13505_v63, %v9125_v45  ;;  %v5397_v43 = vsel %vm2190_vm4, 1.0, %v13325_v50  ;;  %v9974_v20 = vsub.f32 %v5393_v9, %v5393_v9  ;;  %v5400_v62 = vsel %vm2193_vm13, 1.0, %v13325_v50 }
 0x28b   : > { %13503 = vst [vmem:[#allocation166_spill] sm:$0xff] %v9953_v19  ;;  %vm9970_vm7 = vmpackc.low %vm2190_vm4, %vm2186_vm15  ;;  %v9979_v39 = vsub.f32 %v5397_v43, %v5397_v43  ;;  %v5404_v8 = vsel %vm2197_vm6, 1.0, %v13325_v50  ;;  %v13511_v46 = vmov 0  ;;  %vm2195_vm15 = vcmp.eq.s32.totalorder %v13504_v56, %v9131_v13 }
 0x28c   : > { %v13507_v25 = vsel %vm9970_vm7, 4294967295, %v13506_v25  ;;  %13509 = vst [vmem:[#allocation158_spill] sm:$0xff] %v9974_v20  ;;  %6253 = vmatpush1.bf16.msk.msra.mxu1 %vm9970_vm7, %v13323_v1  ;;  %vm9983_vm1 = vmpackc.low %vm2197_vm6, %vm2193_vm13  ;;  %v9995_v43 = vsub.f32 %v5404_v8, %v5404_v8  ;;  %vm2199_vm4 = vcmp.eq.s32.totalorder %v13505_v63, %v9131_v13  ;;  %v5402_v17 = vsel %vm2195_vm15, 1.0, %v13325_v50 }
 0x28d   : > { %13508 = vst [vmem:[#allocation157_spill] sm:$0xff] %v13507_v25  ;;  %13510 = vst [vmem:[#allocation167_spill] sm:$0xff] %v9979_v39  ;;  %v13512_v46 = vsel %vm9983_vm1, 4294967295, %v13511_v46  ;;  %5871 = vmatprep.subr.msk.bf16.mxu0 %vm9983_vm1, %v13323_v1  ;;  %v9993_v25 = vsub.f32 %v5400_v62, %v5400_v62  ;;  %v5406_v60 = vsel %vm2199_vm4, 1.0, %v13325_v50  ;;  %vm2192_vm6 = vcmp.eq.s32.totalorder %v13504_v56, %v8918_v16 }
 0x28e   : > { %13513 = vst [vmem:[#allocation168_spill] sm:$0xff] %v13512_v46  ;;  %13515 = vst [vmem:[#allocation170_spill] sm:$0xff] %v9995_v43  ;;  %v10011_v62 = vsub.f32 %v5402_v17, %v5402_v17  ;;  %v10013_v8 = vsub.f32 %v5406_v60, %v5406_v60  ;;  %vm2196_vm1 = vcmp.eq.s32.totalorder %v13505_v63, %v8918_v16  ;;  %v5399_v19 = vsel %vm2192_vm6, 1.0, %v13325_v50 }
 0x28f   : > { %13514 = vst [vmem:[#allocation169_spill] sm:$0xff] %v9993_v25  ;;  %vm10002_vm13 = vmpackc.low %vm2199_vm4, %vm2195_vm15  ;;  %v5403_v9 = vsel %vm2196_vm1, 1.0, %v13325_v50  ;;  %v13521_v46 = vmov 0  ;;  %v10023_v43 = vsub.f32 %v5399_v19, %v5399_v19  ;;  %vm2194_vm4 = vcmp.eq.s32.totalorder %v13504_v56, %v9129_v35  ;;  %v13529_v19 = vld [vmem:[#allocation159_spill] sm:$0xff] }
 0x290   : > { %v13517_v42 = vsel %vm10002_vm13, 4294967295, %v13516_v42  ;;  %6255 = vmatprep.subr.msk.bf16.mxu1 %vm10002_vm13, %v13323_v1  ;;  %13519 = vst [vmem:[#allocation172_spill] sm:$0xff] %v10011_v62  ;;  %13520 = vst [vmem:[#allocation173_spill] sm:$0xff] %v10013_v8  ;;  %vm2198_vm13 = vcmp.eq.s32.totalorder %v13505_v63, %v9129_v35  ;;  %v10032_v17 = vsub.f32 %v5403_v9, %v5403_v9  ;;  %v5401_v60 = vsel %vm2194_vm4, 1.0, %v13325_v50 }
 0x291   : > { %13518 = vst [vmem:[#allocation171_spill] sm:$0xff] %v13517_v42  ;;  %vm10019_vm15 = vmpackc.low %vm2196_vm1, %vm2192_vm6  ;;  %v5405_v42 = vsel %vm2198_vm13, 1.0, %v13325_v50  ;;  %v13526_v8 = vmov 0  ;;  %vm2201_vm6 = vcmp.eq.s32.totalorder %v13529_v19, %v9125_v45  ;;  %v10046_v63 = vsub.f32 %v5401_v60, %v5401_v60 }
 0x292   : > { %v13522_v46 = vsel %vm10019_vm15, 4294967295, %v13521_v46  ;;  %13524 = vst [vmem:[#allocation175_spill] sm:$0xff] %v10023_v43  ;;  %5873 = vmatpush1.bf16.msk.msra.mxu0 %vm10019_vm15, %v13323_v1  ;;  %13525 = vst [vmem:[#allocation176_spill] sm:$0xff] %v10032_v17  ;;  %v10048_v9 = vsub.f32 %v5405_v42, %v5405_v42  ;;  %v5408_v39 = vsel %vm2201_vm6, 1.0, %v13325_v50  ;;  %v13533_v20 = vmov 0 }
 0x293   : > { %13523 = vst [vmem:[#allocation174_spill] sm:$0xff] %v13522_v46  ;;  %vm10036_vm1 = vmpackc.low %vm2198_vm13, %vm2194_vm4  ;;  %v13532_v46 = vld [vmem:[#allocation160_spill] sm:$0xff]  ;;  %vm2203_vm4 = vcmp.eq.s32.totalorder %v13529_v19, %v9131_v13  ;;  %v10066_v62 = vsub.f32 %v5408_v39, %v5408_v39  ;;  %v13538_v60 = vmov 0  ;;  %v13560_v43 = vmov 0 }
 0x294   : > { %v13527_v8 = vsel %vm10036_vm1, 4294967295, %v13526_v8  ;;  %6257 = vmatpush1.bf16.msk.msra.mxu1 %vm10036_vm1, %v13323_v1  ;;  %13530 = vst [vmem:[#allocation159_spill] sm:$0xff] %v10046_v63  ;;  %13531 = vst [vmem:[#allocation178_spill] sm:$0xff] %v10048_v9  ;;  %vm2205_vm15 = vcmp.eq.s32.totalorder %v13532_v46, %v9125_v45  ;;  %vm2204_vm1 = vcmp.eq.s32.totalorder %v13532_v46, %v8918_v16  ;;  %v13543_v9 = vmov 0 }
 0x295   : > { %13528 = vst [vmem:[#allocation177_spill] sm:$0xff] %v13527_v8  ;;  %v5412_v25 = vsel %vm2205_vm15, 1.0, %v13325_v50  ;;  %vm10055_vm13 = vmpackc.low %vm2205_vm15, %vm2201_vm6  ;;  %vm2207_vm15 = vcmp.eq.s32.totalorder %v13532_v46, %v9131_v13  ;;  %v5410_v8 = vsel %vm2203_vm4, 1.0, %v13325_v50  ;;  %vm2200_vm6 = vcmp.eq.s32.totalorder %v13529_v19, %v8918_v16 }
 0x296   : > { %v13534_v20 = vsel %vm10055_vm13, 4294967295, %v13533_v20  ;;  %5875 = vmatprep.subr.msk.bf16.mxu0 %vm10055_vm13, %v13323_v1  ;;  %13536 = vst [vmem:[#allocation179_spill] sm:$0xff] %v10066_v62  ;;  %v10068_v56 = vsub.f32 %v5412_v25, %v5412_v25  ;;  %v5414_v42 = vsel %vm2207_vm15, 1.0, %v13325_v50  ;;  %vm10078_vm7 = vmpackc.low %vm2207_vm15, %vm2203_vm4  ;;  %v10082_v39 = vsub.f32 %v5410_v8, %v5410_v8 }
 0x297   : > { %13535 = vst [vmem:[#allocation160_spill] sm:$0xff] %v13534_v20  ;;  %v13539_v60 = vsel %vm10078_vm7, 4294967295, %v13538_v60  ;;  %v5407_v25 = vsel %vm2200_vm6, 1.0, %v13325_v50  ;;  %v5411_v20 = vsel %vm2204_vm1, 1.0, %v13325_v50  ;;  %6259 = vmatprep.subr.msk.bf16.mxu1 %vm10078_vm7, %v13323_v1  ;;  %vm10091_vm13 = vmpackc.low %vm2204_vm1, %vm2200_vm6  ;;  %vm2202_vm4 = vcmp.eq.s32.totalorder %v13529_v19, %v9129_v35 }
 0x298   : > { %13537 = vst [vmem:[#allocation180_spill] sm:$0xff] %v10068_v56  ;;  %13540 = vst [vmem:[#allocation181_spill] sm:$0xff] %v13539_v60  ;;  %v10089_v56 = vsub.f32 %v5414_v42, %v5414_v42  ;;  %v13544_v9 = vsel %vm10091_vm13, 4294967295, %v13543_v9  ;;  %v10095_v62 = vsub.f32 %v5407_v25, %v5407_v25  ;;  %v10097_v63 = vsub.f32 %v5411_v20, %v5411_v20  ;;  %v13548_v42 = vld [vmem:[#allocation161_spill] sm:$0xff]  ;;  %v13549_v25 = vld [vmem:[#allocation162_spill] sm:$0xff] }
 0x299   : > { %13541 = vst [vmem:[#allocation182_spill] sm:$0xff] %v10082_v39  ;;  %13545 = vst [vmem:[#allocation184_spill] sm:$0xff] %v13544_v9  ;;  %5877 = vmatpush1.bf16.msk.msra.mxu0 %vm10091_vm13, %v13323_v1  ;;  %vm2206_vm15 = vcmp.eq.s32.totalorder %v13532_v46, %v9129_v35  ;;  %v5409_v8 = vsel %vm2202_vm4, 1.0, %v13325_v50  ;;  %vm2209_vm1 = vcmp.eq.s32.totalorder %v13548_v42, %v9125_v45  ;;  %v13550_v9 = vmov 0 }
 0x29a   : > { %13542 = vst [vmem:[#allocation183_spill] sm:$0xff] %v10089_v56  ;;  %13546 = vst [vmem:[#allocation185_spill] sm:$0xff] %v10095_v62  ;;  %vm2213_vm6 = vcmp.eq.s32.totalorder %v13549_v25, %v9125_v45  ;;  %v5413_v19 = vsel %vm2206_vm15, 1.0, %v13325_v50  ;;  %v10118_v56 = vsub.f32 %v5409_v8, %v5409_v8  ;;  %v5416_v39 = vsel %vm2209_vm1, 1.0, %v13325_v50 }
 0x29b   : > { %13547 = vst [vmem:[#allocation186_spill] sm:$0xff] %v10097_v63  ;;  %vm10114_vm7 = vmpackc.low %vm2206_vm15, %vm2202_vm4  ;;  %v10123_v46 = vsub.f32 %v5413_v19, %v5413_v19  ;;  %v5420_v20 = vsel %vm2213_vm6, 1.0, %v13325_v50  ;;  %v13555_v60 = vmov 0  ;;  %vm2211_vm4 = vcmp.eq.s32.totalorder %v13548_v42, %v9131_v13 }
 0x29c   : > { %v13551_v9 = vsel %vm10114_vm7, 4294967295, %v13550_v9  ;;  %13553 = vst [vmem:[#allocation162_spill] sm:$0xff] %v10118_v56  ;;  %6261 = vmatpush1.bf16.msk.msra.mxu1 %vm10114_vm7, %v13323_v1  ;;  %vm10127_vm13 = vmpackc.low %vm2213_vm6, %vm2209_vm1  ;;  %v10139_v19 = vsub.f32 %v5420_v20, %v5420_v20  ;;  %vm2215_vm15 = vcmp.eq.s32.totalorder %v13549_v25, %v9131_v13  ;;  %v5418_v62 = vsel %vm2211_vm4, 1.0, %v13325_v50 }
 0x29d   : > { %13552 = vst [vmem:[#allocation161_spill] sm:$0xff] %v13551_v9  ;;  %13554 = vst [vmem:[#allocation187_spill] sm:$0xff] %v10123_v46  ;;  %v13556_v60 = vsel %vm10127_vm13, 4294967295, %v13555_v60  ;;  %5879 = vmatprep.subr.msk.bf16.mxu0 %vm10127_vm13, %v13323_v1  ;;  %v10137_v9 = vsub.f32 %v5416_v39, %v5416_v39  ;;  %v5422_v17 = vsel %vm2215_vm15, 1.0, %v13325_v50  ;;  %vm2208_vm6 = vcmp.eq.s32.totalorder %v13548_v42, %v8918_v16 }
 0x29e   : > { %13557 = vst [vmem:[#allocation188_spill] sm:$0xff] %v13556_v60  ;;  %13559 = vst [vmem:[#allocation190_spill] sm:$0xff] %v10139_v19  ;;  %v10155_v39 = vsub.f32 %v5418_v62, %v5418_v62  ;;  %v10157_v20 = vsub.f32 %v5422_v17, %v5422_v17  ;;  %vm2212_vm13 = vcmp.eq.s32.totalorder %v13549_v25, %v8918_v16  ;;  %v5415_v63 = vsel %vm2208_vm6, 1.0, %v13325_v50 }
 0x29f   : > { %13558 = vst [vmem:[#allocation189_spill] sm:$0xff] %v10137_v9  ;;  %vm10146_vm1 = vmpackc.low %vm2215_vm15, %vm2211_vm4  ;;  %v5419_v8 = vsel %vm2212_vm13, 1.0, %v13325_v50  ;;  %v13565_v60 = vmov 0  ;;  %v10167_v19 = vsub.f32 %v5415_v63, %v5415_v63  ;;  %vm2210_vm15 = vcmp.eq.s32.totalorder %v13548_v42, %v9129_v35  ;;  %v13573_v63 = vld [vmem:[#allocation163_spill] sm:$0xff] }
 0x2a0   : > { %v13561_v43 = vsel %vm10146_vm1, 4294967295, %v13560_v43  ;;  %6263 = vmatprep.subr.msk.bf16.mxu1 %vm10146_vm1, %v13323_v1  ;;  %13563 = vst [vmem:[#allocation192_spill] sm:$0xff] %v10155_v39  ;;  %13564 = vst [vmem:[#allocation193_spill] sm:$0xff] %v10157_v20  ;;  %vm2214_vm1 = vcmp.eq.s32.totalorder %v13549_v25, %v9129_v35  ;;  %v10176_v62 = vsub.f32 %v5419_v8, %v5419_v8  ;;  %v5417_v17 = vsel %vm2210_vm15, 1.0, %v13325_v50 }
 0x2a1   : > { %13562 = vst [vmem:[#allocation191_spill] sm:$0xff] %v13561_v43  ;;  %vm10163_vm4 = vmpackc.low %vm2212_vm13, %vm2208_vm6  ;;  %v5421_v43 = vsel %vm2214_vm1, 1.0, %v13325_v50  ;;  %v13570_v20 = vmov 0  ;;  %vm2217_vm6 = vcmp.eq.s32.totalorder %v13573_v63, %v9125_v45  ;;  %v10190_v25 = vsub.f32 %v5417_v17, %v5417_v17 }
 0x2a2   : > { %v13566_v60 = vsel %vm10163_vm4, 4294967295, %v13565_v60  ;;  %13568 = vst [vmem:[#allocation195_spill] sm:$0xff] %v10167_v19  ;;  %5881 = vmatpush1.bf16.msk.msra.mxu0 %vm10163_vm4, %v13323_v1  ;;  %13569 = vst [vmem:[#allocation196_spill] sm:$0xff] %v10176_v62  ;;  %v10192_v8 = vsub.f32 %v5421_v43, %v5421_v43  ;;  %vm2221_vm4 = vcmp.eq.s32.totalorder %v13175_v33, %v9125_v45  ;;  %v5424_v39 = vsel %vm2217_vm6, 1.0, %v13325_v50 }
 0x2a3   : > { %13567 = vst [vmem:[#allocation194_spill] sm:$0xff] %v13566_v60  ;;  %vm10180_vm13 = vmpackc.low %vm2214_vm1, %vm2210_vm15  ;;  %v5428_v46 = vsel %vm2221_vm4, 1.0, %v13325_v50  ;;  %v13576_v9 = vmov 0  ;;  %vm2219_vm15 = vcmp.eq.s32.totalorder %v13573_v63, %v9131_v13  ;;  %v10210_v45 = vsub.f32 %v5424_v39, %v5424_v39 }
 0x2a4   : > { %v13571_v20 = vsel %vm10180_vm13, 4294967295, %v13570_v20  ;;  %6265 = vmatpush1.bf16.msk.msra.mxu1 %vm10180_vm13, %v13323_v1  ;;  %13574 = vst [vmem:[#allocation163_spill] sm:$0xff] %v10190_v25  ;;  %13575 = vst [vmem:[#allocation198_spill] sm:$0xff] %v10192_v8  ;;  %v10212_v60 = vsub.f32 %v5428_v46, %v5428_v46  ;;  %v5426_v42 = vsel %vm2219_vm15, 1.0, %v13325_v50  ;;  %vm2220_vm13 = vcmp.eq.s32.totalorder %v13175_v33, %v8918_v16 }
 0x2a5   : > { %13572 = vst [vmem:[#allocation197_spill] sm:$0xff] %v13571_v20  ;;  %vm10199_vm1 = vmpackc.low %vm2221_vm4, %vm2217_vm6  ;;  %vm2223_vm4 = vcmp.eq.s32.totalorder %v13175_v33, %v9131_v13  ;;  %vm2216_vm6 = vcmp.eq.s32.totalorder %v13573_v63, %v8918_v16  ;;  %v13580_v17 = vmov 0  ;;  %v10226_v46 = vsub.f32 %v5426_v42, %v5426_v42 }
 0x2a6   : > { %v13577_v9 = vsel %vm10199_vm1, 4294967295, %v13576_v9  ;;  %5883 = vmatprep.subr.msk.bf16.mxu0 %vm10199_vm1, %v13323_v1  ;;  %13579 = vst [vmem:[#allocation200_spill] sm:$0xff] %v10212_v60  ;;  %v5430_v43 = vsel %vm2223_vm4, 1.0, %v13325_v50  ;;  %vm10222_vm7 = vmpackc.low %vm2223_vm4, %vm2219_vm15  ;;  %v5423_v13 = vsel %vm2216_vm6, 1.0, %v13325_v50  ;;  %v5427_v39 = vsel %vm2220_vm13, 1.0, %v13325_v50 }
 0x2a7   : > { %13578 = vst [vmem:[#allocation199_spill] sm:$0xff] %v13577_v9  ;;  %v13581_v17 = vsel %vm10222_vm7, 4294967295, %v13580_v17  ;;  %13583 = vst [vmem:[#allocation202_spill] sm:$0xff] %v10226_v46  ;;  %6267 = vmatprep.subr.msk.bf16.mxu1 %vm10222_vm7, %v13323_v1  ;;  %v10233_v9 = vsub.f32 %v5430_v43, %v5430_v43  ;;  %v13585_v16 = vmov 0  ;;  %v10239_v20 = vsub.f32 %v5423_v13, %v5423_v13  ;;  %v2481_v13 = vld [vmem:[%s6919_s21 + $0x8] sm:$0xff] }
 0x2a8   : > { %13582 = vst [vmem:[#allocation201_spill] sm:$0xff] %v13581_v17  ;;  %vm10235_vm1 = vmpackc.low %vm2220_vm13, %vm2216_vm6  ;;  %v10241_v60 = vsub.f32 %v5427_v39, %v5427_v39  ;;  %vm2218_vm15 = vcmp.eq.s32.totalorder %v13573_v63, %v9129_v35  ;;  %vm2222_vm4 = vcmp.eq.s32.totalorder %v13175_v33, %v9129_v35  ;;  %v12508_v43 = vand.u32 4294901760, %v9160_v2 }
 0x2a9   : > { %13584 = vst [vmem:[#allocation203_spill] sm:$0xff] %v10233_v9  ;;  %v13586_v16 = vsel %vm10235_vm1, 4294967295, %v13585_v16  ;;  %13588 = vst [vmem:[#allocation205_spill] sm:$0xff] %v10239_v20  ;;  %5885 = vmatpush1.bf16.msk.msra.mxu0 %vm10235_vm1, %v13323_v1  ;;  %v5425_v42 = vsel %vm2218_vm15, 1.0, %v13325_v50  ;;  %v12509_v17 = vand.u32 4294901760, %v9162_v28  ;;  %v2480_v9 = vld [vmem:[%s6919_s21] sm:$0xff] }
 0x2aa   : > { %13587 = vst [vmem:[#allocation204_spill] sm:$0xff] %v13586_v16  ;;  %13589 = vst [vmem:[#allocation206_spill] sm:$0xff] %v10241_v60  ;;  %v5429_v63 = vsel %vm2222_vm4, 1.0, %v13325_v50  ;;  %v13590_v16 = vmov 0  ;;  %v10262_v8 = vsub.f32 %v5425_v42, %v5425_v42  ;;  %v2630_v35 = vsub.f32 %v9160_v2, %v12508_v43 }
 0x2ab   : > { %vm10258_vm13 = vmpackc.low %vm2222_vm4, %vm2218_vm15  ;;  %v10267_v33 = vsub.f32 %v5429_v63, %v5429_v63  ;;  %v2642_v50 = vsub.f32 %v9162_v28, %v12509_v17  ;;  %v12518_v46 = vand.u32 4294901760, %v9173_v44  ;;  %v12521_v42 = vand.u32 4294901760, %v9175_v51 }
 0x2ac   : > { %v13591_v16 = vsel %vm10258_vm13, 4294967295, %v13590_v16  ;;  %13593 = vst [vmem:[#allocation208_spill] sm:$0xff] %v10262_v8  ;;  %6269 = vmatpush1.bf16.msk.msra.mxu1 %vm10258_vm13, %v13323_v1  ;;  %v10278_v60 = vand.u32 4294901760, %v2481_v13  ;;  %v2631_v1 = vand.u32 4294901760, %v2630_v35  ;;  %v13599_v2 = vand.u32 4294901760, %v8971_v52 }
 0x2ad   : > { %13592 = vst [vmem:[#allocation207_spill] sm:$0xff] %v13591_v16  ;;  %13594 = vst [vmem:[#allocation209_spill] sm:$0xff] %v10267_v33  ;;  %v10280_v16 = vand.u32 4294901760, %v2480_v9  ;;  %v2643_v20 = vand.u32 4294901760, %v2642_v50  ;;  %v3914_v43 = vsub.f32 %v9173_v44, %v12518_v46  ;;  %v3926_v17 = vsub.f32 %v9175_v51, %v12521_v42 }
 0x2ae   : > { %13595 = vst [vmem:[#allocation210_spill] sm:$0xff] %v10278_v60  ;;  %v10290_v39 = vsub.f32 %v2481_v13, %v10278_v60  ;;  %v13600_v63 = vand.u32 4294901760, %v8979_v7  ;;  %v13601_v8 = vand.u32 4294901760, %v9249_v5  ;;  %v13602_v46 = vand.u32 4294901760, %v9265_v37 }
 0x2af   : > { %13596 = vst [vmem:[#allocation211_spill] sm:$0xff] %v10280_v16  ;;  %v10293_v28 = vsub.f32 %v2480_v9, %v10280_v16  ;;  %v5886_v50 = vpack.c.bf16 %v2643_v20, %v2631_v1  ;;  %v3915_v33 = vand.u32 4294901760, %v3914_v43  ;;  %v12524_v42 = vand.u32 4294901760, %v9208_v47 }
 0x2b0   : > { %13597 = vst [vmem:[#allocation212_spill] sm:$0xff] %v10290_v39  ;;  %v5888_v35 = vpack.c.bf16 %v13600_v63, %v13599_v2  ;;  %v6272_v44 = vpack.c.bf16 %v13602_v46, %v13601_v8  ;;  %v3927_v51 = vand.u32 4294901760, %v3926_v17  ;;  %v10305_v13 = vand.u32 4294901760, %v10290_v39 }
 0x2b1   : > { %13598 = vst [vmem:[#allocation213_spill] sm:$0xff] %v10293_v28  ;;  %v10308_v9 = vand.u32 4294901760, %v10293_v28  ;;  %v12531_v52 = vand.u32 4294901760, %v9210_v21  ;;  %5887 = vmatprep.subr.bf16.mxu0 %v5886_v50  ;;  %v2654_v7 = vsub.f32 %v9208_v47, %v12524_v42  ;;  %v12534_v1 = vand.u32 4294901760, %v9239_v11 }
 0x2b2   : > { %13603 = vst [vmem:[#allocation214_spill] sm:$0xff] %v10305_v13  ;;  %v12541_v2 = vand.u32 4294901760, %v9254_v54  ;;  %v13605_v5 = vand.u32 4294901760, %v9016_v36  ;;  %v6270_v20 = vpack.c.bf16 %v3927_v51, %v3915_v33  ;;  %v2613_v8 = vsub.f32 %v10290_v39, %v10305_v13 }
 0x2b3   : > { %13604 = vst [vmem:[#allocation215_spill] sm:$0xff] %v10308_v9  ;;  %v2619_v17 = vsub.f32 %v10293_v28, %v10308_v9  ;;  %v2666_v46 = vsub.f32 %v9210_v21, %v12531_v52  ;;  %v2655_v43 = vand.u32 4294901760, %v2654_v7  ;;  %v3938_v63 = vsub.f32 %v9239_v11, %v12534_v1 }
 0x2b4   : > { %v2660_v37 = vsub.f32 %v9016_v36, %v13605_v5  ;;  %v3950_v50 = vsub.f32 %v9254_v54, %v12541_v2  ;;  %6271 = vmatprep.subr.bf16.mxu1 %v6270_v20  ;;  %v2614_v33 = vand.u32 4294901760, %v2613_v8  ;;  %v13606_v9 = vand.u32 4294901760, %v9021_v10 }
 0x2b5   : > { %v2620_v5 = vand.u32 4294901760, %v2619_v17  ;;  %v2667_v42 = vand.u32 4294901760, %v2666_v46  ;;  %v3939_v28 = vand.u32 4294901760, %v3938_v63  ;;  %v13607_v7 = vand.u32 4294901760, %v9270_v24 }
 0x2b6   : > { %v2661_v51 = vand.u32 4294901760, %v2660_v37  ;;  %v2672_v13 = vsub.f32 %v9021_v10, %v13606_v9  ;;  %v3951_v52 = vand.u32 4294901760, %v3950_v50  ;;  %v13608_v1 = vand.u32 4294901760, %v9272_v23  ;;  %2615 = vmatprep.mubr.f32.mxu0 %v2614_v33  ;;  %3899 = vmatprep.mubr.f32.mxu1 %v2614_v33 }
 0x2b7   : > { %v3944_v39 = vsub.f32 %v9270_v24, %v13607_v7  ;;  %v5890_v37 = vpack.c.bf16 %v2667_v42, %v2655_v43  ;;  %v12540_v8 = vand.u32 4294901760, %v9293_v26  ;;  %v12539_v17 = vand.u32 4294901760, %v9295_v57  ;;  %2621 = vmatmul.mubr.f32.vlgmr.msra.gmra.mrb[0].mxu0 %v2620_v5  ;;  %3905 = vmatmul.mubr.f32.vlgmr.msra.gmra.mrb[0].mxu1 %v2620_v5 }
 0x2b8   : > { %v3956_v36 = vsub.f32 %v9272_v23, %v13608_v1  ;;  %v2673_v20 = vand.u32 4294901760, %v2672_v13  ;;  %v6274_v9 = vpack.c.bf16 %v3951_v52, %v3939_v28  ;;  %v12538_v50 = vand.u32 4294901760, %v9315_v15  ;;  %5889 = vmatpush1.bf16.msra.mxu0 %v5888_v35  ;;  %6273 = vmatpush1.bf16.msra.mxu1 %v6272_v44 }
 0x2b9   : > { %v3945_v46 = vand.u32 4294901760, %v3944_v39  ;;  %v2678_v1 = vsub.f32 %v9293_v26, %v12540_v8  ;;  %v2690_v42 = vsub.f32 %v9295_v57, %v12539_v17  ;;  %v12537_v13 = vand.u32 4294901760, %v9327_v18  ;;  %5891 = vmatprep.subr.bf16.mxu0 %v5890_v37  ;;  %3012 = vmatprep.mubr.f32.mxu0 %v10278_v60 }
 0x2ba   : > { %v3957_v63 = vand.u32 4294901760, %v3956_v36  ;;  %v5892_v7 = vpack.c.bf16 %v2673_v20, %v2661_v51  ;;  %6275 = vmatprep.subr.bf16.mxu1 %v6274_v9  ;;  %v3962_v36 = vsub.f32 %v9315_v15, %v12538_v50  ;;  %v13609_v44 = vand.u32 4294901760, %v9058_v12  ;;  %4296 = vmatprep.mubr.f32.mxu1 %v10278_v60 }
 0x2bb   : > { %v12549_v35 = vand.u32 4294901760, %v9362_v40  ;;  %v2679_v52 = vand.u32 4294901760, %v2678_v1  ;;  %v2691_v43 = vand.u32 4294901760, %v2690_v42  ;;  %v3974_v51 = vsub.f32 %v9327_v18, %v12537_v13 }
 0x2bc   : > { %v6276_v28 = vpack.c.bf16 %v3957_v63, %v3945_v46  ;;  %v2684_v39 = vsub.f32 %v9058_v12, %v13609_v44  ;;  %v13610_v33 = vand.u32 4294901760, %v9063_v6  ;;  %v3963_v37 = vand.u32 4294901760, %v3962_v36  ;;  %5893 = vmatpush1.bf16.msra.mxu0 %v5892_v7 }
 0x2bd   : > { %v13611_v9 = vand.u32 4294901760, %v9340_v38  ;;  %v13612_v63 = vand.u32 4294901760, %v9342_v55  ;;  %v5894_v42 = vpack.c.bf16 %v2691_v43, %v2679_v52  ;;  %v3975_v44 = vand.u32 4294901760, %v3974_v51 }
 0x2be   : > { %v2696_v5 = vsub.f32 %v9063_v6, %v13610_v33  ;;  %v2685_v20 = vand.u32 4294901760, %v2684_v39  ;;  %6277 = vmatpush1.bf16.msra.mxu1 %v6276_v28  ;;  %v2702_v33 = vsub.f32 %v9362_v40, %v12549_v35  ;;  %v12544_v39 = vand.u32 4294901760, %v9373_v32  ;;  %v13704_v40 = vld [vmem:[#allocation172_spill] sm:$0xff] }
 0x2bf   : > { %v3968_v46 = vsub.f32 %v9340_v38, %v13611_v9  ;;  %v3980_v1 = vsub.f32 %v9342_v55, %v13612_v63  ;;  %v12543_v17 = vand.u32 4294901760, %v9384_v61  ;;  %5895 = vmatprep.subr.bf16.mxu0 %v5894_v42  ;;  %v6278_v9 = vpack.c.bf16 %v3975_v44, %v3963_v37  ;;  %v13705_v55 = vld [vmem:[#allocation173_spill] sm:$0xff] }
 0x2c0   : > { %v2697_v13 = vand.u32 4294901760, %v2696_v5  ;;  %v2703_v2 = vand.u32 4294901760, %v2702_v33  ;;  %v12542_v7 = vand.u32 4294901760, %v9393_v29  ;;  %v2714_v52 = vsub.f32 %v9373_v32, %v12544_v39 }
 0x2c1   : > { %v3969_v50 = vand.u32 4294901760, %v3968_v46  ;;  %v3981_v36 = vand.u32 4294901760, %v3980_v1  ;;  %v3986_v43 = vsub.f32 %v9384_v61, %v12543_v17  ;;  %v13613_v51 = vand.u32 4294901760, %v9087_v48  ;;  %6279 = vmatprep.subr.bf16.mxu1 %v6278_v9 }
 0x2c2   : > { %v5896_v8 = vpack.c.bf16 %v2697_v13, %v2685_v20  ;;  %v3998_v13 = vsub.f32 %v9393_v29, %v12542_v7  ;;  %v13615_v20 = vand.u32 4294901760, %v9406_v14  ;;  %v12548_v63 = vand.u32 4294901760, %v9428_v0  ;;  %v13693_v29 = vld [vmem:[#allocation153_spill] sm:$0xff] }
 0x2c3   : > { %v6280_v28 = vpack.c.bf16 %v3981_v36, %v3969_v50  ;;  %v2708_v5 = vsub.f32 %v9087_v48, %v13613_v51  ;;  %v13614_v50 = vand.u32 4294901760, %v9091_v30  ;;  %v2715_v1 = vand.u32 4294901760, %v2714_v52  ;;  %v13692_v48 = vld [vmem:[#allocation150_spill] sm:$0xff] }
 0x2c4   : > { %5897 = vmatpush1.bf16.msra.mxu0 %v5896_v8  ;;  %v3992_v46 = vsub.f32 %v9406_v14, %v13615_v20  ;;  %v3987_v42 = vand.u32 4294901760, %v3986_v43  ;;  %v13616_v8 = vand.u32 4294901760, %v9408_v31  ;;  %v3999_v36 = vand.u32 4294901760, %v3998_v13 }
 0x2c5   : > { %v2720_v37 = vsub.f32 %v9091_v30, %v13614_v50  ;;  %6281 = vmatpush1.bf16.msra.mxu1 %v6280_v28  ;;  %v2709_v44 = vand.u32 4294901760, %v2708_v5  ;;  %v2726_v50 = vsub.f32 %v9428_v0, %v12548_v63  ;;  %v5898_v7 = vpack.c.bf16 %v2715_v1, %v2703_v2  ;;  %v13621_v63 = vld [vmem:[#allocation27_spill] sm:$0xff]  ;;  %v13680_v0 = vld [vmem:[#allocation138_spill] sm:$0xff] }
 0x2c6   : > { %v4004_v33 = vsub.f32 %v9408_v31, %v13616_v8  ;;  %v3993_v51 = vand.u32 4294901760, %v3992_v46  ;;  %v12547_v20 = vand.u32 4294901760, %v9439_v53  ;;  %v12546_v28 = vand.u32 4294901760, %v9450_v22  ;;  %v13681_v31 = vld [vmem:[#allocation139_spill] sm:$0xff] }
 0x2c7   : > { %v2721_v9 = vand.u32 4294901760, %v2720_v37  ;;  %v6282_v52 = vpack.c.bf16 %v3999_v36, %v3987_v42  ;;  %v2727_v5 = vand.u32 4294901760, %v2726_v50  ;;  %v12545_v39 = vand.u32 4294901760, %v9459_v59  ;;  %5899 = vmatprep.subr.bf16.mxu0 %v5898_v7 }
 0x2c8   : > { %v4005_v17 = vand.u32 4294901760, %v4004_v33  ;;  %v2738_v13 = vsub.f32 %v9439_v53, %v12547_v20  ;;  %v4010_v2 = vsub.f32 %v9450_v22, %v12546_v28  ;;  %v13617_v37 = vand.u32 4294901760, %v9107_v49 }
 0x2c9   : > { %v5900_v43 = vpack.c.bf16 %v2721_v9, %v2709_v44  ;;  %6283 = vmatprep.subr.bf16.mxu1 %v6282_v52  ;;  %v4022_v1 = vsub.f32 %v9459_v59, %v12545_v39  ;;  %v13619_v42 = vand.u32 4294901760, %v9472_v58  ;;  %v12552_v33 = vand.u32 4294901760, %v9494_v34  ;;  %v13669_v59 = vld [vmem:[#allocation70_spill] sm:$0xff] }
 0x2ca   : > { %v6284_v8 = vpack.c.bf16 %v4005_v17, %v3993_v51  ;;  %v2732_v46 = vsub.f32 %v9107_v49, %v13617_v37  ;;  %v13618_v17 = vand.u32 4294901760, %v9109_v41  ;;  %v2739_v36 = vand.u32 4294901760, %v2738_v13  ;;  %v13668_v49 = vld [vmem:[#allocation69_spill] sm:$0xff] }
 0x2cb   : > { %5901 = vmatpush1.bf16.msra.mxu0 %v5900_v43  ;;  %v4016_v44 = vsub.f32 %v9472_v58, %v13619_v42  ;;  %v4011_v9 = vand.u32 4294901760, %v4010_v2  ;;  %v13620_v50 = vand.u32 4294901760, %v9474_v27  ;;  %v4023_v43 = vand.u32 4294901760, %v4022_v1 }
 0x2cc   : > { %v2744_v7 = vsub.f32 %v9109_v41, %v13618_v17  ;;  %6285 = vmatpush1.bf16.msra.mxu1 %v6284_v8  ;;  %v2733_v51 = vand.u32 4294901760, %v2732_v46  ;;  %v2750_v17 = vsub.f32 %v9494_v34, %v12552_v33  ;;  %v5902_v28 = vpack.c.bf16 %v2739_v36, %v2727_v5 }
 0x2cd   : > { %v4028_v52 = vsub.f32 %v9474_v27, %v13620_v50  ;;  %v4017_v39 = vand.u32 4294901760, %v4016_v44  ;;  %v12551_v42 = vand.u32 4294901760, %v9505_v4  ;;  %v12550_v8 = vand.u32 4294901760, %v9516_v3  ;;  %v13657_v27 = vld [vmem:[#allocation59_spill] sm:$0xff] }
 0x2ce   : > { %v2745_v37 = vand.u32 4294901760, %v2744_v7  ;;  %v6286_v13 = vpack.c.bf16 %v4023_v43, %v4011_v9  ;;  %v2751_v46 = vand.u32 4294901760, %v2750_v17  ;;  %v12555_v35 = vand.u32 4294901760, %v13621_v63  ;;  %5903 = vmatprep.subr.bf16.mxu0 %v5902_v28  ;;  %v13622_v7 = vld [vmem:[#allocation84_spill] sm:$0xff]  ;;  %v13624_v28 = vld [vmem:[#allocation26_spill] sm:$0xff] }
 0x2cf   : > { %v4029_v20 = vand.u32 4294901760, %v4028_v52  ;;  %v2762_v1 = vsub.f32 %v9505_v4, %v12551_v42  ;;  %v4034_v5 = vsub.f32 %v9516_v3, %v12550_v8  ;;  %v13623_v44 = vand.u32 4294901760, %v13622_v7  ;;  %v13632_v3 = vld [vmem:[#allocation34_spill] sm:$0xff]  ;;  %v13633_v4 = vld [vmem:[#allocation35_spill] sm:$0xff] }
 0x2d0   : > { %v5904_v2 = vpack.c.bf16 %v2745_v37, %v2733_v51  ;;  %6287 = vmatprep.subr.bf16.mxu1 %v6286_v13  ;;  %v4046_v9 = vsub.f32 %v13621_v63, %v12555_v35  ;;  %v13626_v51 = vld [vmem:[#allocation29_spill] sm:$0xff]  ;;  %v13629_v13 = vld [vmem:[#allocation30_spill] sm:$0xff]  ;;  %v12570_v34 = vand.u32 4294901760, %v13633_v4  ;;  %v12596_v58 = vand.u32 4294901760, %v13657_v27 }
 0x2d1   : > { %v6288_v50 = vpack.c.bf16 %v4029_v20, %v4017_v39  ;;  %v2756_v36 = vsub.f32 %v13622_v7, %v13623_v44  ;;  %v13625_v39 = vand.u32 4294901760, %v13624_v28  ;;  %v13627_v52 = vand.u32 4294901760, %v13626_v51  ;;  %v13628_v37 = vld [vmem:[#allocation129_spill] sm:$0xff] }
 0x2d2   : > { %5905 = vmatpush1.bf16.msra.mxu0 %v5904_v2  ;;  %v12568_v17 = vand.u32 4294901760, %v13628_v37  ;;  %v2763_v8 = vand.u32 4294901760, %v2762_v1  ;;  %v4035_v42 = vand.u32 4294901760, %v4034_v5  ;;  %v13630_v2 = vand.u32 4294901760, %v13629_v13 }
 0x2d3   : > { %v2768_v20 = vsub.f32 %v13624_v28, %v13625_v39  ;;  %v4040_v43 = vsub.f32 %v13626_v51, %v13627_v52  ;;  %6289 = vmatpush1.bf16.msra.mxu1 %v6288_v50  ;;  %v2757_v44 = vand.u32 4294901760, %v2756_v36  ;;  %v4047_v60 = vand.u32 4294901760, %v4046_v9  ;;  %v13631_v52 = vld [vmem:[#allocation32_spill] sm:$0xff] }
 0x2d4   : > { %v4052_v33 = vsub.f32 %v13629_v13, %v13630_v2  ;;  %v2774_v39 = vsub.f32 %v13628_v37, %v12568_v17  ;;  %v5906_v28 = vpack.c.bf16 %v2763_v8, %v2751_v46  ;;  %v12567_v51 = vand.u32 4294901760, %v13631_v52  ;;  %v13645_v37 = vld [vmem:[#allocation47_spill] sm:$0xff] }
 0x2d5   : > { %v2769_v35 = vand.u32 4294901760, %v2768_v20  ;;  %v4041_v7 = vand.u32 4294901760, %v4040_v43  ;;  %v12566_v50 = vand.u32 4294901760, %v13632_v3  ;;  %v6290_v1 = vpack.c.bf16 %v4047_v60, %v4035_v42 }
 0x2d6   : > { %v4053_v63 = vand.u32 4294901760, %v4052_v33  ;;  %v2775_v36 = vand.u32 4294901760, %v2774_v39  ;;  %5907 = vmatprep.subr.bf16.mxu0 %v5906_v28  ;;  %v2786_v9 = vsub.f32 %v13631_v52, %v12567_v51  ;;  %v13634_v33 = vld [vmem:[#allocation37_spill] sm:$0xff]  ;;  %v4070_v60 = vsub.f32 %v13633_v4, %v12570_v34  ;;  %v13644_v52 = vld [vmem:[#allocation46_spill] sm:$0xff] }
 0x2d7   : > { %v5908_v5 = vpack.c.bf16 %v2769_v35, %v2757_v44  ;;  %v4058_v8 = vsub.f32 %v13632_v3, %v12566_v50  ;;  %v13635_v46 = vand.u32 4294901760, %v13634_v33  ;;  %6291 = vmatprep.subr.bf16.mxu1 %v6290_v1  ;;  %v13636_v35 = vld [vmem:[#allocation38_spill] sm:$0xff]  ;;  %v13640_v44 = vld [vmem:[#allocation43_spill] sm:$0xff]  ;;  %v13641_v1 = vld [vmem:[#allocation41_spill] sm:$0xff]  ;;  %v12582_v13 = vand.u32 4294901760, %v13645_v37 }
 0x2d8   : > { %v6292_v2 = vpack.c.bf16 %v4053_v63, %v4041_v7  ;;  %v13637_v63 = vand.u32 4294901760, %v13636_v35  ;;  %v13638_v7 = vld [vmem:[#allocation40_spill] sm:$0xff]  ;;  %v12580_v39 = vand.u32 4294901760, %v13640_v44  ;;  %v2787_v50 = vand.u32 4294901760, %v2786_v9 }
 0x2d9   : > { %v2780_v20 = vsub.f32 %v13634_v33, %v13635_v46  ;;  %5909 = vmatpush1.bf16.msra.mxu0 %v5908_v5  ;;  %v13639_v28 = vand.u32 4294901760, %v13638_v7  ;;  %v4059_v51 = vand.u32 4294901760, %v4058_v8  ;;  %v13642_v5 = vand.u32 4294901760, %v13641_v1 }
 0x2da   : > { %v2792_v42 = vsub.f32 %v13636_v35, %v13637_v63  ;;  %6293 = vmatpush1.bf16.msra.mxu1 %v6292_v2  ;;  %v4071_v33 = vand.u32 4294901760, %v4070_v60  ;;  %v2798_v63 = vsub.f32 %v13640_v44, %v12580_v39  ;;  %v5910_v35 = vpack.c.bf16 %v2787_v50, %v2775_v36 }
 0x2db   : > { %v4064_v43 = vsub.f32 %v13638_v7, %v13639_v28  ;;  %v2781_v46 = vand.u32 4294901760, %v2780_v20  ;;  %v4076_v17 = vsub.f32 %v13641_v1, %v13642_v5  ;;  %v13643_v28 = vld [vmem:[#allocation44_spill] sm:$0xff]  ;;  %v12578_v2 = vand.u32 4294901760, %v13644_v52  ;;  %v13656_v1 = vld [vmem:[#allocation58_spill] sm:$0xff] }
 0x2dc   : > { %v2793_v34 = vand.u32 4294901760, %v2792_v42  ;;  %v12579_v7 = vand.u32 4294901760, %v13643_v28  ;;  %v6294_v9 = vpack.c.bf16 %v4071_v33, %v4059_v51  ;;  %v2799_v20 = vand.u32 4294901760, %v2798_v63  ;;  %5911 = vmatprep.subr.bf16.mxu0 %v5910_v35  ;;  %v13648_v51 = vld [vmem:[#allocation50_spill] sm:$0xff]  ;;  %v13650_v33 = vld [vmem:[#allocation52_spill] sm:$0xff] }
 0x2dd   : > { %v4065_v4 = vand.u32 4294901760, %v4064_v43  ;;  %v4077_v3 = vand.u32 4294901760, %v4076_v17  ;;  %v4082_v50 = vsub.f32 %v13644_v52, %v12578_v2  ;;  %v13646_v17 = vld [vmem:[#allocation49_spill] sm:$0xff]  ;;  %v13651_v35 = vand.u32 4294901760, %v13650_v33 }
 0x2de   : > { %v5912_v8 = vpack.c.bf16 %v2793_v34, %v2781_v46  ;;  %v2810_v60 = vsub.f32 %v13643_v28, %v12579_v7  ;;  %v13647_v36 = vand.u32 4294901760, %v13646_v17  ;;  %6295 = vmatprep.subr.bf16.mxu1 %v6294_v9  ;;  %v4094_v34 = vsub.f32 %v13645_v37, %v12582_v13  ;;  %v13652_v46 = vld [vmem:[#allocation55_spill] sm:$0xff]  ;;  %v13653_v9 = vld [vmem:[#allocation53_spill] sm:$0xff] }
 0x2df   : > { %v6296_v5 = vpack.c.bf16 %v4077_v3, %v4065_v4  ;;  %v13649_v4 = vand.u32 4294901760, %v13648_v51  ;;  %v4088_v43 = vsub.f32 %v13650_v33, %v13651_v35  ;;  %v12594_v63 = vand.u32 4294901760, %v13652_v46  ;;  %v13655_v35 = vld [vmem:[#allocation56_spill] sm:$0xff] }
 0x2e0   : > { %v2804_v42 = vsub.f32 %v13646_v17, %v13647_v36  ;;  %5913 = vmatpush1.bf16.msra.mxu0 %v5912_v8  ;;  %v2811_v2 = vand.u32 4294901760, %v2810_v60  ;;  %v4083_v7 = vand.u32 4294901760, %v4082_v50  ;;  %v13654_v8 = vand.u32 4294901760, %v13653_v9 }
 0x2e1   : > { %v2816_v3 = vsub.f32 %v13648_v51, %v13649_v4  ;;  %6297 = vmatpush1.bf16.msra.mxu1 %v6296_v5  ;;  %v4095_v17 = vand.u32 4294901760, %v4094_v34  ;;  %v4089_v28 = vand.u32 4294901760, %v4088_v43  ;;  %v2822_v4 = vsub.f32 %v13652_v46, %v12594_v63 }
 0x2e2   : > { %v2805_v36 = vand.u32 4294901760, %v2804_v42  ;;  %v4100_v39 = vsub.f32 %v13653_v9, %v13654_v8  ;;  %v5914_v51 = vpack.c.bf16 %v2811_v2, %v2799_v20  ;;  %v12593_v33 = vand.u32 4294901760, %v13655_v35 }
 0x2e3   : > { %v2817_v13 = vand.u32 4294901760, %v2816_v3  ;;  %v12592_v5 = vand.u32 4294901760, %v13656_v1  ;;  %v6298_v60 = vpack.c.bf16 %v4095_v17, %v4083_v7  ;;  %v2823_v42 = vand.u32 4294901760, %v2822_v4  ;;  %v13660_v7 = vld [vmem:[#allocation62_spill] sm:$0xff] }
 0x2e4   : > { %v4101_v44 = vand.u32 4294901760, %v4100_v39  ;;  %5915 = vmatprep.subr.bf16.mxu0 %v5914_v51  ;;  %v2834_v34 = vsub.f32 %v13655_v35, %v12593_v33  ;;  %v13658_v39 = vld [vmem:[#allocation61_spill] sm:$0xff]  ;;  %v13662_v17 = vld [vmem:[#allocation130_spill] sm:$0xff]  ;;  %v12612_v22 = vand.u32 4294901760, %v13669_v59  ;;  %v12628_v14 = vand.u32 4294901760, %v13681_v31 }
 0x2e5   : > { %v5916_v50 = vpack.c.bf16 %v2817_v13, %v2805_v36  ;;  %v4106_v2 = vsub.f32 %v13656_v1, %v12592_v5  ;;  %v13659_v20 = vand.u32 4294901760, %v13658_v39  ;;  %6299 = vmatprep.subr.bf16.mxu1 %v6298_v60  ;;  %v4118_v13 = vsub.f32 %v13657_v27, %v12596_v58  ;;  %v13664_v36 = vld [vmem:[#allocation66_spill] sm:$0xff]  ;;  %v13665_v60 = vld [vmem:[#allocation64_spill] sm:$0xff] }
 0x2e6   : > { %v6300_v8 = vpack.c.bf16 %v4101_v44, %v4089_v28  ;;  %v13661_v44 = vand.u32 4294901760, %v13660_v7  ;;  %v13663_v51 = vand.u32 4294901760, %v13662_v17  ;;  %v12610_v4 = vand.u32 4294901760, %v13664_v36 }
 0x2e7   : > { %v2828_v3 = vsub.f32 %v13658_v39, %v13659_v20  ;;  %5917 = vmatpush1.bf16.msra.mxu0 %v5916_v50  ;;  %v2835_v5 = vand.u32 4294901760, %v2834_v34  ;;  %v4107_v33 = vand.u32 4294901760, %v4106_v2  ;;  %v13666_v50 = vand.u32 4294901760, %v13665_v60 }
 0x2e8   : > { %v2840_v28 = vsub.f32 %v13660_v7, %v13661_v44  ;;  %v4112_v43 = vsub.f32 %v13662_v17, %v13663_v51  ;;  %6301 = vmatpush1.bf16.msra.mxu1 %v6300_v8  ;;  %v4119_v39 = vand.u32 4294901760, %v4118_v13  ;;  %v2846_v44 = vsub.f32 %v13664_v36, %v12610_v4  ;;  %v13667_v51 = vld [vmem:[#allocation67_spill] sm:$0xff] }
 0x2e9   : > { %v2829_v20 = vand.u32 4294901760, %v2828_v3  ;;  %v4124_v63 = vsub.f32 %v13665_v60, %v13666_v50  ;;  %v5918_v7 = vpack.c.bf16 %v2835_v5, %v2823_v42  ;;  %v12609_v17 = vand.u32 4294901760, %v13667_v51 }
 0x2ea   : > { %v2841_v58 = vand.u32 4294901760, %v2840_v28  ;;  %v4113_v9 = vand.u32 4294901760, %v4112_v43  ;;  %v12608_v8 = vand.u32 4294901760, %v13668_v49  ;;  %v6302_v34 = vpack.c.bf16 %v4119_v39, %v4107_v33  ;;  %v13672_v33 = vld [vmem:[#allocation73_spill] sm:$0xff]  ;;  %v13674_v39 = vld [vmem:[#allocation132_spill] sm:$0xff] }
 0x2eb   : > { %v4125_v41 = vand.u32 4294901760, %v4124_v63  ;;  %v2847_v3 = vand.u32 4294901760, %v2846_v44  ;;  %5919 = vmatprep.subr.bf16.mxu0 %v5918_v7  ;;  %v2858_v13 = vsub.f32 %v13667_v51, %v12609_v17  ;;  %v13670_v63 = vld [vmem:[#allocation72_spill] sm:$0xff]  ;;  %v13675_v7 = vand.u32 4294901760, %v13674_v39 }
 0x2ec   : > { %v5920_v2 = vpack.c.bf16 %v2841_v58, %v2829_v20  ;;  %v4130_v5 = vsub.f32 %v13668_v49, %v12608_v8  ;;  %v13671_v42 = vand.u32 4294901760, %v13670_v63  ;;  %6303 = vmatprep.subr.bf16.mxu1 %v6302_v34  ;;  %v4142_v58 = vsub.f32 %v13669_v59, %v12612_v22  ;;  %v13676_v20 = vld [vmem:[#allocation135_spill] sm:$0xff]  ;;  %v13677_v34 = vld [vmem:[#allocation133_spill] sm:$0xff] }
 0x2ed   : > { %v6304_v50 = vpack.c.bf16 %v4125_v41, %v4113_v9  ;;  %v13673_v41 = vand.u32 4294901760, %v13672_v33  ;;  %v4136_v43 = vsub.f32 %v13674_v39, %v13675_v7  ;;  %v12625_v44 = vand.u32 4294901760, %v13676_v20  ;;  %v13679_v7 = vld [vmem:[#allocation136_spill] sm:$0xff] }
 0x2ee   : > { %v2852_v28 = vsub.f32 %v13670_v63, %v13671_v42  ;;  %5921 = vmatpush1.bf16.msra.mxu0 %v5920_v2  ;;  %v2859_v8 = vand.u32 4294901760, %v2858_v13  ;;  %v4131_v17 = vand.u32 4294901760, %v4130_v5  ;;  %v13678_v2 = vand.u32 4294901760, %v13677_v34 }
 0x2ef   : > { %v2864_v9 = vsub.f32 %v13672_v33, %v13673_v41  ;;  %6305 = vmatpush1.bf16.msra.mxu1 %v6304_v50  ;;  %v4143_v63 = vand.u32 4294901760, %v4142_v58  ;;  %v4137_v60 = vand.u32 4294901760, %v4136_v43  ;;  %v2870_v41 = vsub.f32 %v13676_v20, %v12625_v44 }
 0x2f0   : > { %v2853_v42 = vand.u32 4294901760, %v2852_v28  ;;  %v4148_v4 = vsub.f32 %v13677_v34, %v13678_v2  ;;  %v5922_v33 = vpack.c.bf16 %v2859_v8, %v2847_v3  ;;  %v12624_v39 = vand.u32 4294901760, %v13679_v7 }
 0x2f1   : > { %v2865_v22 = vand.u32 4294901760, %v2864_v9  ;;  %v12626_v50 = vand.u32 4294901760, %v13680_v0  ;;  %v6306_v13 = vpack.c.bf16 %v4143_v63, %v4131_v17  ;;  %v2871_v28 = vand.u32 4294901760, %v2870_v41  ;;  %v13684_v17 = vld [vmem:[#allocation142_spill] sm:$0xff]  ;;  %v13686_v63 = vld [vmem:[#allocation144_spill] sm:$0xff] }
 0x2f2   : > { %v4149_v53 = vand.u32 4294901760, %v4148_v4  ;;  %5923 = vmatprep.subr.bf16.mxu0 %v5922_v33  ;;  %v2882_v58 = vsub.f32 %v13679_v7, %v12624_v39  ;;  %v13682_v4 = vld [vmem:[#allocation141_spill] sm:$0xff]  ;;  %v13687_v33 = vand.u32 4294901760, %v13686_v63  ;;  %v12644_v61 = vand.u32 4294901760, %v13693_v29 }
 0x2f3   : > { %v5924_v5 = vpack.c.bf16 %v2865_v22, %v2853_v42  ;;  %v4154_v8 = vsub.f32 %v13680_v0, %v12626_v50  ;;  %v13683_v3 = vand.u32 4294901760, %v13682_v4  ;;  %6307 = vmatprep.subr.bf16.mxu1 %v6306_v13  ;;  %v4166_v22 = vsub.f32 %v13681_v31, %v12628_v14  ;;  %v13688_v42 = vld [vmem:[#allocation147_spill] sm:$0xff]  ;;  %v13689_v13 = vld [vmem:[#allocation145_spill] sm:$0xff] }
 0x2f4   : > { %v6308_v2 = vpack.c.bf16 %v4149_v53, %v4137_v60  ;;  %v13685_v53 = vand.u32 4294901760, %v13684_v17  ;;  %v4160_v43 = vsub.f32 %v13686_v63, %v13687_v33  ;;  %v12642_v41 = vand.u32 4294901760, %v13688_v42  ;;  %v13691_v33 = vld [vmem:[#allocation148_spill] sm:$0xff] }
 0x2f5   : > { %v2876_v9 = vsub.f32 %v13682_v4, %v13683_v3  ;;  %5925 = vmatpush1.bf16.msra.mxu0 %v5924_v5  ;;  %v2883_v39 = vand.u32 4294901760, %v2882_v58  ;;  %v4155_v44 = vand.u32 4294901760, %v4154_v8  ;;  %v13690_v5 = vand.u32 4294901760, %v13689_v13 }
 0x2f6   : > { %v2888_v60 = vsub.f32 %v13684_v17, %v13685_v53  ;;  %6309 = vmatpush1.bf16.msra.mxu1 %v6308_v2  ;;  %v4167_v34 = vand.u32 4294901760, %v4166_v22  ;;  %v4161_v4 = vand.u32 4294901760, %v4160_v43  ;;  %v2894_v53 = vsub.f32 %v13688_v42, %v12642_v41 }
 0x2f7   : > { %v2877_v3 = vand.u32 4294901760, %v2876_v9  ;;  %v4172_v50 = vsub.f32 %v13689_v13, %v13690_v5  ;;  %v5926_v17 = vpack.c.bf16 %v2883_v39, %v2871_v28  ;;  %v12641_v63 = vand.u32 4294901760, %v13691_v33 }
 0x2f8   : > { %v2889_v14 = vand.u32 4294901760, %v2888_v60  ;;  %v12640_v2 = vand.u32 4294901760, %v13692_v48  ;;  %v6310_v58 = vpack.c.bf16 %v4167_v34, %v4155_v44  ;;  %v2895_v9 = vand.u32 4294901760, %v2894_v53  ;;  %v13696_v44 = vld [vmem:[#allocation166_spill] sm:$0xff] }
 0x2f9   : > { %v4173_v30 = vand.u32 4294901760, %v4172_v50  ;;  %5927 = vmatprep.subr.bf16.mxu0 %v5926_v17  ;;  %v2906_v22 = vsub.f32 %v13691_v33, %v12641_v63  ;;  %v13694_v50 = vld [vmem:[#allocation165_spill] sm:$0xff]  ;;  %v12660_v38 = vand.u32 4294901760, %v13705_v55 }
 0x2fa   : > { %v5928_v8 = vpack.c.bf16 %v2889_v14, %v2877_v3  ;;  %v4178_v39 = vsub.f32 %v13692_v48, %v12640_v2  ;;  %v13695_v28 = vand.u32 4294901760, %v13694_v50  ;;  %6311 = vmatprep.subr.bf16.mxu1 %v6310_v58  ;;  %v4190_v14 = vsub.f32 %v13693_v29, %v12644_v61  ;;  %v13700_v3 = vld [vmem:[#allocation169_spill] sm:$0xff]  ;;  %v13701_v58 = vld [vmem:[#allocation167_spill] sm:$0xff] }
 0x2fb   : > { %v6312_v5 = vpack.c.bf16 %v4173_v30, %v4161_v4  ;;  %v13697_v30 = vand.u32 4294901760, %v13696_v44  ;;  %v13698_v4 = vld [vmem:[#allocation158_spill] sm:$0xff]  ;;  %v12658_v53 = vand.u32 4294901760, %v13700_v3  ;;  %v2907_v2 = vand.u32 4294901760, %v2906_v22 }
 0x2fc   : > { %v2900_v60 = vsub.f32 %v13694_v50, %v13695_v28  ;;  %5929 = vmatpush1.bf16.msra.mxu0 %v5928_v8  ;;  %v13699_v17 = vand.u32 4294901760, %v13698_v4  ;;  %v4179_v63 = vand.u32 4294901760, %v4178_v39  ;;  %v13702_v8 = vand.u32 4294901760, %v13701_v58 }
 0x2fd   : > { %v2912_v34 = vsub.f32 %v13696_v44, %v13697_v30  ;;  %6313 = vmatpush1.bf16.msra.mxu1 %v6312_v5  ;;  %v4191_v50 = vand.u32 4294901760, %v4190_v14  ;;  %v2918_v30 = vsub.f32 %v13700_v3, %v12658_v53  ;;  %v5930_v44 = vpack.c.bf16 %v2907_v2, %v2895_v9 }
 0x2fe   : > { %v4184_v43 = vsub.f32 %v13698_v4, %v13699_v17  ;;  %v2901_v28 = vand.u32 4294901760, %v2900_v60  ;;  %v4196_v41 = vsub.f32 %v13701_v58, %v13702_v8  ;;  %v13703_v17 = vld [vmem:[#allocation170_spill] sm:$0xff]  ;;  %v12656_v5 = vand.u32 4294901760, %v13704_v40 }
 0x2ff   : > { %v2913_v61 = vand.u32 4294901760, %v2912_v34  ;;  %v12657_v4 = vand.u32 4294901760, %v13703_v17  ;;  %v6314_v22 = vpack.c.bf16 %v4191_v50, %v4179_v63  ;;  %v2919_v60 = vand.u32 4294901760, %v2918_v30  ;;  %5931 = vmatprep.subr.bf16.mxu0 %v5930_v44  ;;  %v13708_v63 = vld [vmem:[#allocation176_spill] sm:$0xff]  ;;  %v13710_v50 = vld [vmem:[#allocation159_spill] sm:$0xff] }
 0x300   : > { %v4185_v13 = vand.u32 4294901760, %v4184_v43  ;;  %v4197_v32 = vand.u32 4294901760, %v4196_v41  ;;  %v4202_v2 = vsub.f32 %v13704_v40, %v12656_v5  ;;  %v13706_v41 = vld [vmem:[#allocation175_spill] sm:$0xff]  ;;  %v13711_v44 = vand.u32 4294901760, %v13710_v50  ;;  %v13716_v40 = vld [vmem:[#allocation182_spill] sm:$0xff] }
 0x301   : > { %v5932_v39 = vpack.c.bf16 %v2913_v61, %v2901_v28  ;;  %v2930_v14 = vsub.f32 %v13703_v17, %v12657_v4  ;;  %v13707_v9 = vand.u32 4294901760, %v13706_v41  ;;  %6315 = vmatprep.subr.bf16.mxu1 %v6314_v22  ;;  %v4214_v61 = vsub.f32 %v13705_v55, %v12660_v38  ;;  %v13712_v28 = vld [vmem:[#allocation179_spill] sm:$0xff]  ;;  %v13713_v22 = vld [vmem:[#allocation178_spill] sm:$0xff] }
 0x302   : > { %v6316_v8 = vpack.c.bf16 %v4197_v32, %v4185_v13  ;;  %v13709_v32 = vand.u32 4294901760, %v13708_v63  ;;  %v4208_v43 = vsub.f32 %v13710_v50, %v13711_v44  ;;  %v12670_v30 = vand.u32 4294901760, %v13712_v28  ;;  %v13715_v44 = vld [vmem:[#allocation180_spill] sm:$0xff]  ;;  %v13717_v17 = vld [vmem:[#allocation183_spill] sm:$0xff] }
 0x303   : > { %v2924_v34 = vsub.f32 %v13706_v41, %v13707_v9  ;;  %5933 = vmatpush1.bf16.msra.mxu0 %v5932_v39  ;;  %v2931_v5 = vand.u32 4294901760, %v2930_v14  ;;  %v4203_v4 = vand.u32 4294901760, %v4202_v2  ;;  %v13714_v39 = vand.u32 4294901760, %v13713_v22 }
 0x304   : > { %v2936_v13 = vsub.f32 %v13708_v63, %v13709_v32  ;;  %6317 = vmatpush1.bf16.msra.mxu1 %v6316_v8  ;;  %v4215_v41 = vand.u32 4294901760, %v4214_v61  ;;  %v4209_v58 = vand.u32 4294901760, %v4208_v43  ;;  %v2942_v32 = vsub.f32 %v13712_v28, %v12670_v30  ;;  %v13723_v43 = vld [vmem:[#allocation189_spill] sm:$0xff] }
 0x305   : > { %v2925_v9 = vand.u32 4294901760, %v2924_v34  ;;  %v4220_v53 = vsub.f32 %v13713_v22, %v13714_v39  ;;  %v5934_v63 = vpack.c.bf16 %v2931_v5, %v2919_v60  ;;  %v12669_v50 = vand.u32 4294901760, %v13715_v44 }
 0x306   : > { %v2937_v38 = vand.u32 4294901760, %v2936_v13  ;;  %v12668_v8 = vand.u32 4294901760, %v13716_v40  ;;  %v6318_v14 = vpack.c.bf16 %v4215_v41, %v4203_v4  ;;  %v2943_v34 = vand.u32 4294901760, %v2942_v32  ;;  %v13720_v4 = vld [vmem:[#allocation186_spill] sm:$0xff] }
 0x307   : > { %v4221_v55 = vand.u32 4294901760, %v4220_v53  ;;  %v12671_v3 = vand.u32 4294901760, %v13717_v17  ;;  %5935 = vmatprep.subr.bf16.mxu0 %v5934_v63  ;;  %v2954_v61 = vsub.f32 %v13715_v44, %v12669_v50  ;;  %v13718_v53 = vld [vmem:[#allocation185_spill] sm:$0xff]  ;;  %v13722_v41 = vand.u32 4294901760, %v10118_v56 }
 0x308   : > { %v5936_v2 = vpack.c.bf16 %v2937_v38, %v2925_v9  ;;  %v4226_v5 = vsub.f32 %v13716_v40, %v12668_v8  ;;  %v13719_v60 = vand.u32 4294901760, %v13718_v53  ;;  %6319 = vmatprep.subr.bf16.mxu1 %v6318_v14  ;;  %v12683_v9 = vand.u32 4294901760, %v13723_v43  ;;  %v13724_v14 = vld [vmem:[#allocation187_spill] sm:$0xff]  ;;  %v13728_v40 = vld [vmem:[#allocation193_spill] sm:$0xff] }
 0x309   : > { %v6320_v39 = vpack.c.bf16 %v4221_v55, %v4209_v58  ;;  %v4238_v38 = vsub.f32 %v13717_v17, %v12671_v3  ;;  %v13721_v55 = vand.u32 4294901760, %v13720_v4  ;;  %v4232_v63 = vsub.f32 %v10118_v56, %v13722_v41  ;;  %v13726_v41 = vld [vmem:[#allocation190_spill] sm:$0xff]  ;;  %v13727_v17 = vld [vmem:[#allocation192_spill] sm:$0xff] }
 0x30a   : > { %v2948_v13 = vsub.f32 %v13718_v53, %v13719_v60  ;;  %5937 = vmatpush1.bf16.msra.mxu0 %v5936_v2  ;;  %v2955_v32 = vand.u32 4294901760, %v2954_v61  ;;  %v4227_v8 = vand.u32 4294901760, %v4226_v5  ;;  %v13725_v2 = vand.u32 4294901760, %v13724_v14 }
 0x30b   : > { %v2960_v58 = vsub.f32 %v13720_v4, %v13721_v55  ;;  %6321 = vmatpush1.bf16.msra.mxu1 %v6320_v39  ;;  %v4239_v30 = vand.u32 4294901760, %v4238_v38  ;;  %v4233_v53 = vand.u32 4294901760, %v4232_v63  ;;  %v2966_v55 = vsub.f32 %v13723_v43, %v12683_v9 }
 0x30c   : > { %v2949_v60 = vand.u32 4294901760, %v2948_v13  ;;  %v4244_v50 = vsub.f32 %v13724_v14, %v13725_v2  ;;  %v5938_v4 = vpack.c.bf16 %v2955_v32, %v2943_v34  ;;  %v12682_v56 = vand.u32 4294901760, %v13726_v41 }
 0x30d   : > { %v2961_v3 = vand.u32 4294901760, %v2960_v58  ;;  %v12681_v39 = vand.u32 4294901760, %v13727_v17  ;;  %v6322_v61 = vpack.c.bf16 %v4239_v30, %v4227_v8  ;;  %v2967_v13 = vand.u32 4294901760, %v2966_v55  ;;  %v13732_v55 = vld [vmem:[#allocation198_spill] sm:$0xff] }
 0x30e   : > { %v4245_v22 = vand.u32 4294901760, %v4244_v50  ;;  %v12680_v44 = vand.u32 4294901760, %v13728_v40  ;;  %5939 = vmatprep.subr.bf16.mxu0 %v5938_v4  ;;  %v2978_v38 = vsub.f32 %v13726_v41, %v12682_v56  ;;  %v13729_v50 = vand.u32 4294901760, %v10167_v19 }
 0x30f   : > { %v5940_v5 = vpack.c.bf16 %v2961_v3, %v2949_v60  ;;  %v4250_v34 = vsub.f32 %v13727_v17, %v12681_v39  ;;  %6323 = vmatprep.subr.bf16.mxu1 %v6322_v61  ;;  %v13730_v30 = vand.u32 4294901760, %v10176_v62  ;;  %v13731_v8 = vand.u32 4294901760, %v10190_v25 }
 0x310   : > { %v6324_v2 = vpack.c.bf16 %v4245_v22, %v4233_v53  ;;  %v2972_v58 = vsub.f32 %v10167_v19, %v13729_v50  ;;  %v4262_v3 = vsub.f32 %v13728_v40, %v12680_v44  ;;  %v12693_v4 = vand.u32 4294901760, %v10210_v45  ;;  %v13736_v19 = vld [vmem:[#allocation203_spill] sm:$0xff] }
 0x311   : > { %5941 = vmatpush1.bf16.msra.mxu0 %v5940_v5  ;;  %v2984_v22 = vsub.f32 %v10176_v62, %v13730_v30  ;;  %v4256_v53 = vsub.f32 %v10190_v25, %v13731_v8  ;;  %v2979_v63 = vand.u32 4294901760, %v2978_v38  ;;  %v4251_v32 = vand.u32 4294901760, %v4250_v34  ;;  %v13734_v8 = vld [vmem:[#allocation200_spill] sm:$0xff]  ;;  %v13735_v62 = vld [vmem:[#allocation202_spill] sm:$0xff] }
 0x312   : > { %6325 = vmatpush1.bf16.msra.mxu1 %v6324_v2  ;;  %v2973_v60 = vand.u32 4294901760, %v2972_v58  ;;  %v13733_v61 = vand.u32 4294901760, %v13732_v55  ;;  %v4263_v50 = vand.u32 4294901760, %v4262_v3  ;;  %v2990_v30 = vsub.f32 %v10210_v45, %v12693_v4 }
 0x313   : > { %v2985_v44 = vand.u32 4294901760, %v2984_v22  ;;  %v4257_v39 = vand.u32 4294901760, %v4256_v53  ;;  %v5942_v56 = vpack.c.bf16 %v2979_v63, %v2967_v13  ;;  %v12692_v25 = vand.u32 4294901760, %v13734_v8  ;;  %v13737_v22 = vld [vmem:[#allocation205_spill] sm:$0xff] }
 0x314   : > { %v4268_v5 = vsub.f32 %v13732_v55, %v13733_v61  ;;  %v12691_v2 = vand.u32 4294901760, %v13735_v62  ;;  %v6326_v38 = vpack.c.bf16 %v4263_v50, %v4251_v32  ;;  %v2991_v58 = vand.u32 4294901760, %v2990_v30  ;;  %v13741_v32 = vld [vmem:[#allocation208_spill] sm:$0xff] }
 0x315   : > { %v5944_v34 = vpack.c.bf16 %v2985_v44, %v2973_v60  ;;  %v12695_v14 = vand.u32 4294901760, %v13736_v19  ;;  %5943 = vmatprep.subr.bf16.mxu0 %v5942_v56  ;;  %v3002_v3 = vsub.f32 %v13734_v8, %v12692_v25  ;;  %v13738_v53 = vand.u32 4294901760, %v13737_v22  ;;  %v13739_v56 = vld [vmem:[#allocation206_spill] sm:$0xff]  ;;  %v13743_v25 = vld [vmem:[#allocation209_spill] sm:$0xff]  ;;  %v13746_v8 = vld [vmem:[#allocation88_spill] sm:$0xff] }
 0x316   : > { %v4269_v9 = vand.u32 4294901760, %v4268_v5  ;;  %v4274_v13 = vsub.f32 %v13735_v62, %v12691_v2  ;;  %6327 = vmatprep.subr.bf16.mxu1 %v6326_v38  ;;  %v13742_v60 = vand.u32 4294901760, %v13741_v32 }
 0x317   : > { %v2996_v63 = vsub.f32 %v13737_v22, %v13738_v53  ;;  %5945 = vmatpush1.bf16.msra.mxu0 %v5944_v34  ;;  %v4286_v44 = vsub.f32 %v13736_v19, %v12695_v14  ;;  %v3003_v50 = vand.u32 4294901760, %v3002_v3  ;;  %v13744_v53 = vand.u32 4294901760, %v13743_v25  ;;  %v13748_v3 = vld [vmem:[#allocation91_spill] sm:$0xff] }
 0x318   : > { %v6328_v61 = vpack.c.bf16 %v4269_v9, %v4257_v39  ;;  %v13740_v9 = vand.u32 4294901760, %v13739_v56  ;;  %v4280_v5 = vsub.f32 %v13741_v32, %v13742_v60  ;;  %v4275_v30 = vand.u32 4294901760, %v4274_v13 }
 0x319   : > { %v2997_v2 = vand.u32 4294901760, %v2996_v63  ;;  %v4292_v38 = vsub.f32 %v13743_v25, %v13744_v53  ;;  %v4287_v34 = vand.u32 4294901760, %v4286_v44  ;;  %v5946_v14 = vpack.c.bf16 %v3003_v50, %v2991_v58  ;;  %v13749_v63 = vld [vmem:[#allocation74_spill] sm:$0xff]  ;;  %v13750_v44 = vld [vmem:[#allocation75_spill] sm:$0xff]  ;;  %v13751_v58 = vld [vmem:[#allocation93_spill] sm:$0xff] }
 0x31a   : > { %v3008_v39 = vsub.f32 %v13739_v56, %v13740_v9  ;;  %6329 = vmatpush1.bf16.msra.mxu1 %v6328_v61  ;;  %v4281_v22 = vand.u32 4294901760, %v4280_v5  ;;  %v13745_v56 = vld [vmem:[#allocation87_spill] sm:$0xff]  ;;  %v13747_v61 = vld [vmem:[#allocation90_spill] sm:$0xff]  ;;  %v6340_v5 = vpack.c.bf16 %v9272_v23, %v9270_v24  ;;  %v5958_v50 = vpack.c.bf16 %v9295_v57, %v9293_v26  ;;  %v13776_v23 = vld [vmem:[#allocation128_spill] sm:$0xff] }
 0x31b   : > { %v4293_v55 = vand.u32 4294901760, %v4292_v38  ;;  %v6330_v19 = vpack.c.bf16 %v4287_v34, %v4275_v30  ;;  %5947 = vmatprep.subr.bf16.mxu0 %v5946_v14  ;;  %v5950_v60 = vpack.c.bf16 %v13746_v8, %v13745_v56  ;;  %v6334_v13 = vpack.c.bf16 %v13748_v3, %v13747_v61  ;;  %v13754_v38 = vld [vmem:[#allocation212_spill] sm:$0xff]  ;;  %v13760_v30 = vld [vmem:[#allocation170_spill] sm:$0xff]  ;;  %v13773_v26 = vld [vmem:[#allocation123_spill] sm:$0xff] }
 0x31c   : > { %v3009_v4 = vand.u32 4294901760, %v3008_v39  ;;  %v5952_v39 = vpack.c.bf16 %v13750_v44, %v13749_v63  ;;  %v6342_v34 = vpack.c.bf16 %v9327_v18, %v9315_v15  ;;  %v13766_v15 = vld [vmem:[#allocation182_spill] sm:$0xff]  ;;  %v13772_v18 = vld [vmem:[#allocation203_spill] sm:$0xff] }
 0x31d   : > { %v6332_v9 = vpack.c.bf16 %v4293_v55, %v4281_v22  ;;  %6331 = vmatprep.subr.bf16.mxu1 %v6330_v19  ;;  %v5954_v55 = vpack.c.bf16 %v9210_v21, %v9208_v47  ;;  %v6338_v19 = vpack.c.bf16 %v9254_v54, %v9239_v11  ;;  %v13777_v22 = vld [vmem:[#allocation18_spill] sm:$0xff]  ;;  %v13784_v11 = vld [vmem:[#allocation23_spill] sm:$0xff]  ;;  %v6793_v47 = vmov 1966171168  }
 0x31e   : > { %v5948_v62 = vpack.c.bf16 %v3009_v4, %v2997_v2  ;;  %v13752_v4 = vld [vmem:[#allocation94_spill] sm:$0xff] }
 0x31f   : > { %6333 = vmatpush1.bf16.msra.mxu1 %v6332_v9  ;;  %v6336_v14 = vpack.c.bf16 %v13752_v4, %v13751_v58  ;;  %v13758_v9 = vld [vmem:[#allocation118_spill] sm:$0xff]  ;;  %v13804_v4 = vld [vmem:[#allocation53_spill] sm:$0xff] }
 0x320   : > { %5949 = vmatpush1.bf16.msra.mxu0 %v5948_v62  ;;  %6335 = vmatprep.subr.bf16.mxu1 %v6334_v13  ;;  %v13753_v62 = vld [vmem:[#allocation76_spill] sm:$0xff]  ;;  %v13759_v13 = vld [vmem:[#allocation169_spill] sm:$0xff]  ;;  %v13783_v57 = vld [vmem:[#allocation22_spill] sm:$0xff] }
 0x321   : > { %5951 = vmatprep.subr.bf16.mxu0 %v5950_v60  ;;  %v5956_v2 = vpack.c.bf16 %v9021_v10, %v13753_v62  ;;  %v13756_v60 = vld [vmem:[#allocation114_spill] sm:$0xff]  ;;  %v13778_v10 = vld [vmem:[#allocation15_spill] sm:$0xff]  ;;  %v13782_v62 = vld [vmem:[#allocation20_spill] sm:$0xff]  ;;  %v5970_v21 = vpack.c.bf16 %v13784_v11, %v13783_v57 }
 0x322   : > { %4298 = vmatmul.mubr.f32.vlgmr.msra.gmra.mrb[0].mxu1 %v10280_v16  ;;  %v13799_v57 = vld [vmem:[#allocation43_spill] sm:$0xff] }
 0x323   : > { %3014 = vmatmul.mubr.f32.vlgmr.msra.gmra.mrb[0].mxu0 %v10280_v16  ;;  %6337 = vmatpush1.bf16.msra.mxu1 %v6336_v14  ;;  %v5960_v14 = vpack.c.bf16 %v9063_v6, %v9058_v12  ;;  %v13763_v6 = vld [vmem:[#allocation120_spill] sm:$0xff]  ;;  %v6350_v16 = vpack.c.bf16 %v13778_v10, %v13777_v22  ;;  %v13790_v10 = vld [vmem:[#allocation30_spill] sm:$0xff] }
 0x324   : > { %5953 = vmatpush1.bf16.msra.mxu0 %v5952_v39  ;;  %6339 = vmatprep.subr.bf16.mxu1 %v6338_v19  ;;  %v13761_v39 = vld [vmem:[#allocation172_spill] sm:$0xff] }
 0x325   : > { %5955 = vmatprep.subr.bf16.mxu0 %v5954_v55  ;;  %3214 = vmatprep.mubr.f32.mxu0 %v13754_v38  ;;  %v13764_v55 = vld [vmem:[#allocation121_spill] sm:$0xff]  ;;  %v13765_v19 = vld [vmem:[#allocation180_spill] sm:$0xff] }
 0x326   : > { %4498 = vmatprep.mubr.f32.mxu1 %v13754_v38  ;;  %v6346_v12 = vpack.c.bf16 %v13764_v55, %v13763_v6  ;;  %v13768_v38 = vld [vmem:[#allocation80_spill] sm:$0xff] }
 0x327   : > { %6341 = vmatpush1.bf16.msra.mxu1 %v6340_v5  ;;  %v13770_v55 = vld [vmem:[#allocation200_spill] sm:$0xff] }
 0x328   : > { %5957 = vmatpush1.bf16.msra.mxu0 %v5956_v2  ;;  %6343 = vmatprep.subr.bf16.mxu1 %v6342_v34  ;;  %v13755_v2 = vld [vmem:[#allocation113_spill] sm:$0xff]  ;;  %v13781_v6 = vld [vmem:[#allocation16_spill] sm:$0xff] }
 0x329   : > { %5959 = vmatprep.subr.bf16.mxu0 %v5958_v50  ;;  %v6344_v5 = vpack.c.bf16 %v13756_v60, %v13755_v2  ;;  %v13757_v50 = vld [vmem:[#allocation117_spill] sm:$0xff]  ;;  %v13767_v60 = vld [vmem:[#allocation183_spill] sm:$0xff]  ;;  %v13774_v2 = vld [vmem:[#allocation124_spill] sm:$0xff]  ;;  %v6352_v54 = vpack.c.bf16 %v13782_v62, %v13781_v6 }
 0x32a   : > { %v5962_v53 = vpack.c.bf16 %v13758_v9, %v13757_v50  ;;  %v13762_v34 = vld [vmem:[#allocation173_spill] sm:$0xff]  ;;  %v13771_v50 = vld [vmem:[#allocation202_spill] sm:$0xff]  ;;  %v13794_v6 = vld [vmem:[#allocation35_spill] sm:$0xff] }
 0x32b   : > { %6345 = vmatpush1.bf16.msra.mxu1 %v6344_v5  ;;  %v6348_v5 = vpack.c.bf16 %v13774_v2, %v13773_v26  ;;  %v13785_v2 = vld [vmem:[#allocation25_spill] sm:$0xff]  ;;  %v13786_v26 = vld [vmem:[#allocation27_spill] sm:$0xff]  ;;  %v13793_v62 = vld [vmem:[#allocation34_spill] sm:$0xff] }
 0x32c   : > { %5961 = vmatpush1.bf16.msra.mxu0 %v5960_v14  ;;  %6347 = vmatprep.subr.bf16.mxu1 %v6346_v12  ;;  %v13769_v14 = vld [vmem:[#allocation81_spill] sm:$0xff]  ;;  %v13779_v12 = vld [vmem:[#allocation82_spill] sm:$0xff]  ;;  %v6358_v11 = vpack.c.bf16 %v13794_v6, %v13793_v62 }
 0x32d   : > { %5963 = vmatprep.subr.bf16.mxu0 %v5962_v53  ;;  %v5964_v9 = vpack.c.bf16 %v13769_v14, %v13768_v38  ;;  %v13775_v53 = vld [vmem:[#allocation127_spill] sm:$0xff] }
 0x32e   : > { %v5966_v24 = vpack.c.bf16 %v13776_v23, %v13775_v53  ;;  %v13780_v14 = vld [vmem:[#allocation83_spill] sm:$0xff]  ;;  %v6354_v23 = vpack.c.bf16 %v13786_v26, %v13785_v2  ;;  %v13796_v26 = vld [vmem:[#allocation38_spill] sm:$0xff] }
 0x32f   : > { %6349 = vmatpush1.bf16.msra.mxu1 %v6348_v5  ;;  %v5968_v38 = vpack.c.bf16 %v13780_v14, %v13779_v12  ;;  %v13788_v5 = vld [vmem:[#allocation26_spill] sm:$0xff]  ;;  %v13791_v14 = vld [vmem:[#allocation129_spill] sm:$0xff]  ;;  %v13792_v12 = vld [vmem:[#allocation32_spill] sm:$0xff] }
 0x330   : > { %5965 = vmatpush1.bf16.msra.mxu0 %v5964_v9  ;;  %6351 = vmatprep.subr.bf16.mxu1 %v6350_v16  ;;  %v13787_v9 = vld [vmem:[#allocation84_spill] sm:$0xff]  ;;  %v13789_v16 = vld [vmem:[#allocation29_spill] sm:$0xff]  ;;  %v5974_v53 = vpack.c.bf16 %v13792_v12, %v13791_v14  ;;  %v13802_v12 = vld [vmem:[#allocation50_spill] sm:$0xff] }
 0x331   : > { %5967 = vmatprep.subr.bf16.mxu0 %v5966_v24  ;;  %v5972_v24 = vpack.c.bf16 %v13788_v5, %v13787_v9  ;;  %v6356_v22 = vpack.c.bf16 %v13790_v10, %v13789_v16  ;;  %v13800_v5 = vld [vmem:[#allocation44_spill] sm:$0xff]  ;;  %v5087_v10 = vunpack.c.l.s4 %v6793_v47  ;;  %v13801_v16 = vld [vmem:[#allocation49_spill] sm:$0xff] }
 0x332   : > { %v5978_v9 = vpack.c.bf16 %v13800_v5, %v13799_v57  ;;  %v13803_v14 = vld [vmem:[#allocation52_spill] sm:$0xff]  ;;  %v13815_v57 = vld [vmem:[#allocation145_spill] sm:$0xff] }
 0x333   : > { %6353 = vmatpush1.bf16.msra.mxu1 %v6352_v54  ;;  %v6364_v6 = vpack.c.bf16 %v13804_v4, %v13803_v14  ;;  %v13813_v47 = vld [vmem:[#allocation144_spill] sm:$0xff]  ;;  %v13816_v58 = vand.u32 4294901760, %v13815_v57  ;;  %v13818_v4 = vand.u32 4294901760, %v13688_v42  ;;  %v13819_v14 = vand.u32 4294901760, %v13691_v33 }
 0x334   : > { %5969 = vmatpush1.bf16.msra.mxu0 %v5968_v38  ;;  %6355 = vmatprep.subr.bf16.mxu1 %v6354_v23  ;;  %v13795_v38 = vld [vmem:[#allocation37_spill] sm:$0xff] }
 0x335   : > { %5971 = vmatprep.subr.bf16.mxu0 %v5970_v21  ;;  %v5976_v54 = vpack.c.bf16 %v13796_v26, %v13795_v38  ;;  %v13797_v21 = vld [vmem:[#allocation40_spill] sm:$0xff]  ;;  %v13798_v23 = vld [vmem:[#allocation41_spill] sm:$0xff] }
 0x336   : > { %v6360_v2 = vpack.c.bf16 %v13798_v23, %v13797_v21  ;;  %v13808_v38 = vld [vmem:[#allocation141_spill] sm:$0xff]  ;;  %v13810_v21 = vld [vmem:[#allocation142_spill] sm:$0xff] }
 0x337   : > { %6357 = vmatpush1.bf16.msra.mxu1 %v6356_v22  ;;  %v13805_v22 = vand.u32 4294901760, %v13680_v0  ;;  %v13809_v23 = vand.u32 4294901760, %v13808_v38  ;;  %v13811_v62 = vand.u32 4294901760, %v13810_v21 }
 0x338   : > { %5973 = vmatpush1.bf16.msra.mxu0 %v5972_v24  ;;  %6359 = vmatprep.subr.bf16.mxu1 %v6358_v11  ;;  %v5980_v24 = vpack.c.bf16 %v13802_v12, %v13801_v16  ;;  %v13814_v11 = vand.u32 4294901760, %v13813_v47  ;;  %v10857_v16 = vpack.c.bf16 %v13819_v14, %v13818_v4  ;;  %v13834_v4 = vand.u32 4294901760, %v13759_v13 }
 0x339   : > { %5975 = vmatprep.subr.bf16.mxu0 %v5974_v53  ;;  %v13806_v53 = vand.u32 4294901760, %v13681_v31  ;;  %v10845_v5 = vpack.c.bf16 %v13811_v62, %v13809_v23  ;;  %v13824_v62 = vld [vmem:[#allocation165_spill] sm:$0xff]  ;;  %v13835_v14 = vand.u32 4294901760, %v13760_v30 }
 0x33a   : > { %v10851_v12 = vpack.c.bf16 %v13816_v58, %v13814_v11  ;;  %13820 = vst [vmem:[#allocation59_spill] sm:$0xff] %v10857_v16  ;;  %v13825_v23 = vand.u32 4294901760, %v13824_v62  ;;  %v13829_v58 = vld [vmem:[#allocation158_spill] sm:$0xff] }
 0x33b   : > { %v10839_v26 = vpack.c.bf16 %v13806_v53, %v13805_v22  ;;  %13812 = vst [vmem:[#allocation56_spill] sm:$0xff] %v10845_v5  ;;  %v13821_v22 = vand.u32 4294901760, %v13692_v48  ;;  %v13822_v53 = vand.u32 4294901760, %v13693_v29  ;;  %v13826_v5 = vld [vmem:[#allocation166_spill] sm:$0xff]  ;;  %v13830_v11 = vand.u32 4294901760, %v13829_v58  ;;  %6361 = vmatpush1.bf16.msra.mxu1 %v6360_v2 }
 0x33c   : > { %13817 = vst [vmem:[#allocation58_spill] sm:$0xff] %v10851_v12  ;;  %v13827_v44 = vand.u32 4294901760, %v13826_v5  ;;  %5977 = vmatpush1.bf16.msra.mxu0 %v5976_v54  ;;  %v13831_v12 = vld [vmem:[#allocation167_spill] sm:$0xff]  ;;  %v10881_v16 = vpack.c.bf16 %v13835_v14, %v13834_v4  ;;  %v13850_v14 = vand.u32 4294901760, %v13712_v28  ;;  %v5050_v2 = vld [vmem:[#allocation2] sm:$0xf] }
 0x33d   : > { %13807 = vst [vmem:[#allocation55_spill] sm:$0xff] %v10839_v26  ;;  %v10863_v26 = vpack.c.bf16 %v13822_v53, %v13821_v22  ;;  %v13832_v3 = vand.u32 4294901760, %v13831_v12  ;;  %v13837_v22 = vand.u32 4294901760, %v13761_v39  ;;  %v13838_v53 = vand.u32 4294901760, %v13762_v34  ;;  %5979 = vmatprep.subr.bf16.mxu0 %v5978_v9 }
 0x33e   : > { %v10869_v63 = vpack.c.bf16 %v13827_v44, %v13825_v23  ;;  %13836 = vst [vmem:[#allocation136_spill] sm:$0xff] %v10881_v16  ;;  %v13840_v44 = vld [vmem:[#allocation175_spill] sm:$0xff]  ;;  %v13842_v23 = vld [vmem:[#allocation176_spill] sm:$0xff]  ;;  %v13851_v16 = vand.u32 4294901760, %v13765_v19  ;;  %v5088_v9 = vunpack.c.0.s8 %v5087_v10  ;;  %v13868_v10 = vand.u32 4294901760, %v13726_v41 }
 0x33f   : > { %13823 = vst [vmem:[#allocation69_spill] sm:$0xff] %v10863_v26  ;;  %v10875_v61 = vpack.c.bf16 %v13832_v3, %v13830_v11  ;;  %v10887_v26 = vpack.c.bf16 %v13838_v53, %v13837_v22  ;;  %v13841_v54 = vand.u32 4294901760, %v13840_v44  ;;  %v13845_v3 = vld [vmem:[#allocation159_spill] sm:$0xff]  ;;  %v13853_v53 = vand.u32 4294901760, %v13766_v15 }
 0x340   : > { %13828 = vst [vmem:[#allocation70_spill] sm:$0xff] %v10869_v63  ;;  %v13843_v63 = vand.u32 4294901760, %v13842_v23  ;;  %v13846_v11 = vand.u32 4294901760, %v13845_v3  ;;  %v10905_v22 = vpack.c.bf16 %v13851_v16, %v13850_v14  ;;  %v13862_v16 = vld [vmem:[#allocation162_spill] sm:$0xff]  ;;  %5981 = vmatpush1.bf16.msra.mxu0 %v5980_v24  ;;  %v13901_v24 = vpack.c.bf16 %v13655_v35, %v13652_v46 }
 0x341   : > { %13833 = vst [vmem:[#allocation135_spill] sm:$0xff] %v10875_v61  ;;  %13839 = vst [vmem:[#allocation138_spill] sm:$0xff] %v10887_v26  ;;  %v13847_v61 = vld [vmem:[#allocation178_spill] sm:$0xff]  ;;  %v13854_v26 = vand.u32 4294901760, %v13767_v60  ;;  %v13863_v14 = vand.u32 4294901760, %v13862_v16 }
 0x342   : > { %v10893_v8 = vpack.c.bf16 %v13843_v63, %v13841_v54  ;;  %v13848_v56 = vand.u32 4294901760, %v13847_v61  ;;  %13852 = vst [vmem:[#allocation148_spill] sm:$0xff] %v10905_v22  ;;  %v13856_v54 = vpack.c.bf16 %v13645_v37, %v13644_v52  ;;  %v13864_v22 = vld [vmem:[#allocation187_spill] sm:$0xff]  ;;  %5983 = vmatprep.subr.bf16.mxu0 %v13901_v24  ;;  %v13911_v24 = vld [vmem:[#allocation130_spill] sm:$0xff] }
 0x343   : > { %v10911_v63 = vpack.c.bf16 %v13854_v26, %v13853_v53  ;;  %v13865_v15 = vand.u32 4294901760, %v13864_v22  ;;  %v13867_v26 = vand.u32 4294901760, %v13723_v43 }
 0x344   : > { %13844 = vst [vmem:[#allocation139_spill] sm:$0xff] %v10893_v8  ;;  %v10899_v4 = vpack.c.bf16 %v13848_v56, %v13846_v11  ;;  %6363 = vmatprep.subr.bf16.mxu1 %v13856_v54  ;;  %v13857_v56 = vld [vmem:[#allocation185_spill] sm:$0xff]  ;;  %v13870_v54 = vand.u32 4294901760, %v13727_v17 }
 0x345   : > { %13855 = vst [vmem:[#allocation150_spill] sm:$0xff] %v10911_v63  ;;  %v13858_v11 = vand.u32 4294901760, %v13857_v56  ;;  %v10926_v19 = vpack.c.bf16 %v13865_v15, %v13863_v14  ;;  %v10932_v53 = vpack.c.bf16 %v13868_v10, %v13867_v26  ;;  %v13871_v63 = vand.u32 4294901760, %v13728_v40  ;;  %v13878_v15 = vld [vmem:[#allocation163_spill] sm:$0xff]  ;;  %6365 = vmatpush1.bf16.msra.mxu1 %v6364_v6 }
 0x346   : > { %13849 = vst [vmem:[#allocation147_spill] sm:$0xff] %v10899_v4  ;;  %v13859_v4 = vld [vmem:[#allocation186_spill] sm:$0xff]  ;;  %v13879_v14 = vand.u32 4294901760, %v13878_v15  ;;  %v13883_v26 = vand.u32 4294901760, %v10210_v45  ;;  %v13884_v10 = vand.u32 4294901760, %v13770_v55  ;;  %v13910_v6 = vld [vmem:[#allocation155_spill] sm:$0xff] }
 0x347   : > { %v13860_v8 = vand.u32 4294901760, %v13859_v4  ;;  %13866 = vst [vmem:[#allocation190_spill] sm:$0xff] %v10926_v19  ;;  %13869 = vst [vmem:[#allocation192_spill] sm:$0xff] %v10932_v53  ;;  %v10938_v37 = vpack.c.bf16 %v13871_v63, %v13870_v54  ;;  %v13880_v19 = vld [vmem:[#allocation198_spill] sm:$0xff]  ;;  %v13886_v63 = vand.u32 4294901760, %v13771_v50  ;;  %v13887_v54 = vand.u32 4294901760, %v13772_v18 }
 0x348   : > { %v13881_v43 = vand.u32 4294901760, %v13880_v19  ;;  %v10956_v53 = vpack.c.bf16 %v13884_v10, %v13883_v26  ;;  %v13897_v26 = vld [vmem:[#allocation11_spill] sm:$0xff] }
 0x349   : > { %v10920_v28 = vpack.c.bf16 %v13860_v8, %v13858_v11  ;;  %13872 = vst [vmem:[#allocation193_spill] sm:$0xff] %v10938_v37  ;;  %v13873_v8 = vld [vmem:[#allocation195_spill] sm:$0xff]  ;;  %v10962_v37 = vpack.c.bf16 %v13887_v54, %v13886_v63  ;;  %v10977_v10 = vrot.slane %v5050_v2, %v13897_v26  ;;  %v13902_v63 = vld [vmem:[#allocation12_spill] sm:$0xff]  ;;  %v13904_v54 = vld [vmem:[#allocation14_spill] sm:$0xff] }
 0x34a   : > { %v13874_v11 = vand.u32 4294901760, %v13873_v8  ;;  %v10950_v22 = vpack.c.bf16 %v13881_v43, %v13879_v14  ;;  %13885 = vst [vmem:[#allocation212_spill] sm:$0xff] %v10956_v53  ;;  %v13894_v43 = vand.u32 4294901760, %v13741_v32  ;;  %v13895_v14 = vand.u32 4294901760, %v13743_v25  ;;  %v13899_v53 = vld [vmem:[#allocation13_spill] sm:$0xff]  ;;  %v13908_v26 = vld [vmem:[#allocation62_spill] sm:$0xff] }
 0x34b   : > { %13861 = vst [vmem:[#allocation153_spill] sm:$0xff] %v10920_v28  ;;  %v13875_v28 = vld [vmem:[#allocation196_spill] sm:$0xff]  ;;  %13888 = vst [vmem:[#allocation169_spill] sm:$0xff] %v10962_v37  ;;  %v10980_v50 = vrot.slane %v5050_v2, %v13899_v53  ;;  %v13909_v53 = vld [vmem:[#allocation151_spill] sm:$0xff] }
 0x34c   : > { %v13876_v52 = vand.u32 4294901760, %v13875_v28  ;;  %13882 = vst [vmem:[#allocation209_spill] sm:$0xff] %v10950_v22  ;;  %v10974_v22 = vpack.c.bf16 %v13895_v14, %v13894_v43  ;;  %13898 = vst [vmem:[#allocation173_spill] sm:$0xff] %v10977_v10  ;;  %v13906_v43 = vpack.c.bf16 %v13657_v27, %v13656_v1  ;;  %v13907_v14 = vld [vmem:[#allocation61_spill] sm:$0xff]  ;;  %vm12738_vm6 = vcmp.lt.f32.partialorder %v13909_v53, %v10977_v10  ;;  %v13914_v37 = vld [vmem:[#allocation10_spill] sm:$0xff] }
 0x34d   : > { %13900 = vst [vmem:[#allocation183_spill] sm:$0xff] %v10980_v50  ;;  %vm12737_vm15 = vcmp.lt.f32.partialorder %v13910_v6, %v10980_v50 }
 0x34e   : > { %v10944_v16 = vpack.c.bf16 %v13876_v52, %v13874_v11  ;;  %v13889_v52 = vld [vmem:[#allocation205_spill] sm:$0xff]  ;;  %13896 = vst [vmem:[#allocation172_spill] sm:$0xff] %v10974_v22  ;;  %6367 = vmatprep.subr.bf16.mxu1 %v13906_v43  ;;  %v5984_v22 = vpack.c.bf16 %v13908_v26, %v13907_v14  ;;  %v13913_v43 = vld [vmem:[#allocation152_spill] sm:$0xff]  ;;  %v5091_v26 = vsub.s32 %v5088_v9, %v13914_v37 }
 0x34f   : > { %v13890_v11 = vand.u32 4294901760, %v13889_v52  ;;  %v13917_v9 = vpack.c.bf16 %v13669_v59, %v13668_v49 }
 0x350   : > { %13877 = vst [vmem:[#allocation208_spill] sm:$0xff] %v10944_v16  ;;  %v13891_v16 = vld [vmem:[#allocation206_spill] sm:$0xff]  ;;  %5985 = vmatpush1.bf16.msra.mxu0 %v5984_v22 }
 0x351   : > { %v13892_v15 = vand.u32 4294901760, %v13891_v16 }
 0x353   : > { %v10968_v19 = vpack.c.bf16 %v13892_v15, %v13890_v11  ;;  %v10986_v15 = vrot.slane %v5050_v2, %v13902_v63  ;;  %v10989_v11 = vrot.slane %v5050_v2, %v13904_v54  ;;  %v5076_v2 = vsel %vm12738_vm6, %v13909_v53, %v10977_v10  ;;  %v13920_v10 = vld [vmem:[#allocation132_spill] sm:$0xff]  ;;  %v13921_v53 = vld [vmem:[#allocation133_spill] sm:$0xff] }
 0x354   : > { %v5078_v54 = vsel %vm12737_vm15, %v13910_v6, %v10980_v50  ;;  %v13919_v50 = vld [vmem:[#allocation73_spill] sm:$0xff] }
 0x355   : > { %13893 = vst [vmem:[#allocation170_spill] sm:$0xff] %v10968_v19  ;;  %13903 = vst [vmem:[#allocation200_spill] sm:$0xff] %v10986_v15  ;;  %v13912_v19 = vld [vmem:[#allocation64_spill] sm:$0xff]  ;;  %vm12736_vm4 = vcmp.lt.f32.partialorder %v13913_v43, %v10986_v15 }
 0x356   : > { %13905 = vst [vmem:[#allocation203_spill] sm:$0xff] %v10989_v11  ;;  %v6368_v63 = vpack.c.bf16 %v13912_v19, %v13911_v24  ;;  %v13915_v19 = vld [vmem:[#allocation156_spill] sm:$0xff]  ;;  %v13916_v24 = vpack.c.bf16 %v13667_v51, %v13664_v36  ;;  %v5077_v22 = vsel %vm12736_vm4, %v13913_v43, %v10986_v15  ;;  %v6372_v51 = vpack.c.bf16 %v13921_v53, %v13920_v10 }
 0x357   : > { %vm12735_vm13 = vcmp.lt.f32.partialorder %v13915_v19, %v10989_v11  ;;  %v13922_v43 = vpack.c.bf16 %v13679_v7, %v13676_v20 }
 0x358   : > { %6369 = vmatpush1.bf16.msra.mxu1 %v6368_v63  ;;  %5987 = vmatprep.subr.bf16.mxu0 %v13916_v24  ;;  %v5079_v37 = vsel %vm12735_vm13, %v13915_v19, %v10989_v11  ;;  %v13918_v63 = vld [vmem:[#allocation72_spill] sm:$0xff]  ;;  %v5084_v24 = vcombine.low %v5076_v2, %v5077_v22  ;;  %v13923_v19 = vpack.c.bf16 %v13681_v31, %v13680_v0 }
 0x359   : > { %6371 = vmatprep.subr.bf16.mxu1 %v13917_v9  ;;  %v5988_v6 = vpack.c.bf16 %v13919_v50, %v13918_v63  ;;  %v5085_v36 = vcombine.low %v5078_v54, %v5079_v37  ;;  %v5992_v9 = vpack.c.bf16 %v13810_v21, %v13808_v38  ;;  %v6376_v2 = vpack.c.bf16 %v13815_v57, %v13813_v47  ;;  %v13932_v38 = vld [vmem:[#allocation182_spill] sm:$0xff]  ;;  %v13959_v54 = vld [vmem:[#allocation108_spill] sm:$0xff] }
 0x35a   : > { %v5092_v15 = vrot.slane %v5084_v24, %v5091_v26  ;;  %v13926_v0 = vpack.c.bf16 %v13693_v29, %v13692_v48  ;;  %v5996_v31 = vpack.c.bf16 %v13826_v5, %v13824_v62  ;;  %v6380_v57 = vpack.c.bf16 %v13831_v12, %v13829_v58  ;;  %v13930_v12 = vld [vmem:[#allocation179_spill] sm:$0xff]  ;;  %v13963_v37 = vld [vmem:[#allocation116_spill] sm:$0xff] }
 0x35b   : > { %5989 = vmatpush1.bf16.msra.mxu0 %v5988_v6  ;;  %v5099_v11 = vrot.slane %v5085_v36, %v5091_v26  ;;  %v13924_v6 = vlaneseq  ;;  %v6000_v48 = vpack.c.bf16 %v13842_v23, %v13840_v44  ;;  %v6384_v29 = vpack.c.bf16 %v13847_v61, %v13845_v3  ;;  %v13936_v61 = vld [vmem:[#allocation189_spill] sm:$0xff]  ;;  %v13939_v58 = vld [vmem:[#allocation163_spill] sm:$0xff]  ;;  %v13940_v44 = vld [vmem:[#allocation198_spill] sm:$0xff] }
 0x35c   : > { %6373 = vmatpush1.bf16.msra.mxu1 %v6372_v51  ;;  %5991 = vmatprep.subr.bf16.mxu0 %v13922_v43  ;;  %v13925_v51 = vpack.c.bf16 %v13691_v33, %v13688_v42  ;;  %v13928_v42 = vpack.c.bf16 %v13762_v34, %v13761_v39  ;;  %v13929_v33 = vld [vmem:[#allocation180_spill] sm:$0xff]  ;;  %v13934_v39 = vld [vmem:[#allocation162_spill] sm:$0xff]  ;;  %v13935_v34 = vld [vmem:[#allocation187_spill] sm:$0xff]  ;;  %v13937_v47 = vpack.c.bf16 %v13726_v41, %v13936_v61 }
 0x35d   : > { %6375 = vmatprep.subr.bf16.mxu1 %v13923_v19  ;;  %v5100_v22 = vcombine.low %v5092_v15, %v5099_v11  ;;  %vm5111_vm13 = vcmp.lt.s32.totalorder %v13924_v6, 512  ;;  %v13927_v19 = vpack.c.bf16 %v13760_v30, %v13759_v13  ;;  %v13931_v5 = vpack.c.bf16 %v13929_v33, %v13930_v12  ;;  %v13955_v15 = vld [vmem:[#allocation105_spill] sm:$0xff]  ;;  %v13961_v43 = vld [vmem:[#allocation112_spill] sm:$0xff]  ;;  %v13965_v24 = vld [vmem:[#allocation119_spill] sm:$0xff] }
 0x35e   : > { %v13933_v30 = vpack.c.bf16 %v13767_v60, %v13932_v38  ;;  %v6004_v13 = vpack.c.bf16 %v13859_v4, %v13857_v56  ;;  %v6388_v21 = vpack.c.bf16 %v13935_v34, %v13934_v39  ;;  %v13938_v62 = vpack.c.bf16 %v13728_v40, %v13727_v17  ;;  %v13942_v4 = vld [vmem:[#allocation202_spill] sm:$0xff]  ;;  %v13957_v11 = vld [vmem:[#allocation109_spill] sm:$0xff]  ;;  %v13973_v6 = vld [vmem:[#allocation164_spill] sm:$0xff] }
 0x35f   : > { %5993 = vmatpush1.bf16.msra.mxu0 %v5992_v9  ;;  %v5107_v36 = vrot.slane %v5100_v22, %v5091_v26  ;;  %v6008_v60 = vpack.c.bf16 %v13875_v28, %v13873_v8  ;;  %v6392_v23 = vpack.c.bf16 %v13940_v44, %v13939_v58  ;;  %v13941_v3 = vpack.c.bf16 %v13770_v55, %v10210_v45  ;;  %v13947_v45 = vld [vmem:[#allocation213_spill] sm:$0xff]  ;;  %v13954_v26 = vld [vmem:[#allocation102_spill] sm:$0xff]  ;;  %v13967_v9 = vld [vmem:[#allocation115_spill] sm:$0xff] }
 0x360   : > { %6377 = vmatpush1.bf16.msra.mxu1 %v6376_v2  ;;  %5995 = vmatprep.subr.bf16.mxu0 %v13925_v51  ;;  %v13943_v41 = vpack.c.bf16 %v13772_v18, %v13942_v4  ;;  %v6012_v40 = vpack.c.bf16 %v13891_v16, %v13889_v52  ;;  %v6396_v17 = vpack.c.bf16 %v13743_v25, %v13741_v32  ;;  %v13944_v28 = vmov 1.0|1.0   ;;  %v13952_v16 = vld [vmem:[#allocation214_spill] sm:$0xff]  ;;  %v13975_v51 = vld [vmem:[#allocation125_spill] sm:$0xff]  ;;  %v13991_v33 = vld [vmem:[#allocation39_spill] sm:$0xff] }
 0x361   : > { %6379 = vmatprep.subr.bf16.mxu1 %v13926_v0  ;;  %5113 = vst.msk [vmem:[#allocation2] sm:$0xf] %vm5111_vm13, %v5107_v36  ;;  %v13953_v52 = vld [vmem:[#allocation98_spill] sm:$0xff]  ;;  %vm13956_vm13 = vnez %v13955_v15  ;;  %vm13958_vm4 = vnez %v13957_v11  ;;  %vm13960_vm15 = vnez %v13959_v54  ;;  %vm13962_vm6 = vnez %v13961_v43  ;;  %v13977_v36 = vld [vmem:[#allocation19_spill] sm:$0xff]  ;;  %v13979_v0 = vld [vmem:[#allocation21_spill] sm:$0xff] }
 0x362   : > { %v13969_v2 = vld [vmem:[#allocation122_spill] sm:$0xff]  ;;  %v13997_v38 = vld [vmem:[#allocation48_spill] sm:$0xff]  ;;  %v14003_v39 = vld [vmem:[#allocation57_spill] sm:$0xff] }
 0x363   : > { %5997 = vmatpush1.bf16.msra.mxu0 %v5996_v31  ;;  %v13971_v22 = vld [vmem:[#allocation126_spill] sm:$0xff]  ;;  %v13980_v31 = vld [vmem:[#allocation24_spill] sm:$0xff]  ;;  %v14009_v61 = vld [vmem:[#allocation65_spill] sm:$0xff] }
 0x364   : > { %6381 = vmatpush1.bf16.msra.mxu1 %v6380_v57  ;;  %5999 = vmatprep.subr.bf16.mxu0 %v13927_v19  ;;  %v13981_v57 = vld [vmem:[#allocation17_spill] sm:$0xff]  ;;  %v13983_v19 = vld [vmem:[#allocation28_spill] sm:$0xff]  ;;  %v13993_v12 = vld [vmem:[#allocation42_spill] sm:$0xff] }
 0x365   : > { %6383 = vmatprep.subr.bf16.mxu1 %v13928_v42  ;;  %v13985_v42 = vld [vmem:[#allocation31_spill] sm:$0xff]  ;;  %v14005_v34 = vld [vmem:[#allocation60_spill] sm:$0xff]  ;;  %v14017_v58 = vld [vmem:[#allocation134_spill] sm:$0xff] }
 0x366   : > { %v14019_v44 = vld [vmem:[#allocation137_spill] sm:$0xff]  ;;  %v14025_v4 = vld [vmem:[#allocation146_spill] sm:$0xff]  ;;  %v14264_v18 = vld [vmem:[#allocation48_spill] sm:$0xff] }
 0x367   : > { %6001 = vmatpush1.bf16.msra.mxu0 %v6000_v48  ;;  %v13987_v48 = vld [vmem:[#allocation33_spill] sm:$0xff]  ;;  %v14260_v56 = vld [vmem:[#allocation42_spill] sm:$0xff]  ;;  %v14266_v25 = vld [vmem:[#allocation51_spill] sm:$0xff] }
 0x368   : > { %6385 = vmatpush1.bf16.msra.mxu1 %v6384_v29  ;;  %6003 = vmatprep.subr.bf16.mxu0 %v13931_v5  ;;  %v13989_v29 = vld [vmem:[#allocation36_spill] sm:$0xff]  ;;  %v13995_v5 = vld [vmem:[#allocation45_spill] sm:$0xff]  ;;  %v14268_v32 = vld [vmem:[#allocation54_spill] sm:$0xff] }
 0x369   : > { %6387 = vmatprep.subr.bf16.mxu1 %v13933_v30  ;;  %v13999_v30 = vld [vmem:[#allocation51_spill] sm:$0xff]  ;;  %v14262_v8 = vld [vmem:[#allocation45_spill] sm:$0xff] }
 0x36a   : > { %v14270_v55 = vld [vmem:[#allocation57_spill] sm:$0xff] }
 0x36b   : > { %6005 = vmatpush1.bf16.msra.mxu0 %v6004_v13  ;;  %v14001_v13 = vld [vmem:[#allocation54_spill] sm:$0xff] }
 0x36c   : > { %6389 = vmatpush1.bf16.msra.mxu1 %v6388_v21  ;;  %6007 = vmatprep.subr.bf16.mxu0 %v13937_v47  ;;  %v14007_v21 = vld [vmem:[#allocation63_spill] sm:$0xff]  ;;  %v14011_v47 = vld [vmem:[#allocation68_spill] sm:$0xff] }
 0x36d   : > { %6391 = vmatprep.subr.bf16.mxu1 %v13938_v62  ;;  %v14013_v62 = vld [vmem:[#allocation71_spill] sm:$0xff] }
 0x36f   : > { %6009 = vmatpush1.bf16.msra.mxu0 %v6008_v60  ;;  %v14015_v60 = vld [vmem:[#allocation131_spill] sm:$0xff] }
 0x370   : > { %6393 = vmatpush1.bf16.msra.mxu1 %v6392_v23  ;;  %6011 = vmatprep.subr.bf16.mxu0 %v13941_v3  ;;  %v14021_v23 = vld [vmem:[#allocation140_spill] sm:$0xff]  ;;  %v14023_v3 = vld [vmem:[#allocation143_spill] sm:$0xff] }
 0x371   : > { %6395 = vmatprep.subr.bf16.mxu1 %v13943_v41  ;;  %v14027_v41 = vld [vmem:[#allocation149_spill] sm:$0xff] }
 0x373   : > { %6013 = vmatpush1.bf16.msra.mxu0 %v6012_v40  ;;  %v14029_v40 = vld [vmem:[#allocation154_spill] sm:$0xff] }
 0x374   : > { %6397 = vmatpush1.bf16.msra.mxu1 %v6396_v17  ;;  %6015 = vmatprep.subr.msk.bf16.mxu0 %vm9149_vm9, %v13944_v28  ;;  %v14031_v17 = vld [vmem:[#allocation157_spill] sm:$0xff] }
 0x375   : > { %6399 = vmatprep.subr.msk.bf16.mxu1 %vm9166_vm2, %v13944_v28 }
 0x376   : > { %3217 = vmatmul.mubr.f32.vlgmr.msra.gmra.mrb[0].mxu0 %v13947_v45 }
 0x377   : > { %6017 = vmatpush1.bf16.msk.msra.mxu0 %vm9143_vm10, %v13944_v28  ;;  %4501 = vmatmul.mubr.f32.vlgmr.msra.gmra.mrb[0].mxu1 %v13947_v45  ;;  %v14033_v45 = vld [vmem:[#allocation168_spill] sm:$0xff] }
 0x378   : > { %6401 = vmatpush1.bf16.msk.msra.mxu1 %vm9191_vm8, %v13944_v28  ;;  %6019 = vmatprep.subr.msk.bf16.mxu0 %vm9204_vm3, %v13944_v28 }
 0x379   : > { %6403 = vmatprep.subr.msk.bf16.mxu1 %vm9235_vm14, %v13944_v28  ;;  %3354 = vmatprep.mubr.f32.mxu0 %v13952_v16 }
 0x37a   : > { %4638 = vmatprep.mubr.f32.mxu1 %v13952_v16  ;;  %v14035_v16 = vld [vmem:[#allocation171_spill] sm:$0xff] }
 0x37b   : > { %6021 = vmatpush1.bf16.msk.msra.mxu0 %vm9227_vm12, %v13944_v28  ;;  %vm13964_vm12 = vnez %v13963_v37 }
 0x37c   : > { %6405 = vmatpush1.bf16.msk.msra.mxu1 %vm9258_vm5, %v13944_v28  ;;  %6023 = vmatprep.subr.msk.bf16.mxu0 %vm13956_vm13, %v13944_v28  ;;  %vm13966_vm5 = vnez %v13965_v24  ;;  %vm13968_vm13 = vnez %v13967_v9  ;;  %v14288_v9 = vld [vmem:[#allocation140_spill] sm:$0xff] }
 0x37d   : > { %6407 = vmatprep.subr.msk.bf16.mxu1 %vm13958_vm4, %v13944_v28  ;;  %vm13970_vm4 = vnez %v13969_v2  ;;  %v14290_v2 = vld [vmem:[#allocation143_spill] sm:$0xff] }
 0x37f   : > { %6025 = vmatpush1.bf16.msk.msra.mxu0 %vm13960_vm15, %v13944_v28  ;;  %vm13972_vm15 = vnez %v13971_v22 }
 0x380   : > { %6409 = vmatpush1.bf16.msk.msra.mxu1 %vm13962_vm6, %v13944_v28  ;;  %6027 = vmatprep.subr.msk.bf16.mxu0 %vm13964_vm12, %v13944_v28  ;;  %vm13974_vm6 = vnez %v13973_v6  ;;  %vm13976_vm12 = vnez %v13975_v51 }
 0x381   : > { %6411 = vmatprep.subr.msk.bf16.mxu1 %vm13966_vm5, %v13944_v28  ;;  %vm13978_vm5 = vnez %v13977_v36 }
 0x383   : > { %6029 = vmatpush1.bf16.msk.msra.mxu0 %vm13968_vm13, %v13944_v28 }
 0x384   : > { %6413 = vmatpush1.bf16.msk.msra.mxu1 %vm13970_vm4, %v13944_v28  ;;  %6031 = vmatprep.subr.msk.bf16.mxu0 %vm13972_vm15, %v13944_v28  ;;  %vm13982_vm15 = vnez %v13981_v57 }
 0x385   : > { %6415 = vmatprep.subr.msk.bf16.mxu1 %vm13974_vm6, %v13944_v28  ;;  %vm13984_vm6 = vnez %v13983_v19 }
 0x387   : > { %6033 = vmatpush1.bf16.msk.msra.mxu0 %vm13976_vm12, %v13944_v28  ;;  %vm13986_vm12 = vnez %v13985_v42 }
 0x388   : > { %6417 = vmatpush1.bf16.msk.msra.mxu1 %vm13978_vm5, %v13944_v28  ;;  %6035 = vmatprep.subr.msk.bf16.mxu0 %vm9490_vm0, %v13944_v28  ;;  %vm13988_vm5 = vnez %v13987_v48  ;;  %vm13990_vm0 = vnez %v13989_v29 }
 0x389   : > { %6419 = vmatprep.subr.msk.bf16.mxu1 %vm9508_vm11, %v13944_v28  ;;  %vm13992_vm11 = vnez %v13991_v33 }
 0x38b   : > { %6037 = vmatpush1.bf16.msk.msra.mxu0 %vm13982_vm15, %v13944_v28  ;;  %vm13994_vm15 = vnez %v13993_v12 }
 0x38c   : > { %6421 = vmatpush1.bf16.msk.msra.mxu1 %vm13984_vm6, %v13944_v28  ;;  %6039 = vmatprep.subr.msk.bf16.mxu0 %vm13986_vm12, %v13944_v28  ;;  %vm13996_vm6 = vnez %v13995_v5  ;;  %vm13998_vm12 = vnez %v13997_v38  ;;  %v14099_v38 = vld [vmem:[#allocation107_spill] sm:$0xff]  ;;  %v14115_v5 = vld [vmem:[#allocation118_spill] sm:$0xff] }
 0x38d   : > { %6423 = vmatprep.subr.msk.bf16.mxu1 %vm13988_vm5, %v13944_v28  ;;  %vm14000_vm5 = vnez %v13999_v30  ;;  %v14097_v30 = vld [vmem:[#allocation106_spill] sm:$0xff] }
 0x38f   : > { %6041 = vmatpush1.bf16.msk.msra.mxu0 %vm13990_vm0, %v13944_v28  ;;  %vm14002_vm0 = vnez %v14001_v13 }
 0x390   : > { %6425 = vmatpush1.bf16.msk.msra.mxu1 %vm13992_vm11, %v13944_v28  ;;  %6043 = vmatprep.subr.msk.bf16.mxu0 %vm13994_vm15, %v13944_v28  ;;  %vm14004_vm11 = vnez %v14003_v39  ;;  %vm14006_vm15 = vnez %v14005_v34  ;;  %v14078_v34 = vld [vmem:[#allocation94_spill] sm:$0xff] }
 0x391   : > { %6427 = vmatprep.subr.msk.bf16.mxu1 %vm13996_vm6, %v13944_v28  ;;  %vm14008_vm6 = vnez %v14007_v21 }
 0x393   : > { %6045 = vmatpush1.bf16.msk.msra.mxu0 %vm13998_vm12, %v13944_v28  ;;  %vm14010_vm12 = vnez %v14009_v61  ;;  %v14073_v61 = vld [vmem:[#allocation75_spill] sm:$0xff] }
 0x394   : > { %6429 = vmatpush1.bf16.msk.msra.mxu1 %vm14000_vm5, %v13944_v28  ;;  %6047 = vmatprep.subr.msk.bf16.mxu0 %vm14002_vm0, %v13944_v28  ;;  %vm14012_vm5 = vnez %v14011_v47  ;;  %vm14014_vm0 = vnez %v14013_v62 }
 0x395   : > { %6431 = vmatprep.subr.msk.bf16.mxu1 %vm14004_vm11, %v13944_v28  ;;  %vm14016_vm11 = vnez %v14015_v60  ;;  %v14067_v60 = vld [vmem:[#allocation91_spill] sm:$0xff] }
 0x396   : > { %v14068_v62 = vand.u32 4294901760, %v14067_v60  ;;  %v14080_v60 = vld [vmem:[#allocation96_spill] sm:$0xff] }
 0x397   : > { %6049 = vmatpush1.bf16.msk.msra.mxu0 %vm14006_vm15, %v13944_v28  ;;  %vm14018_vm15 = vnez %v14017_v58  ;;  %v14065_v58 = vld [vmem:[#allocation90_spill] sm:$0xff] }
 0x398   : > { %6433 = vmatpush1.bf16.msk.msra.mxu1 %vm14008_vm6, %v13944_v28  ;;  %6051 = vmatprep.subr.msk.bf16.mxu0 %vm14010_vm12, %v13944_v28  ;;  %vm14020_vm6 = vnez %v14019_v44  ;;  %vm14022_vm12 = vnez %v14021_v23 }
 0x399   : > { %6435 = vmatprep.subr.msk.bf16.mxu1 %vm14012_vm5, %v13944_v28  ;;  %vm14024_vm5 = vnez %v14023_v3 }
 0x39b   : > { %6053 = vmatpush1.bf16.msk.msra.mxu0 %vm14014_vm0, %v13944_v28  ;;  %vm14026_vm0 = vnez %v14025_v4  ;;  %v14037_v4 = vld [vmem:[#allocation174_spill] sm:$0xff] }
 0x39c   : > { %6437 = vmatpush1.bf16.msk.msra.mxu1 %vm14016_vm11, %v13944_v28  ;;  %6055 = vmatprep.subr.msk.bf16.mxu0 %vm14018_vm15, %v13944_v28  ;;  %vm14028_vm11 = vnez %v14027_v41  ;;  %vm14030_vm15 = vnez %v14029_v40  ;;  %v14039_v41 = vld [vmem:[#allocation177_spill] sm:$0xff]  ;;  %v14041_v40 = vld [vmem:[#allocation160_spill] sm:$0xff] }
 0x39d   : > { %6439 = vmatprep.subr.msk.bf16.mxu1 %vm14020_vm6, %v13944_v28  ;;  %vm14032_vm6 = vnez %v14031_v17  ;;  %v14043_v17 = vld [vmem:[#allocation181_spill] sm:$0xff] }
 0x39f   : > { %6057 = vmatpush1.bf16.msk.msra.mxu0 %vm14022_vm12, %v13944_v28  ;;  %vm14034_vm12 = vnez %v14033_v45  ;;  %v14045_v45 = vld [vmem:[#allocation184_spill] sm:$0xff] }
 0x3a0   : > { %6441 = vmatpush1.bf16.msk.msra.mxu1 %vm14024_vm5, %v13944_v28  ;;  %6059 = vmatprep.subr.msk.bf16.mxu0 %vm14026_vm0, %v13944_v28  ;;  %vm14036_vm5 = vnez %v14035_v16  ;;  %vm14038_vm0 = vnez %v14037_v4  ;;  %v14047_v16 = vld [vmem:[#allocation161_spill] sm:$0xff]  ;;  %v14049_v4 = vld [vmem:[#allocation188_spill] sm:$0xff] }
 0x3a1   : > { %6443 = vmatprep.subr.msk.bf16.mxu1 %vm14028_vm11, %v13944_v28  ;;  %vm14040_vm11 = vnez %v14039_v41  ;;  %v14051_v41 = vld [vmem:[#allocation191_spill] sm:$0xff] }
 0x3a3   : > { %6061 = vmatpush1.bf16.msk.msra.mxu0 %vm14030_vm15, %v13944_v28  ;;  %vm14042_vm15 = vnez %v14041_v40  ;;  %v14053_v40 = vld [vmem:[#allocation194_spill] sm:$0xff] }
 0x3a4   : > { %6445 = vmatpush1.bf16.msk.msra.mxu1 %vm14032_vm6, %v13944_v28  ;;  %6063 = vmatprep.subr.msk.bf16.mxu0 %vm14034_vm12, %v13944_v28  ;;  %vm14044_vm6 = vnez %v14043_v17  ;;  %vm14046_vm12 = vnez %v14045_v45  ;;  %v14055_v17 = vld [vmem:[#allocation197_spill] sm:$0xff]  ;;  %v14057_v45 = vld [vmem:[#allocation199_spill] sm:$0xff] }
 0x3a5   : > { %6447 = vmatprep.subr.msk.bf16.mxu1 %vm14036_vm5, %v13944_v28  ;;  %vm14048_vm5 = vnez %v14047_v16  ;;  %v14071_v16 = vld [vmem:[#allocation74_spill] sm:$0xff] }
 0x3a7   : > { %6065 = vmatpush1.bf16.msk.msra.mxu0 %vm14038_vm0, %v13944_v28  ;;  %vm14050_vm0 = vnez %v14049_v4  ;;  %v14060_v4 = vld [vmem:[#allocation87_spill] sm:$0xff] }
 0x3a8   : > { %6449 = vmatpush1.bf16.msk.msra.mxu1 %vm14040_vm11, %v13944_v28  ;;  %6067 = vmatprep.subr.msk.bf16.mxu0 %vm14042_vm15, %v13944_v28  ;;  %vm14052_vm11 = vnez %v14051_v41  ;;  %vm14054_vm15 = vnez %v14053_v40  ;;  %v14061_v3 = vand.u32 4294901760, %v14060_v4  ;;  %v14062_v41 = vld [vmem:[#allocation88_spill] sm:$0xff]  ;;  %v14072_v4 = vand.u32 4294901760, %v14071_v16  ;;  %v14076_v40 = vld [vmem:[#allocation93_spill] sm:$0xff] }
 0x3a9   : > { %6451 = vmatprep.subr.msk.bf16.mxu1 %vm14044_vm6, %v13944_v28  ;;  %vm14056_vm6 = vnez %v14055_v17  ;;  %v14063_v23 = vand.u32 4294901760, %v14062_v41  ;;  %v14066_v17 = vand.u32 4294901760, %v14065_v58  ;;  %v14074_v41 = vand.u32 4294901760, %v14073_v61  ;;  %v14086_v16 = vld [vmem:[#allocation101_spill] sm:$0xff] }
 0x3aa   : > { %v14077_v21 = vand.u32 4294901760, %v14076_v40  ;;  %v14079_v58 = vand.u32 4294901760, %v14078_v34  ;;  %v14087_v61 = vand.u32 4294901760, %v14086_v16  ;;  %v14088_v40 = vld [vmem:[#allocation76_spill] sm:$0xff]  ;;  %v14090_v34 = vld [vmem:[#allocation77_spill] sm:$0xff]  ;;  %v14100_v16 = vand.u32 4294901760, %v14099_v38 }
 0x3ab   : > { %6069 = vmatpush1.bf16.msk.msra.mxu0 %vm14046_vm12, %v13944_v28  ;;  %vm14058_vm12 = vnez %v14057_v45  ;;  %v6078_v44 = vpack.c.bf16 %v14063_v23, %v14061_v3  ;;  %v6462_v47 = vpack.c.bf16 %v14068_v62, %v14066_v17  ;;  %v14069_v45 = vld [vmem:[#allocation207_spill] sm:$0xff]  ;;  %v6080_v23 = vpack.c.bf16 %v14074_v41, %v14072_v4  ;;  %v14082_v17 = vld [vmem:[#allocation97_spill] sm:$0xff]  ;;  %v14111_v38 = vld [vmem:[#allocation114_spill] sm:$0xff] }
 0x3ac   : > { %6453 = vmatpush1.bf16.msk.msra.mxu1 %vm14048_vm5, %v13944_v28  ;;  %6071 = vmatprep.subr.msk.bf16.mxu0 %vm14050_vm0, %v13944_v28  ;;  %v14075_v3 = vld [vmem:[#allocation215_spill] sm:$0xff]  ;;  %v6464_v39 = vpack.c.bf16 %v14079_v58, %v14077_v21  ;;  %v14081_v62 = vand.u32 4294901760, %v14080_v60  ;;  %v14083_v13 = vand.u32 4294901760, %v14082_v17  ;;  %v14089_v41 = vand.u32 4294901760, %v14088_v40  ;;  %v14092_v60 = vld [vmem:[#allocation210_spill] sm:$0xff] }
 0x3ad   : > { %6455 = vmatprep.subr.msk.bf16.mxu1 %vm14052_vm11, %v13944_v28  ;;  %v14091_v21 = vand.u32 4294901760, %v14090_v34  ;;  %v14093_v17 = vld [vmem:[#allocation103_spill] sm:$0xff] }
 0x3af   : > { %6073 = vmatpush1.bf16.msk.msra.mxu0 %vm14054_vm15, %v13944_v28  ;;  %v6084_v58 = vpack.c.bf16 %v14091_v21, %v14089_v41  ;;  %v14105_v41 = vld [vmem:[#allocation78_spill] sm:$0xff]  ;;  %v14107_v21 = vld [vmem:[#allocation79_spill] sm:$0xff] }
 0x3b0   : > { %6457 = vmatpush1.bf16.msk.msra.mxu1 %vm14056_vm6, %v13944_v28  ;;  %6075 = vmatprep.subr.msk.bf16.mxu0 %vm14058_vm12, %v13944_v28  ;;  %vm14070_vm12 = vnez %v14069_v45  ;;  %v6082_v45 = vpack.c.bf16 %v14083_v13, %v14081_v62  ;;  %v14094_v13 = vand.u32 4294901760, %v14093_v17  ;;  %v14106_v34 = vand.u32 4294901760, %v14105_v41 }
 0x3b1   : > { %6459 = vmatprep.subr.msk.bf16.mxu1 %vm10222_vm7, %v13944_v28  ;;  %v14108_v17 = vand.u32 4294901760, %v14107_v21 }
 0x3b3   : > { %6077 = vmatpush1.bf16.msk.msra.mxu0 %vm10235_vm1, %v13944_v28 }
 0x3b4   : > { %6461 = vmatpush1.bf16.msk.msra.mxu1 %vm14070_vm12, %v13944_v28  ;;  %6079 = vmatprep.subr.bf16.mxu0 %v6078_v44 }
 0x3b5   : > { %6463 = vmatprep.subr.bf16.mxu1 %v6462_v47  ;;  %v14084_v47 = vld [vmem:[#allocation100_spill] sm:$0xff] }
 0x3b6   : > { %3358 = vmatmul.mubr.f32.vlgmr.msra.gmra.mrb[0].mxu0 %v14075_v3  ;;  %v14085_v44 = vand.u32 4294901760, %v14084_v47  ;;  %v14098_v47 = vand.u32 4294901760, %v14097_v30  ;;  %v14109_v30 = vld [vmem:[#allocation113_spill] sm:$0xff] }
 0x3b7   : > { %6081 = vmatpush1.bf16.msra.mxu0 %v6080_v23  ;;  %4642 = vmatmul.mubr.f32.vlgmr.msra.gmra.mrb[0].mxu1 %v14075_v3  ;;  %v14095_v23 = vld [vmem:[#allocation104_spill] sm:$0xff] }
 0x3b8   : > { %v6466_v4 = vpack.c.bf16 %v14087_v61, %v14085_v44  ;;  %6465 = vmatpush1.bf16.msra.mxu1 %v6464_v39  ;;  %6083 = vmatprep.subr.bf16.mxu0 %v6082_v45  ;;  %v14096_v62 = vand.u32 4294901760, %v14095_v23  ;;  %v6086_v44 = vpack.c.bf16 %v14100_v16, %v14098_v47  ;;  %v14101_v39 = vld [vmem:[#allocation110_spill] sm:$0xff]  ;;  %v14103_v61 = vld [vmem:[#allocation111_spill] sm:$0xff]  ;;  %v14110_v23 = vand.u32 4294901760, %v14109_v30  ;;  %v14113_v16 = vld [vmem:[#allocation117_spill] sm:$0xff] }
 0x3b9   : > { %3621 = vmatprep.mubr.f32.mxu0 %v14092_v60  ;;  %4905 = vmatprep.mubr.f32.mxu1 %v14092_v60  ;;  %v14102_v45 = vand.u32 4294901760, %v14101_v39  ;;  %v14116_v39 = vand.u32 4294901760, %v14115_v5  ;;  %v14125_v30 = vld [vmem:[#allocation123_spill] sm:$0xff] }
 0x3ba   : > { %6467 = vmatprep.subr.bf16.mxu1 %v6466_v4  ;;  %v6468_v3 = vpack.c.bf16 %v14096_v62, %v14094_v13  ;;  %v14104_v4 = vand.u32 4294901760, %v14103_v61  ;;  %v6088_v13 = vpack.c.bf16 %v14108_v17, %v14106_v34  ;;  %v14112_v62 = vand.u32 4294901760, %v14111_v38  ;;  %v14123_v34 = vld [vmem:[#allocation81_spill] sm:$0xff]  ;;  %v14127_v38 = vld [vmem:[#allocation124_spill] sm:$0xff] }
 0x3bb   : > { %6085 = vmatpush1.bf16.msra.mxu0 %v6084_v58  ;;  %v14114_v58 = vand.u32 4294901760, %v14113_v16  ;;  %v14124_v21 = vand.u32 4294901760, %v14123_v34  ;;  %v14129_v16 = vld [vmem:[#allocation127_spill] sm:$0xff] }
 0x3bc   : > { %v6470_v40 = vpack.c.bf16 %v14104_v4, %v14102_v45  ;;  %6469 = vmatpush1.bf16.msra.mxu1 %v6468_v3  ;;  %6087 = vmatprep.subr.bf16.mxu0 %v6086_v44  ;;  %v6472_v47 = vpack.c.bf16 %v14112_v62, %v14110_v23  ;;  %v14117_v45 = vld [vmem:[#allocation120_spill] sm:$0xff]  ;;  %v14119_v44 = vld [vmem:[#allocation121_spill] sm:$0xff]  ;;  %v14126_v23 = vand.u32 4294901760, %v14125_v30  ;;  %v14128_v62 = vand.u32 4294901760, %v14127_v38 }
 0x3bd   : > { %v6090_v12 = vpack.c.bf16 %v14116_v39, %v14114_v58  ;;  %v14118_v3 = vand.u32 4294901760, %v14117_v45  ;;  %v14120_v61 = vand.u32 4294901760, %v14119_v44  ;;  %v14131_v58 = vld [vmem:[#allocation128_spill] sm:$0xff] }
 0x3be   : > { %6471 = vmatprep.subr.bf16.mxu1 %v6470_v40  ;;  %v14121_v40 = vld [vmem:[#allocation80_spill] sm:$0xff]  ;;  %v6476_v5 = vpack.c.bf16 %v14128_v62, %v14126_v23  ;;  %v14132_v39 = vand.u32 4294901760, %v14131_v58  ;;  %v14147_v58 = vld [vmem:[#allocation23_spill] sm:$0xff] }
 0x3bf   : > { %6089 = vmatpush1.bf16.msra.mxu0 %v6088_v13  ;;  %v6474_v4 = vpack.c.bf16 %v14120_v61, %v14118_v3  ;;  %v14122_v41 = vand.u32 4294901760, %v14121_v40  ;;  %v14130_v13 = vand.u32 4294901760, %v14129_v16  ;;  %v14133_v3 = vld [vmem:[#allocation18_spill] sm:$0xff]  ;;  %v14141_v30 = vld [vmem:[#allocation16_spill] sm:$0xff] }
 0x3c0   : > { %6473 = vmatpush1.bf16.msra.mxu1 %v6472_v47  ;;  %6091 = vmatprep.subr.bf16.mxu0 %v6090_v12  ;;  %v14134_v47 = vand.u32 4294901760, %v14133_v3  ;;  %v14135_v12 = vld [vmem:[#allocation15_spill] sm:$0xff]  ;;  %v14142_v23 = vand.u32 4294901760, %v14141_v30  ;;  %v14143_v38 = vld [vmem:[#allocation20_spill] sm:$0xff]  ;;  %v14157_v30 = vld [vmem:[#allocation29_spill] sm:$0xff] }
 0x3c1   : > { %6475 = vmatprep.subr.bf16.mxu1 %v6474_v4  ;;  %v6092_v17 = vpack.c.bf16 %v14124_v21, %v14122_v41  ;;  %v6094_v45 = vpack.c.bf16 %v14132_v39, %v14130_v13  ;;  %v14136_v44 = vand.u32 4294901760, %v14135_v12  ;;  %v14137_v4 = vld [vmem:[#allocation82_spill] sm:$0xff]  ;;  %v14139_v41 = vld [vmem:[#allocation83_spill] sm:$0xff]  ;;  %v14144_v62 = vand.u32 4294901760, %v14143_v38 }
 0x3c2   : > { %v14138_v40 = vand.u32 4294901760, %v14137_v4  ;;  %v14140_v34 = vand.u32 4294901760, %v14139_v41  ;;  %v14145_v13 = vld [vmem:[#allocation22_spill] sm:$0xff]  ;;  %v14148_v39 = vand.u32 4294901760, %v14147_v58  ;;  %v14163_v58 = vld [vmem:[#allocation32_spill] sm:$0xff] }
 0x3c3   : > { %6093 = vmatpush1.bf16.msra.mxu0 %v6092_v17  ;;  %v6478_v61 = vpack.c.bf16 %v14136_v44, %v14134_v47  ;;  %v6480_v16 = vpack.c.bf16 %v14144_v62, %v14142_v23  ;;  %v14146_v17 = vand.u32 4294901760, %v14145_v13  ;;  %v14149_v47 = vld [vmem:[#allocation25_spill] sm:$0xff]  ;;  %v14158_v23 = vand.u32 4294901760, %v14157_v30  ;;  %v14159_v38 = vld [vmem:[#allocation30_spill] sm:$0xff]  ;;  %v14173_v30 = vld [vmem:[#allocation40_spill] sm:$0xff] }
 0x3c4   : > { %6477 = vmatpush1.bf16.msra.mxu1 %v6476_v5  ;;  %6095 = vmatprep.subr.bf16.mxu0 %v6094_v45  ;;  %v6096_v21 = vpack.c.bf16 %v14140_v34, %v14138_v40  ;;  %v14150_v5 = vand.u32 4294901760, %v14149_v47  ;;  %v14151_v45 = vld [vmem:[#allocation27_spill] sm:$0xff]  ;;  %v14155_v40 = vld [vmem:[#allocation26_spill] sm:$0xff]  ;;  %v14160_v62 = vand.u32 4294901760, %v14159_v38  ;;  %v14175_v38 = vld [vmem:[#allocation41_spill] sm:$0xff] }
 0x3c5   : > { %6479 = vmatprep.subr.bf16.mxu1 %v6478_v61  ;;  %v6098_v3 = vpack.c.bf16 %v14148_v39, %v14146_v17  ;;  %v14152_v12 = vand.u32 4294901760, %v14151_v45  ;;  %v14153_v61 = vld [vmem:[#allocation84_spill] sm:$0xff]  ;;  %v14156_v41 = vand.u32 4294901760, %v14155_v40  ;;  %v14161_v17 = vld [vmem:[#allocation129_spill] sm:$0xff]  ;;  %v14164_v39 = vand.u32 4294901760, %v14163_v58 }
 0x3c6   : > { %v14154_v4 = vand.u32 4294901760, %v14153_v61  ;;  %v6484_v13 = vpack.c.bf16 %v14160_v62, %v14158_v23  ;;  %v14174_v23 = vand.u32 4294901760, %v14173_v30  ;;  %v14176_v62 = vand.u32 4294901760, %v14175_v38  ;;  %v14179_v58 = vld [vmem:[#allocation44_spill] sm:$0xff]  ;;  %v14191_v38 = vld [vmem:[#allocation53_spill] sm:$0xff] }
 0x3c7   : > { %6097 = vmatpush1.bf16.msra.mxu0 %v6096_v21  ;;  %v6482_v44 = vpack.c.bf16 %v14152_v12, %v14150_v5  ;;  %v14162_v21 = vand.u32 4294901760, %v14161_v17  ;;  %v14165_v5 = vld [vmem:[#allocation34_spill] sm:$0xff]  ;;  %v14189_v30 = vld [vmem:[#allocation52_spill] sm:$0xff] }
 0x3c8   : > { %6481 = vmatpush1.bf16.msra.mxu1 %v6480_v16  ;;  %6099 = vmatprep.subr.bf16.mxu0 %v6098_v3  ;;  %v6100_v34 = vpack.c.bf16 %v14156_v41, %v14154_v4  ;;  %v14166_v16 = vand.u32 4294901760, %v14165_v5  ;;  %v14167_v3 = vld [vmem:[#allocation35_spill] sm:$0xff]  ;;  %v14171_v4 = vld [vmem:[#allocation38_spill] sm:$0xff]  ;;  %v6488_v17 = vpack.c.bf16 %v14176_v62, %v14174_v23  ;;  %v14190_v23 = vand.u32 4294901760, %v14189_v30 }
 0x3c9   : > { %6483 = vmatprep.subr.bf16.mxu1 %v6482_v44  ;;  %v6102_v47 = vpack.c.bf16 %v14164_v39, %v14162_v21  ;;  %v14168_v45 = vand.u32 4294901760, %v14167_v3  ;;  %v14169_v44 = vld [vmem:[#allocation37_spill] sm:$0xff]  ;;  %v14172_v40 = vand.u32 4294901760, %v14171_v4  ;;  %v14177_v21 = vld [vmem:[#allocation43_spill] sm:$0xff]  ;;  %v14180_v39 = vand.u32 4294901760, %v14179_v58 }
 0x3ca   : > { %v14170_v61 = vand.u32 4294901760, %v14169_v44  ;;  %v14192_v62 = vand.u32 4294901760, %v14191_v38 }
 0x3cb   : > { %6101 = vmatpush1.bf16.msra.mxu0 %v6100_v34  ;;  %v6486_v12 = vpack.c.bf16 %v14168_v45, %v14166_v16  ;;  %v14178_v34 = vand.u32 4294901760, %v14177_v21  ;;  %v14181_v16 = vld [vmem:[#allocation46_spill] sm:$0xff] }
 0x3cc   : > { %6485 = vmatpush1.bf16.msra.mxu1 %v6484_v13  ;;  %6103 = vmatprep.subr.bf16.mxu0 %v6102_v47  ;;  %v6104_v41 = vpack.c.bf16 %v14172_v40, %v14170_v61  ;;  %v14182_v13 = vand.u32 4294901760, %v14181_v16  ;;  %v14183_v47 = vld [vmem:[#allocation47_spill] sm:$0xff]  ;;  %v14187_v61 = vld [vmem:[#allocation50_spill] sm:$0xff]  ;;  %v6492_v21 = vpack.c.bf16 %v14192_v62, %v14190_v23  ;;  %v14197_v16 = vand.u32 4294901760, %v13907_v14 }
 0x3cd   : > { %6487 = vmatprep.subr.bf16.mxu1 %v6486_v12  ;;  %v6106_v5 = vpack.c.bf16 %v14180_v39, %v14178_v34  ;;  %v14184_v3 = vand.u32 4294901760, %v14183_v47  ;;  %v14185_v12 = vld [vmem:[#allocation49_spill] sm:$0xff]  ;;  %v14188_v4 = vand.u32 4294901760, %v14187_v61  ;;  %v14194_v34 = vand.u32 4294901760, %v13655_v35  ;;  %v14204_v61 = vld [vmem:[#allocation66_spill] sm:$0xff] }
 0x3ce   : > { %v14186_v44 = vand.u32 4294901760, %v14185_v12  ;;  %v14196_v39 = vand.u32 4294901760, %v13657_v27  ;;  %v14208_v27 = vand.u32 4294901760, %v13668_v49  ;;  %v14209_v23 = vand.u32 4294901760, %v13669_v59  ;;  %v14216_v59 = vld [vmem:[#allocation55_spill] sm:$0xff] }
 0x3cf   : > { %6105 = vmatpush1.bf16.msra.mxu0 %v6104_v41  ;;  %v6490_v45 = vpack.c.bf16 %v14184_v3, %v14182_v13  ;;  %v14193_v41 = vand.u32 4294901760, %v13652_v46  ;;  %v14198_v13 = vld [vmem:[#allocation62_spill] sm:$0xff]  ;;  %v14202_v46 = vld [vmem:[#allocation64_spill] sm:$0xff]  ;;  %v14210_v14 = vand.u32 4294901760, %v13918_v63  ;;  %v14211_v62 = vand.u32 4294901760, %v13919_v50  ;;  %v14219_v50 = vld [vmem:[#allocation59_spill] sm:$0xff] }
 0x3d0   : > { %6489 = vmatpush1.bf16.msra.mxu1 %v6488_v17  ;;  %6107 = vmatprep.subr.bf16.mxu0 %v6106_v5  ;;  %v6108_v40 = vpack.c.bf16 %v14188_v4, %v14186_v44  ;;  %v14195_v17 = vand.u32 4294901760, %v13656_v1  ;;  %v14199_v47 = vand.u32 4294901760, %v14198_v13  ;;  %v14203_v44 = vand.u32 4294901760, %v14202_v46  ;;  %v14218_v63 = vld [vmem:[#allocation58_spill] sm:$0xff]  ;;  %v14225_v13 = vld [vmem:[#allocation139_spill] sm:$0xff] }
 0x3d1   : > { %6491 = vmatprep.subr.bf16.mxu1 %v6490_v45  ;;  %v6110_v58 = vpack.c.bf16 %v14194_v34, %v14193_v41  ;;  %v14200_v45 = vld [vmem:[#allocation130_spill] sm:$0xff]  ;;  %v14205_v4 = vand.u32 4294901760, %v14204_v61  ;;  %v6498_v38 = vpack.c.bf16 %v14209_v23, %v14208_v27  ;;  %v14212_v41 = vand.u32 4294901760, %v13920_v10  ;;  %v14220_v10 = vld [vmem:[#allocation69_spill] sm:$0xff]  ;;  %v14233_v61 = vld [vmem:[#allocation208_spill] sm:$0xff] }
 0x3d2   : > { %v6494_v5 = vpack.c.bf16 %v14196_v39, %v14195_v17  ;;  %v6112_v3 = vpack.c.bf16 %v14199_v47, %v14197_v16  ;;  %v14201_v12 = vand.u32 4294901760, %v14200_v45  ;;  %v14213_v34 = vand.u32 4294901760, %v13921_v53  ;;  %v14221_v53 = vld [vmem:[#allocation70_spill] sm:$0xff]  ;;  %v14222_v16 = vld [vmem:[#allocation135_spill] sm:$0xff]  ;;  %v14238_v27 = vld [vmem:[#allocation172_spill] sm:$0xff] }
 0x3d3   : > { %6109 = vmatpush1.bf16.msra.mxu0 %v6108_v40  ;;  %v14206_v40 = vld [vmem:[#allocation67_spill] sm:$0xff]  ;;  %v14214_v17 = vand.u32 4294901760, %v13676_v20  ;;  %v14215_v49 = vand.u32 4294901760, %v13679_v7  ;;  %v14223_v20 = vld [vmem:[#allocation136_spill] sm:$0xff]  ;;  %v14224_v7 = vld [vmem:[#allocation138_spill] sm:$0xff] }
 0x3d4   : > { %6493 = vmatpush1.bf16.msra.mxu1 %v6492_v21  ;;  %6111 = vmatprep.subr.bf16.mxu0 %v6110_v58  ;;  %v6496_v35 = vpack.c.bf16 %v14203_v44, %v14201_v12  ;;  %v14207_v1 = vand.u32 4294901760, %v14206_v40  ;;  %v6116_v21 = vpack.c.bf16 %v14211_v62, %v14210_v14  ;;  %v6500_v58 = vpack.c.bf16 %v14213_v34, %v14212_v41  ;;  %v14226_v47 = vld [vmem:[#allocation147_spill] sm:$0xff]  ;;  %v14228_v45 = vld [vmem:[#allocation150_spill] sm:$0xff]  ;;  %v14229_v12 = vld [vmem:[#allocation153_spill] sm:$0xff] }
 0x3d5   : > { %6495 = vmatprep.subr.bf16.mxu1 %v6494_v5  ;;  %v6118_v39 = vpack.c.bf16 %v14215_v49, %v14214_v17  ;;  %v14217_v5 = vld [vmem:[#allocation56_spill] sm:$0xff]  ;;  %v14230_v46 = vld [vmem:[#allocation190_spill] sm:$0xff]  ;;  %v14239_v23 = vld [vmem:[#allocation211_spill] sm:$0xff]  ;;  %v14324_v17 = vmov 0  }
 0x3d6   : > { %v6114_v30 = vpack.c.bf16 %v14207_v1, %v14205_v4  ;;  %v14231_v44 = vld [vmem:[#allocation192_spill] sm:$0xff]  ;;  %v14234_v4 = vld [vmem:[#allocation209_spill] sm:$0xff]  ;;  %v14325_v49 = vld [vmem:[#allocation151_spill] sm:$0xff] }
 0x3d7   : > { %6113 = vmatpush1.bf16.msra.mxu0 %v6112_v3  ;;  %v14227_v3 = vld [vmem:[#allocation148_spill] sm:$0xff]  ;;  %v14236_v1 = vld [vmem:[#allocation169_spill] sm:$0xff] }
 0x3d8   : > { %6497 = vmatpush1.bf16.msra.mxu1 %v6496_v35  ;;  %6115 = vmatprep.subr.bf16.mxu0 %v6114_v30  ;;  %v14232_v35 = vld [vmem:[#allocation193_spill] sm:$0xff]  ;;  %v14235_v40 = vld [vmem:[#allocation212_spill] sm:$0xff]  ;;  %v14237_v30 = vld [vmem:[#allocation170_spill] sm:$0xff] }
 0x3d9   : > { %6499 = vmatprep.subr.bf16.mxu1 %v6498_v38 }
 0x3db   : > { %6117 = vmatpush1.bf16.msra.mxu0 %v6116_v21  ;;  %v14319_v21 = vld [vmem:[#allocation199_spill] sm:$0xff] }
 0x3dc   : > { %6501 = vmatpush1.bf16.msra.mxu1 %v6500_v58  ;;  %6119 = vmatprep.subr.bf16.mxu0 %v6118_v39  ;;  %v14326_v39 = vld [vmem:[#allocation173_spill] sm:$0xff] }
 0x3dd   : > { %6503 = vmatprep.subr.bf16.mxu1 %v14216_v59 }
 0x3df   : > { %6121 = vmatpush1.bf16.msra.mxu0 %v14217_v5  ;;  %v14328_v5 = vld [vmem:[#allocation155_spill] sm:$0xff] }
 0x3e0   : > { %6505 = vmatpush1.bf16.msra.mxu1 %v14218_v63  ;;  %6123 = vmatprep.subr.bf16.mxu0 %v14219_v50  ;;  %v14329_v63 = vld [vmem:[#allocation183_spill] sm:$0xff] }
 0x3e1   : > { %6507 = vmatprep.subr.bf16.mxu1 %v14220_v10  ;;  %v14331_v10 = vld [vmem:[#allocation152_spill] sm:$0xff] }
 0x3e3   : > { %6125 = vmatpush1.bf16.msra.mxu0 %v14221_v53  ;;  %v14332_v53 = vld [vmem:[#allocation200_spill] sm:$0xff] }
 0x3e4   : > { %6509 = vmatpush1.bf16.msra.mxu1 %v14222_v16  ;;  %6127 = vmatprep.subr.bf16.mxu0 %v14223_v20  ;;  %v14335_v20 = vld [vmem:[#allocation203_spill] sm:$0xff] }
 0x3e5   : > { %6511 = vmatprep.subr.bf16.mxu1 %v14224_v7 }
 0x3e7   : > { %6129 = vmatpush1.bf16.msra.mxu0 %v14225_v13  ;;  %v14337_v13 = vld [vmem:[#allocation11_spill] sm:$0xff] }
 0x3e8   : > { %6513 = vmatpush1.bf16.msra.mxu1 %v14226_v47  ;;  %6131 = vmatprep.subr.bf16.mxu0 %v14227_v3 }
 0x3e9   : > { %6515 = vmatprep.subr.bf16.mxu1 %v14228_v45 }
 0x3eb   : > { %6133 = vmatpush1.bf16.msra.mxu0 %v14229_v12  ;;  %v5114_v12 = vld [vmem:[#allocation3] sm:$0xff] }
 0x3ec   : > { %6517 = vmatpush1.bf16.msra.mxu1 %v14230_v46  ;;  %6135 = vmatprep.subr.bf16.mxu0 %v14231_v44  ;;  %v5116_v44 = vld [vmem:[#allocation3 + $0x10] sm:$0xff] }
 0x3ed   : > { %6519 = vmatprep.subr.bf16.mxu1 %v14232_v35  ;;  %v5115_v35 = vld [vmem:[#allocation3 + $0x8] sm:$0xff] }
 0x3ef   : > { %6137 = vmatpush1.bf16.msra.mxu0 %v14233_v61 }
 0x3f0   : > { %6521 = vmatpush1.bf16.msra.mxu1 %v14234_v4  ;;  %6139 = vmatprep.subr.bf16.mxu0 %v14235_v40  ;;  %v5117_v4 = vld [vmem:[#allocation3 + $0x18] sm:$0xff] }
 0x3f1   : > { %6523 = vmatprep.subr.bf16.mxu1 %v14236_v1 }
 0x3f3   : > { %6141 = vmatpush1.bf16.msra.mxu0 %v14237_v30 }
 0x3f4   : > { %6525 = vmatpush1.bf16.msra.mxu1 %v14238_v27  ;;  %6143 = vmatprep.subr.msk.bf16.mxu0 %vm9149_vm9, %v13944_v28  ;;  %vm14241_vm9 = vnez %v13954_v26  ;;  %v14274_v26 = vld [vmem:[#allocation63_spill] sm:$0xff] }
 0x3f5   : > { %6527 = vmatprep.subr.msk.bf16.mxu1 %vm9166_vm2, %v13944_v28  ;;  %vm14242_vm2 = vnez %v13955_v15  ;;  %v14276_v15 = vld [vmem:[#allocation65_spill] sm:$0xff] }
 0x3f6   : > { %3623 = vmatmul.mubr.f32.vlgmr.msra.gmra.mrb[0].mxu0 %v14239_v23 }
 0x3f7   : > { %6145 = vmatpush1.bf16.msk.msra.mxu0 %vm9143_vm10, %v13944_v28  ;;  %4907 = vmatmul.mubr.f32.vlgmr.msra.gmra.mrb[0].mxu1 %v14239_v23  ;;  %vm14240_vm10 = vnez %v13953_v52  ;;  %v14272_v52 = vld [vmem:[#allocation60_spill] sm:$0xff] }
 0x3f8   : > { %6529 = vmatpush1.bf16.msk.msra.mxu1 %vm9191_vm8, %v13944_v28  ;;  %6147 = vmatprep.subr.msk.bf16.mxu0 %vm9204_vm3, %v13944_v28  ;;  %vm14243_vm3 = vnez %v13957_v11  ;;  %vm14245_vm8 = vnez %v13961_v43  ;;  %v14278_v11 = vld [vmem:[#allocation68_spill] sm:$0xff]  ;;  %v14282_v43 = vld [vmem:[#allocation131_spill] sm:$0xff] }
 0x3f9   : > { %6531 = vmatprep.subr.msk.bf16.mxu1 %vm9235_vm14, %v13944_v28  ;;  %3758 = vmatprep.mubr.f32.mxu0 %v14092_v60  ;;  %vm14244_vm14 = vnez %v13959_v54  ;;  %v14280_v54 = vld [vmem:[#allocation71_spill] sm:$0xff] }
 0x3fa   : > { %5042 = vmatprep.mubr.f32.mxu1 %v14092_v60 }
 0x3fb   : > { %6149 = vmatpush1.bf16.msk.msra.mxu0 %vm14240_vm10, %v13944_v28  ;;  %vm14246_vm10 = vnez %v13963_v37  ;;  %v14284_v37 = vld [vmem:[#allocation134_spill] sm:$0xff] }
 0x3fc   : > { %6533 = vmatpush1.bf16.msk.msra.mxu1 %vm14241_vm9, %v13944_v28  ;;  %6151 = vmatprep.subr.msk.bf16.mxu0 %vm14242_vm2, %v13944_v28  ;;  %vm14247_vm9 = vnez %v13965_v24  ;;  %vm14248_vm2 = vnez %v13971_v22  ;;  %v14286_v24 = vld [vmem:[#allocation137_spill] sm:$0xff]  ;;  %v14292_v22 = vld [vmem:[#allocation146_spill] sm:$0xff] }
 0x3fd   : > { %6535 = vmatprep.subr.msk.bf16.mxu1 %vm14243_vm3, %v13944_v28  ;;  %vm14249_vm3 = vnez %v13973_v6  ;;  %v14294_v6 = vld [vmem:[#allocation149_spill] sm:$0xff] }
 0x3ff   : > { %6153 = vmatpush1.bf16.msk.msra.mxu0 %vm14244_vm14, %v13944_v28  ;;  %vm14250_vm14 = vnez %v13975_v51  ;;  %v14296_v51 = vld [vmem:[#allocation154_spill] sm:$0xff] }
 0x400   : > { %6537 = vmatpush1.bf16.msk.msra.mxu1 %vm14245_vm8, %v13944_v28  ;;  %6155 = vmatprep.subr.msk.bf16.mxu0 %vm14246_vm10, %v13944_v28  ;;  %vm14251_vm8 = vnez %v13977_v36  ;;  %vm14254_vm10 = vnez %v13981_v57  ;;  %v14298_v36 = vld [vmem:[#allocation157_spill] sm:$0xff]  ;;  %v14304_v57 = vld [vmem:[#allocation174_spill] sm:$0xff] }
 0x401   : > { %6539 = vmatprep.subr.msk.bf16.mxu1 %vm14247_vm9, %v13944_v28  ;;  %vm14255_vm9 = vnez %v13983_v19  ;;  %v14306_v19 = vld [vmem:[#allocation177_spill] sm:$0xff] }
 0x403   : > { %6157 = vmatpush1.bf16.msk.msra.mxu0 %vm13968_vm13, %v13944_v28  ;;  %vm14252_vm13 = vnez %v13979_v0  ;;  %v14300_v0 = vld [vmem:[#allocation168_spill] sm:$0xff] }
 0x404   : > { %6541 = vmatpush1.bf16.msk.msra.mxu1 %vm13970_vm4, %v13944_v28  ;;  %6159 = vmatprep.subr.msk.bf16.mxu0 %vm14248_vm2, %v13944_v28  ;;  %vm14253_vm4 = vnez %v13980_v31  ;;  %vm14256_vm2 = vnez %v13985_v42  ;;  %v14302_v31 = vld [vmem:[#allocation171_spill] sm:$0xff]  ;;  %v14308_v42 = vld [vmem:[#allocation160_spill] sm:$0xff] }
 0x405   : > { %6543 = vmatprep.subr.msk.bf16.mxu1 %vm14249_vm3, %v13944_v28  ;;  %vm14257_vm3 = vnez %v13987_v48  ;;  %v14310_v48 = vld [vmem:[#allocation181_spill] sm:$0xff] }
 0x407   : > { %6161 = vmatpush1.bf16.msk.msra.mxu0 %vm14250_vm14, %v13944_v28  ;;  %vm14258_vm14 = vnez %v13989_v29  ;;  %v14312_v29 = vld [vmem:[#allocation184_spill] sm:$0xff] }
 0x408   : > { %6545 = vmatpush1.bf16.msk.msra.mxu1 %vm14251_vm8, %v13944_v28  ;;  %6163 = vmatprep.subr.msk.bf16.mxu0 %vm14252_vm13, %v13944_v28  ;;  %vm14259_vm8 = vnez %v13991_v33  ;;  %vm14261_vm13 = vnez %v14260_v56 }
 0x409   : > { %6547 = vmatprep.subr.msk.bf16.mxu1 %vm14253_vm4, %v13944_v28  ;;  %vm14263_vm4 = vnez %v14262_v8 }
 0x40b   : > { %6165 = vmatpush1.bf16.msk.msra.mxu0 %vm14254_vm10, %v13944_v28  ;;  %vm14265_vm10 = vnez %v14264_v18 }
 0x40c   : > { %6549 = vmatpush1.bf16.msk.msra.mxu1 %vm14255_vm9, %v13944_v28  ;;  %6167 = vmatprep.subr.msk.bf16.mxu0 %vm14256_vm2, %v13944_v28  ;;  %vm14267_vm9 = vnez %v14266_v25  ;;  %vm14269_vm2 = vnez %v14268_v32 }
 0x40d   : > { %6551 = vmatprep.subr.msk.bf16.mxu1 %vm14257_vm3, %v13944_v28  ;;  %vm14271_vm3 = vnez %v14270_v55 }
 0x40f   : > { %6169 = vmatpush1.bf16.msk.msra.mxu0 %vm14258_vm14, %v13944_v28  ;;  %vm14273_vm14 = vnez %v14272_v52 }
 0x410   : > { %6553 = vmatpush1.bf16.msk.msra.mxu1 %vm14259_vm8, %v13944_v28  ;;  %6171 = vmatprep.subr.msk.bf16.mxu0 %vm14261_vm13, %v13944_v28  ;;  %vm14275_vm8 = vnez %v14274_v26  ;;  %vm14277_vm13 = vnez %v14276_v15 }
 0x411   : > { %6555 = vmatprep.subr.msk.bf16.mxu1 %vm14263_vm4, %v13944_v28  ;;  %vm14279_vm4 = vnez %v14278_v11 }
 0x413   : > { %6173 = vmatpush1.bf16.msk.msra.mxu0 %vm14265_vm10, %v13944_v28  ;;  %vm14281_vm10 = vnez %v14280_v54 }
 0x414   : > { %6557 = vmatpush1.bf16.msk.msra.mxu1 %vm14267_vm9, %v13944_v28  ;;  %6175 = vmatprep.subr.msk.bf16.mxu0 %vm14269_vm2, %v13944_v28  ;;  %vm14283_vm9 = vnez %v14282_v43  ;;  %vm14285_vm2 = vnez %v14284_v37 }
 0x415   : > { %6559 = vmatprep.subr.msk.bf16.mxu1 %vm14271_vm3, %v13944_v28  ;;  %vm14287_vm3 = vnez %v14286_v24 }
 0x417   : > { %6177 = vmatpush1.bf16.msk.msra.mxu0 %vm14273_vm14, %v13944_v28  ;;  %vm14289_vm14 = vnez %v14288_v9 }
 0x418   : > { %6561 = vmatpush1.bf16.msk.msra.mxu1 %vm14275_vm8, %v13944_v28  ;;  %6179 = vmatprep.subr.msk.bf16.mxu0 %vm14277_vm13, %v13944_v28  ;;  %vm14291_vm8 = vnez %v14290_v2  ;;  %vm14293_vm13 = vnez %v14292_v22 }
 0x419   : > { %6563 = vmatprep.subr.msk.bf16.mxu1 %vm14279_vm4, %v13944_v28  ;;  %vm14295_vm4 = vnez %v14294_v6 }
 0x41b   : > { %6181 = vmatpush1.bf16.msk.msra.mxu0 %vm14281_vm10, %v13944_v28  ;;  %vm14297_vm10 = vnez %v14296_v51 }
 0x41c   : > { %6565 = vmatpush1.bf16.msk.msra.mxu1 %vm14283_vm9, %v13944_v28  ;;  %6183 = vmatprep.subr.msk.bf16.mxu0 %vm14285_vm2, %v13944_v28  ;;  %vm14299_vm9 = vnez %v14298_v36  ;;  %vm14301_vm2 = vnez %v14300_v0 }
 0x41d   : > { %6567 = vmatprep.subr.msk.bf16.mxu1 %vm14287_vm3, %v13944_v28  ;;  %vm14303_vm3 = vnez %v14302_v31 }
 0x41f   : > { %6185 = vmatpush1.bf16.msk.msra.mxu0 %vm14289_vm14, %v13944_v28  ;;  %vm14305_vm14 = vnez %v14304_v57 }
 0x420   : > { %6569 = vmatpush1.bf16.msk.msra.mxu1 %vm14291_vm8, %v13944_v28  ;;  %6187 = vmatprep.subr.msk.bf16.mxu0 %vm14293_vm13, %v13944_v28  ;;  %vm14307_vm8 = vnez %v14306_v19  ;;  %vm14309_vm13 = vnez %v14308_v42 }
 0x421   : > { %6571 = vmatprep.subr.msk.bf16.mxu1 %vm14295_vm4, %v13944_v28  ;;  %vm14311_vm4 = vnez %v14310_v48 }
 0x423   : > { %6189 = vmatpush1.bf16.msk.msra.mxu0 %vm14297_vm10, %v13944_v28  ;;  %vm14313_vm10 = vnez %v14312_v29 }
 0x424   : > { %6573 = vmatpush1.bf16.msk.msra.mxu1 %vm14299_vm9, %v13944_v28  ;;  %6191 = vmatprep.subr.msk.bf16.mxu0 %vm14301_vm2, %v13944_v28  ;;  %vm14320_vm9 = vnez %v14319_v21 }
 0x425   : > { %6575 = vmatprep.subr.msk.bf16.mxu1 %vm14303_vm3, %v13944_v28 }
 0x427   : > { %6193 = vmatpush1.bf16.msk.msra.mxu0 %vm14305_vm14, %v13944_v28 }
 0x428   : > { %6577 = vmatpush1.bf16.msk.msra.mxu1 %vm14307_vm8, %v13944_v28  ;;  %6195 = vmatprep.subr.msk.bf16.mxu0 %vm14309_vm13, %v13944_v28 }
 0x429   : > { %6579 = vmatprep.subr.msk.bf16.mxu1 %vm14311_vm4, %v13944_v28 }
 0x42b   : > { %6197 = vmatpush1.bf16.msk.msra.mxu0 %vm14313_vm10, %v13944_v28 }
 0x42c   : > { %6581 = vmatpush1.bf16.msk.msra.mxu1 %vm14048_vm5, %v13944_v28  ;;  %6199 = vmatprep.subr.msk.bf16.mxu0 %vm14050_vm0, %v13944_v28  ;;  %vm14327_vm5 = vcmp.lt.f32.partialorder %v14325_v49, %v14326_v39  ;;  %vm14330_vm0 = vcmp.lt.f32.partialorder %v14328_v5, %v14329_v63 }
 0x42d   : > { %6583 = vmatprep.subr.msk.bf16.mxu1 %vm14052_vm11, %v13944_v28  ;;  %v5118_v59 = vsel %vm14327_vm5, 1, %v14324_v17  ;;  %v5120_v50 = vsel %vm14330_vm0, 1, %v14324_v17  ;;  %vm14333_vm11 = vcmp.lt.f32.partialorder %v14331_v10, %v14332_v53 }
 0x42e   : > { %v5119_v16 = vsel %vm14333_vm11, 1, %v14324_v17  ;;  %v5125_v47 = vrot.slane %v5118_v59, %v14337_v13  ;;  %v5133_v3 = vrot.slane %v5120_v50, %v14337_v13 }
 0x42f   : > { %6201 = vmatpush1.bf16.msk.msra.mxu0 %vm14054_vm15, %v13944_v28  ;;  %v5129_v45 = vrot.slane %v5119_v16, %v14337_v13 }
 0x430   : > { %6585 = vmatpush1.bf16.msk.msra.mxu1 %vm14056_vm6, %v13944_v28  ;;  %6203 = vmatprep.subr.msk.bf16.mxu0 %vm14320_vm9, %v13944_v28 }
 0x431   : > { %6587 = vmatprep.subr.msk.bf16.mxu1 %vm10222_vm7, %v13944_v28  ;;  %vm5138_vm7 = vcmp.eq.s32.totalorder %v5125_v47, 1  ;;  %vm5139_vm6 = vcmp.eq.s32.totalorder %v5129_v45, 1 }
 0x433   : > { %6205 = vmatpush1.bf16.msk.msra.mxu0 %vm10235_vm1, %v13944_v28  ;;  %vm5140_vm1 = vcmp.eq.s32.totalorder %v5133_v3, 1 }
 0x434   : > { %6589 = vmatpush1.bf16.msk.msra.mxu1 %vm14070_vm12, %v13944_v28  ;;  %v14334_v28 = vld [vmem:[#allocation156_spill] sm:$0xff] }
 0x435   : > { %vm14336_vm12 = vcmp.lt.f32.partialorder %v14334_v28, %v14335_v20 }
 0x436   : > { %3760 = vmatmul.mubr.f32.vlgmr.msra.gmra.mrb[0].mxu0 %v14239_v23  ;;  %v5121_v7 = vsel %vm14336_vm12, 1, %v14324_v17 }
 0x437   : > { %5044 = vmatmul.mubr.f32.vlgmr.msra.gmra.mrb[0].mxu1 %v14239_v23  ;;  %v5137_v46 = vrot.slane %v5121_v7, %v14337_v13 }
 0x439   : > { %vm5141_vm15 = vcmp.eq.s32.totalorder %v5137_v46, 1 }
 0x507   : > { %5153 = sbr.rel (%p5815_p10) target bundleno = 1302 (0x516), region = 52 }
 0x509   : > { %v3761_v61 = vpop.f32.mrb[0].mxu0 }
 0x50a   : > { %v5142_v40 = vsel %vm5138_vm7, %v3761_v61, %v5114_v12  ;;  %v5045_v1 = vpop.f32.mrb[0].mxu1  ;;  %v3763_v30 = vpop.f32.mrb[1].mxu0 }
 0x50b   : > { %5146 = vst [vmem:[#allocation3] sm:$0xff] %v5142_v40  ;;  %v5144_v27 = vsel %vm5140_vm1, %v5045_v1, %v5116_v44  ;;  %v5143_v23 = vsel %vm5139_vm6, %v3763_v30, %v5115_v35  ;;  %v5047_v56 = vpop.f32.mrb[1].mxu1 }
 0x50c   : > { %5148 = vst [vmem:[#allocation3 + $0x10] sm:$0xff] %v5144_v27  ;;  %5147 = vst [vmem:[#allocation3 + $0x8] sm:$0xff] %v5143_v23  ;;  %v5145_v8 = vsel %vm5141_vm15, %v5047_v56, %v5117_v4 }
 0x50d   : > { %5149 = vst [vmem:[#allocation3 + $0x18] sm:$0xff] %v5145_v8 }
 0x512   : > { %v5154_v18 = vld [vmem:[#allocation3] sm:$0xff] }
 0x513   : > { %v5155_v25 = vld [vmem:[#allocation3 + $0x8] sm:$0xff]  ;;  %v5156_v32 = vld [vmem:[#allocation3 + $0x10] sm:$0xff]  ;;  %5158 = vst [vmem:[%s6925_s29] sm:$0xff] %v5154_v18 }
 0x514   : > { %5159 = vst [vmem:[%s6925_s29 + $0x8] sm:$0xff] %v5155_v25  ;;  %5160 = vst [vmem:[%s6925_s29 + $0x10] sm:$0xff] %v5156_v32  ;;  %v5157_v55 = vld [vmem:[#allocation3 + $0x18] sm:$0xff] }
 0x515   : > { %5161 = vst [vmem:[%s6925_s29 + $0x18] sm:$0xff] %v5157_v55 }
 0x516 PF: > { %s5821_s18 = sshll.u32 %s6773_s19, 9  ;;  %s5177_s8 = sshll.u32 %s6925_s29, 4  ;;  %s5178_s8 = int_to_ptr.vmem [resolvable:$true] %s5177_s8 }
 0x517   : > { %s11712_s26 = scalar_lea.hbm %s11766_s4, %s5821_s18  ;;  %s14338_s12 = sand.u32 1, %s6761_s16  }
 0x518   : > { %s5163_s24 = scalar_lea.sflag [#allocation5], %s14338_s12  ;;  %s6691_s30 = scalar_lea.vmem %s5178_s8, 512 }
 0x519   : > { %p6692_p11 = scmp.ne.s32.totalorder %s5178_s8, %s6691_s30  ;;  %s6794_s7 = smov [#allocation4]  }
 0x51a   : > { %s6695_s9 = sshll.u32 %s6794_s7, 4  ;;  %s6696_s9 = int_to_ptr.vmem [resolvable:$false] %s6695_s9 }
 0x51b   : > { %p6693_p12 = pnand %p6692_p11, %p6869_p3  ;;  %s6697_s10 = scalar_lea.vmem %s6696_s9, 1024 }
 0x51c   : > { %p6698_p0 = scmp.lt.s32.totalorder %s5178_s8, %s6696_s9  ;;  %p6699_p1 = scmp.lt.s32.totalorder %s6697_s10, %s6691_s30 }
 0x51d   : > { %p6694_p13 = pneg %p6693_p12 }
 0x51e   : > { %p6700_p2 = por %p6699_p1, %p6698_p0 }
 0x520   : > { %p6701_p4 = pnand %p6700_p2, %p6694_p13 }
 0x522   : > { %6704 = shalt.err (!%p6701_p4)
}
 0x523   : > { %s6705_s19 = scalar_lea.hbm %s11712_s26, 512  ;;  %s6709_s14 = scalar_lea.hbm %s11766_s4, 2048 }
 0x524   : > { %p6706_p5 = scmp.ne.s32.totalorder %s11712_s26, %s6705_s19  ;;  %p6710_p8 = scmp.lt.u32.totalorder %s11712_s26, %s11766_s4 }
 0x525   : > { %p6711_p10 = scmp.lt.u32.totalorder %s6709_s14, %s6705_s19  ;;  %p6713_p12 = scmp.lt.u32.totalorder %s6705_s19, %s11712_s26 }
 0x526   : > { %p6707_p6 = pnand %p6706_p5, %p6869_p3 }
 0x527   : > { %p6712_p11 = por %p6711_p10, %p6710_p8 }
 0x528   : > { %p6708_p7 = pneg %p6707_p6 }
 0x529   : > { %p6714_p13 = por %p6713_p12, %p6712_p11 }
 0x52b   : > { %p6715_p0 = pnand %p6714_p13, %p6708_p7 }
 0x52d   : > { %6718 = shalt.err (!%p6715_p0)
}
 0x52e   : > { %6610 = dma.vmem_to_hbm [thread:$0]  (%p6869_p3), %s5178_s8, 512, %s11712_s26, %s5163_s24  }
 0x52f PF: > { %p6616_p1 = scmp.ge.s32.totalorder %s6785_s22, 2  ;;  %s5189_s29 = sand.u32 1, %s6757_s15  }
 0x530   : > { %s5190_s18 = scalar_lea.sflag [#allocation5], %s5189_s29 }
 0x531   : > { %p6613_p2 = pnand %p6616_p1, %p6879_p9 }
 0x533   : > { %6752 = dma.done.wait (!%p6613_p2), %s5190_s18, 512  }
 0x534   : > { %6754 = vsyncadd (!%p6613_p2), %s5190_s18, 4294966784  ;;  %s17_s22 = sadd.s32 1, %s6785_s22   ;;  %s14339_s19 = sld [smem:[#allocation7_spill]] }
 0x535   : > { %p14_p4 = scmp.ge.s32.totalorder %s17_s22, 10   ;;  %s14340_s27 = sld [smem:[#allocation8_spill]] }
 0x536   : > { %s14341_s21 = sld [smem:[#allocation9_spill]]  ;;  %s14342_s15 = smov %s6761_s16 }
 0x537   : > { %s14343_s16 = smov %s6765_s17  ;;  %s14344_s17 = smov %s6887_s5 }
 0x538   : > { %s14345_s18 = smov %s6777_s20  ;;  %16 = sbr.rel (!%p14_p4) target bundleno = 5 (0x5), region = 97 }
 0x53b   : > { %s14346_s20 = smov %s14340_s27 }
 0x53f   :  { %5195 = vsyncpa [#allocation5], 1 }
 0x540   :  { %5197 = vsyncpa [#allocation5 + $0x1], 1 }

</bundles_post_ra>
